<compile_context>
chip_gen: v7x
topology: tpu7x:2x2x1
jax: 0.10.0
libtpu: 0.0.40
codegen_flags: <defaults>
</compile_context>

<pallas_src>
import functools

import numpy as np
import jax
import jax.numpy as jnp
from jax.experimental import pallas as pl
from jax.experimental.pallas import tpu as pltpu

LEAKY_SLOPE = 0.01        # nn.LeakyReLU() default
IN_EPS = 1e-5             # nn.InstanceNorm2d default (affine=False, biased variance)

# Input spatial size chosen so the flattened feature size is exactly 1280
# (16 channels * 8 * 10 after the conv stack), matching nn.Linear(1280, 64).
IMG_H, IMG_W = 13, 18

# (name, kh, kw, cin, cout, instance_norm?)
_CONV_DEFS = (
    ("pre", 1, 1, 3, 32, False),
    ("c1", 3, 3, 32, 64, True),
    ("c2", 3, 3, 64, 64, True),
    ("c4", 2, 3, 64, 32, True),
    ("c5", 1, 3, 32, 16, True),
)


def _compute_geometry():
    geo = []
    in_len = IMG_H * IMG_W
    vh, vw = IMG_H, IMG_W
    for name, kh, kw, cin, cout, norm in _CONV_DEFS:
        vh, vw = vh - kh + 1, vw - kw + 1
        out_len = in_len - ((kh - 1) * IMG_W + (kw - 1))
        geo.append(dict(name=name, kh=kh, kw=kw, cin=cin, cout=cout, norm=norm,
                        in_len=in_len, out_len=out_len, vh=vh, vw=vw, n_valid=vh * vw))
        in_len = out_len
    return tuple(geo)


_GEO = _compute_geometry()
_FLAT_FEATURES = _GEO[-1]["cout"] * _GEO[-1]["n_valid"]   # 16 * 8 * 10 = 1280


# ---------------------------------------------------------------------------
# Fused Pallas kernel (one grid step == one batch sample, whole network)
# ---------------------------------------------------------------------------
def _fused_cnn_kernel(x_ref,
                      wpre_ref, bpre_ref,
                      w1_ref, b1_ref, m1_ref,
                      w2_ref, b2_ref, m2_ref,
                      w4_ref, b4_ref, m4_ref,
                      w5_ref, b5_ref, m5_ref,
                      wf1_ref, bf1_ref, wf2_ref, bf2_ref, wf3_ref, bf3_ref,
                      o_ref, *, geo):

    def leaky(v):
        return jnp.where(v >= 0, v, LEAKY_SLOPE * v)

    def conv_norm_act(x, w_ref, b_ref, m_ref, g):
        # x: (Cin, in_len); w_ref: (kh*kw, Cout, Cin); b_ref: (Cout, 1); m_ref: (1, out_len)
        out_len = g["out_len"]
        y = None
        t = 0
        for i in range(g["kh"]):
            for j in range(g["kw"]):
                off = i * IMG_W + j                       # contiguous lane slice per tap
                part = jnp.dot(w_ref[t], x[:, off:off + out_len],
                               preferred_element_type=jnp.float32)
                y = part if y is None else y + part
                t += 1
        y = y + b_ref[...]
        if g["norm"]:
            # InstanceNorm2d over the *valid* spatial positions only (one-pass sum/sumsq).
            m = m_ref[...]
            inv_n = 1.0 / float(g["n_valid"])
            mean = jnp.sum(y * m, axis=1, keepdims=True) * inv_n
            msq = jnp.sum((y * y) * m, axis=1, keepdims=True) * inv_n
            var = jnp.maximum(msq - mean * mean, 0.0)
            y = (y - mean) * jax.lax.rsqrt(var + IN_EPS)
        return leaky(y)

    x = x_ref[0].astype(jnp.float32)                      # (3, H*W)

    # pre_conv: 1x1, Cin=3 -> 32. K=3 would waste the MXU; do 3 VPU multiply-adds instead.
    wpre = wpre_ref[0]                                    # (32, 3)
    y = wpre[:, 0:1] * x[0:1, :]
    y = y + wpre[:, 1:2] * x[1:2, :]
    y = y + wpre[:, 2:3] * x[2:3, :]
    y = leaky(y + bpre_ref[...])                          # (32, 234)

    y = conv_norm_act(y, w1_ref, b1_ref, m1_ref, geo[1])  # (64, 196)
    y = conv_norm_act(y, w2_ref, b2_ref, m2_ref, geo[2])  # (64, 158)
    y = conv_norm_act(y, w4_ref, b4_ref, m4_ref, geo[3])  # (32, 138)
    y = conv_norm_act(y, w5_ref, b5_ref, m5_ref, geo[4])  # (16, 136)

    # Fused FC head. fc1 contracts over (channel, valid spatial); the torch NCHW-Flatten
    # permutation and the zeroing of garbage columns are baked into wf1 host-side, so the
    # contraction is 16 per-channel (1,136)@(136,64) matmuls -- no reshapes/transposes.
    h = bf1_ref[...]                                      # (1, 64)
    for c in range(y.shape[0]):
        h = h + jnp.dot(y[c:c + 1, :], wf1_ref[c], preferred_element_type=jnp.float32)
    h = leaky(h)
    h = leaky(jnp.dot(h, wf2_ref[...], preferred_element_type=jnp.float32) + bf2_ref[...])
    h = jnp.dot(h, wf3_ref[...], preferred_element_type=jnp.float32) + bf3_ref[...]
    o_ref[0] = jnp.tanh(h)                                # (1, 3)


# ---------------------------------------------------------------------------
# Parameter init (PyTorch layouts) + repacking into the fused-kernel layout
# ---------------------------------------------------------------------------
def init_params(seed=42):
    """Deterministic random params in PyTorch layouts (Conv: OIHW, Linear: (out, in))."""
    keys = jax.random.split(jax.random.PRNGKey(seed), 8)

    def conv_init(key, kh, kw, cin, cout):
        k1, k2 = jax.random.split(key)
        w = jax.random.normal(k1, (cout, cin, kh, kw), jnp.float32) / jnp.sqrt(float(kh * kw * cin))
        b = 0.01 * jax.random.normal(k2, (cout,), jnp.float32)
        return w, b

    def fc_init(key, fin, fout):
        k1, k2 = jax.random.split(key)
        w = jax.random.normal(k1, (fout, fin), jnp.float32) / jnp.sqrt(float(fin))
        b = 0.01 * jax.random.normal(k2, (fout,), jnp.float32)
        return w, b

    p = {}
    p["pre_w"], p["pre_b"] = conv_init(keys[0], 1, 1, 3, 32)
    p["c1_w"], p["c1_b"] = conv_init(keys[1], 3, 3, 32, 64)
    p["c2_w"], p["c2_b"] = conv_init(keys[2], 3, 3, 64, 64)
    p["c4_w"], p["c4_b"] = conv_init(keys[3], 2, 3, 64, 32)
    p["c5_w"], p["c5_b"] = conv_init(keys[4], 1, 3, 32, 16)
    p["fc1_w"], p["fc1_b"] = fc_init(keys[5], _FLAT_FEATURES, 64)
    p["fc2_w"], p["fc2_b"] = fc_init(keys[6], 64, 32)
    p["fc3_w"], p["fc3_b"] = fc_init(keys[7], 32, 3)
    return p


def _pack_conv(w_oihw, b):
    cout, cin, kh, kw = w_oihw.shape
    w_taps = jnp.transpose(w_oihw, (2, 3, 0, 1)).reshape(kh * kw, cout, cin)
    return w_taps, b.reshape(cout, 1)


def _valid_mask(out_len, vw):
    q = np.arange(out_len)
    return jnp.asarray(((q % IMG_W) < vw).astype(np.float32).reshape(1, out_len))


def _pack_fc1(w_out_in):
    # torch fc1 weight (64, 1280); torch flat index = c*vh*vw + h*vw + w (NCHW flatten).
    g = _GEO[-1]
    vh, vw, out_len, cch = g["vh"], g["vw"], g["out_len"], g["cout"]
    fout = w_out_in.shape[0]
    idx = np.arange(cch * vh * vw)
    c = idx // (vh * vw)
    h = (idx % (vh * vw)) // vw
    w = idx % vw
    p = h * IMG_W + w                                     # position in the (C, 136) kernel layout
    packed = jnp.zeros((cch, out_len, fout), jnp.float32)
    packed = packed.at[c, p, :].set(jnp.transpose(w_out_in))
    return packed


def prepare_params(raw):
    """Repack torch-layout params into the fused-kernel layout (+ InstanceNorm valid masks)."""
    kp = {}
    kp["pre_w"], kp["pre_b"] = _pack_conv(raw["pre_w"], raw["pre_b"])
    kp["c1_w"], kp["c1_b"] = _pack_conv(raw["c1_w"], raw["c1_b"])
    kp["c2_w"], kp["c2_b"] = _pack_conv(raw["c2_w"], raw["c2_b"])
    kp["c4_w"], kp["c4_b"] = _pack_conv(raw["c4_w"], raw["c4_b"])
    kp["c5_w"], kp["c5_b"] = _pack_conv(raw["c5_w"], raw["c5_b"])
    for g in _GEO[1:]:
        kp[g["name"] + "_mask"] = _valid_mask(g["out_len"], g["vw"])
    kp["fc1_w"] = _pack_fc1(raw["fc1_w"])
    kp["fc1_b"] = raw["fc1_b"].reshape(1, -1)
    kp["fc2_w"] = jnp.transpose(raw["fc2_w"])
    kp["fc2_b"] = raw["fc2_b"].reshape(1, -1)
    kp["fc3_w"] = jnp.transpose(raw["fc3_w"])
    kp["fc3_b"] = raw["fc3_b"].reshape(1, -1)
    return kp


# ---------------------------------------------------------------------------
# Forward pass: ONE pallas_call for the whole network
# ---------------------------------------------------------------------------
def _full_block_spec(arr):
    nd = arr.ndim
    return pl.BlockSpec(arr.shape, lambda b, _nd=nd: (0,) * _nd)


@jax.jit
def cnn_forward(x_nchw, kparams):
    """x_nchw: (B, 3, 13, 18) float32 (PyTorch NCHW). Returns (B, 3)."""
    B = x_nchw.shape[0]
    # NCHW flattened per channel == exactly the in-kernel (C, H*W) layout; free reshape.
    x_flat = x_nchw.reshape(B, 3, IMG_H * IMG_W).astype(jnp.float32)

    ordered = (
        kparams["pre_w"], kparams["pre_b"],
        kparams["c1_w"], kparams["c1_b"], kparams["c1_mask"],
        kparams["c2_w"], kparams["c2_b"], kparams["c2_mask"],
        kparams["c4_w"], kparams["c4_b"], kparams["c4_mask"],
        kparams["c5_w"], kparams["c5_b"], kparams["c5_mask"],
        kparams["fc1_w"], kparams["fc1_b"],
        kparams["fc2_w"], kparams["fc2_b"],
        kparams["fc3_w"], kparams["fc3_b"],
    )
    in_specs = [pl.BlockSpec((1, 3, IMG_H * IMG_W), lambda b: (b, 0, 0))]
    in_specs += [_full_block_spec(a) for a in ordered]

    out = pl.pallas_call(
        functools.partial(_fused_cnn_kernel, geo=_GEO),
        out_shape=jax.ShapeDtypeStruct((B, 1, 3), jnp.float32),
        grid=(B,),
        in_specs=in_specs,
        out_specs=pl.BlockSpec((1, 1, 3), lambda b: (b, 0, 0)),
        compiler_params=pltpu.CompilerParams(
            dimension_semantics=("parallel",),   # v7x: one sample per TensorCore
        ),
    )(x_flat, *ordered)
    return out.reshape(B, 3)


# ---------------------------------------------------------------------------
# Plain-JAX reference (direct transcription of the PyTorch module)
# ---------------------------------------------------------------------------
def reference_forward(x_nchw, raw):
    def conv(x, w, b):
        y = jax.lax.conv_general_dilated(
            x, w, window_strides=(1, 1), padding="VALID",
            dimension_numbers=("NCHW", "OIHW", "NCHW"))
        return y + b.reshape(1, -1, 1, 1)

    def inorm(y):
        m = jnp.mean(y, axis=(2, 3), keepdims=True)
        v = jnp.mean(jnp.square(y - m), axis=(2, 3), keepdims=True)
        return (y - m) * jax.lax.rsqrt(v + IN_EPS)

    def leaky(v):
        return jnp.where(v >= 0, v, LEAKY_SLOPE * v)

    y = leaky(conv(x_nchw, raw["pre_w"], raw["pre_b"]))
    y = leaky(inorm(conv(y, raw["c1_w"], raw["c1_b"])))
    y = leaky(inorm(conv(y, raw["c2_w"], raw["c2_b"])))
    y = leaky(inorm(conv(y, raw["c4_w"], raw["c4_b"])))
    y = leaky(inorm(conv(y, raw["c5_w"], raw["c5_b"])))
    f = y.reshape(y.shape[0], -1)                         # torch.nn.Flatten on NCHW
    h = leaky(f @ raw["fc1_w"].T + raw["fc1_b"])
    h = leaky(h @ raw["fc2_w"].T + raw["fc2_b"])
    h = h @ raw["fc3_w"].T + raw["fc3_b"]
    return jnp.tanh(h)


if __name__ == "__main__":
    B = 2
    x = jax.random.normal(jax.random.PRNGKey(0), (B, 3, IMG_H, IMG_W), jnp.float32)
    raw = init_params(seed=42)
    kparams = prepare_params(raw)

    out = cnn_forward(x, kparams)
    out = jax.block_until_ready(out)

    assert out.shape == (B, 3), out.shape
    assert bool(jnp.all(jnp.isfinite(out)))
    assert bool(jnp.all(jnp.abs(out) <= 1.0))             # tanh output range

    # Cross-check the fused kernel against a plain-JAX transcription of the module.
    # (Loose tolerance: MXU f32-matmul pass count may differ from XLA's conv lowering.)
    ref = reference_forward(x, raw)
    np.testing.assert_allclose(np.asarray(out), np.asarray(ref), rtol=8e-2, atol=8e-2)

    print("KERNEL_OK")
</pallas_src>

<mosaic_0001>
module attributes {stable_mosaic.version = 11 : i64} {
  func.func @_fused_cnn_kernel(%arg0: i32, %arg1: memref<1x3x234xf32, #tpu.memory_space<vmem>>, %arg2: memref<1x32x3xf32, #tpu.memory_space<vmem>>, %arg3: memref<32x1xf32, #tpu.memory_space<vmem>>, %arg4: memref<9x64x32xf32, #tpu.memory_space<vmem>>, %arg5: memref<64x1xf32, #tpu.memory_space<vmem>>, %arg6: memref<1x196xf32, #tpu.memory_space<vmem>>, %arg7: memref<9x64x64xf32, #tpu.memory_space<vmem>>, %arg8: memref<64x1xf32, #tpu.memory_space<vmem>>, %arg9: memref<1x158xf32, #tpu.memory_space<vmem>>, %arg10: memref<6x32x64xf32, #tpu.memory_space<vmem>>, %arg11: memref<32x1xf32, #tpu.memory_space<vmem>>, %arg12: memref<1x138xf32, #tpu.memory_space<vmem>>, %arg13: memref<3x16x32xf32, #tpu.memory_space<vmem>>, %arg14: memref<16x1xf32, #tpu.memory_space<vmem>>, %arg15: memref<1x136xf32, #tpu.memory_space<vmem>>, %arg16: memref<16x136x64xf32, #tpu.memory_space<vmem>>, %arg17: memref<1x64xf32, #tpu.memory_space<vmem>>, %arg18: memref<64x32xf32, #tpu.memory_space<vmem>>, %arg19: memref<1x32xf32, #tpu.memory_space<vmem>>, %arg20: memref<32x3xf32, #tpu.memory_space<vmem>>, %arg21: memref<1x3xf32, #tpu.memory_space<vmem>>, %arg22: memref<1x1x3xf32, #tpu.memory_space<vmem>>) attributes {dimension_semantics = [#tpu.dimension_semantics<parallel>], iteration_bounds = array<i64: 2>, scalar_prefetch = 0 : i64, scratch_operands = 0 : i64, tpu.core_type = #tpu.core_type<tc>, window_params = [{transform_indices = @transform_0, window_bounds = array<i64: 1, 3, 234>}, {pipeline_mode = #tpu.pipeline_mode<synchronous>, transform_indices = @transform_1, window_bounds = array<i64: 1, 32, 3>}, {pipeline_mode = #tpu.pipeline_mode<synchronous>, transform_indices = @transform_2, window_bounds = array<i64: 32, 1>}, {pipeline_mode = #tpu.pipeline_mode<synchronous>, transform_indices = @transform_3, window_bounds = array<i64: 9, 64, 32>}, {pipeline_mode = #tpu.pipeline_mode<synchronous>, transform_indices = @transform_4, window_bounds = array<i64: 64, 1>}, {pipeline_mode = #tpu.pipeline_mode<synchronous>, transform_indices = @transform_5, window_bounds = array<i64: 1, 196>}, {pipeline_mode = #tpu.pipeline_mode<synchronous>, transform_indices = @transform_6, window_bounds = array<i64: 9, 64, 64>}, {pipeline_mode = #tpu.pipeline_mode<synchronous>, transform_indices = @transform_7, window_bounds = array<i64: 64, 1>}, {pipeline_mode = #tpu.pipeline_mode<synchronous>, transform_indices = @transform_8, window_bounds = array<i64: 1, 158>}, {pipeline_mode = #tpu.pipeline_mode<synchronous>, transform_indices = @transform_9, window_bounds = array<i64: 6, 32, 64>}, {pipeline_mode = #tpu.pipeline_mode<synchronous>, transform_indices = @transform_10, window_bounds = array<i64: 32, 1>}, {pipeline_mode = #tpu.pipeline_mode<synchronous>, transform_indices = @transform_11, window_bounds = array<i64: 1, 138>}, {pipeline_mode = #tpu.pipeline_mode<synchronous>, transform_indices = @transform_12, window_bounds = array<i64: 3, 16, 32>}, {pipeline_mode = #tpu.pipeline_mode<synchronous>, transform_indices = @transform_13, window_bounds = array<i64: 16, 1>}, {pipeline_mode = #tpu.pipeline_mode<synchronous>, transform_indices = @transform_14, window_bounds = array<i64: 1, 136>}, {pipeline_mode = #tpu.pipeline_mode<synchronous>, transform_indices = @transform_15, window_bounds = array<i64: 16, 136, 64>}, {pipeline_mode = #tpu.pipeline_mode<synchronous>, transform_indices = @transform_16, window_bounds = array<i64: 1, 64>}, {pipeline_mode = #tpu.pipeline_mode<synchronous>, transform_indices = @transform_17, window_bounds = array<i64: 64, 32>}, {pipeline_mode = #tpu.pipeline_mode<synchronous>, transform_indices = @transform_18, window_bounds = array<i64: 1, 32>}, {pipeline_mode = #tpu.pipeline_mode<synchronous>, transform_indices = @transform_19, window_bounds = array<i64: 32, 3>}, {pipeline_mode = #tpu.pipeline_mode<synchronous>, transform_indices = @transform_20, window_bounds = array<i64: 1, 3>}, {transform_indices = @transform_21, window_bounds = array<i64: 1, 1, 3>}]} {
    %c0 = arith.constant 0 : index
    %c0_0 = arith.constant 0 : index
    %c0_1 = arith.constant 0 : index
    %0 = vector.load %arg1[%c0, %c0_0, %c0_1] : memref<1x3x234xf32, #tpu.memory_space<vmem>>, vector<1x3x234xf32>
    %1 = vector.shape_cast %0 : vector<1x3x234xf32> to vector<3x234xf32>
    %c0_2 = arith.constant 0 : index
    %c0_3 = arith.constant 0 : index
    %c0_4 = arith.constant 0 : index
    %2 = vector.load %arg2[%c0_2, %c0_3, %c0_4] : memref<1x32x3xf32, #tpu.memory_space<vmem>>, vector<1x32x3xf32>
    %3 = vector.shape_cast %2 : vector<1x32x3xf32> to vector<32x3xf32>
    %4 = vector.extract_strided_slice %3 {offsets = [0, 0], sizes = [32, 1], strides = [1, 1]} : vector<32x3xf32> to vector<32x1xf32>
    %5 = vector.extract_strided_slice %1 {offsets = [0, 0], sizes = [1, 234], strides = [1, 1]} : vector<3x234xf32> to vector<1x234xf32>
    %6 = vector.broadcast %4 : vector<32x1xf32> to vector<32x234xf32>
    %7 = vector.broadcast %5 : vector<1x234xf32> to vector<32x234xf32>
    %8 = arith.mulf %6, %7 : vector<32x234xf32>
    %9 = vector.extract_strided_slice %3 {offsets = [0, 1], sizes = [32, 1], strides = [1, 1]} : vector<32x3xf32> to vector<32x1xf32>
    %10 = vector.extract_strided_slice %1 {offsets = [1, 0], sizes = [1, 234], strides = [1, 1]} : vector<3x234xf32> to vector<1x234xf32>
    %11 = vector.broadcast %9 : vector<32x1xf32> to vector<32x234xf32>
    %12 = vector.broadcast %10 : vector<1x234xf32> to vector<32x234xf32>
    %13 = arith.mulf %11, %12 : vector<32x234xf32>
    %14 = arith.addf %8, %13 : vector<32x234xf32>
    %15 = vector.extract_strided_slice %3 {offsets = [0, 2], sizes = [32, 1], strides = [1, 1]} : vector<32x3xf32> to vector<32x1xf32>
    %16 = vector.extract_strided_slice %1 {offsets = [2, 0], sizes = [1, 234], strides = [1, 1]} : vector<3x234xf32> to vector<1x234xf32>
    %17 = vector.broadcast %15 : vector<32x1xf32> to vector<32x234xf32>
    %18 = vector.broadcast %16 : vector<1x234xf32> to vector<32x234xf32>
    %19 = arith.mulf %17, %18 : vector<32x234xf32>
    %20 = arith.addf %14, %19 : vector<32x234xf32>
    %c0_5 = arith.constant 0 : index
    %c0_6 = arith.constant 0 : index
    %21 = vector.load %arg3[%c0_5, %c0_6] : memref<32x1xf32, #tpu.memory_space<vmem>>, vector<32x1xf32>
    %22 = vector.broadcast %21 : vector<32x1xf32> to vector<32x234xf32>
    %23 = arith.addf %20, %22 : vector<32x234xf32>
    %cst = arith.constant 0.000000e+00 : f32
    %24 = vector.broadcast %cst : f32 to vector<32x234xf32>
    %25 = arith.cmpf oge, %23, %24 : vector<32x234xf32>
    %cst_7 = arith.constant 0.00999999977 : f32
    %26 = vector.broadcast %cst_7 : f32 to vector<32x234xf32>
    %27 = arith.mulf %26, %23 : vector<32x234xf32>
    %28 = arith.select %25, %23, %27 : vector<32x234xi1>, vector<32x234xf32>
    %c0_8 = arith.constant 0 : index
    %c0_9 = arith.constant 0 : index
    %c0_10 = arith.constant 0 : index
    %29 = vector.load %arg4[%c0_8, %c0_9, %c0_10] : memref<9x64x32xf32, #tpu.memory_space<vmem>>, vector<1x64x32xf32>
    %30 = vector.shape_cast %29 : vector<1x64x32xf32> to vector<64x32xf32>
    %31 = vector.extract_strided_slice %28 {offsets = [0, 0], sizes = [32, 196], strides = [1, 1]} : vector<32x234xf32> to vector<32x196xf32>
    %cst_11 = arith.constant dense<0.000000e+00> : vector<64x196xf32>
    %32 = tpu.matmul %30, %31, %cst_11 {dimension_numbers = #tpu.dot_dimension_numbers<[1], [0], [0], [1], [0, 0, 1, 1], [], []>} : vector<64x32xf32>, vector<32x196xf32>, vector<64x196xf32> -> vector<64x196xf32>
    %c1 = arith.constant 1 : index
    %c0_12 = arith.constant 0 : index
    %c0_13 = arith.constant 0 : index
    %33 = vector.load %arg4[%c1, %c0_12, %c0_13] : memref<9x64x32xf32, #tpu.memory_space<vmem>>, vector<1x64x32xf32>
    %34 = vector.shape_cast %33 : vector<1x64x32xf32> to vector<64x32xf32>
    %35 = vector.extract_strided_slice %28 {offsets = [0, 1], sizes = [32, 196], strides = [1, 1]} : vector<32x234xf32> to vector<32x196xf32>
    %cst_14 = arith.constant dense<0.000000e+00> : vector<64x196xf32>
    %36 = tpu.matmul %34, %35, %cst_14 {dimension_numbers = #tpu.dot_dimension_numbers<[1], [0], [0], [1], [0, 0, 1, 1], [], []>} : vector<64x32xf32>, vector<32x196xf32>, vector<64x196xf32> -> vector<64x196xf32>
    %37 = arith.addf %32, %36 : vector<64x196xf32>
    %c2 = arith.constant 2 : index
    %c0_15 = arith.constant 0 : index
    %c0_16 = arith.constant 0 : index
    %38 = vector.load %arg4[%c2, %c0_15, %c0_16] : memref<9x64x32xf32, #tpu.memory_space<vmem>>, vector<1x64x32xf32>
    %39 = vector.shape_cast %38 : vector<1x64x32xf32> to vector<64x32xf32>
    %40 = vector.extract_strided_slice %28 {offsets = [0, 2], sizes = [32, 196], strides = [1, 1]} : vector<32x234xf32> to vector<32x196xf32>
    %cst_17 = arith.constant dense<0.000000e+00> : vector<64x196xf32>
    %41 = tpu.matmul %39, %40, %cst_17 {dimension_numbers = #tpu.dot_dimension_numbers<[1], [0], [0], [1], [0, 0, 1, 1], [], []>} : vector<64x32xf32>, vector<32x196xf32>, vector<64x196xf32> -> vector<64x196xf32>
    %42 = arith.addf %37, %41 : vector<64x196xf32>
    %c3 = arith.constant 3 : index
    %c0_18 = arith.constant 0 : index
    %c0_19 = arith.constant 0 : index
    %43 = vector.load %arg4[%c3, %c0_18, %c0_19] : memref<9x64x32xf32, #tpu.memory_space<vmem>>, vector<1x64x32xf32>
    %44 = vector.shape_cast %43 : vector<1x64x32xf32> to vector<64x32xf32>
    %45 = vector.extract_strided_slice %28 {offsets = [0, 18], sizes = [32, 196], strides = [1, 1]} : vector<32x234xf32> to vector<32x196xf32>
    %cst_20 = arith.constant dense<0.000000e+00> : vector<64x196xf32>
    %46 = tpu.matmul %44, %45, %cst_20 {dimension_numbers = #tpu.dot_dimension_numbers<[1], [0], [0], [1], [0, 0, 1, 1], [], []>} : vector<64x32xf32>, vector<32x196xf32>, vector<64x196xf32> -> vector<64x196xf32>
    %47 = arith.addf %42, %46 : vector<64x196xf32>
    %c4 = arith.constant 4 : index
    %c0_21 = arith.constant 0 : index
    %c0_22 = arith.constant 0 : index
    %48 = vector.load %arg4[%c4, %c0_21, %c0_22] : memref<9x64x32xf32, #tpu.memory_space<vmem>>, vector<1x64x32xf32>
    %49 = vector.shape_cast %48 : vector<1x64x32xf32> to vector<64x32xf32>
    %50 = vector.extract_strided_slice %28 {offsets = [0, 19], sizes = [32, 196], strides = [1, 1]} : vector<32x234xf32> to vector<32x196xf32>
    %cst_23 = arith.constant dense<0.000000e+00> : vector<64x196xf32>
    %51 = tpu.matmul %49, %50, %cst_23 {dimension_numbers = #tpu.dot_dimension_numbers<[1], [0], [0], [1], [0, 0, 1, 1], [], []>} : vector<64x32xf32>, vector<32x196xf32>, vector<64x196xf32> -> vector<64x196xf32>
    %52 = arith.addf %47, %51 : vector<64x196xf32>
    %c5 = arith.constant 5 : index
    %c0_24 = arith.constant 0 : index
    %c0_25 = arith.constant 0 : index
    %53 = vector.load %arg4[%c5, %c0_24, %c0_25] : memref<9x64x32xf32, #tpu.memory_space<vmem>>, vector<1x64x32xf32>
    %54 = vector.shape_cast %53 : vector<1x64x32xf32> to vector<64x32xf32>
    %55 = vector.extract_strided_slice %28 {offsets = [0, 20], sizes = [32, 196], strides = [1, 1]} : vector<32x234xf32> to vector<32x196xf32>
    %cst_26 = arith.constant dense<0.000000e+00> : vector<64x196xf32>
    %56 = tpu.matmul %54, %55, %cst_26 {dimension_numbers = #tpu.dot_dimension_numbers<[1], [0], [0], [1], [0, 0, 1, 1], [], []>} : vector<64x32xf32>, vector<32x196xf32>, vector<64x196xf32> -> vector<64x196xf32>
    %57 = arith.addf %52, %56 : vector<64x196xf32>
    %c6 = arith.constant 6 : index
    %c0_27 = arith.constant 0 : index
    %c0_28 = arith.constant 0 : index
    %58 = vector.load %arg4[%c6, %c0_27, %c0_28] : memref<9x64x32xf32, #tpu.memory_space<vmem>>, vector<1x64x32xf32>
    %59 = vector.shape_cast %58 : vector<1x64x32xf32> to vector<64x32xf32>
    %60 = vector.extract_strided_slice %28 {offsets = [0, 36], sizes = [32, 196], strides = [1, 1]} : vector<32x234xf32> to vector<32x196xf32>
    %cst_29 = arith.constant dense<0.000000e+00> : vector<64x196xf32>
    %61 = tpu.matmul %59, %60, %cst_29 {dimension_numbers = #tpu.dot_dimension_numbers<[1], [0], [0], [1], [0, 0, 1, 1], [], []>} : vector<64x32xf32>, vector<32x196xf32>, vector<64x196xf32> -> vector<64x196xf32>
    %62 = arith.addf %57, %61 : vector<64x196xf32>
    %c7 = arith.constant 7 : index
    %c0_30 = arith.constant 0 : index
    %c0_31 = arith.constant 0 : index
    %63 = vector.load %arg4[%c7, %c0_30, %c0_31] : memref<9x64x32xf32, #tpu.memory_space<vmem>>, vector<1x64x32xf32>
    %64 = vector.shape_cast %63 : vector<1x64x32xf32> to vector<64x32xf32>
    %65 = vector.extract_strided_slice %28 {offsets = [0, 37], sizes = [32, 196], strides = [1, 1]} : vector<32x234xf32> to vector<32x196xf32>
    %cst_32 = arith.constant dense<0.000000e+00> : vector<64x196xf32>
    %66 = tpu.matmul %64, %65, %cst_32 {dimension_numbers = #tpu.dot_dimension_numbers<[1], [0], [0], [1], [0, 0, 1, 1], [], []>} : vector<64x32xf32>, vector<32x196xf32>, vector<64x196xf32> -> vector<64x196xf32>
    %67 = arith.addf %62, %66 : vector<64x196xf32>
    %c8 = arith.constant 8 : index
    %c0_33 = arith.constant 0 : index
    %c0_34 = arith.constant 0 : index
    %68 = vector.load %arg4[%c8, %c0_33, %c0_34] : memref<9x64x32xf32, #tpu.memory_space<vmem>>, vector<1x64x32xf32>
    %69 = vector.shape_cast %68 : vector<1x64x32xf32> to vector<64x32xf32>
    %70 = vector.extract_strided_slice %28 {offsets = [0, 38], sizes = [32, 196], strides = [1, 1]} : vector<32x234xf32> to vector<32x196xf32>
    %cst_35 = arith.constant dense<0.000000e+00> : vector<64x196xf32>
    %71 = tpu.matmul %69, %70, %cst_35 {dimension_numbers = #tpu.dot_dimension_numbers<[1], [0], [0], [1], [0, 0, 1, 1], [], []>} : vector<64x32xf32>, vector<32x196xf32>, vector<64x196xf32> -> vector<64x196xf32>
    %72 = arith.addf %67, %71 : vector<64x196xf32>
    %c0_36 = arith.constant 0 : index
    %c0_37 = arith.constant 0 : index
    %73 = vector.load %arg5[%c0_36, %c0_37] : memref<64x1xf32, #tpu.memory_space<vmem>>, vector<64x1xf32>
    %74 = vector.broadcast %73 : vector<64x1xf32> to vector<64x196xf32>
    %75 = arith.addf %72, %74 : vector<64x196xf32>
    %c0_38 = arith.constant 0 : index
    %c0_39 = arith.constant 0 : index
    %76 = vector.load %arg6[%c0_38, %c0_39] : memref<1x196xf32, #tpu.memory_space<vmem>>, vector<1x196xf32>
    %77 = vector.broadcast %76 : vector<1x196xf32> to vector<64x196xf32>
    %78 = arith.mulf %75, %77 : vector<64x196xf32>
    %cst_40 = arith.constant dense<0.000000e+00> : vector<64xf32>
    %79 = vector.multi_reduction <add>, %78, %cst_40 [1] : vector<64x196xf32> to vector<64xf32>
    %80 = vector.shape_cast %79 : vector<64xf32> to vector<64x1xf32>
    %cst_41 = arith.constant 0.00568181835 : f32
    %81 = vector.broadcast %cst_41 : f32 to vector<64x1xf32>
    %82 = arith.mulf %80, %81 : vector<64x1xf32>
    %83 = arith.mulf %75, %75 : vector<64x196xf32>
    %84 = vector.broadcast %76 : vector<1x196xf32> to vector<64x196xf32>
    %85 = arith.mulf %83, %84 : vector<64x196xf32>
    %cst_42 = arith.constant dense<0.000000e+00> : vector<64xf32>
    %86 = vector.multi_reduction <add>, %85, %cst_42 [1] : vector<64x196xf32> to vector<64xf32>
    %87 = vector.shape_cast %86 : vector<64xf32> to vector<64x1xf32>
    %cst_43 = arith.constant 0.00568181835 : f32
    %88 = vector.broadcast %cst_43 : f32 to vector<64x1xf32>
    %89 = arith.mulf %87, %88 : vector<64x1xf32>
    %90 = arith.mulf %82, %82 : vector<64x1xf32>
    %91 = arith.subf %89, %90 : vector<64x1xf32>
    %cst_44 = arith.constant 0.000000e+00 : f32
    %92 = vector.broadcast %cst_44 : f32 to vector<64x1xf32>
    %93 = arith.maximumf %91, %92 : vector<64x1xf32>
    %94 = vector.broadcast %82 : vector<64x1xf32> to vector<64x196xf32>
    %95 = arith.subf %75, %94 : vector<64x196xf32>
    %cst_45 = arith.constant 9.99999974E-6 : f32
    %96 = vector.broadcast %cst_45 : f32 to vector<64x1xf32>
    %97 = arith.addf %93, %96 : vector<64x1xf32>
    %98 = math.rsqrt %97 : vector<64x1xf32>
    %99 = vector.broadcast %98 : vector<64x1xf32> to vector<64x196xf32>
    %100 = arith.mulf %95, %99 : vector<64x196xf32>
    %cst_46 = arith.constant 0.000000e+00 : f32
    %101 = vector.broadcast %cst_46 : f32 to vector<64x196xf32>
    %102 = arith.cmpf oge, %100, %101 : vector<64x196xf32>
    %cst_47 = arith.constant 0.00999999977 : f32
    %103 = vector.broadcast %cst_47 : f32 to vector<64x196xf32>
    %104 = arith.mulf %103, %100 : vector<64x196xf32>
    %105 = arith.select %102, %100, %104 : vector<64x196xi1>, vector<64x196xf32>
    %c0_48 = arith.constant 0 : index
    %c0_49 = arith.constant 0 : index
    %c0_50 = arith.constant 0 : index
    %106 = vector.load %arg7[%c0_48, %c0_49, %c0_50] : memref<9x64x64xf32, #tpu.memory_space<vmem>>, vector<1x64x64xf32>
    %107 = vector.shape_cast %106 : vector<1x64x64xf32> to vector<64x64xf32>
    %108 = vector.extract_strided_slice %105 {offsets = [0, 0], sizes = [64, 158], strides = [1, 1]} : vector<64x196xf32> to vector<64x158xf32>
    %cst_51 = arith.constant dense<0.000000e+00> : vector<64x158xf32>
    %109 = tpu.matmul %107, %108, %cst_51 {dimension_numbers = #tpu.dot_dimension_numbers<[1], [0], [0], [1], [0, 0, 1, 1], [], []>} : vector<64x64xf32>, vector<64x158xf32>, vector<64x158xf32> -> vector<64x158xf32>
    %c1_52 = arith.constant 1 : index
    %c0_53 = arith.constant 0 : index
    %c0_54 = arith.constant 0 : index
    %110 = vector.load %arg7[%c1_52, %c0_53, %c0_54] : memref<9x64x64xf32, #tpu.memory_space<vmem>>, vector<1x64x64xf32>
    %111 = vector.shape_cast %110 : vector<1x64x64xf32> to vector<64x64xf32>
    %112 = vector.extract_strided_slice %105 {offsets = [0, 1], sizes = [64, 158], strides = [1, 1]} : vector<64x196xf32> to vector<64x158xf32>
    %cst_55 = arith.constant dense<0.000000e+00> : vector<64x158xf32>
    %113 = tpu.matmul %111, %112, %cst_55 {dimension_numbers = #tpu.dot_dimension_numbers<[1], [0], [0], [1], [0, 0, 1, 1], [], []>} : vector<64x64xf32>, vector<64x158xf32>, vector<64x158xf32> -> vector<64x158xf32>
    %114 = arith.addf %109, %113 : vector<64x158xf32>
    %c2_56 = arith.constant 2 : index
    %c0_57 = arith.constant 0 : index
    %c0_58 = arith.constant 0 : index
    %115 = vector.load %arg7[%c2_56, %c0_57, %c0_58] : memref<9x64x64xf32, #tpu.memory_space<vmem>>, vector<1x64x64xf32>
    %116 = vector.shape_cast %115 : vector<1x64x64xf32> to vector<64x64xf32>
    %117 = vector.extract_strided_slice %105 {offsets = [0, 2], sizes = [64, 158], strides = [1, 1]} : vector<64x196xf32> to vector<64x158xf32>
    %cst_59 = arith.constant dense<0.000000e+00> : vector<64x158xf32>
    %118 = tpu.matmul %116, %117, %cst_59 {dimension_numbers = #tpu.dot_dimension_numbers<[1], [0], [0], [1], [0, 0, 1, 1], [], []>} : vector<64x64xf32>, vector<64x158xf32>, vector<64x158xf32> -> vector<64x158xf32>
    %119 = arith.addf %114, %118 : vector<64x158xf32>
    %c3_60 = arith.constant 3 : index
    %c0_61 = arith.constant 0 : index
    %c0_62 = arith.constant 0 : index
    %120 = vector.load %arg7[%c3_60, %c0_61, %c0_62] : memref<9x64x64xf32, #tpu.memory_space<vmem>>, vector<1x64x64xf32>
    %121 = vector.shape_cast %120 : vector<1x64x64xf32> to vector<64x64xf32>
    %122 = vector.extract_strided_slice %105 {offsets = [0, 18], sizes = [64, 158], strides = [1, 1]} : vector<64x196xf32> to vector<64x158xf32>
    %cst_63 = arith.constant dense<0.000000e+00> : vector<64x158xf32>
    %123 = tpu.matmul %121, %122, %cst_63 {dimension_numbers = #tpu.dot_dimension_numbers<[1], [0], [0], [1], [0, 0, 1, 1], [], []>} : vector<64x64xf32>, vector<64x158xf32>, vector<64x158xf32> -> vector<64x158xf32>
    %124 = arith.addf %119, %123 : vector<64x158xf32>
    %c4_64 = arith.constant 4 : index
    %c0_65 = arith.constant 0 : index
    %c0_66 = arith.constant 0 : index
    %125 = vector.load %arg7[%c4_64, %c0_65, %c0_66] : memref<9x64x64xf32, #tpu.memory_space<vmem>>, vector<1x64x64xf32>
    %126 = vector.shape_cast %125 : vector<1x64x64xf32> to vector<64x64xf32>
    %127 = vector.extract_strided_slice %105 {offsets = [0, 19], sizes = [64, 158], strides = [1, 1]} : vector<64x196xf32> to vector<64x158xf32>
    %cst_67 = arith.constant dense<0.000000e+00> : vector<64x158xf32>
    %128 = tpu.matmul %126, %127, %cst_67 {dimension_numbers = #tpu.dot_dimension_numbers<[1], [0], [0], [1], [0, 0, 1, 1], [], []>} : vector<64x64xf32>, vector<64x158xf32>, vector<64x158xf32> -> vector<64x158xf32>
    %129 = arith.addf %124, %128 : vector<64x158xf32>
    %c5_68 = arith.constant 5 : index
    %c0_69 = arith.constant 0 : index
    %c0_70 = arith.constant 0 : index
    %130 = vector.load %arg7[%c5_68, %c0_69, %c0_70] : memref<9x64x64xf32, #tpu.memory_space<vmem>>, vector<1x64x64xf32>
    %131 = vector.shape_cast %130 : vector<1x64x64xf32> to vector<64x64xf32>
    %132 = vector.extract_strided_slice %105 {offsets = [0, 20], sizes = [64, 158], strides = [1, 1]} : vector<64x196xf32> to vector<64x158xf32>
    %cst_71 = arith.constant dense<0.000000e+00> : vector<64x158xf32>
    %133 = tpu.matmul %131, %132, %cst_71 {dimension_numbers = #tpu.dot_dimension_numbers<[1], [0], [0], [1], [0, 0, 1, 1], [], []>} : vector<64x64xf32>, vector<64x158xf32>, vector<64x158xf32> -> vector<64x158xf32>
    %134 = arith.addf %129, %133 : vector<64x158xf32>
    %c6_72 = arith.constant 6 : index
    %c0_73 = arith.constant 0 : index
    %c0_74 = arith.constant 0 : index
    %135 = vector.load %arg7[%c6_72, %c0_73, %c0_74] : memref<9x64x64xf32, #tpu.memory_space<vmem>>, vector<1x64x64xf32>
    %136 = vector.shape_cast %135 : vector<1x64x64xf32> to vector<64x64xf32>
    %137 = vector.extract_strided_slice %105 {offsets = [0, 36], sizes = [64, 158], strides = [1, 1]} : vector<64x196xf32> to vector<64x158xf32>
    %cst_75 = arith.constant dense<0.000000e+00> : vector<64x158xf32>
    %138 = tpu.matmul %136, %137, %cst_75 {dimension_numbers = #tpu.dot_dimension_numbers<[1], [0], [0], [1], [0, 0, 1, 1], [], []>} : vector<64x64xf32>, vector<64x158xf32>, vector<64x158xf32> -> vector<64x158xf32>
    %139 = arith.addf %134, %138 : vector<64x158xf32>
    %c7_76 = arith.constant 7 : index
    %c0_77 = arith.constant 0 : index
    %c0_78 = arith.constant 0 : index
    %140 = vector.load %arg7[%c7_76, %c0_77, %c0_78] : memref<9x64x64xf32, #tpu.memory_space<vmem>>, vector<1x64x64xf32>
    %141 = vector.shape_cast %140 : vector<1x64x64xf32> to vector<64x64xf32>
    %142 = vector.extract_strided_slice %105 {offsets = [0, 37], sizes = [64, 158], strides = [1, 1]} : vector<64x196xf32> to vector<64x158xf32>
    %cst_79 = arith.constant dense<0.000000e+00> : vector<64x158xf32>
    %143 = tpu.matmul %141, %142, %cst_79 {dimension_numbers = #tpu.dot_dimension_numbers<[1], [0], [0], [1], [0, 0, 1, 1], [], []>} : vector<64x64xf32>, vector<64x158xf32>, vector<64x158xf32> -> vector<64x158xf32>
    %144 = arith.addf %139, %143 : vector<64x158xf32>
    %c8_80 = arith.constant 8 : index
    %c0_81 = arith.constant 0 : index
    %c0_82 = arith.constant 0 : index
    %145 = vector.load %arg7[%c8_80, %c0_81, %c0_82] : memref<9x64x64xf32, #tpu.memory_space<vmem>>, vector<1x64x64xf32>
    %146 = vector.shape_cast %145 : vector<1x64x64xf32> to vector<64x64xf32>
    %147 = vector.extract_strided_slice %105 {offsets = [0, 38], sizes = [64, 158], strides = [1, 1]} : vector<64x196xf32> to vector<64x158xf32>
    %cst_83 = arith.constant dense<0.000000e+00> : vector<64x158xf32>
    %148 = tpu.matmul %146, %147, %cst_83 {dimension_numbers = #tpu.dot_dimension_numbers<[1], [0], [0], [1], [0, 0, 1, 1], [], []>} : vector<64x64xf32>, vector<64x158xf32>, vector<64x158xf32> -> vector<64x158xf32>
    %149 = arith.addf %144, %148 : vector<64x158xf32>
    %c0_84 = arith.constant 0 : index
    %c0_85 = arith.constant 0 : index
    %150 = vector.load %arg8[%c0_84, %c0_85] : memref<64x1xf32, #tpu.memory_space<vmem>>, vector<64x1xf32>
    %151 = vector.broadcast %150 : vector<64x1xf32> to vector<64x158xf32>
    %152 = arith.addf %149, %151 : vector<64x158xf32>
    %c0_86 = arith.constant 0 : index
    %c0_87 = arith.constant 0 : index
    %153 = vector.load %arg9[%c0_86, %c0_87] : memref<1x158xf32, #tpu.memory_space<vmem>>, vector<1x158xf32>
    %154 = vector.broadcast %153 : vector<1x158xf32> to vector<64x158xf32>
    %155 = arith.mulf %152, %154 : vector<64x158xf32>
    %cst_88 = arith.constant dense<0.000000e+00> : vector<64xf32>
    %156 = vector.multi_reduction <add>, %155, %cst_88 [1] : vector<64x158xf32> to vector<64xf32>
    %157 = vector.shape_cast %156 : vector<64xf32> to vector<64x1xf32>
    %cst_89 = arith.constant 0.00793650839 : f32
    %158 = vector.broadcast %cst_89 : f32 to vector<64x1xf32>
    %159 = arith.mulf %157, %158 : vector<64x1xf32>
    %160 = arith.mulf %152, %152 : vector<64x158xf32>
    %161 = vector.broadcast %153 : vector<1x158xf32> to vector<64x158xf32>
    %162 = arith.mulf %160, %161 : vector<64x158xf32>
    %cst_90 = arith.constant dense<0.000000e+00> : vector<64xf32>
    %163 = vector.multi_reduction <add>, %162, %cst_90 [1] : vector<64x158xf32> to vector<64xf32>
    %164 = vector.shape_cast %163 : vector<64xf32> to vector<64x1xf32>
    %cst_91 = arith.constant 0.00793650839 : f32
    %165 = vector.broadcast %cst_91 : f32 to vector<64x1xf32>
    %166 = arith.mulf %164, %165 : vector<64x1xf32>
    %167 = arith.mulf %159, %159 : vector<64x1xf32>
    %168 = arith.subf %166, %167 : vector<64x1xf32>
    %cst_92 = arith.constant 0.000000e+00 : f32
    %169 = vector.broadcast %cst_92 : f32 to vector<64x1xf32>
    %170 = arith.maximumf %168, %169 : vector<64x1xf32>
    %171 = vector.broadcast %159 : vector<64x1xf32> to vector<64x158xf32>
    %172 = arith.subf %152, %171 : vector<64x158xf32>
    %cst_93 = arith.constant 9.99999974E-6 : f32
    %173 = vector.broadcast %cst_93 : f32 to vector<64x1xf32>
    %174 = arith.addf %170, %173 : vector<64x1xf32>
    %175 = math.rsqrt %174 : vector<64x1xf32>
    %176 = vector.broadcast %175 : vector<64x1xf32> to vector<64x158xf32>
    %177 = arith.mulf %172, %176 : vector<64x158xf32>
    %cst_94 = arith.constant 0.000000e+00 : f32
    %178 = vector.broadcast %cst_94 : f32 to vector<64x158xf32>
    %179 = arith.cmpf oge, %177, %178 : vector<64x158xf32>
    %cst_95 = arith.constant 0.00999999977 : f32
    %180 = vector.broadcast %cst_95 : f32 to vector<64x158xf32>
    %181 = arith.mulf %180, %177 : vector<64x158xf32>
    %182 = arith.select %179, %177, %181 : vector<64x158xi1>, vector<64x158xf32>
    %c0_96 = arith.constant 0 : index
    %c0_97 = arith.constant 0 : index
    %c0_98 = arith.constant 0 : index
    %183 = vector.load %arg10[%c0_96, %c0_97, %c0_98] : memref<6x32x64xf32, #tpu.memory_space<vmem>>, vector<1x32x64xf32>
    %184 = vector.shape_cast %183 : vector<1x32x64xf32> to vector<32x64xf32>
    %185 = vector.extract_strided_slice %182 {offsets = [0, 0], sizes = [64, 138], strides = [1, 1]} : vector<64x158xf32> to vector<64x138xf32>
    %cst_99 = arith.constant dense<0.000000e+00> : vector<32x138xf32>
    %186 = tpu.matmul %184, %185, %cst_99 {dimension_numbers = #tpu.dot_dimension_numbers<[1], [0], [0], [1], [0, 0, 1, 1], [], []>} : vector<32x64xf32>, vector<64x138xf32>, vector<32x138xf32> -> vector<32x138xf32>
    %c1_100 = arith.constant 1 : index
    %c0_101 = arith.constant 0 : index
    %c0_102 = arith.constant 0 : index
    %187 = vector.load %arg10[%c1_100, %c0_101, %c0_102] : memref<6x32x64xf32, #tpu.memory_space<vmem>>, vector<1x32x64xf32>
    %188 = vector.shape_cast %187 : vector<1x32x64xf32> to vector<32x64xf32>
    %189 = vector.extract_strided_slice %182 {offsets = [0, 1], sizes = [64, 138], strides = [1, 1]} : vector<64x158xf32> to vector<64x138xf32>
    %cst_103 = arith.constant dense<0.000000e+00> : vector<32x138xf32>
    %190 = tpu.matmul %188, %189, %cst_103 {dimension_numbers = #tpu.dot_dimension_numbers<[1], [0], [0], [1], [0, 0, 1, 1], [], []>} : vector<32x64xf32>, vector<64x138xf32>, vector<32x138xf32> -> vector<32x138xf32>
    %191 = arith.addf %186, %190 : vector<32x138xf32>
    %c2_104 = arith.constant 2 : index
    %c0_105 = arith.constant 0 : index
    %c0_106 = arith.constant 0 : index
    %192 = vector.load %arg10[%c2_104, %c0_105, %c0_106] : memref<6x32x64xf32, #tpu.memory_space<vmem>>, vector<1x32x64xf32>
    %193 = vector.shape_cast %192 : vector<1x32x64xf32> to vector<32x64xf32>
    %194 = vector.extract_strided_slice %182 {offsets = [0, 2], sizes = [64, 138], strides = [1, 1]} : vector<64x158xf32> to vector<64x138xf32>
    %cst_107 = arith.constant dense<0.000000e+00> : vector<32x138xf32>
    %195 = tpu.matmul %193, %194, %cst_107 {dimension_numbers = #tpu.dot_dimension_numbers<[1], [0], [0], [1], [0, 0, 1, 1], [], []>} : vector<32x64xf32>, vector<64x138xf32>, vector<32x138xf32> -> vector<32x138xf32>
    %196 = arith.addf %191, %195 : vector<32x138xf32>
    %c3_108 = arith.constant 3 : index
    %c0_109 = arith.constant 0 : index
    %c0_110 = arith.constant 0 : index
    %197 = vector.load %arg10[%c3_108, %c0_109, %c0_110] : memref<6x32x64xf32, #tpu.memory_space<vmem>>, vector<1x32x64xf32>
    %198 = vector.shape_cast %197 : vector<1x32x64xf32> to vector<32x64xf32>
    %199 = vector.extract_strided_slice %182 {offsets = [0, 18], sizes = [64, 138], strides = [1, 1]} : vector<64x158xf32> to vector<64x138xf32>
    %cst_111 = arith.constant dense<0.000000e+00> : vector<32x138xf32>
    %200 = tpu.matmul %198, %199, %cst_111 {dimension_numbers = #tpu.dot_dimension_numbers<[1], [0], [0], [1], [0, 0, 1, 1], [], []>} : vector<32x64xf32>, vector<64x138xf32>, vector<32x138xf32> -> vector<32x138xf32>
    %201 = arith.addf %196, %200 : vector<32x138xf32>
    %c4_112 = arith.constant 4 : index
    %c0_113 = arith.constant 0 : index
    %c0_114 = arith.constant 0 : index
    %202 = vector.load %arg10[%c4_112, %c0_113, %c0_114] : memref<6x32x64xf32, #tpu.memory_space<vmem>>, vector<1x32x64xf32>
    %203 = vector.shape_cast %202 : vector<1x32x64xf32> to vector<32x64xf32>
    %204 = vector.extract_strided_slice %182 {offsets = [0, 19], sizes = [64, 138], strides = [1, 1]} : vector<64x158xf32> to vector<64x138xf32>
    %cst_115 = arith.constant dense<0.000000e+00> : vector<32x138xf32>
    %205 = tpu.matmul %203, %204, %cst_115 {dimension_numbers = #tpu.dot_dimension_numbers<[1], [0], [0], [1], [0, 0, 1, 1], [], []>} : vector<32x64xf32>, vector<64x138xf32>, vector<32x138xf32> -> vector<32x138xf32>
    %206 = arith.addf %201, %205 : vector<32x138xf32>
    %c5_116 = arith.constant 5 : index
    %c0_117 = arith.constant 0 : index
    %c0_118 = arith.constant 0 : index
    %207 = vector.load %arg10[%c5_116, %c0_117, %c0_118] : memref<6x32x64xf32, #tpu.memory_space<vmem>>, vector<1x32x64xf32>
    %208 = vector.shape_cast %207 : vector<1x32x64xf32> to vector<32x64xf32>
    %209 = vector.extract_strided_slice %182 {offsets = [0, 20], sizes = [64, 138], strides = [1, 1]} : vector<64x158xf32> to vector<64x138xf32>
    %cst_119 = arith.constant dense<0.000000e+00> : vector<32x138xf32>
    %210 = tpu.matmul %208, %209, %cst_119 {dimension_numbers = #tpu.dot_dimension_numbers<[1], [0], [0], [1], [0, 0, 1, 1], [], []>} : vector<32x64xf32>, vector<64x138xf32>, vector<32x138xf32> -> vector<32x138xf32>
    %211 = arith.addf %206, %210 : vector<32x138xf32>
    %c0_120 = arith.constant 0 : index
    %c0_121 = arith.constant 0 : index
    %212 = vector.load %arg11[%c0_120, %c0_121] : memref<32x1xf32, #tpu.memory_space<vmem>>, vector<32x1xf32>
    %213 = vector.broadcast %212 : vector<32x1xf32> to vector<32x138xf32>
    %214 = arith.addf %211, %213 : vector<32x138xf32>
    %c0_122 = arith.constant 0 : index
    %c0_123 = arith.constant 0 : index
    %215 = vector.load %arg12[%c0_122, %c0_123] : memref<1x138xf32, #tpu.memory_space<vmem>>, vector<1x138xf32>
    %216 = vector.broadcast %215 : vector<1x138xf32> to vector<32x138xf32>
    %217 = arith.mulf %214, %216 : vector<32x138xf32>
    %cst_124 = arith.constant dense<0.000000e+00> : vector<32xf32>
    %218 = vector.multi_reduction <add>, %217, %cst_124 [1] : vector<32x138xf32> to vector<32xf32>
    %219 = vector.shape_cast %218 : vector<32xf32> to vector<32x1xf32>
    %cst_125 = arith.constant 0.010416667 : f32
    %220 = vector.broadcast %cst_125 : f32 to vector<32x1xf32>
    %221 = arith.mulf %219, %220 : vector<32x1xf32>
    %222 = arith.mulf %214, %214 : vector<32x138xf32>
    %223 = vector.broadcast %215 : vector<1x138xf32> to vector<32x138xf32>
    %224 = arith.mulf %222, %223 : vector<32x138xf32>
    %cst_126 = arith.constant dense<0.000000e+00> : vector<32xf32>
    %225 = vector.multi_reduction <add>, %224, %cst_126 [1] : vector<32x138xf32> to vector<32xf32>
    %226 = vector.shape_cast %225 : vector<32xf32> to vector<32x1xf32>
    %cst_127 = arith.constant 0.010416667 : f32
    %227 = vector.broadcast %cst_127 : f32 to vector<32x1xf32>
    %228 = arith.mulf %226, %227 : vector<32x1xf32>
    %229 = arith.mulf %221, %221 : vector<32x1xf32>
    %230 = arith.subf %228, %229 : vector<32x1xf32>
    %cst_128 = arith.constant 0.000000e+00 : f32
    %231 = vector.broadcast %cst_128 : f32 to vector<32x1xf32>
    %232 = arith.maximumf %230, %231 : vector<32x1xf32>
    %233 = vector.broadcast %221 : vector<32x1xf32> to vector<32x138xf32>
    %234 = arith.subf %214, %233 : vector<32x138xf32>
    %cst_129 = arith.constant 9.99999974E-6 : f32
    %235 = vector.broadcast %cst_129 : f32 to vector<32x1xf32>
    %236 = arith.addf %232, %235 : vector<32x1xf32>
    %237 = math.rsqrt %236 : vector<32x1xf32>
    %238 = vector.broadcast %237 : vector<32x1xf32> to vector<32x138xf32>
    %239 = arith.mulf %234, %238 : vector<32x138xf32>
    %cst_130 = arith.constant 0.000000e+00 : f32
    %240 = vector.broadcast %cst_130 : f32 to vector<32x138xf32>
    %241 = arith.cmpf oge, %239, %240 : vector<32x138xf32>
    %cst_131 = arith.constant 0.00999999977 : f32
    %242 = vector.broadcast %cst_131 : f32 to vector<32x138xf32>
    %243 = arith.mulf %242, %239 : vector<32x138xf32>
    %244 = arith.select %241, %239, %243 : vector<32x138xi1>, vector<32x138xf32>
    %c0_132 = arith.constant 0 : index
    %c0_133 = arith.constant 0 : index
    %c0_134 = arith.constant 0 : index
    %245 = vector.load %arg13[%c0_132, %c0_133, %c0_134] : memref<3x16x32xf32, #tpu.memory_space<vmem>>, vector<1x16x32xf32>
    %246 = vector.shape_cast %245 : vector<1x16x32xf32> to vector<16x32xf32>
    %247 = vector.extract_strided_slice %244 {offsets = [0, 0], sizes = [32, 136], strides = [1, 1]} : vector<32x138xf32> to vector<32x136xf32>
    %cst_135 = arith.constant dense<0.000000e+00> : vector<16x136xf32>
    %248 = tpu.matmul %246, %247, %cst_135 {dimension_numbers = #tpu.dot_dimension_numbers<[1], [0], [0], [1], [0, 0, 1, 1], [], []>} : vector<16x32xf32>, vector<32x136xf32>, vector<16x136xf32> -> vector<16x136xf32>
    %c1_136 = arith.constant 1 : index
    %c0_137 = arith.constant 0 : index
    %c0_138 = arith.constant 0 : index
    %249 = vector.load %arg13[%c1_136, %c0_137, %c0_138] : memref<3x16x32xf32, #tpu.memory_space<vmem>>, vector<1x16x32xf32>
    %250 = vector.shape_cast %249 : vector<1x16x32xf32> to vector<16x32xf32>
    %251 = vector.extract_strided_slice %244 {offsets = [0, 1], sizes = [32, 136], strides = [1, 1]} : vector<32x138xf32> to vector<32x136xf32>
    %cst_139 = arith.constant dense<0.000000e+00> : vector<16x136xf32>
    %252 = tpu.matmul %250, %251, %cst_139 {dimension_numbers = #tpu.dot_dimension_numbers<[1], [0], [0], [1], [0, 0, 1, 1], [], []>} : vector<16x32xf32>, vector<32x136xf32>, vector<16x136xf32> -> vector<16x136xf32>
    %253 = arith.addf %248, %252 : vector<16x136xf32>
    %c2_140 = arith.constant 2 : index
    %c0_141 = arith.constant 0 : index
    %c0_142 = arith.constant 0 : index
    %254 = vector.load %arg13[%c2_140, %c0_141, %c0_142] : memref<3x16x32xf32, #tpu.memory_space<vmem>>, vector<1x16x32xf32>
    %255 = vector.shape_cast %254 : vector<1x16x32xf32> to vector<16x32xf32>
    %256 = vector.extract_strided_slice %244 {offsets = [0, 2], sizes = [32, 136], strides = [1, 1]} : vector<32x138xf32> to vector<32x136xf32>
    %cst_143 = arith.constant dense<0.000000e+00> : vector<16x136xf32>
    %257 = tpu.matmul %255, %256, %cst_143 {dimension_numbers = #tpu.dot_dimension_numbers<[1], [0], [0], [1], [0, 0, 1, 1], [], []>} : vector<16x32xf32>, vector<32x136xf32>, vector<16x136xf32> -> vector<16x136xf32>
    %258 = arith.addf %253, %257 : vector<16x136xf32>
    %c0_144 = arith.constant 0 : index
    %c0_145 = arith.constant 0 : index
    %259 = vector.load %arg14[%c0_144, %c0_145] : memref<16x1xf32, #tpu.memory_space<vmem>>, vector<16x1xf32>
    %260 = vector.broadcast %259 : vector<16x1xf32> to vector<16x136xf32>
    %261 = arith.addf %258, %260 : vector<16x136xf32>
    %c0_146 = arith.constant 0 : index
    %c0_147 = arith.constant 0 : index
    %262 = vector.load %arg15[%c0_146, %c0_147] : memref<1x136xf32, #tpu.memory_space<vmem>>, vector<1x136xf32>
    %263 = vector.broadcast %262 : vector<1x136xf32> to vector<16x136xf32>
    %264 = arith.mulf %261, %263 : vector<16x136xf32>
    %cst_148 = arith.constant dense<0.000000e+00> : vector<16xf32>
    %265 = vector.multi_reduction <add>, %264, %cst_148 [1] : vector<16x136xf32> to vector<16xf32>
    %266 = vector.shape_cast %265 : vector<16xf32> to vector<16x1xf32>
    %cst_149 = arith.constant 1.250000e-02 : f32
    %267 = vector.broadcast %cst_149 : f32 to vector<16x1xf32>
    %268 = arith.mulf %266, %267 : vector<16x1xf32>
    %269 = arith.mulf %261, %261 : vector<16x136xf32>
    %270 = vector.broadcast %262 : vector<1x136xf32> to vector<16x136xf32>
    %271 = arith.mulf %269, %270 : vector<16x136xf32>
    %cst_150 = arith.constant dense<0.000000e+00> : vector<16xf32>
    %272 = vector.multi_reduction <add>, %271, %cst_150 [1] : vector<16x136xf32> to vector<16xf32>
    %273 = vector.shape_cast %272 : vector<16xf32> to vector<16x1xf32>
    %cst_151 = arith.constant 1.250000e-02 : f32
    %274 = vector.broadcast %cst_151 : f32 to vector<16x1xf32>
    %275 = arith.mulf %273, %274 : vector<16x1xf32>
    %276 = arith.mulf %268, %268 : vector<16x1xf32>
    %277 = arith.subf %275, %276 : vector<16x1xf32>
    %cst_152 = arith.constant 0.000000e+00 : f32
    %278 = vector.broadcast %cst_152 : f32 to vector<16x1xf32>
    %279 = arith.maximumf %277, %278 : vector<16x1xf32>
    %280 = vector.broadcast %268 : vector<16x1xf32> to vector<16x136xf32>
    %281 = arith.subf %261, %280 : vector<16x136xf32>
    %cst_153 = arith.constant 9.99999974E-6 : f32
    %282 = vector.broadcast %cst_153 : f32 to vector<16x1xf32>
    %283 = arith.addf %279, %282 : vector<16x1xf32>
    %284 = math.rsqrt %283 : vector<16x1xf32>
    %285 = vector.broadcast %284 : vector<16x1xf32> to vector<16x136xf32>
    %286 = arith.mulf %281, %285 : vector<16x136xf32>
    %cst_154 = arith.constant 0.000000e+00 : f32
    %287 = vector.broadcast %cst_154 : f32 to vector<16x136xf32>
    %288 = arith.cmpf oge, %286, %287 : vector<16x136xf32>
    %cst_155 = arith.constant 0.00999999977 : f32
    %289 = vector.broadcast %cst_155 : f32 to vector<16x136xf32>
    %290 = arith.mulf %289, %286 : vector<16x136xf32>
    %291 = arith.select %288, %286, %290 : vector<16x136xi1>, vector<16x136xf32>
    %c0_156 = arith.constant 0 : index
    %c0_157 = arith.constant 0 : index
    %292 = vector.load %arg17[%c0_156, %c0_157] : memref<1x64xf32, #tpu.memory_space<vmem>>, vector<1x64xf32>
    %293 = vector.extract_strided_slice %291 {offsets = [0, 0], sizes = [1, 136], strides = [1, 1]} : vector<16x136xf32> to vector<1x136xf32>
    %c0_158 = arith.constant 0 : index
    %c0_159 = arith.constant 0 : index
    %c0_160 = arith.constant 0 : index
    %294 = vector.load %arg16[%c0_158, %c0_159, %c0_160] : memref<16x136x64xf32, #tpu.memory_space<vmem>>, vector<1x136x64xf32>
    %295 = vector.shape_cast %294 : vector<1x136x64xf32> to vector<136x64xf32>
    %cst_161 = arith.constant dense<0.000000e+00> : vector<1x64xf32>
    %296 = tpu.matmul %293, %295, %cst_161 {dimension_numbers = #tpu.dot_dimension_numbers<[1], [0], [0], [1], [0, 0, 1, 1], [], []>} : vector<1x136xf32>, vector<136x64xf32>, vector<1x64xf32> -> vector<1x64xf32>
    %297 = arith.addf %292, %296 : vector<1x64xf32>
    %298 = vector.extract_strided_slice %291 {offsets = [1, 0], sizes = [1, 136], strides = [1, 1]} : vector<16x136xf32> to vector<1x136xf32>
    %c1_162 = arith.constant 1 : index
    %c0_163 = arith.constant 0 : index
    %c0_164 = arith.constant 0 : index
    %299 = vector.load %arg16[%c1_162, %c0_163, %c0_164] : memref<16x136x64xf32, #tpu.memory_space<vmem>>, vector<1x136x64xf32>
    %300 = vector.shape_cast %299 : vector<1x136x64xf32> to vector<136x64xf32>
    %cst_165 = arith.constant dense<0.000000e+00> : vector<1x64xf32>
    %301 = tpu.matmul %298, %300, %cst_165 {dimension_numbers = #tpu.dot_dimension_numbers<[1], [0], [0], [1], [0, 0, 1, 1], [], []>} : vector<1x136xf32>, vector<136x64xf32>, vector<1x64xf32> -> vector<1x64xf32>
    %302 = arith.addf %297, %301 : vector<1x64xf32>
    %303 = vector.extract_strided_slice %291 {offsets = [2, 0], sizes = [1, 136], strides = [1, 1]} : vector<16x136xf32> to vector<1x136xf32>
    %c2_166 = arith.constant 2 : index
    %c0_167 = arith.constant 0 : index
    %c0_168 = arith.constant 0 : index
    %304 = vector.load %arg16[%c2_166, %c0_167, %c0_168] : memref<16x136x64xf32, #tpu.memory_space<vmem>>, vector<1x136x64xf32>
    %305 = vector.shape_cast %304 : vector<1x136x64xf32> to vector<136x64xf32>
    %cst_169 = arith.constant dense<0.000000e+00> : vector<1x64xf32>
    %306 = tpu.matmul %303, %305, %cst_169 {dimension_numbers = #tpu.dot_dimension_numbers<[1], [0], [0], [1], [0, 0, 1, 1], [], []>} : vector<1x136xf32>, vector<136x64xf32>, vector<1x64xf32> -> vector<1x64xf32>
    %307 = arith.addf %302, %306 : vector<1x64xf32>
    %308 = vector.extract_strided_slice %291 {offsets = [3, 0], sizes = [1, 136], strides = [1, 1]} : vector<16x136xf32> to vector<1x136xf32>
    %c3_170 = arith.constant 3 : index
    %c0_171 = arith.constant 0 : index
    %c0_172 = arith.constant 0 : index
    %309 = vector.load %arg16[%c3_170, %c0_171, %c0_172] : memref<16x136x64xf32, #tpu.memory_space<vmem>>, vector<1x136x64xf32>
    %310 = vector.shape_cast %309 : vector<1x136x64xf32> to vector<136x64xf32>
    %cst_173 = arith.constant dense<0.000000e+00> : vector<1x64xf32>
    %311 = tpu.matmul %308, %310, %cst_173 {dimension_numbers = #tpu.dot_dimension_numbers<[1], [0], [0], [1], [0, 0, 1, 1], [], []>} : vector<1x136xf32>, vector<136x64xf32>, vector<1x64xf32> -> vector<1x64xf32>
    %312 = arith.addf %307, %311 : vector<1x64xf32>
    %313 = vector.extract_strided_slice %291 {offsets = [4, 0], sizes = [1, 136], strides = [1, 1]} : vector<16x136xf32> to vector<1x136xf32>
    %c4_174 = arith.constant 4 : index
    %c0_175 = arith.constant 0 : index
    %c0_176 = arith.constant 0 : index
    %314 = vector.load %arg16[%c4_174, %c0_175, %c0_176] : memref<16x136x64xf32, #tpu.memory_space<vmem>>, vector<1x136x64xf32>
    %315 = vector.shape_cast %314 : vector<1x136x64xf32> to vector<136x64xf32>
    %cst_177 = arith.constant dense<0.000000e+00> : vector<1x64xf32>
    %316 = tpu.matmul %313, %315, %cst_177 {dimension_numbers = #tpu.dot_dimension_numbers<[1], [0], [0], [1], [0, 0, 1, 1], [], []>} : vector<1x136xf32>, vector<136x64xf32>, vector<1x64xf32> -> vector<1x64xf32>
    %317 = arith.addf %312, %316 : vector<1x64xf32>
    %318 = vector.extract_strided_slice %291 {offsets = [5, 0], sizes = [1, 136], strides = [1, 1]} : vector<16x136xf32> to vector<1x136xf32>
    %c5_178 = arith.constant 5 : index
    %c0_179 = arith.constant 0 : index
    %c0_180 = arith.constant 0 : index
    %319 = vector.load %arg16[%c5_178, %c0_179, %c0_180] : memref<16x136x64xf32, #tpu.memory_space<vmem>>, vector<1x136x64xf32>
    %320 = vector.shape_cast %319 : vector<1x136x64xf32> to vector<136x64xf32>
    %cst_181 = arith.constant dense<0.000000e+00> : vector<1x64xf32>
    %321 = tpu.matmul %318, %320, %cst_181 {dimension_numbers = #tpu.dot_dimension_numbers<[1], [0], [0], [1], [0, 0, 1, 1], [], []>} : vector<1x136xf32>, vector<136x64xf32>, vector<1x64xf32> -> vector<1x64xf32>
    %322 = arith.addf %317, %321 : vector<1x64xf32>
    %323 = vector.extract_strided_slice %291 {offsets = [6, 0], sizes = [1, 136], strides = [1, 1]} : vector<16x136xf32> to vector<1x136xf32>
    %c6_182 = arith.constant 6 : index
    %c0_183 = arith.constant 0 : index
    %c0_184 = arith.constant 0 : index
    %324 = vector.load %arg16[%c6_182, %c0_183, %c0_184] : memref<16x136x64xf32, #tpu.memory_space<vmem>>, vector<1x136x64xf32>
    %325 = vector.shape_cast %324 : vector<1x136x64xf32> to vector<136x64xf32>
    %cst_185 = arith.constant dense<0.000000e+00> : vector<1x64xf32>
    %326 = tpu.matmul %323, %325, %cst_185 {dimension_numbers = #tpu.dot_dimension_numbers<[1], [0], [0], [1], [0, 0, 1, 1], [], []>} : vector<1x136xf32>, vector<136x64xf32>, vector<1x64xf32> -> vector<1x64xf32>
    %327 = arith.addf %322, %326 : vector<1x64xf32>
    %328 = vector.extract_strided_slice %291 {offsets = [7, 0], sizes = [1, 136], strides = [1, 1]} : vector<16x136xf32> to vector<1x136xf32>
    %c7_186 = arith.constant 7 : index
    %c0_187 = arith.constant 0 : index
    %c0_188 = arith.constant 0 : index
    %329 = vector.load %arg16[%c7_186, %c0_187, %c0_188] : memref<16x136x64xf32, #tpu.memory_space<vmem>>, vector<1x136x64xf32>
    %330 = vector.shape_cast %329 : vector<1x136x64xf32> to vector<136x64xf32>
    %cst_189 = arith.constant dense<0.000000e+00> : vector<1x64xf32>
    %331 = tpu.matmul %328, %330, %cst_189 {dimension_numbers = #tpu.dot_dimension_numbers<[1], [0], [0], [1], [0, 0, 1, 1], [], []>} : vector<1x136xf32>, vector<136x64xf32>, vector<1x64xf32> -> vector<1x64xf32>
    %332 = arith.addf %327, %331 : vector<1x64xf32>
    %333 = vector.extract_strided_slice %291 {offsets = [8, 0], sizes = [1, 136], strides = [1, 1]} : vector<16x136xf32> to vector<1x136xf32>
    %c8_190 = arith.constant 8 : index
    %c0_191 = arith.constant 0 : index
    %c0_192 = arith.constant 0 : index
    %334 = vector.load %arg16[%c8_190, %c0_191, %c0_192] : memref<16x136x64xf32, #tpu.memory_space<vmem>>, vector<1x136x64xf32>
    %335 = vector.shape_cast %334 : vector<1x136x64xf32> to vector<136x64xf32>
    %cst_193 = arith.constant dense<0.000000e+00> : vector<1x64xf32>
    %336 = tpu.matmul %333, %335, %cst_193 {dimension_numbers = #tpu.dot_dimension_numbers<[1], [0], [0], [1], [0, 0, 1, 1], [], []>} : vector<1x136xf32>, vector<136x64xf32>, vector<1x64xf32> -> vector<1x64xf32>
    %337 = arith.addf %332, %336 : vector<1x64xf32>
    %338 = vector.extract_strided_slice %291 {offsets = [9, 0], sizes = [1, 136], strides = [1, 1]} : vector<16x136xf32> to vector<1x136xf32>
    %c9 = arith.constant 9 : index
    %c0_194 = arith.constant 0 : index
    %c0_195 = arith.constant 0 : index
    %339 = vector.load %arg16[%c9, %c0_194, %c0_195] : memref<16x136x64xf32, #tpu.memory_space<vmem>>, vector<1x136x64xf32>
    %340 = vector.shape_cast %339 : vector<1x136x64xf32> to vector<136x64xf32>
    %cst_196 = arith.constant dense<0.000000e+00> : vector<1x64xf32>
    %341 = tpu.matmul %338, %340, %cst_196 {dimension_numbers = #tpu.dot_dimension_numbers<[1], [0], [0], [1], [0, 0, 1, 1], [], []>} : vector<1x136xf32>, vector<136x64xf32>, vector<1x64xf32> -> vector<1x64xf32>
    %342 = arith.addf %337, %341 : vector<1x64xf32>
    %343 = vector.extract_strided_slice %291 {offsets = [10, 0], sizes = [1, 136], strides = [1, 1]} : vector<16x136xf32> to vector<1x136xf32>
    %c10 = arith.constant 10 : index
    %c0_197 = arith.constant 0 : index
    %c0_198 = arith.constant 0 : index
    %344 = vector.load %arg16[%c10, %c0_197, %c0_198] : memref<16x136x64xf32, #tpu.memory_space<vmem>>, vector<1x136x64xf32>
    %345 = vector.shape_cast %344 : vector<1x136x64xf32> to vector<136x64xf32>
    %cst_199 = arith.constant dense<0.000000e+00> : vector<1x64xf32>
    %346 = tpu.matmul %343, %345, %cst_199 {dimension_numbers = #tpu.dot_dimension_numbers<[1], [0], [0], [1], [0, 0, 1, 1], [], []>} : vector<1x136xf32>, vector<136x64xf32>, vector<1x64xf32> -> vector<1x64xf32>
    %347 = arith.addf %342, %346 : vector<1x64xf32>
    %348 = vector.extract_strided_slice %291 {offsets = [11, 0], sizes = [1, 136], strides = [1, 1]} : vector<16x136xf32> to vector<1x136xf32>
    %c11 = arith.constant 11 : index
    %c0_200 = arith.constant 0 : index
    %c0_201 = arith.constant 0 : index
    %349 = vector.load %arg16[%c11, %c0_200, %c0_201] : memref<16x136x64xf32, #tpu.memory_space<vmem>>, vector<1x136x64xf32>
    %350 = vector.shape_cast %349 : vector<1x136x64xf32> to vector<136x64xf32>
    %cst_202 = arith.constant dense<0.000000e+00> : vector<1x64xf32>
    %351 = tpu.matmul %348, %350, %cst_202 {dimension_numbers = #tpu.dot_dimension_numbers<[1], [0], [0], [1], [0, 0, 1, 1], [], []>} : vector<1x136xf32>, vector<136x64xf32>, vector<1x64xf32> -> vector<1x64xf32>
    %352 = arith.addf %347, %351 : vector<1x64xf32>
    %353 = vector.extract_strided_slice %291 {offsets = [12, 0], sizes = [1, 136], strides = [1, 1]} : vector<16x136xf32> to vector<1x136xf32>
    %c12 = arith.constant 12 : index
    %c0_203 = arith.constant 0 : index
    %c0_204 = arith.constant 0 : index
    %354 = vector.load %arg16[%c12, %c0_203, %c0_204] : memref<16x136x64xf32, #tpu.memory_space<vmem>>, vector<1x136x64xf32>
    %355 = vector.shape_cast %354 : vector<1x136x64xf32> to vector<136x64xf32>
    %cst_205 = arith.constant dense<0.000000e+00> : vector<1x64xf32>
    %356 = tpu.matmul %353, %355, %cst_205 {dimension_numbers = #tpu.dot_dimension_numbers<[1], [0], [0], [1], [0, 0, 1, 1], [], []>} : vector<1x136xf32>, vector<136x64xf32>, vector<1x64xf32> -> vector<1x64xf32>
    %357 = arith.addf %352, %356 : vector<1x64xf32>
    %358 = vector.extract_strided_slice %291 {offsets = [13, 0], sizes = [1, 136], strides = [1, 1]} : vector<16x136xf32> to vector<1x136xf32>
    %c13 = arith.constant 13 : index
    %c0_206 = arith.constant 0 : index
    %c0_207 = arith.constant 0 : index
    %359 = vector.load %arg16[%c13, %c0_206, %c0_207] : memref<16x136x64xf32, #tpu.memory_space<vmem>>, vector<1x136x64xf32>
    %360 = vector.shape_cast %359 : vector<1x136x64xf32> to vector<136x64xf32>
    %cst_208 = arith.constant dense<0.000000e+00> : vector<1x64xf32>
    %361 = tpu.matmul %358, %360, %cst_208 {dimension_numbers = #tpu.dot_dimension_numbers<[1], [0], [0], [1], [0, 0, 1, 1], [], []>} : vector<1x136xf32>, vector<136x64xf32>, vector<1x64xf32> -> vector<1x64xf32>
    %362 = arith.addf %357, %361 : vector<1x64xf32>
    %363 = vector.extract_strided_slice %291 {offsets = [14, 0], sizes = [1, 136], strides = [1, 1]} : vector<16x136xf32> to vector<1x136xf32>
    %c14 = arith.constant 14 : index
    %c0_209 = arith.constant 0 : index
    %c0_210 = arith.constant 0 : index
    %364 = vector.load %arg16[%c14, %c0_209, %c0_210] : memref<16x136x64xf32, #tpu.memory_space<vmem>>, vector<1x136x64xf32>
    %365 = vector.shape_cast %364 : vector<1x136x64xf32> to vector<136x64xf32>
    %cst_211 = arith.constant dense<0.000000e+00> : vector<1x64xf32>
    %366 = tpu.matmul %363, %365, %cst_211 {dimension_numbers = #tpu.dot_dimension_numbers<[1], [0], [0], [1], [0, 0, 1, 1], [], []>} : vector<1x136xf32>, vector<136x64xf32>, vector<1x64xf32> -> vector<1x64xf32>
    %367 = arith.addf %362, %366 : vector<1x64xf32>
    %368 = vector.extract_strided_slice %291 {offsets = [15, 0], sizes = [1, 136], strides = [1, 1]} : vector<16x136xf32> to vector<1x136xf32>
    %c15 = arith.constant 15 : index
    %c0_212 = arith.constant 0 : index
    %c0_213 = arith.constant 0 : index
    %369 = vector.load %arg16[%c15, %c0_212, %c0_213] : memref<16x136x64xf32, #tpu.memory_space<vmem>>, vector<1x136x64xf32>
    %370 = vector.shape_cast %369 : vector<1x136x64xf32> to vector<136x64xf32>
    %cst_214 = arith.constant dense<0.000000e+00> : vector<1x64xf32>
    %371 = tpu.matmul %368, %370, %cst_214 {dimension_numbers = #tpu.dot_dimension_numbers<[1], [0], [0], [1], [0, 0, 1, 1], [], []>} : vector<1x136xf32>, vector<136x64xf32>, vector<1x64xf32> -> vector<1x64xf32>
    %372 = arith.addf %367, %371 : vector<1x64xf32>
    %cst_215 = arith.constant 0.000000e+00 : f32
    %373 = vector.broadcast %cst_215 : f32 to vector<1x64xf32>
    %374 = arith.cmpf oge, %372, %373 : vector<1x64xf32>
    %cst_216 = arith.constant 0.00999999977 : f32
    %375 = vector.broadcast %cst_216 : f32 to vector<1x64xf32>
    %376 = arith.mulf %375, %372 : vector<1x64xf32>
    %377 = arith.select %374, %372, %376 : vector<1x64xi1>, vector<1x64xf32>
    %c0_217 = arith.constant 0 : index
    %c0_218 = arith.constant 0 : index
    %378 = vector.load %arg18[%c0_217, %c0_218] : memref<64x32xf32, #tpu.memory_space<vmem>>, vector<64x32xf32>
    %cst_219 = arith.constant dense<0.000000e+00> : vector<1x32xf32>
    %379 = tpu.matmul %377, %378, %cst_219 {dimension_numbers = #tpu.dot_dimension_numbers<[1], [0], [0], [1], [0, 0, 1, 1], [], []>} : vector<1x64xf32>, vector<64x32xf32>, vector<1x32xf32> -> vector<1x32xf32>
    %c0_220 = arith.constant 0 : index
    %c0_221 = arith.constant 0 : index
    %380 = vector.load %arg19[%c0_220, %c0_221] : memref<1x32xf32, #tpu.memory_space<vmem>>, vector<1x32xf32>
    %381 = arith.addf %379, %380 : vector<1x32xf32>
    %cst_222 = arith.constant 0.000000e+00 : f32
    %382 = vector.broadcast %cst_222 : f32 to vector<1x32xf32>
    %383 = arith.cmpf oge, %381, %382 : vector<1x32xf32>
    %cst_223 = arith.constant 0.00999999977 : f32
    %384 = vector.broadcast %cst_223 : f32 to vector<1x32xf32>
    %385 = arith.mulf %384, %381 : vector<1x32xf32>
    %386 = arith.select %383, %381, %385 : vector<1x32xi1>, vector<1x32xf32>
    %c0_224 = arith.constant 0 : index
    %c0_225 = arith.constant 0 : index
    %387 = vector.load %arg20[%c0_224, %c0_225] : memref<32x3xf32, #tpu.memory_space<vmem>>, vector<32x3xf32>
    %cst_226 = arith.constant dense<0.000000e+00> : vector<1x3xf32>
    %388 = tpu.matmul %386, %387, %cst_226 {dimension_numbers = #tpu.dot_dimension_numbers<[1], [0], [0], [1], [0, 0, 1, 1], [], []>} : vector<1x32xf32>, vector<32x3xf32>, vector<1x3xf32> -> vector<1x3xf32>
    %c0_227 = arith.constant 0 : index
    %c0_228 = arith.constant 0 : index
    %389 = vector.load %arg21[%c0_227, %c0_228] : memref<1x3xf32, #tpu.memory_space<vmem>>, vector<1x3xf32>
    %390 = arith.addf %388, %389 : vector<1x3xf32>
    %391 = math.tanh %390 : vector<1x3xf32>
    %c0_229 = arith.constant 0 : index
    %c0_230 = arith.constant 0 : index
    %c0_231 = arith.constant 0 : index
    %392 = vector.load %arg22[%c0_229, %c0_230, %c0_231] : memref<1x1x3xf32, #tpu.memory_space<vmem>>, vector<1x1x3xf32>
    %393 = vector.shape_cast %392 : vector<1x1x3xf32> to vector<1x3xf32>
    %394 = vector.shape_cast %391 : vector<1x3xf32> to vector<1x1x3xf32>
    tpu.vector_store %arg22[%c0_229, %c0_230, %c0_231], %394 {strides = array<i32>} : memref<1x1x3xf32, #tpu.memory_space<vmem>>, vector<1x1x3xf32>,
    return
  }
  func.func @transform_0(%arg0: i32) -> (i32, i32, i32) {
    %c0_i32 = arith.constant 0 : i32
    %c0_i32_0 = arith.constant 0 : i32
    %c0_i32_1 = arith.constant 0 : i32
    return %arg0, %c0_i32, %c0_i32_0 : i32, i32, i32
  }
  func.func @transform_1(%arg0: i32) -> (i32, i32, i32) {
    %c0_i32 = arith.constant 0 : i32
    %c0_i32_0 = arith.constant 0 : i32
    %c0_i32_1 = arith.constant 0 : i32
    %c0_i32_2 = arith.constant 0 : i32
    return %c0_i32, %c0_i32_0, %c0_i32_1 : i32, i32, i32
  }
  func.func @transform_2(%arg0: i32) -> (i32, i32) {
    %c0_i32 = arith.constant 0 : i32
    %c0_i32_0 = arith.constant 0 : i32
    %c0_i32_1 = arith.constant 0 : i32
    return %c0_i32, %c0_i32_0 : i32, i32
  }
  func.func @transform_3(%arg0: i32) -> (i32, i32, i32) {
    %c0_i32 = arith.constant 0 : i32
    %c0_i32_0 = arith.constant 0 : i32
    %c0_i32_1 = arith.constant 0 : i32
    %c0_i32_2 = arith.constant 0 : i32
    return %c0_i32, %c0_i32_0, %c0_i32_1 : i32, i32, i32
  }
  func.func @transform_4(%arg0: i32) -> (i32, i32) {
    %c0_i32 = arith.constant 0 : i32
    %c0_i32_0 = arith.constant 0 : i32
    %c0_i32_1 = arith.constant 0 : i32
    return %c0_i32, %c0_i32_0 : i32, i32
  }
  func.func @transform_5(%arg0: i32) -> (i32, i32) {
    %c0_i32 = arith.constant 0 : i32
    %c0_i32_0 = arith.constant 0 : i32
    %c0_i32_1 = arith.constant 0 : i32
    return %c0_i32, %c0_i32_0 : i32, i32
  }
  func.func @transform_6(%arg0: i32) -> (i32, i32, i32) {
    %c0_i32 = arith.constant 0 : i32
    %c0_i32_0 = arith.constant 0 : i32
    %c0_i32_1 = arith.constant 0 : i32
    %c0_i32_2 = arith.constant 0 : i32
    return %c0_i32, %c0_i32_0, %c0_i32_1 : i32, i32, i32
  }
  func.func @transform_7(%arg0: i32) -> (i32, i32) {
    %c0_i32 = arith.constant 0 : i32
    %c0_i32_0 = arith.constant 0 : i32
    %c0_i32_1 = arith.constant 0 : i32
    return %c0_i32, %c0_i32_0 : i32, i32
  }
  func.func @transform_8(%arg0: i32) -> (i32, i32) {
    %c0_i32 = arith.constant 0 : i32
    %c0_i32_0 = arith.constant 0 : i32
    %c0_i32_1 = arith.constant 0 : i32
    return %c0_i32, %c0_i32_0 : i32, i32
  }
  func.func @transform_9(%arg0: i32) -> (i32, i32, i32) {
    %c0_i32 = arith.constant 0 : i32
    %c0_i32_0 = arith.constant 0 : i32
    %c0_i32_1 = arith.constant 0 : i32
    %c0_i32_2 = arith.constant 0 : i32
    return %c0_i32, %c0_i32_0, %c0_i32_1 : i32, i32, i32
  }
  func.func @transform_10(%arg0: i32) -> (i32, i32) {
    %c0_i32 = arith.constant 0 : i32
    %c0_i32_0 = arith.constant 0 : i32
    %c0_i32_1 = arith.constant 0 : i32
    return %c0_i32, %c0_i32_0 : i32, i32
  }
  func.func @transform_11(%arg0: i32) -> (i32, i32) {
    %c0_i32 = arith.constant 0 : i32
    %c0_i32_0 = arith.constant 0 : i32
    %c0_i32_1 = arith.constant 0 : i32
    return %c0_i32, %c0_i32_0 : i32, i32
  }
  func.func @transform_12(%arg0: i32) -> (i32, i32, i32) {
    %c0_i32 = arith.constant 0 : i32
    %c0_i32_0 = arith.constant 0 : i32
    %c0_i32_1 = arith.constant 0 : i32
    %c0_i32_2 = arith.constant 0 : i32
    return %c0_i32, %c0_i32_0, %c0_i32_1 : i32, i32, i32
  }
  func.func @transform_13(%arg0: i32) -> (i32, i32) {
    %c0_i32 = arith.constant 0 : i32
    %c0_i32_0 = arith.constant 0 : i32
    %c0_i32_1 = arith.constant 0 : i32
    return %c0_i32, %c0_i32_0 : i32, i32
  }
  func.func @transform_14(%arg0: i32) -> (i32, i32) {
    %c0_i32 = arith.constant 0 : i32
    %c0_i32_0 = arith.constant 0 : i32
    %c0_i32_1 = arith.constant 0 : i32
    return %c0_i32, %c0_i32_0 : i32, i32
  }
  func.func @transform_15(%arg0: i32) -> (i32, i32, i32) {
    %c0_i32 = arith.constant 0 : i32
    %c0_i32_0 = arith.constant 0 : i32
    %c0_i32_1 = arith.constant 0 : i32
    %c0_i32_2 = arith.constant 0 : i32
    return %c0_i32, %c0_i32_0, %c0_i32_1 : i32, i32, i32
  }
  func.func @transform_16(%arg0: i32) -> (i32, i32) {
    %c0_i32 = arith.constant 0 : i32
    %c0_i32_0 = arith.constant 0 : i32
    %c0_i32_1 = arith.constant 0 : i32
    return %c0_i32, %c0_i32_0 : i32, i32
  }
  func.func @transform_17(%arg0: i32) -> (i32, i32) {
    %c0_i32 = arith.constant 0 : i32
    %c0_i32_0 = arith.constant 0 : i32
    %c0_i32_1 = arith.constant 0 : i32
    return %c0_i32, %c0_i32_0 : i32, i32
  }
  func.func @transform_18(%arg0: i32) -> (i32, i32) {
    %c0_i32 = arith.constant 0 : i32
    %c0_i32_0 = arith.constant 0 : i32
    %c0_i32_1 = arith.constant 0 : i32
    return %c0_i32, %c0_i32_0 : i32, i32
  }
  func.func @transform_19(%arg0: i32) -> (i32, i32) {
    %c0_i32 = arith.constant 0 : i32
    %c0_i32_0 = arith.constant 0 : i32
    %c0_i32_1 = arith.constant 0 : i32
    return %c0_i32, %c0_i32_0 : i32, i32
  }
  func.func @transform_20(%arg0: i32) -> (i32, i32) {
    %c0_i32 = arith.constant 0 : i32
    %c0_i32_0 = arith.constant 0 : i32
    %c0_i32_1 = arith.constant 0 : i32
    return %c0_i32, %c0_i32_0 : i32, i32
  }
  func.func @transform_21(%arg0: i32) -> (i32, i32, i32) {
    %c0_i32 = arith.constant 0 : i32
    %c0_i32_0 = arith.constant 0 : i32
    %c0_i32_1 = arith.constant 0 : i32
    return %arg0, %c0_i32, %c0_i32_0 : i32, i32, i32
  }
}

</mosaic_0001>

<bundles_post_ra>
// kernel: cnn_forward.1
= control target key start
LH: loop header
LB: loop body
LE: loop exit
PB: predicated region body
PF: predicated region fallthrough
CT: control target
= control target key end

     0   :  { %s14512_s0 = inlined_call_operand.vmem [shape: f32[2,3,234], index: 0, kind: input, shape index: {}]   ;;  %s14513_s1 = inlined_call_operand.vmem [shape: f32[1,32,3], index: 1, kind: input, shape index: {}]   ;;  %s14514_s2 = inlined_call_operand.vmem [shape: f32[32,1], index: 2, kind: input, shape index: {}]   ;;  %s14515_s3 = inlined_call_operand.vmem [shape: f32[9,64,32], index: 3, kind: input, shape index: {}]   ;;  %s14516_s4 = inlined_call_operand.vmem [shape: f32[64,1], index: 4, kind: input, shape index: {}]   ;;  %s14517_s5 = inlined_call_operand.vmem [shape: f32[1,196], index: 5, kind: input, shape index: {}]   ;;  %s14518_s6 = inlined_call_operand.vmem [shape: f32[9,64,64], index: 6, kind: input, shape index: {}]   ;;  %s14519_s7 = inlined_call_operand.vmem [shape: f32[64,1], index: 7, kind: input, shape index: {}]   ;;  %s14520_s8 = inlined_call_operand.vmem [shape: f32[1,158], index: 8, kind: input, shape index: {}]   ;;  %s14521_s9 = inlined_call_operand.vmem [shape: f32[6,32,64], index: 9, kind: input, shape index: {}]   ;;  %s14522_s10 = inlined_call_operand.vmem [shape: f32[32,1], index: 10, kind: input, shape index: {}]   ;;  %s14523_s11 = inlined_call_operand.vmem [shape: f32[1,138], index: 11, kind: input, shape index: {}]   ;;  %s14524_s12 = inlined_call_operand.vmem [shape: f32[3,16,32], index: 12, kind: input, shape index: {}]   ;;  %s14525_s13 = inlined_call_operand.vmem [shape: f32[16,1], index: 13, kind: input, shape index: {}]   ;;  %s14526_s14 = inlined_call_operand.vmem [shape: f32[1,136], index: 14, kind: input, shape index: {}]   ;;  %s14527_s15 = inlined_call_operand.vmem [shape: f32[16,136,64], index: 15, kind: input, shape index: {}]   ;;  %s14528_s16 = inlined_call_operand.vmem [shape: f32[1,64], index: 16, kind: input, shape index: {}]   ;;  %s14529_s17 = inlined_call_operand.vmem [shape: f32[64,32], index: 17, kind: input, shape index: {}]   ;;  %s14530_s18 = inlined_call_operand.vmem [shape: f32[1,32], index: 18, kind: input, shape index: {}]   ;;  %s14531_s19 = inlined_call_operand.vmem [shape: f32[32,3], index: 19, kind: input, shape index: {}]   ;;  %s14532_s20 = inlined_call_operand.vmem [shape: f32[1,3], index: 20, kind: input, shape index: {}]   ;;  %s14533_s21 = inlined_call_operand.hbm [shape: f32[2,1,3], index: 21, kind: output, shape index: {}]  }
   0x1   :  { %14562 = sst [smem:[#allocation11_spill]] %s14512_s0 }
   0x2   :  { %14563 = sst [smem:[#allocation12_spill]] %s14513_s1 }
   0x3   :  { %14564 = sst [smem:[#allocation13_spill]] %s14514_s2 }
   0x4   :  { %14565 = sst [smem:[#allocation14_spill]] %s14515_s3 }
   0x5   :  { %14566 = sst [smem:[#allocation15_spill]] %s14516_s4 }
   0x6   :  { %14567 = sst [smem:[#allocation16_spill]] %s14517_s5 }
   0x7   :  { %26 = vsyncpa [#allocation3], 0 }
   0x8   :  { %28 = vsyncpa [#allocation3 + $0x1], 0  ;;  %s11096_s2 = smov 0   ;;  %s11098_s25 = smov 0  }
   0x9   :  { %s11100_s26 = smov 0   ;;  %s11102_s27 = smov 0  }
   0xa LB: > { %14568 = sst [smem:[#allocation5_spill]] %s10957_s2  ;;  %s11117_s3 = sadd.s32 4294967295, %s10969_s27   ;;  %s10969_s27 = sphi %s11102_s27, %s14593_s27   ;;  %s10965_s26 = sphi %s11100_s26, %s14595_s26   ;;  %s10961_s25 = sphi %s11098_s25, %s14597_s25   ;;  %s10957_s2 = sphi %s11096_s2, %s14596_s2  }
   0xb   : > { %14569 = sst [smem:[#allocation6_spill]] %s10965_s26  ;;  %s8355_s28 = sadd.s32 4294967294, %s10969_s27  }
   0xc   : > { %14570 = sst [smem:[#allocation7_spill]] %s10969_s27  ;;  %s11121_s29 = sadd.s32 1, %s10969_s27  }
   0xd   : > { %14571 = sst [smem:[#allocation8_spill]] %s11121_s29  ;;  %s487_s0 = sadd.s32 1, %s10965_s26 }
   0xe   : > { %s484_s4 = ssub.s32 %s10969_s27, %s11121_s29  ;;  %p497_p0 = scmp.ne.s32.totalorder %s10965_s26, %s10961_s25 }
   0xf   : > { %p485_p1 = scmp.eq.s32.totalorder %s484_s4, 0  ;;  %p498_p2 = scmp.eq.s32.totalorder %s11117_s3, 1 }
  0x10   : > { %p503_p3 = scmp.ne.s32.totalorder %s10961_s25, %s10957_s2  ;;  %p504_p4 = scmp.eq.s32.totalorder %s8355_s28, 1 }
  0x11   : > { %s11132_s30 = scalar_select %p485_p1, %s10965_s26, %s487_s0  }
  0x12   : > { %p11134_p5 = por %p498_p2, %p497_p0  ;;  %p11138_p6 = por %p504_p4, %p503_p3 }
  0x13   : > { %14572 = sst [smem:[#allocation9_spill]] %s11132_s30  ;;  %p8358_p7 = scmp.ge.s32.totalorder %s10969_s27, 1 }
  0x14   : > { %s14574_s22 = scalar_select %p11138_p6, 1, 0 }
  0x15   : > { %p590_p8 = scmp.lt.s32.totalorder %s10969_s27, 3 }
  0x16   : > { %14575 = sst [smem:[#allocation10_spill]] %s14574_s22 }
  0x17   : > { %p591_p9 = pnand %p8358_p7, %p590_p8 }
  0x18   : > { %s14576_s24 = sld [smem:[#allocation12_spill]] (!%p591_p9)  ;;  %v10971_v1 = vmov (!%p591_p9), 2   ;;  %v10972_v2 = vmov (!%p591_p9), 1   ;;  %v10973_v5 = vmov (!%p591_p9), 0   ;;  %s14577_s0 = sld [smem:[#allocation13_spill]] (!%p591_p9)  ;;  %v680_v11 = vlaneseq (!%p591_p9) }
  0x19   : > { %594 = sbr.rel (%p591_p9) target bundleno = 3861 (0xf15), region = 104  ;;  %10134 = vset.pattern.permute.xlu0 (!%p591_p9), %v10971_v1  ;;  %10133 = vset.pattern.permute.xlu1 (!%p591_p9), %v10972_v2  ;;  %p649_p10 = scmp.lt.s32.totalorder (!%p591_p9), %s11117_s3, 1  ;;  %vm903_vm8 = vcmask (!%p591_p9), 1039360   ;;  %vm916_vm9 = vcmask (!%p591_p9), 261120   ;;  %vm1216_vm10 = vcmask (!%p591_p9), 1031168   ;;  %vm1407_vm11 = vcmask (!%p591_p9), 900096  }
  0x1a   : > { %v681_v12 = vshrl.u32 (!%p591_p9), %v680_v11, 7  ;;  %s14578_s22 = sld [smem:[#allocation11_spill]] (!%p591_p9)  ;;  %s14556_s29 = smov (!%p591_p9), 126   ;;  %vm1598_vm12 = vcmask (!%p591_p9), 891904   ;;  %vm1789_vm13 = vcmask (!%p591_p9), 883712   ;;  %vm1980_vm14 = vcmask (!%p591_p9), 752640  }
  0x1b   : > { %s14548_s23 = smov (!%p591_p9), 108   ;;  %s14546_s1 = smov (!%p591_p9), 92   ;;  %vm2171_vm15 = vcmask (!%p591_p9), 744448  }
  0x1c   : > { %v11173_v15 = vsub.s32 (!%p591_p9), 1, %v681_v12  ;;  %v728_v16 = vsub.s32 (!%p591_p9), 5, %v681_v12  ;;  %v11177_v19 = vsub.s32 (!%p591_p9), 0, %v681_v12  ;;  %v686_v20 = vsub.s32 (!%p591_p9), 4, %v681_v12  ;;  %s14582_s26 = sld [smem:[#allocation16_spill]] (!%p591_p9)  ;;  %s14584_s4 = smov (!%p591_p9), 110  }
  0x1d   : > { %v774_v22 = vsub.s32 (!%p591_p9), 2, %v681_v12  ;;  %v778_v23 = vsub.s32 (!%p591_p9), 6, %v681_v12  ;;  %s14586_s27 = smov (!%p591_p9), 108  }
  0x1e   : > { %v655_v0 = vld [vmem:[%s14576_s24] sm:$0xff] (!%p591_p9)  ;;  %v657_v3 = vld [vmem:[%s14576_s24 + $0x10] sm:$0xff] (!%p591_p9)  ;;  %v656_v4 = vld [vmem:[%s14576_s24 + $0x8] sm:$0xff] (!%p591_p9) }
  0x1f   : > { %757 = vperm.xlu0 (!%p591_p9), %10134, %v655_v0   ;;  %707 = vperm.xlu1 (!%p591_p9), %10133, %v655_v0   ;;  %v658_v6 = vld [vmem:[%s14576_s24 + $0x18] sm:$0xff] (!%p591_p9)  ;;  %v807_v7 = vld [vmem:[%s14577_s0 + $0x8] sm:$0xff] (!%p591_p9)  ;;  %v806_v8 = vld [vmem:[%s14577_s0] sm:$0xff] (!%p591_p9)  ;;  %s14550_s24 = smov (!%p591_p9), 109  }
  0x20   : > { %v808_v9 = vld [vmem:[%s14577_s0 + $0x10] sm:$0xff]  ;;  %v809_v10 = vld [vmem:[%s14577_s0 + $0x18] sm:$0xff]  ;;  %s650_s30 = scalar_select %p649_p10, %s11117_s3, 1 }
  0x21   : > { %s14587_s0 = smov 92  }
  0x22   : > { %s8963_s28 = sshll.u32 %s650_s30, 3  ;;  %s14552_s30 = smov 91  }
  0x23   : > { %765 = vperm.xlu0 %10134, %v657_v3   ;;  %711 = vperm.xlu1 %10133, %v656_v4   ;;  %s653_s2 = scalar_lea.vmem %s14578_s22, %s8963_s28  ;;  %s14554_s22 = smov 110  }
  0x24   : > { %v654_v21 = vld [vmem:[%s653_s2] sm:$0x77]  ;;  %s14544_s2 = smov 127   ;;  %s10982_s28 = smov 90  }
  0x25   : > { %v725_v24 = vrot.slane %v654_v21, %v11173_v15  ;;  %v729_v25 = vrot.slane %v654_v21, %v728_v16  ;;  %v683_v26 = vrot.slane %v654_v21, %v11177_v19  ;;  %v687_v27 = vrot.slane %v654_v21, %v686_v20 }
  0x26   : > { %v775_v28 = vrot.slane %v654_v21, %v774_v22  ;;  %v779_v29 = vrot.slane %v654_v21, %v778_v23 }
  0x27   : > { %10138 = vset.pattern.permute.xlu0 %v10973_v5  ;;  %10135 = vset.pattern.permute.xlu1 %v10971_v1  ;;  %v735_v32 = vrot.slane %v725_v24, %v11173_v15  ;;  %v739_v33 = vrot.slane %v729_v25, %v11173_v15  ;;  %v693_v34 = vrot.slane %v683_v26, %v11177_v19 }
  0x28   : > { %661 = vperm.xlu0 %10138, %v655_v0   ;;  %761 = vperm.xlu1 %10135, %v656_v4   ;;  %v697_v35 = vrot.slane %v687_v27, %v11177_v19  ;;  %v785_v36 = vrot.slane %v775_v28, %v774_v22  ;;  %v789_v37 = vrot.slane %v779_v29, %v774_v22 }
  0x2c   : > { %666 = vperm.xlu0 %10138, %v656_v4   ;;  %10136 = vset.pattern.permute.xlu1 %v10973_v5 }
  0x2d   : > { %671 = vperm.xlu1 %10136, %v657_v3  }
  0x30   : > { %676 = vperm.xlu0 %10138, %v658_v6  }
  0x31   : > { %10137 = vset.pattern.permute.xlu1 %v10972_v2 }
  0x32   : > { %715 = vperm.xlu1 %10137, %v657_v3  }
  0x34   : > { %817 = vperm.xlu0 %10138, %v807_v7  }
  0x36   : > { %719 = vperm.xlu1 %10137, %v658_v6  }
  0x3a   : > { %10139 = vset.pattern.permute.xlu1 %v10971_v1 }
  0x3b   : > { %769 = vperm.xlu1 %10139, %v658_v6  }
  0x3f   : > { %10140 = vset.pattern.permute.xlu1 %v10973_v5 }
  0x40   : > { %812 = vperm.xlu1 %10140, %v806_v8  }
  0x44   : > { %822 = vperm.xlu1 %10140, %v808_v9  }
  0x48   : > { %827 = vperm.xlu1 %10140, %v809_v10  }
  0x9e   : > { %v708_v13 = vpop.permute.xlu1 %707  ;;  %v758_v14 = vpop.permute.xlu0 %757 }
  0x9f   : > { %v740_v60 = vmul.f32 %v735_v32, %v708_v13  ;;  %v741_v61 = vmul.f32 %v739_v33, %v708_v13  ;;  %v790_v3 = vmul.f32 %v785_v36, %v758_v14  ;;  %v791_v4 = vmul.f32 %v789_v37, %v758_v14 }
  0xa2   : > { %v712_v17 = vpop.permute.xlu1 %711  ;;  %v11175_v18 = vpop.permute.xlu0 %765 }
  0xa3   : > { %v742_v39 = vmul.f32 %v735_v32, %v712_v17  ;;  %v743_v40 = vmul.f32 %v739_v33, %v712_v17  ;;  %v794_v12 = vmul.f32 %v785_v36, %v11175_v18  ;;  %v795_v13 = vmul.f32 %v789_v37, %v11175_v18 }
  0xa7   : > { %v662_v30 = vpop.permute.xlu0 %661  ;;  %v762_v31 = vpop.permute.xlu1 %761 }
  0xa8   : > { %v792_v47 = vmul.f32 %v785_v36, %v762_v31  ;;  %v793_v48 = vmul.f32 %v789_v37, %v762_v31  ;;  %v698_v55 = vmul.f32 %v693_v34, %v662_v30  ;;  %v699_v56 = vmul.f32 %v697_v35, %v662_v30 }
  0xaa   : > { %v748_v5 = vadd.f32 %v740_v60, %v698_v55  ;;  %v749_v6 = vadd.f32 %v741_v61, %v699_v56  ;;  %v10975_v55 = vmov 0.0  }
  0xab   : > { %v667_v38 = vpop.permute.xlu0 %666  ;;  %1005 = vmatprep.mubr.f32.mxu0 %v10975_v55  ;;  %3168 = vmatprep.mubr.f32.mxu1 %v10975_v55 }
  0xac   : > { %v700_v41 = vmul.f32 %v693_v34, %v667_v38  ;;  %v701_v42 = vmul.f32 %v697_v35, %v667_v38  ;;  %v672_v43 = vpop.permute.xlu1 %671  ;;  %v798_v16 = vadd.f32 %v790_v3, %v748_v5  ;;  %v799_v17 = vadd.f32 %v791_v4, %v749_v6 }
  0xad   : > { %v702_v8 = vmul.f32 %v693_v34, %v672_v43  ;;  %v703_v9 = vmul.f32 %v697_v35, %v672_v43 }
  0xae   : > { %v750_v44 = vadd.f32 %v742_v39, %v700_v41  ;;  %v751_v45 = vadd.f32 %v743_v40, %v701_v42 }
  0xaf   : > { %v677_v46 = vpop.permute.xlu0 %676 }
  0xb0   : > { %v800_v50 = vadd.f32 %v792_v47, %v750_v44  ;;  %v801_v51 = vadd.f32 %v793_v48, %v751_v45  ;;  %v704_v20 = vmul.f32 %v693_v34, %v677_v46  ;;  %v705_v21 = vmul.f32 %v697_v35, %v677_v46 }
  0xb1   : > { %v716_v49 = vpop.permute.xlu1 %715 }
  0xb2   : > { %v744_v0 = vmul.f32 %v735_v32, %v716_v49  ;;  %v745_v1 = vmul.f32 %v739_v33, %v716_v49 }
  0xb3   : > { %v818_v52 = vpop.permute.xlu0 %817 }
  0xb4   : > { %v832_v53 = vadd.f32 %v818_v52, %v800_v50  ;;  %v833_v54 = vadd.f32 %v818_v52, %v801_v51  ;;  %v752_v10 = vadd.f32 %v744_v0, %v702_v8  ;;  %v753_v11 = vadd.f32 %v745_v1, %v703_v9 }
  0xb5   : > { %v720_v57 = vpop.permute.xlu1 %719 }
  0xb6   : > { %vm840_vm0 = vcmp.ge.f32.partialorder %v832_v53, 0.0  ;;  %vm841_vm1 = vcmp.ge.f32.partialorder %v833_v54, 0.0  ;;  %v848_v58 = vmul.f32 0.01, %v832_v53  ;;  %v849_v59 = vmul.f32 0.01, %v833_v54 }
  0xb7   : > { %v746_v14 = vmul.f32 %v735_v32, %v720_v57  ;;  %v747_v22 = vmul.f32 %v739_v33, %v720_v57  ;;  %v802_v28 = vadd.f32 %v794_v12, %v752_v10  ;;  %v803_v29 = vadd.f32 %v795_v13, %v753_v11 }
  0xb8   : > { %v11185_v62 = vsel %vm840_vm0, %v832_v53, %v848_v58  ;;  %v11187_v63 = vsel %vm841_vm1, %v833_v54, %v849_v59  ;;  %vm2362_vm0 = vcmask 736256   ;;  %vm2620_vm1 = vcmask 556032  }
  0xb9   : > { %v11191_v2 = vpack.i.bf16 %v11187_v63, %v11185_v62  ;;  %v754_v38 = vadd.f32 %v746_v14, %v704_v20  ;;  %v755_v39 = vadd.f32 %v747_v22, %v705_v21 }
  0xba   : > { %v770_v7 = vpop.permute.xlu1 %769 }
  0xbb   : > { %10147 = vrot.lane.b32.xlu1 %v11191_v2, %s14544_s2  ;;  %v796_v26 = vmul.f32 %v785_v36, %v770_v7  ;;  %v797_v27 = vmul.f32 %v789_v37, %v770_v7 }
  0xbd   : > { %v804_v35 = vadd.f32 %v796_v26, %v754_v38  ;;  %v805_v41 = vadd.f32 %v797_v27, %v755_v39 }
  0xbf   : > { %v813_v23 = vpop.permute.xlu1 %812 }
  0xc0   : > { %v830_v24 = vadd.f32 %v813_v23, %v798_v16  ;;  %v831_v25 = vadd.f32 %v813_v23, %v799_v17 }
  0xc2   : > { %vm838_vm2 = vcmp.ge.f32.partialorder %v830_v24, 0.0  ;;  %vm839_vm3 = vcmp.ge.f32.partialorder %v831_v25, 0.0  ;;  %v846_v30 = vmul.f32 0.01, %v830_v24  ;;  %v847_v31 = vmul.f32 0.01, %v831_v25 }
  0xc3   : > { %v823_v18 = vpop.permute.xlu1 %822 }
  0xc4   : > { %v11197_v40 = vsel %vm838_vm2, %v830_v24, %v846_v30  ;;  %v11199_v34 = vsel %vm839_vm3, %v831_v25, %v847_v31  ;;  %v834_v32 = vadd.f32 %v823_v18, %v802_v28  ;;  %v835_v33 = vadd.f32 %v823_v18, %v803_v29 }
  0xc5   : > { %v10141_v36 = vpack.i.bf16 %v11199_v34, %v11197_v40  ;;  %v9016_v53 = vpack.c.bf16 %v11187_v63, %v11199_v34  ;;  %v9018_v56 = vpack.c.bf16 %v11185_v62, %v11197_v40 }
  0xc6   : > { %vm842_vm4 = vcmp.ge.f32.partialorder %v834_v32, 0.0  ;;  %vm843_vm5 = vcmp.ge.f32.partialorder %v835_v33, 0.0  ;;  %v850_v37 = vmul.f32 0.01, %v834_v32  ;;  %v851_v42 = vmul.f32 0.01, %v835_v33 }
  0xc7   : > { %v828_v43 = vpop.permute.xlu1 %827  ;;  %10142 = vrot.lane.b32.xlu0 %v10141_v36, %s14544_s2 }
  0xc8   : > { %v11204_v44 = vsel %vm842_vm4, %v834_v32, %v850_v37  ;;  %v11206_v45 = vsel %vm843_vm5, %v835_v33, %v851_v42  ;;  %v836_v46 = vadd.f32 %v828_v43, %v804_v35  ;;  %v837_v47 = vadd.f32 %v828_v43, %v805_v41 }
  0xc9   : > { %v10151_v48 = vpack.i.bf16 %v11206_v45, %v11204_v44 }
  0xca   : > { %vm844_vm6 = vcmp.ge.f32.partialorder %v836_v46, 0.0  ;;  %vm845_vm7 = vcmp.ge.f32.partialorder %v837_v47, 0.0  ;;  %v852_v49 = vmul.f32 0.01, %v836_v46  ;;  %v853_v50 = vmul.f32 0.01, %v837_v47 }
  0xcb   : > { %10152 = vrot.lane.b32.xlu0 %v10151_v48, %s14544_s2 }
  0xcc   : > { %v11211_v51 = vsel %vm844_vm6, %v836_v46, %v852_v49  ;;  %v11213_v52 = vsel %vm845_vm7, %v837_v47, %v853_v50 }
  0xcd   : > { %v10156_v54 = vpack.i.bf16 %v11213_v52, %v11211_v51  ;;  %v9020_v57 = vpack.c.bf16 %v11213_v52, %v11206_v45  ;;  %v9022_v58 = vpack.c.bf16 %v11211_v51, %v11204_v44 }
  0xcf   : > { %10157 = vrot.lane.b32.xlu1 %v10156_v54, %s14544_s2  ;;  %10162 = vrot.lane.b32.xlu0 %v10141_v36, %s14556_s29  ;;  %s14579_s2 = sld [smem:[#allocation15_spill]] }
  0xd3   : > { %10167 = vrot.lane.b32.xlu1 %v11191_v2, %s14556_s29  ;;  %10172 = vrot.lane.b32.xlu0 %v10151_v48, %s14556_s29 }
  0xd5   : > { %v2528_v59 = vld [vmem:[%s14579_s2] sm:$0xff] }
  0xd7   : > { %10177 = vrot.lane.b32.xlu1 %v10156_v54, %s14556_s29  ;;  %10182 = vrot.lane.b32.xlu0 %v10141_v36, %s14554_s22  ;;  %s14581_s29 = sld [smem:[#allocation14_spill]] }
  0xdb   : > { %10187 = vrot.lane.b32.xlu1 %v11191_v2, %s14554_s22  ;;  %10192 = vrot.lane.b32.xlu0 %v10151_v48, %s14554_s22 }
  0xdd   : > { %v8361_v29 = vld [vmem:[%s14581_s29 + $0x40] sm:$0xff]  ;;  %v8362_v38 = vld [vmem:[%s14581_s29 + $0x48] sm:$0xff]  ;;  %v8363_v62 = vld [vmem:[%s14581_s29 + $0x50] sm:$0xff] }
  0xde   : > { %v8364_v18 = vld [vmem:[%s14581_s29 + $0x58] sm:$0xff]  ;;  %v8365_v40 = vld [vmem:[%s14581_s29 + $0x60] sm:$0xff]  ;;  %v8366_v34 = vld [vmem:[%s14581_s29 + $0x68] sm:$0xff] }
  0xdf   : > { %10197 = vrot.lane.b32.xlu1 %v10156_v54, %s14554_s22  ;;  %10202 = vrot.lane.b32.xlu0 %v10141_v36, %s14550_s24  ;;  %v8367_v32 = vld [vmem:[%s14581_s29 + $0x70] sm:$0xff]  ;;  %v862_v46 = vld [vmem:[%s14581_s29] sm:$0xff] }
  0xe3   : > { %10207 = vrot.lane.b32.xlu1 %v11191_v2, %s14550_s24  ;;  %10212 = vrot.lane.b32.xlu0 %v10151_v48, %s14550_s24 }
  0xe7   : > { %10217 = vrot.lane.b32.xlu1 %v10156_v54, %s14550_s24  ;;  %10222 = vrot.lane.b32.xlu0 %v10141_v36, %s14548_s23  ;;  %s14589_s24 = smov 127  }
  0xeb   : > { %10227 = vrot.lane.b32.xlu1 %v11191_v2, %s14548_s23  ;;  %10232 = vrot.lane.b32.xlu0 %v10151_v48, %s14548_s23 }
  0xef   : > { %10237 = vrot.lane.b32.xlu1 %v10156_v54, %s14548_s23  ;;  %10242 = vrot.lane.b32.xlu0 %v10141_v36, %s14546_s1  ;;  %s14585_s23 = smov 109  }
  0xf3   : > { %10247 = vrot.lane.b32.xlu1 %v11191_v2, %s14546_s1  ;;  %10252 = vrot.lane.b32.xlu0 %v10151_v48, %s14546_s1 }
  0xf7   : > { %10257 = vrot.lane.b32.xlu1 %v10156_v54, %s14546_s1  ;;  %10262 = vrot.lane.b32.xlu0 %v10141_v36, %s14552_s30  ;;  %s14580_s1 = smov %s14579_s2  ;;  %s14583_s2 = smov 126  }
  0xf8   : > { %v2529_v60 = vld [vmem:[%s14580_s1 + $0x8] sm:$0xff]  ;;  %v2530_v61 = vld [vmem:[%s14580_s1 + $0x10] sm:$0xff]  ;;  %v2531_v0 = vld [vmem:[%s14580_s1 + $0x18] sm:$0xff] }
  0xf9   : > { %v2532_v1 = vld [vmem:[%s14580_s1 + $0x20] sm:$0xff]  ;;  %v2534_v3 = vld [vmem:[%s14580_s1 + $0x30] sm:$0xff]  ;;  %v2535_v4 = vld [vmem:[%s14580_s1 + $0x38] sm:$0xff] }
  0xfb   : > { %10267 = vrot.lane.b32.xlu1 %v11191_v2, %s14552_s30  ;;  %10272 = vrot.lane.b32.xlu0 %v10151_v48, %s14552_s30 }
  0xff   : > { %10277 = vrot.lane.b32.xlu1 %v10156_v54, %s14552_s30  ;;  %10282 = vrot.lane.b32.xlu0 %v10141_v36, %s10982_s28  ;;  %v8368_v36 = vld [vmem:[%s14581_s29 + $0x78] sm:$0xff] }
 0x103   : > { %10287 = vrot.lane.b32.xlu1 %v11191_v2, %s10982_s28  ;;  %10292 = vrot.lane.b32.xlu0 %v10151_v48, %s10982_s28  ;;  %v2533_v2 = vld [vmem:[%s14580_s1 + $0x28] sm:$0xff] }
 0x107   : > { %10297 = vrot.lane.b32.xlu1 %v10156_v54, %s10982_s28  ;;  %2538 = vperm.xlu0 %10138, %v2528_v59  }
 0x10b   : > { %2543 = vperm.xlu1 %10140, %v2529_v60   ;;  %2548 = vperm.xlu0 %10138, %v2530_v61   ;;  %v864_v61 = vld [vmem:[%s14581_s29 + $0x10] sm:$0xff] }
 0x10f   : > { %2553 = vperm.xlu1 %10140, %v2531_v0   ;;  %2558 = vperm.xlu0 %10138, %v2532_v1   ;;  %v865_v0 = vld [vmem:[%s14581_s29 + $0x18] sm:$0xff]  ;;  %v866_v1 = vld [vmem:[%s14581_s29 + $0x20] sm:$0xff] }
 0x113   : > { %2563 = vperm.xlu1 %10140, %v2533_v2   ;;  %2568 = vperm.xlu0 %10138, %v2534_v3   ;;  %v867_v2 = vld [vmem:[%s14581_s29 + $0x28] sm:$0xff]  ;;  %v868_v3 = vld [vmem:[%s14581_s29 + $0x30] sm:$0xff] }
 0x117   : > { %2573 = vperm.xlu1 %10140, %v2535_v4  }
 0x12d   : > { %v10148_v5 = vpop.permute.xlu1 %10147 }
 0x12e   : > { %v10149_v6 = vunpack.i.l.bf16 %v10148_v5  ;;  %v10150_v7 = vunpack.i.h.bf16 %v10148_v5 }
 0x130   : > { %v905_v13 = vsel %vm903_vm8, %v10149_v6, %v10150_v7 }
 0x139   : > { %v10143_v8 = vpop.permute.xlu0 %10142 }
 0x13a   : > { %v10144_v9 = vunpack.i.l.bf16 %v10143_v8  ;;  %v10145_v10 = vunpack.i.h.bf16 %v10143_v8 }
 0x13c   : > { %v9008_v11 = vpack.c.bf16 %v10150_v7, %v10145_v10  ;;  %v904_v12 = vsel %vm903_vm8, %v10144_v9, %v10145_v10  ;;  %v869_v7 = vld [vmem:[%s14581_s29 + $0x38] sm:$0xff] }
 0x13d   : > { %v10153_v16 = vpop.permute.xlu0 %10152  ;;  %v9010_v17 = vpack.c.bf16 %v905_v13, %v904_v12  ;;  %v8385_v13 = vld [vmem:[%s14581_s29 + $0x80] sm:$0xff] }
 0x13e   : > { %9009 = vmatprep.subr.bf16.mxu0 %v9008_v11  ;;  %v10155_v20 = vunpack.i.h.bf16 %v10153_v16  ;;  %v10154_v21 = vunpack.i.l.bf16 %v10153_v16 }
 0x13f   : > { %9011 = vmatpush1.bf16.msra.mxu0 %v9010_v17 }
 0x140   : > { %v906_v25 = vsel %vm903_vm8, %v10154_v21, %v10155_v20 }
 0x141   : > { %v10158_v14 = vpop.permute.xlu1 %10157  ;;  %v10163_v30 = vpop.permute.xlu0 %10162 }
 0x142   : > { %v10160_v22 = vunpack.i.h.bf16 %v10158_v14  ;;  %v10159_v23 = vunpack.i.l.bf16 %v10158_v14  ;;  %v10165_v39 = vunpack.i.h.bf16 %v10163_v30  ;;  %v10164_v37 = vunpack.i.l.bf16 %v10163_v30  ;;  %v8387_v30 = vld [vmem:[%s14581_s29 + $0x90] sm:$0xff] }
 0x144   : > { %v9012_v24 = vpack.c.bf16 %v10160_v22, %v10155_v20  ;;  %v907_v26 = vsel %vm903_vm8, %v10159_v23, %v10160_v22  ;;  %v1217_v47 = vsel %vm1216_vm10, %v10164_v37, %v10165_v39  ;;  %v8401_v37 = vld [vmem:[%s14581_s29 + $0xc0] sm:$0xff] }
 0x145   : > { %v9014_v27 = vpack.c.bf16 %v907_v26, %v906_v25  ;;  %v10168_v28 = vpop.permute.xlu1 %10167  ;;  %v10173_v41 = vpop.permute.xlu0 %10172  ;;  %v8386_v25 = vld [vmem:[%s14581_s29 + $0x88] sm:$0xff] }
 0x146   : > { %9013 = vmatprep.subr.bf16.mxu0 %v9012_v24  ;;  %v10170_v31 = vunpack.i.h.bf16 %v10168_v28  ;;  %v10169_v35 = vunpack.i.l.bf16 %v10168_v28  ;;  %v10175_v48 = vunpack.i.h.bf16 %v10173_v41  ;;  %v10174_v49 = vunpack.i.l.bf16 %v10173_v41 }
 0x147   : > { %9015 = vmatpush1.bf16.msra.mxu0 %v9014_v27 }
 0x148   : > { %9017 = vmatprep.subr.bf16.mxu0 %v9016_v53  ;;  %v9024_v63 = vpack.c.bf16 %v10170_v31, %v10165_v39  ;;  %v1218_v42 = vsel %vm1216_vm10, %v10169_v35, %v10170_v31  ;;  %v8388_v31 = vld [vmem:[%s14581_s29 + $0x98] sm:$0xff]  ;;  %v8390_v39 = vld [vmem:[%s14581_s29 + $0xa8] sm:$0xff] }
 0x149   : > { %v10178_v33 = vpop.permute.xlu1 %10177  ;;  %v10183_v50 = vpop.permute.xlu0 %10182  ;;  %v9026_v51 = vpack.c.bf16 %v1218_v42, %v1217_v47 }
 0x14a   : > { %8369 = vmatmul.mubr.msk.f32.vlgmr.msra.gmra.mrb[0].mxu0 %vm916_vm9, %v8361_v29  ;;  %v10180_v43 = vunpack.i.h.bf16 %v10178_v33  ;;  %v10179_v44 = vunpack.i.l.bf16 %v10178_v33  ;;  %v10184_v8 = vunpack.i.l.bf16 %v10183_v50 }
 0x14b   : > { %9019 = vmatpush1.bf16.msra.mxu0 %v9018_v56  ;;  %1011 = vmatprep.mubr.f32.mxu0 %v10975_v55  ;;  %v863_v56 = vld [vmem:[%s14581_s29 + $0x8] sm:$0xff] }
 0x14c   : > { %9021 = vmatprep.subr.bf16.mxu0 %v9020_v57  ;;  %v1220_v52 = vsel %vm1216_vm10, %v10179_v44, %v10180_v43  ;;  %v9028_v54 = vpack.c.bf16 %v10180_v43, %v10175_v48  ;;  %v1219_v57 = vsel %vm1216_vm10, %v10174_v49, %v10175_v48 }
 0x14d   : > { %v10188_v45 = vpop.permute.xlu1 %10187  ;;  %v9030_v59 = vpack.c.bf16 %v1220_v52, %v1219_v57  ;;  %v10193_v6 = vpop.permute.xlu0 %10192  ;;  %v8404_v57 = vld [vmem:[%s14581_s29 + $0xd8] sm:$0xff] }
 0x14e   : > { %8370 = vmatmul.mubr.msk.f32.gmra.mrb[2].mxu0 %vm916_vm9, %v8362_v38  ;;  %v10190_v53 = vunpack.i.h.bf16 %v10188_v45  ;;  %v10189_v5 = vunpack.i.l.bf16 %v10188_v45  ;;  %v10195_v17 = vunpack.i.h.bf16 %v10193_v6  ;;  %v10194_v20 = vunpack.i.l.bf16 %v10193_v6  ;;  %v8389_v38 = vld [vmem:[%s14581_s29 + $0xa0] sm:$0xff] }
 0x14f   : > { %9023 = vmatpush1.bf16.msra.mxu0 %v9022_v58  ;;  %1017 = vmatprep.mubr.f32.mxu0 %v10975_v55  ;;  %v10185_v58 = vunpack.i.h.bf16 %v10183_v50  ;;  %v8402_v50 = vld [vmem:[%s14581_s29 + $0xc8] sm:$0xff] }
 0x150   : > { %9025 = vmatprep.subr.bf16.mxu0 %v9024_v63  ;;  %v1409_v9 = vsel %vm1407_vm11, %v10189_v5, %v10190_v53  ;;  %v1410_v26 = vsel %vm1407_vm11, %v10194_v20, %v10195_v17  ;;  %v8391_v63 = vld [vmem:[%s14581_s29 + $0xb0] sm:$0xff] }
 0x151   : > { %v9032_v60 = vpack.c.bf16 %v10190_v53, %v10185_v58  ;;  %v10198_v4 = vpop.permute.xlu1 %10197  ;;  %v1408_v16 = vsel %vm1407_vm11, %v10184_v8, %v10185_v58  ;;  %v10203_v21 = vpop.permute.xlu0 %10202  ;;  %v8405_v58 = vld [vmem:[%s14581_s29 + $0xe0] sm:$0xff] }
 0x152   : > { %8371 = vmatmul.mubr.msk.f32.gmra.mrb[4].mxu0 %vm916_vm9, %v8363_v62  ;;  %v10200_v10 = vunpack.i.h.bf16 %v10198_v4  ;;  %v10199_v11 = vunpack.i.l.bf16 %v10198_v4  ;;  %v9034_v14 = vpack.c.bf16 %v1409_v9, %v1408_v16  ;;  %v10205_v27 = vunpack.i.h.bf16 %v10203_v21  ;;  %v8417_v8 = vld [vmem:[%s14581_s29 + $0x100] sm:$0xff] }
 0x153   : > { %1023 = vmatprep.mubr.f32.mxu0 %v10975_v55 }
 0x154   : > { %v1411_v22 = vsel %vm1407_vm11, %v10199_v11, %v10200_v10  ;;  %v9036_v24 = vpack.c.bf16 %v10200_v10, %v10195_v17 }
 0x155   : > { %v10208_v12 = vpop.permute.xlu1 %10207  ;;  %v9038_v28 = vpack.c.bf16 %v1411_v22, %v1410_v26  ;;  %v8420_v26 = vld [vmem:[%s14581_s29 + $0x118] sm:$0xff] }
 0x156   : > { %8372 = vmatmul.mubr.msk.f32.gmra.mrb[6].mxu0 %vm916_vm9, %v8364_v18  ;;  %v10210_v23 = vunpack.i.h.bf16 %v10208_v12  ;;  %v10209_v18 = vunpack.i.l.bf16 %v10208_v12 }
 0x157   : > { %1029 = vmatprep.mubr.f32.mxu0 %v10975_v55 }
 0x158   : > { %v9040_v29 = vpack.c.bf16 %v10210_v23, %v10205_v27  ;;  %v1600_v33 = vsel %vm1598_vm12, %v10209_v18, %v10210_v23 }
 0x159   : > { %v10218_v62 = vpop.permute.xlu1 %10217 }
 0x15a   : > { %8373 = vmatmul.mubr.msk.f32.gmra.mrb[8].mxu0 %vm916_vm9, %v8365_v40  ;;  %v10213_v40 = vpop.permute.xlu0 %10212  ;;  %v10220_v35 = vunpack.i.h.bf16 %v10218_v62  ;;  %v10219_v41 = vunpack.i.l.bf16 %v10218_v62 }
 0x15b   : > { %1035 = vmatprep.mubr.f32.mxu0 %v10975_v55  ;;  %v10215_v43 = vunpack.i.h.bf16 %v10213_v40  ;;  %v10214_v44 = vunpack.i.l.bf16 %v10213_v40 }
 0x15c   : > { %v1602_v47 = vsel %vm1598_vm12, %v10219_v41, %v10220_v35 }
 0x15d   : > { %v9044_v49 = vpack.c.bf16 %v10220_v35, %v10215_v43 }
 0x15e   : > { %8374 = vmatmul.mubr.msk.f32.gmra.mrb[10].mxu0 %vm916_vm9, %v8366_v34  ;;  %v8392_v34 = vld [vmem:[%s14581_s29 + $0xb8] sm:$0xff]  ;;  %v10223_v45 = vpop.permute.xlu0 %10222 }
 0x15f   : > { %1041 = vmatprep.mubr.f32.mxu0 %v10975_v55  ;;  %v10225_v52 = vunpack.i.h.bf16 %v10223_v45 }
 0x162   : > { %8375 = vmatmul.mubr.msk.f32.gmra.mrb[12].mxu0 %vm916_vm9, %v8367_v32  ;;  %v10204_v32 = vunpack.i.l.bf16 %v10203_v21  ;;  %v8418_v21 = vld [vmem:[%s14581_s29 + $0x108] sm:$0xff] }
 0x163   : > { %1047 = vmatprep.mubr.f32.mxu0 %v10975_v55 }
 0x164   : > { %v1599_v42 = vsel %vm1598_vm12, %v10204_v32, %v10205_v27  ;;  %v8421_v27 = vld [vmem:[%s14581_s29 + $0x120] sm:$0xff] }
 0x165   : > { %v8433_v32 = vld [vmem:[%s14581_s29 + $0x140] sm:$0xff] }
 0x166   : > { %8376 = vmatmul.mubr.msk.f32.gmra.mrb[14].mxu0 %vm916_vm9, %v8368_v36  ;;  %v10228_v36 = vpop.permute.xlu1 %10227 }
 0x167   : > { %1142 = vmatprep.mubr.f32.mxu0 %v10975_v55  ;;  %v10230_v48 = vunpack.i.h.bf16 %v10228_v36 }
 0x16a   : > { %8377 = vmatmul.mubr.msk.f32.vlgmr.msra.gmra.mrb[0].mxu0 %vm916_vm9, %v862_v46  ;;  %v9042_v46 = vpack.c.bf16 %v1600_v33, %v1599_v42 }
 0x16b   : > { %9027 = vmatpush1.bf16.msra.mxu0 %v9026_v51  ;;  %1148 = vmatprep.mubr.f32.mxu0 %v10975_v55  ;;  %v1601_v51 = vsel %vm1598_vm12, %v10214_v44, %v10215_v43 }
 0x16c   : > { %9029 = vmatprep.subr.bf16.mxu0 %v9028_v54  ;;  %v9046_v53 = vpack.c.bf16 %v1602_v47, %v1601_v51  ;;  %v9048_v54 = vpack.c.bf16 %v10230_v48, %v10225_v52  ;;  %v8436_v51 = vld [vmem:[%s14581_s29 + $0x158] sm:$0xff] }
 0x16e   : > { %8378 = vmatmul.mubr.msk.f32.gmra.mrb[2].mxu0 %vm916_vm9, %v863_v56  ;;  %v8403_v56 = vld [vmem:[%s14581_s29 + $0xd0] sm:$0xff] }
 0x16f   : > { %9031 = vmatpush1.bf16.msra.mxu0 %v9030_v59  ;;  %1154 = vmatprep.mubr.f32.mxu0 %v10975_v55  ;;  %v8406_v59 = vld [vmem:[%s14581_s29 + $0xe8] sm:$0xff] }
 0x170   : > { %9033 = vmatprep.subr.bf16.mxu0 %v9032_v60  ;;  %v8407_v60 = vld [vmem:[%s14581_s29 + $0xf0] sm:$0xff] }
 0x172   : > { %8379 = vmatmul.mubr.msk.f32.gmra.mrb[4].mxu0 %vm916_vm9, %v864_v61  ;;  %v10238_v61 = vpop.permute.xlu1 %10237 }
 0x173   : > { %1160 = vmatprep.mubr.f32.mxu0 %v10975_v55  ;;  %v10240_v5 = vunpack.i.h.bf16 %v10238_v61  ;;  %v10239_v6 = vunpack.i.l.bf16 %v10238_v61 }
 0x175   : > { %v1793_v16 = vsel %vm1789_vm13, %v10239_v6, %v10240_v5 }
 0x176   : > { %8380 = vmatmul.mubr.msk.f32.gmra.mrb[6].mxu0 %vm916_vm9, %v865_v0  ;;  %v10229_v0 = vunpack.i.l.bf16 %v10228_v36 }
 0x177   : > { %1166 = vmatprep.mubr.f32.mxu0 %v10975_v55 }
 0x178   : > { %v1791_v4 = vsel %vm1789_vm13, %v10229_v0, %v10230_v48 }
 0x17a   : > { %8381 = vmatmul.mubr.msk.f32.gmra.mrb[8].mxu0 %vm916_vm9, %v866_v1  ;;  %v10233_v1 = vpop.permute.xlu0 %10232 }
 0x17b   : > { %1172 = vmatprep.mubr.f32.mxu0 %v10975_v55  ;;  %v10235_v10 = vunpack.i.h.bf16 %v10233_v1  ;;  %v10234_v11 = vunpack.i.l.bf16 %v10233_v1 }
 0x17d   : > { %v9052_v20 = vpack.c.bf16 %v10240_v5, %v10235_v10 }
 0x17e   : > { %8382 = vmatmul.mubr.msk.f32.gmra.mrb[10].mxu0 %vm916_vm9, %v867_v2  ;;  %v8408_v2 = vld [vmem:[%s14581_s29 + $0xf8] sm:$0xff]  ;;  %v10243_v12 = vpop.permute.xlu0 %10242 }
 0x17f   : > { %1178 = vmatprep.mubr.f32.mxu0 %v10975_v55  ;;  %v10245_v22 = vunpack.i.h.bf16 %v10243_v12 }
 0x182   : > { %8383 = vmatmul.mubr.msk.f32.gmra.mrb[12].mxu0 %vm916_vm9, %v868_v3  ;;  %v10224_v3 = vunpack.i.l.bf16 %v10223_v45  ;;  %v8434_v45 = vld [vmem:[%s14581_s29 + $0x148] sm:$0xff] }
 0x183   : > { %1184 = vmatprep.mubr.f32.mxu0 %v10975_v55 }
 0x184   : > { %v1790_v9 = vsel %vm1789_vm13, %v10224_v3, %v10225_v52  ;;  %v8437_v52 = vld [vmem:[%s14581_s29 + $0x160] sm:$0xff] }
 0x185   : > { %v8449_v3 = vld [vmem:[%s14581_s29 + $0x180] sm:$0xff] }
 0x186   : > { %8384 = vmatmul.mubr.msk.f32.gmra.mrb[14].mxu0 %vm916_vm9, %v869_v7  ;;  %v10248_v7 = vpop.permute.xlu1 %10247 }
 0x187   : > { %1317 = vmatprep.mubr.f32.mxu0 %v10975_v55  ;;  %v10250_v17 = vunpack.i.h.bf16 %v10248_v7 }
 0x18a   : > { %8393 = vmatmul.mubr.msk.f32.vlgmr.msra.gmra.mrb[0].mxu0 %vm916_vm9, %v8385_v13  ;;  %v9050_v13 = vpack.c.bf16 %v1791_v4, %v1790_v9 }
 0x18b   : > { %9035 = vmatpush1.bf16.msra.mxu0 %v9034_v14  ;;  %1323 = vmatprep.mubr.f32.mxu0 %v10975_v55  ;;  %v1792_v14 = vsel %vm1789_vm13, %v10234_v11, %v10235_v10 }
 0x18c   : > { %9037 = vmatprep.subr.bf16.mxu0 %v9036_v24  ;;  %v9054_v23 = vpack.c.bf16 %v1793_v16, %v1792_v14  ;;  %v9056_v24 = vpack.c.bf16 %v10250_v17, %v10245_v22  ;;  %v8452_v14 = vld [vmem:[%s14581_s29 + $0x198] sm:$0xff] }
 0x18e   : > { %8394 = vmatmul.mubr.msk.f32.gmra.mrb[2].mxu0 %vm916_vm9, %v8386_v25  ;;  %v8419_v25 = vld [vmem:[%s14581_s29 + $0x110] sm:$0xff] }
 0x18f   : > { %9039 = vmatpush1.bf16.msra.mxu0 %v9038_v28  ;;  %1329 = vmatprep.mubr.f32.mxu0 %v10975_v55  ;;  %v8422_v28 = vld [vmem:[%s14581_s29 + $0x128] sm:$0xff] }
 0x190   : > { %9041 = vmatprep.subr.bf16.mxu0 %v9040_v29  ;;  %v8423_v29 = vld [vmem:[%s14581_s29 + $0x130] sm:$0xff] }
 0x192   : > { %8395 = vmatmul.mubr.msk.f32.gmra.mrb[4].mxu0 %vm916_vm9, %v8387_v30  ;;  %v10258_v30 = vpop.permute.xlu1 %10257 }
 0x193   : > { %1335 = vmatprep.mubr.f32.mxu0 %v10975_v55  ;;  %v10260_v18 = vunpack.i.h.bf16 %v10258_v30  ;;  %v10259_v40 = vunpack.i.l.bf16 %v10258_v30 }
 0x195   : > { %v1984_v42 = vsel %vm1980_vm14, %v10259_v40, %v10260_v18 }
 0x196   : > { %8396 = vmatmul.mubr.msk.f32.gmra.mrb[6].mxu0 %vm916_vm9, %v8388_v31  ;;  %v10249_v31 = vunpack.i.l.bf16 %v10248_v7 }
 0x197   : > { %1341 = vmatprep.mubr.f32.mxu0 %v10975_v55 }
 0x198   : > { %v1982_v62 = vsel %vm1980_vm14, %v10249_v31, %v10250_v17 }
 0x19a   : > { %8397 = vmatmul.mubr.msk.f32.gmra.mrb[8].mxu0 %vm916_vm9, %v8389_v38  ;;  %v10253_v38 = vpop.permute.xlu0 %10252 }
 0x19b   : > { %1347 = vmatprep.mubr.f32.mxu0 %v10975_v55  ;;  %v10255_v35 = vunpack.i.h.bf16 %v10253_v38  ;;  %v10254_v41 = vunpack.i.l.bf16 %v10253_v38 }
 0x19d   : > { %v9060_v44 = vpack.c.bf16 %v10260_v18, %v10255_v35 }
 0x19e   : > { %8398 = vmatmul.mubr.msk.f32.gmra.mrb[10].mxu0 %vm916_vm9, %v8390_v39  ;;  %v8424_v39 = vld [vmem:[%s14581_s29 + $0x138] sm:$0xff]  ;;  %v10263_v36 = vpop.permute.xlu0 %10262 }
 0x19f   : > { %1353 = vmatprep.mubr.f32.mxu0 %v10975_v55  ;;  %v10265_v47 = vunpack.i.h.bf16 %v10263_v36 }
 0x1a2   : > { %8399 = vmatmul.mubr.msk.f32.gmra.mrb[12].mxu0 %vm916_vm9, %v8391_v63  ;;  %v10244_v63 = vunpack.i.l.bf16 %v10243_v12  ;;  %v8450_v12 = vld [vmem:[%s14581_s29 + $0x188] sm:$0xff] }
 0x1a3   : > { %1359 = vmatprep.mubr.f32.mxu0 %v10975_v55 }
 0x1a4   : > { %v1981_v33 = vsel %vm1980_vm14, %v10244_v63, %v10245_v22  ;;  %v8453_v22 = vld [vmem:[%s14581_s29 + $0x1a0] sm:$0xff] }
 0x1a6   : > { %8400 = vmatmul.mubr.msk.f32.gmra.mrb[14].mxu0 %vm916_vm9, %v8392_v34  ;;  %v10268_v34 = vpop.permute.xlu1 %10267 }
 0x1a7   : > { %1508 = vmatprep.mubr.f32.mxu0 %v10975_v55  ;;  %v10270_v43 = vunpack.i.h.bf16 %v10268_v34 }
 0x1aa   : > { %8409 = vmatmul.mubr.msk.f32.vlgmr.msra.gmra.mrb[0].mxu0 %vm916_vm9, %v8401_v37  ;;  %v9058_v37 = vpack.c.bf16 %v1982_v62, %v1981_v33  ;;  %v8466_v33 = vld [vmem:[%s14581_s29 + $0x1c8] sm:$0xff] }
 0x1ab   : > { %9043 = vmatpush1.bf16.msra.mxu0 %v9042_v46  ;;  %1514 = vmatprep.mubr.f32.mxu0 %v10975_v55  ;;  %v1983_v46 = vsel %vm1980_vm14, %v10254_v41, %v10255_v35 }
 0x1ac   : > { %9045 = vmatprep.subr.bf16.mxu0 %v9044_v49  ;;  %v9062_v48 = vpack.c.bf16 %v1984_v42, %v1983_v46  ;;  %v9064_v49 = vpack.c.bf16 %v10270_v43, %v10265_v47  ;;  %v8469_v42 = vld [vmem:[%s14581_s29 + $0x1e0] sm:$0xff] }
 0x1ad   : > { %v8481_v46 = vld [vmem:[%s14581_s29 + $0x200] sm:$0xff] }
 0x1ae   : > { %8410 = vmatmul.mubr.msk.f32.gmra.mrb[2].mxu0 %vm916_vm9, %v8402_v50  ;;  %v8435_v50 = vld [vmem:[%s14581_s29 + $0x150] sm:$0xff] }
 0x1af   : > { %9047 = vmatpush1.bf16.msra.mxu0 %v9046_v53  ;;  %1520 = vmatprep.mubr.f32.mxu0 %v10975_v55  ;;  %v8438_v53 = vld [vmem:[%s14581_s29 + $0x168] sm:$0xff] }
 0x1b0   : > { %9049 = vmatprep.subr.bf16.mxu0 %v9048_v54  ;;  %v8439_v54 = vld [vmem:[%s14581_s29 + $0x170] sm:$0xff] }
 0x1b2   : > { %8411 = vmatmul.mubr.msk.f32.gmra.mrb[4].mxu0 %vm916_vm9, %v8403_v56  ;;  %v10278_v56 = vpop.permute.xlu1 %10277 }
 0x1b3   : > { %1526 = vmatprep.mubr.f32.mxu0 %v10975_v55  ;;  %v10280_v0 = vunpack.i.h.bf16 %v10278_v56  ;;  %v10279_v1 = vunpack.i.l.bf16 %v10278_v56 }
 0x1b5   : > { %v2175_v9 = vsel %vm2171_vm15, %v10279_v1, %v10280_v0 }
 0x1b6   : > { %8412 = vmatmul.mubr.msk.f32.gmra.mrb[6].mxu0 %vm916_vm9, %v8404_v57  ;;  %v10269_v57 = vunpack.i.l.bf16 %v10268_v34 }
 0x1b7   : > { %1532 = vmatprep.mubr.f32.mxu0 %v10975_v55 }
 0x1b8   : > { %v2173_v61 = vsel %vm2171_vm15, %v10269_v57, %v10270_v43  ;;  %v8470_v43 = vld [vmem:[%s14581_s29 + $0x1e8] sm:$0xff] }
 0x1ba   : > { %8413 = vmatmul.mubr.msk.f32.gmra.mrb[8].mxu0 %vm916_vm9, %v8405_v58  ;;  %v10273_v58 = vpop.permute.xlu0 %10272 }
 0x1bb   : > { %1538 = vmatprep.mubr.f32.mxu0 %v10975_v55  ;;  %v10275_v5 = vunpack.i.h.bf16 %v10273_v58  ;;  %v10274_v6 = vunpack.i.l.bf16 %v10273_v58 }
 0x1bd   : > { %v9068_v11 = vpack.c.bf16 %v10280_v0, %v10275_v5 }
 0x1be   : > { %8414 = vmatmul.mubr.msk.f32.gmra.mrb[10].mxu0 %vm916_vm9, %v8406_v59  ;;  %v8440_v59 = vld [vmem:[%s14581_s29 + $0x178] sm:$0xff]  ;;  %v10283_v7 = vpop.permute.xlu0 %10282 }
 0x1bf   : > { %1544 = vmatprep.mubr.f32.mxu0 %v10975_v55  ;;  %v10285_v16 = vunpack.i.h.bf16 %v10283_v7 }
 0x1c2   : > { %8415 = vmatmul.mubr.msk.f32.gmra.mrb[12].mxu0 %vm916_vm9, %v8407_v60  ;;  %v10264_v60 = vunpack.i.l.bf16 %v10263_v36  ;;  %v8467_v36 = vld [vmem:[%s14581_s29 + $0x1d0] sm:$0xff] }
 0x1c3   : > { %1550 = vmatprep.mubr.f32.mxu0 %v10975_v55 }
 0x1c4   : > { %v2172_v4 = vsel %vm2171_vm15, %v10264_v60, %v10265_v47  ;;  %v8482_v47 = vld [vmem:[%s14581_s29 + $0x208] sm:$0xff] }
 0x1c6   : > { %8416 = vmatmul.mubr.msk.f32.gmra.mrb[14].mxu0 %vm916_vm9, %v8408_v2  ;;  %v10288_v2 = vpop.permute.xlu1 %10287 }
 0x1c7   : > { %1699 = vmatprep.mubr.f32.mxu0 %v10975_v55  ;;  %v10290_v10 = vunpack.i.h.bf16 %v10288_v2 }
 0x1ca   : > { %8425 = vmatmul.mubr.msk.f32.vlgmr.msra.gmra.mrb[0].mxu0 %vm916_vm9, %v8417_v8  ;;  %v9066_v8 = vpack.c.bf16 %v2173_v61, %v2172_v4 }
 0x1cb   : > { %9051 = vmatpush1.bf16.msra.mxu0 %v9050_v13  ;;  %1705 = vmatprep.mubr.f32.mxu0 %v10975_v55  ;;  %v2174_v13 = vsel %vm2171_vm15, %v10274_v6, %v10275_v5 }
 0x1cc   : > { %9053 = vmatprep.subr.bf16.mxu0 %v9052_v20  ;;  %v9070_v17 = vpack.c.bf16 %v2175_v9, %v2174_v13  ;;  %v9072_v20 = vpack.c.bf16 %v10290_v10, %v10285_v16 }
 0x1ce   : > { %8426 = vmatmul.mubr.msk.f32.gmra.mrb[2].mxu0 %vm916_vm9, %v8418_v21  ;;  %v8451_v21 = vld [vmem:[%s14581_s29 + $0x190] sm:$0xff] }
 0x1cf   : > { %9055 = vmatpush1.bf16.msra.mxu0 %v9054_v23  ;;  %1711 = vmatprep.mubr.f32.mxu0 %v10975_v55  ;;  %v8454_v23 = vld [vmem:[%s14581_s29 + $0x1a8] sm:$0xff] }
 0x1d0   : > { %9057 = vmatprep.subr.bf16.mxu0 %v9056_v24  ;;  %v8455_v24 = vld [vmem:[%s14581_s29 + $0x1b0] sm:$0xff] }
 0x1d2   : > { %8427 = vmatmul.mubr.msk.f32.gmra.mrb[4].mxu0 %vm916_vm9, %v8419_v25  ;;  %v10289_v25 = vunpack.i.l.bf16 %v10288_v2 }
 0x1d3   : > { %1717 = vmatprep.mubr.f32.mxu0 %v10975_v55 }
 0x1d4   : > { %v2364_v30 = vsel %vm2362_vm0, %v10289_v25, %v10290_v10 }
 0x1d6   : > { %8428 = vmatmul.mubr.msk.f32.gmra.mrb[6].mxu0 %vm916_vm9, %v8420_v26  ;;  %v10298_v26 = vpop.permute.xlu1 %10297 }
 0x1d7   : > { %1723 = vmatprep.mubr.f32.mxu0 %v10975_v55  ;;  %v10300_v31 = vunpack.i.h.bf16 %v10298_v26  ;;  %v10299_v38 = vunpack.i.l.bf16 %v10298_v26 }
 0x1d9   : > { %v2366_v34 = vsel %vm2362_vm0, %v10299_v38, %v10300_v31 }
 0x1da   : > { %8429 = vmatmul.mubr.msk.f32.gmra.mrb[8].mxu0 %vm916_vm9, %v8421_v27  ;;  %v8456_v27 = vld [vmem:[%s14581_s29 + $0x1b8] sm:$0xff]  ;;  %v2544_v1 = vpop.permute.xlu1 %2543 }
 0x1db   : > { %1729 = vmatprep.mubr.f32.mxu0 %v10975_v55 }
 0x1de   : > { %8430 = vmatmul.mubr.msk.f32.gmra.mrb[10].mxu0 %vm916_vm9, %v8422_v28  ;;  %v10284_v28 = vunpack.i.l.bf16 %v10283_v7 }
 0x1df   : > { %1735 = vmatprep.mubr.f32.mxu0 %v10975_v55 }
 0x1e0   : > { %v2363_v63 = vsel %vm2362_vm0, %v10284_v28, %v10285_v16 }
 0x1e1   : > { %v9074_v40 = vpack.c.bf16 %v2364_v30, %v2363_v63 }
 0x1e2   : > { %8431 = vmatmul.mubr.msk.f32.gmra.mrb[12].mxu0 %vm916_vm9, %v8423_v29  ;;  %v10293_v29 = vpop.permute.xlu0 %10292 }
 0x1e3   : > { %1741 = vmatprep.mubr.f32.mxu0 %v10975_v55  ;;  %v10295_v62 = vunpack.i.h.bf16 %v10293_v29  ;;  %v10294_v18 = vunpack.i.l.bf16 %v10293_v29 }
 0x1e5   : > { %v2365_v35 = vsel %vm2362_vm0, %v10294_v18, %v10295_v62 }
 0x1e6   : > { %8432 = vmatmul.mubr.msk.f32.gmra.mrb[14].mxu0 %vm916_vm9, %v8424_v39  ;;  %v8465_v39 = vld [vmem:[%s14581_s29 + $0x1c0] sm:$0xff]  ;;  %v9078_v41 = vpack.c.bf16 %v2366_v34, %v2365_v35  ;;  %v2539_v57 = vpop.permute.xlu0 %2538 }
 0x1e7   : > { %1890 = vmatprep.mubr.f32.mxu0 %v10975_v55 }
 0x1ea   : > { %8441 = vmatmul.mubr.msk.f32.vlgmr.msra.gmra.mrb[0].mxu0 %vm916_vm9, %v8433_v32  ;;  %v9076_v32 = vpack.c.bf16 %v10300_v31, %v10295_v62  ;;  %v2549_v13 = vpop.permute.xlu0 %2548  ;;  %v2554_v31 = vpop.permute.xlu1 %2553 }
 0x1eb   : > { %9059 = vmatpush1.bf16.msra.mxu0 %v9058_v37  ;;  %1896 = vmatprep.mubr.f32.mxu0 %v10975_v55  ;;  %v8468_v37 = vld [vmem:[%s14581_s29 + $0x1d8] sm:$0xff] }
 0x1ec   : > { %9061 = vmatprep.subr.bf16.mxu0 %v9060_v44  ;;  %v8471_v44 = vld [vmem:[%s14581_s29 + $0x1f0] sm:$0xff] }
 0x1ee   : > { %8442 = vmatmul.mubr.msk.f32.gmra.mrb[2].mxu0 %vm916_vm9, %v8434_v45  ;;  %v8472_v45 = vld [vmem:[%s14581_s29 + $0x1f8] sm:$0xff] }
 0x1ef   : > { %9063 = vmatpush1.bf16.msra.mxu0 %v9062_v48  ;;  %1902 = vmatprep.mubr.f32.mxu0 %v10975_v55  ;;  %v8483_v48 = vld [vmem:[%s14581_s29 + $0x210] sm:$0xff] }
 0x1f0   : > { %9065 = vmatprep.subr.bf16.mxu0 %v9064_v49  ;;  %v8484_v49 = vld [vmem:[%s14581_s29 + $0x218] sm:$0xff] }
 0x1f2   : > { %8443 = vmatmul.mubr.msk.f32.gmra.mrb[4].mxu0 %vm916_vm9, %v8435_v50  ;;  %v8485_v50 = vld [vmem:[%s14581_s29 + $0x220] sm:$0xff] }
 0x1f3   : > { %1908 = vmatprep.mubr.f32.mxu0 %v10975_v55 }
 0x1f6   : > { %8444 = vmatmul.mubr.msk.f32.gmra.mrb[6].mxu0 %vm916_vm9, %v8436_v51  ;;  %v8486_v51 = vld [vmem:[%s14581_s29 + $0x228] sm:$0xff] }
 0x1f7   : > { %1914 = vmatprep.mubr.f32.mxu0 %v10975_v55 }
 0x1fa   : > { %8445 = vmatmul.mubr.msk.f32.gmra.mrb[8].mxu0 %vm916_vm9, %v8437_v52  ;;  %v8487_v52 = vld [vmem:[%s14581_s29 + $0x230] sm:$0xff] }
 0x1fb   : > { %1920 = vmatprep.mubr.f32.mxu0 %v10975_v55 }
 0x1fe   : > { %8446 = vmatmul.mubr.msk.f32.gmra.mrb[10].mxu0 %vm916_vm9, %v8438_v53  ;;  %v8488_v53 = vld [vmem:[%s14581_s29 + $0x238] sm:$0xff] }
 0x1ff   : > { %1926 = vmatprep.mubr.f32.mxu0 %v10975_v55 }
 0x202   : > { %8447 = vmatmul.mubr.msk.f32.gmra.mrb[12].mxu0 %vm916_vm9, %v8439_v54  ;;  %v2592_v54 = vld [vmem:[%s14582_s26] sm:$0x3]  ;;  %s14588_s26 = smov 91  }
 0x203   : > { %1932 = vmatprep.mubr.f32.mxu0 %v10975_v55  ;;  %v11695_v56 = vrot.slane %v2592_v54, %v11173_v15 }
 0x206   : > { %8448 = vmatmul.mubr.msk.f32.gmra.mrb[14].mxu0 %vm916_vm9, %v8440_v59  ;;  %v11698_v59 = vrot.slane %v2592_v54, %v11177_v19 }
 0x207   : > { %2081 = vmatprep.mubr.f32.mxu0 %v10975_v55 }
 0x20a   : > { %8457 = vmatmul.mubr.msk.f32.vlgmr.msra.gmra.mrb[0].mxu0 %vm916_vm9, %v8449_v3 }
 0x20b   : > { %9067 = vmatpush1.bf16.msra.mxu0 %v9066_v8  ;;  %2087 = vmatprep.mubr.f32.mxu0 %v10975_v55 }
 0x20c   : > { %9069 = vmatprep.subr.bf16.mxu0 %v9068_v11 }
 0x20e   : > { %8458 = vmatmul.mubr.msk.f32.gmra.mrb[2].mxu0 %vm916_vm9, %v8450_v12 }
 0x20f   : > { %9071 = vmatpush1.bf16.msra.mxu0 %v9070_v17  ;;  %2093 = vmatprep.mubr.f32.mxu0 %v10975_v55 }
 0x210   : > { %9073 = vmatprep.subr.bf16.mxu0 %v9072_v20 }
 0x212   : > { %8459 = vmatmul.mubr.msk.f32.gmra.mrb[4].mxu0 %vm916_vm9, %v8451_v21 }
 0x213   : > { %2099 = vmatprep.mubr.f32.mxu0 %v10975_v55 }
 0x216   : > { %8460 = vmatmul.mubr.msk.f32.gmra.mrb[6].mxu0 %vm916_vm9, %v8452_v14 }
 0x217   : > { %2105 = vmatprep.mubr.f32.mxu0 %v10975_v55 }
 0x21a   : > { %8461 = vmatmul.mubr.msk.f32.gmra.mrb[8].mxu0 %vm916_vm9, %v8453_v22 }
 0x21b   : > { %2111 = vmatprep.mubr.f32.mxu0 %v10975_v55 }
 0x21e   : > { %8462 = vmatmul.mubr.msk.f32.gmra.mrb[10].mxu0 %vm916_vm9, %v8454_v23 }
 0x21f   : > { %2117 = vmatprep.mubr.f32.mxu0 %v10975_v55 }
 0x222   : > { %8463 = vmatmul.mubr.msk.f32.gmra.mrb[12].mxu0 %vm916_vm9, %v8455_v24 }
 0x223   : > { %2123 = vmatprep.mubr.f32.mxu0 %v10975_v55 }
 0x226   : > { %8464 = vmatmul.mubr.msk.f32.gmra.mrb[14].mxu0 %vm916_vm9, %v8456_v27 }
 0x227   : > { %2272 = vmatprep.mubr.f32.mxu0 %v10975_v55 }
 0x22a   : > { %8473 = vmatmul.mubr.msk.f32.vlgmr.msra.gmra.mrb[0].mxu0 %vm916_vm9, %v8465_v39 }
 0x22b   : > { %9075 = vmatpush1.bf16.msra.mxu0 %v9074_v40  ;;  %2278 = vmatprep.mubr.f32.mxu0 %v10975_v55 }
 0x22c   : > { %9077 = vmatprep.subr.bf16.mxu0 %v9076_v32 }
 0x22e   : > { %8474 = vmatmul.mubr.msk.f32.gmra.mrb[2].mxu0 %vm916_vm9, %v8466_v33 }
 0x22f   : > { %9079 = vmatpush1.bf16.msra.mxu0 %v9078_v41  ;;  %2284 = vmatprep.mubr.f32.mxu0 %v10975_v55 }
 0x232   : > { %8475 = vmatmul.mubr.msk.f32.gmra.mrb[4].mxu0 %vm916_vm9, %v8467_v36 }
 0x233   : > { %2290 = vmatprep.mubr.f32.mxu0 %v10975_v55 }
 0x236   : > { %8476 = vmatmul.mubr.msk.f32.gmra.mrb[6].mxu0 %vm916_vm9, %v8468_v37 }
 0x237   : > { %2296 = vmatprep.mubr.f32.mxu0 %v10975_v55 }
 0x23a   : > { %8477 = vmatmul.mubr.msk.f32.gmra.mrb[8].mxu0 %vm916_vm9, %v8469_v42 }
 0x23b   : > { %2302 = vmatprep.mubr.f32.mxu0 %v10975_v55 }
 0x23e   : > { %8478 = vmatmul.mubr.msk.f32.gmra.mrb[10].mxu0 %vm916_vm9, %v8470_v43  ;;  %v2559_v43 = vpop.permute.xlu0 %2558 }
 0x23f   : > { %2308 = vmatprep.mubr.f32.mxu0 %v10975_v55 }
 0x242   : > { %8479 = vmatmul.mubr.msk.f32.gmra.mrb[12].mxu0 %vm916_vm9, %v8471_v44 }
 0x243   : > { %2314 = vmatprep.mubr.f32.mxu0 %v10975_v55 }
 0x246   : > { %8480 = vmatmul.mubr.msk.f32.gmra.mrb[14].mxu0 %vm916_vm9, %v8472_v45 }
 0x247   : > { %2463 = vmatprep.mubr.f32.mxu0 %v10975_v55 }
 0x24a   : > { %8489 = vmatmul.mubr.msk.f32.vlgmr.msra.gmra.mrb[0].mxu0 %vm916_vm9, %v8481_v46 }
 0x24b   : > { %2469 = vmatprep.mubr.f32.mxu0 %v10975_v55 }
 0x24e   : > { %8490 = vmatmul.mubr.msk.f32.gmra.mrb[2].mxu0 %vm916_vm9, %v8482_v47 }
 0x24f   : > { %2475 = vmatprep.mubr.f32.mxu0 %v10975_v55 }
 0x252   : > { %8491 = vmatmul.mubr.msk.f32.gmra.mrb[4].mxu0 %vm916_vm9, %v8483_v48 }
 0x253   : > { %2481 = vmatprep.mubr.f32.mxu0 %v10975_v55 }
 0x256   : > { %8492 = vmatmul.mubr.msk.f32.gmra.mrb[6].mxu0 %vm916_vm9, %v8484_v49 }
 0x257   : > { %2487 = vmatprep.mubr.f32.mxu0 %v10975_v55 }
 0x25a   : > { %8493 = vmatmul.mubr.msk.f32.gmra.mrb[8].mxu0 %vm916_vm9, %v8485_v50 }
 0x25b   : > { %2493 = vmatprep.mubr.f32.mxu0 %v10975_v55 }
 0x25e   : > { %8494 = vmatmul.mubr.msk.f32.gmra.mrb[10].mxu0 %vm916_vm9, %v8486_v51 }
 0x25f   : > { %2499 = vmatprep.mubr.f32.mxu0 %v10975_v55 }
 0x262   : > { %8495 = vmatmul.mubr.msk.f32.gmra.mrb[12].mxu0 %vm916_vm9, %v8487_v52 }
 0x263   : > { %2505 = vmatprep.mubr.f32.mxu0 %v10975_v55 }
 0x266   : > { %8496 = vmatmul.mubr.msk.f32.gmra.mrb[14].mxu0 %vm916_vm9, %v8488_v53 }
 0x267   : > { %3031 = vmatprep.mubr.f32.mxu0 %v10975_v55 }
 0x31d   : > { %v2465_v58 = vpop.f32.mrb[0].mxu0 }
 0x31e   : > { %v11700_v60 = vadd.f32 %v2539_v57, %v2465_v58  ;;  %v2467_v61 = vpop.f32.mrb[1].mxu0 }
 0x31f   : > { %v11702_v0 = vadd.f32 %v2539_v57, %v2467_v61 }
 0x320   : > { %v2661_v5 = vmul.f32 %v11700_v60, %v11700_v60  ;;  %v2604_v8 = vmul.f32 %v11698_v59, %v11700_v60 }
 0x321   : > { %v2662_v2 = vmul.f32 %v11702_v0, %v11702_v0  ;;  %v2471_v3 = vpop.f32.mrb[2].mxu0  ;;  %v2605_v4 = vmul.f32 %v11695_v56, %v11702_v0 }
 0x322   : > { %v11710_v6 = vadd.f32 %v2544_v1, %v2471_v3  ;;  %v2473_v7 = vpop.f32.mrb[3].mxu0  ;;  %v2677_v24 = vmul.f32 %v2661_v5, %v11698_v59 }
 0x323   : > { %v11714_v9 = vadd.f32 %v2544_v1, %v2473_v7  ;;  %v2621_v10 = vsel %vm2620_vm1, %v2605_v4, 0.0  ;;  %v2678_v11 = vmul.f32 %v2662_v2, %v11695_v56  ;;  %v2564_v1 = vpop.permute.xlu1 %2563 }
 0x324   : > { %v2622_v12 = vadd.f32 %v2621_v10, %v2604_v8  ;;  %v2663_v16 = vmul.f32 %v11710_v6, %v11710_v6  ;;  %v2606_v25 = vmul.f32 %v11698_v59, %v11710_v6 }
 0x325   : > { %v2664_v17 = vmul.f32 %v11714_v9, %v11714_v9  ;;  %v2477_v20 = vpop.f32.mrb[4].mxu0  ;;  %v2693_v21 = vsel %vm2620_vm1, %v2678_v11, 0.0  ;;  %v2607_v14 = vmul.f32 %v11695_v56, %v11714_v9 }
 0x326   : > { %v11725_v22 = vadd.f32 %v2549_v13, %v2477_v20  ;;  %2623 = vadd.xlane.f32.xlu0 %v2622_v12  ;;  %v2479_v23 = vpop.f32.mrb[5].mxu0  ;;  %v2694_v29 = vadd.f32 %v2693_v21, %v2677_v24  ;;  %v2679_v63 = vmul.f32 %v2663_v16, %v11698_v59 }
 0x327   : > { %v11730_v26 = vadd.f32 %v2549_v13, %v2479_v23  ;;  %v2625_v27 = vsel %vm2620_vm1, %v2607_v14, 0.0  ;;  %v2680_v28 = vmul.f32 %v2664_v17, %v11695_v56  ;;  %v2569_v14 = vpop.permute.xlu0 %2568 }
 0x328   : > { %v2626_v30 = vadd.f32 %v2625_v27, %v2606_v25  ;;  %v2665_v40 = vmul.f32 %v11725_v22, %v11725_v22  ;;  %v2608_v33 = vmul.f32 %v11698_v59, %v11725_v22 }
 0x329   : > { %v2666_v38 = vmul.f32 %v11730_v26, %v11730_v26  ;;  %v2483_v39 = vpop.f32.mrb[6].mxu0  ;;  %v2697_v62 = vsel %vm2620_vm1, %v2680_v28, 0.0  ;;  %v2609_v18 = vmul.f32 %v11695_v56, %v11730_v26 }
 0x32a   : > { %v11742_v34 = vadd.f32 %v2554_v31, %v2483_v39  ;;  %2695 = vadd.xlane.f32.xlu0 %v2694_v29  ;;  %2627 = vadd.xlane.f32.xlu1 %v2626_v30  ;;  %v2485_v32 = vpop.f32.mrb[7].mxu0  ;;  %v2698_v37 = vadd.f32 %v2697_v62, %v2679_v63  ;;  %v2681_v51 = vmul.f32 %v2665_v40, %v11698_v59 }
 0x32b   : > { %v11746_v35 = vadd.f32 %v2554_v31, %v2485_v32  ;;  %v2629_v41 = vsel %vm2620_vm1, %v2609_v18, 0.0  ;;  %v2682_v36 = vmul.f32 %v2666_v38, %v11695_v56  ;;  %v2574_v32 = vpop.permute.xlu1 %2573 }
 0x32c   : > { %v2630_v42 = vadd.f32 %v2629_v41, %v2608_v33  ;;  %v2667_v44 = vmul.f32 %v11742_v34, %v11742_v34  ;;  %v2610_v52 = vmul.f32 %v11698_v59, %v11742_v34 }
 0x32d   : > { %v2668_v45 = vmul.f32 %v11746_v35, %v11746_v35  ;;  %v2489_v46 = vpop.f32.mrb[8].mxu0  ;;  %v2701_v47 = vsel %vm2620_vm1, %v2682_v36, 0.0  ;;  %v2611_v48 = vmul.f32 %v11695_v56, %v11746_v35 }
 0x32e   : > { %v11757_v49 = vadd.f32 %v2559_v43, %v2489_v46  ;;  %2699 = vadd.xlane.f32.xlu0 %v2698_v37  ;;  %2631 = vadd.xlane.f32.xlu1 %v2630_v42  ;;  %v2491_v50 = vpop.f32.mrb[9].mxu0  ;;  %v2702_v58 = vadd.f32 %v2701_v47, %v2681_v51  ;;  %v2683_v4 = vmul.f32 %v2667_v44, %v11698_v59 }
 0x32f   : > { %v11762_v53 = vadd.f32 %v2559_v43, %v2491_v50  ;;  %v2633_v54 = vsel %vm2620_vm1, %v2611_v48, 0.0  ;;  %v2684_v57 = vmul.f32 %v2668_v45, %v11695_v56 }
 0x330   : > { %v2634_v61 = vadd.f32 %v2633_v54, %v2610_v52  ;;  %v2669_v8 = vmul.f32 %v11757_v49, %v11757_v49  ;;  %v2612_v12 = vmul.f32 %v11698_v59, %v11757_v49 }
 0x331   : > { %v2670_v2 = vmul.f32 %v11762_v53, %v11762_v53  ;;  %v2495_v3 = vpop.f32.mrb[10].mxu0  ;;  %v2705_v5 = vsel %vm2620_vm1, %v2684_v57, 0.0  ;;  %v2613_v7 = vmul.f32 %v11695_v56, %v11762_v53 }
 0x332   : > { %v11774_v10 = vadd.f32 %v2564_v1, %v2495_v3  ;;  %2703 = vadd.xlane.f32.xlu1 %v2702_v58  ;;  %2635 = vadd.xlane.f32.xlu0 %v2634_v61  ;;  %v2497_v11 = vpop.f32.mrb[11].mxu0  ;;  %v2706_v20 = vadd.f32 %v2705_v5, %v2683_v4  ;;  %v2685_v31 = vmul.f32 %v2669_v8, %v11698_v59 }
 0x333   : > { %v11778_v13 = vadd.f32 %v2564_v1, %v2497_v11  ;;  %v2637_v16 = vsel %vm2620_vm1, %v2613_v7, 0.0  ;;  %v2686_v17 = vmul.f32 %v2670_v2, %v11695_v56 }
 0x334   : > { %v2638_v21 = vadd.f32 %v2637_v16, %v2612_v12  ;;  %v2671_v23 = vmul.f32 %v11774_v10, %v11774_v10  ;;  %v2614_v38 = vmul.f32 %v11698_v59, %v11774_v10 }
 0x335   : > { %v2672_v24 = vmul.f32 %v11778_v13, %v11778_v13  ;;  %v2501_v25 = vpop.f32.mrb[12].mxu0  ;;  %v2709_v27 = vsel %vm2620_vm1, %v2686_v17, 0.0  ;;  %v2615_v28 = vmul.f32 %v11695_v56, %v11778_v13 }
 0x336   : > { %v11789_v29 = vadd.f32 %v2569_v14, %v2501_v25  ;;  %2707 = vadd.xlane.f32.xlu0 %v2706_v20  ;;  %2639 = vadd.xlane.f32.xlu1 %v2638_v21  ;;  %v2503_v30 = vpop.f32.mrb[13].mxu0  ;;  %v2710_v18 = vadd.f32 %v2709_v27, %v2685_v31  ;;  %v2687_v36 = vmul.f32 %v2671_v23, %v11698_v59 }
 0x337   : > { %v11794_v39 = vadd.f32 %v2569_v14, %v2503_v30  ;;  %v2641_v63 = vsel %vm2620_vm1, %v2615_v28, 0.0  ;;  %v2688_v62 = vmul.f32 %v2672_v24, %v11695_v56 }
 0x338   : > { %v2642_v40 = vadd.f32 %v2641_v63, %v2614_v38  ;;  %v2673_v43 = vmul.f32 %v11789_v29, %v11789_v29  ;;  %v2616_v46 = vmul.f32 %v11698_v59, %v11789_v29 }
 0x339   : > { %v2674_v33 = vmul.f32 %v11794_v39, %v11794_v39  ;;  %v2507_v41 = vpop.f32.mrb[14].mxu0  ;;  %v2713_v37 = vsel %vm2620_vm1, %v2688_v62, 0.0  ;;  %v2617_v42 = vmul.f32 %v11695_v56, %v11794_v39 }
 0x33a   : > { %v11806_v44 = vadd.f32 %v2574_v32, %v2507_v41  ;;  %2711 = vadd.xlane.f32.xlu1 %v2710_v18  ;;  %2643 = vadd.xlane.f32.xlu0 %v2642_v40  ;;  %v2509_v45 = vpop.f32.mrb[15].mxu0  ;;  %v2714_v51 = vadd.f32 %v2713_v37, %v2687_v36  ;;  %v2689_v1 = vmul.f32 %v2673_v43, %v11698_v59 }
 0x33b   : > { %v11810_v47 = vadd.f32 %v2574_v32, %v2509_v45  ;;  %v2645_v48 = vsel %vm2620_vm1, %v2617_v42, 0.0  ;;  %v2690_v50 = vmul.f32 %v2674_v33, %v11695_v56 }
 0x33c   : > { %v2646_v52 = vadd.f32 %v2645_v48, %v2616_v46  ;;  %v2675_v61 = vmul.f32 %v11806_v44, %v11806_v44  ;;  %v2618_v2 = vmul.f32 %v11698_v59, %v11806_v44 }
 0x33d   : > { %v2676_v54 = vmul.f32 %v11810_v47, %v11810_v47  ;;  %v2717_v57 = vsel %vm2620_vm1, %v2690_v50, 0.0  ;;  %v2619_v58 = vmul.f32 %v11695_v56, %v11810_v47 }
 0x33e   : > { %2715 = vadd.xlane.f32.xlu0 %v2714_v51  ;;  %2647 = vadd.xlane.f32.xlu1 %v2646_v52  ;;  %v2718_v5 = vadd.f32 %v2717_v57, %v2689_v1  ;;  %v2691_v11 = vmul.f32 %v2675_v61, %v11698_v59 }
 0x33f   : > { %v2649_v3 = vsel %vm2620_vm1, %v2619_v58, 0.0  ;;  %v2692_v4 = vmul.f32 %v2676_v54, %v11695_v56 }
 0x340   : > { %v2650_v7 = vadd.f32 %v2649_v3, %v2618_v2 }
 0x341   : > { %v2721_v8 = vsel %vm2620_vm1, %v2692_v4, 0.0 }
 0x342   : > { %2719 = vadd.xlane.f32.xlu1 %v2718_v5  ;;  %2651 = vadd.xlane.f32.xlu0 %v2650_v7  ;;  %v2722_v12 = vadd.f32 %v2721_v8, %v2691_v11 }
 0x346   : > { %2723 = vadd.xlane.f32.xlu0 %v2722_v12 }
 0x3b3   : > { %v2624_v16 = vpop.xlane.xlu0 %2623 }
 0x3b4   : > { %v2653_v17 = vmul.f32 0.0056818184, %v2624_v16 }
 0x3b6   : > { %v2733_v14 = vmul.f32 %v2653_v17, %v2653_v17  ;;  %v2757_v3 = vsub.f32 %v11700_v60, %v2653_v17  ;;  %v2758_v4 = vsub.f32 %v11702_v0, %v2653_v17 }
 0x3b7   : > { %v2696_v20 = vpop.xlane.xlu0 %2695  ;;  %v2628_v21 = vpop.xlane.xlu1 %2627 }
 0x3b8   : > { %v2725_v23 = vmul.f32 0.0056818184, %v2696_v20  ;;  %v11828_v24 = vmul.f32 0.0056818184, %v2628_v21 }
 0x3ba   : > { %v2741_v25 = vsub.f32 %v2725_v23, %v2733_v14  ;;  %v2734_v31 = vmul.f32 %v11828_v24, %v11828_v24  ;;  %v2759_v5 = vsub.f32 %v11710_v6, %v11828_v24  ;;  %v2760_v8 = vsub.f32 %v11714_v9, %v11828_v24 }
 0x3bb   : > { %v2700_v56 = vpop.xlane.xlu0 %2699  ;;  %v2632_v27 = vpop.xlane.xlu1 %2631 }
 0x3bc   : > { %v2749_v28 = vmax.f32 %v2741_v25, 0.0  ;;  %v2726_v30 = vmul.f32 0.0056818184, %v2700_v56  ;;  %v11832_v38 = vmul.f32 0.0056818184, %v2632_v27 }
 0x3be   : > { %v2773_v59 = vadd.f32 1e-05, %v2749_v28  ;;  %v2742_v63 = vsub.f32 %v2726_v30, %v2734_v31  ;;  %v2735_v62 = vmul.f32 %v11832_v38, %v11832_v38  ;;  %v2761_v11 = vsub.f32 %v11725_v22, %v11832_v38 }
 0x3bf   : > { %v2704_v18 = vpop.xlane.xlu1 %2703  ;;  %v2636_v40 = vpop.xlane.xlu0 %2635  ;;  %v2762_v14 = vsub.f32 %v11730_v26, %v11832_v38 }
 0x3c0   : > { %10861 = vrsqrt.f32 %v2773_v59  ;;  %v2750_v32 = vmax.f32 %v2742_v63, 0.0  ;;  %v2727_v33 = vmul.f32 0.0056818184, %v2704_v18  ;;  %v11836_v41 = vmul.f32 0.0056818184, %v2636_v40 }
 0x3c2   : > { %v2774_v36 = vadd.f32 1e-05, %v2750_v32  ;;  %v2743_v37 = vsub.f32 %v2727_v33, %v2735_v62  ;;  %v2736_v42 = vmul.f32 %v11836_v41, %v11836_v41  ;;  %v2763_v56 = vsub.f32 %v11742_v34, %v11836_v41 }
 0x3c3   : > { %v2708_v43 = vpop.xlane.xlu0 %2707  ;;  %v2640_v45 = vpop.xlane.xlu1 %2639  ;;  %v2764_v26 = vsub.f32 %v11746_v35, %v11836_v41 }
 0x3c4   : > { %10863 = vrsqrt.f32 %v2774_v36  ;;  %v2751_v46 = vmax.f32 %v2743_v37, 0.0  ;;  %v2728_v48 = vmul.f32 0.0056818184, %v2708_v43  ;;  %v11840_v50 = vmul.f32 0.0056818184, %v2640_v45 }
 0x3c6   : > { %v2775_v51 = vadd.f32 1e-05, %v2751_v46  ;;  %v2744_v52 = vsub.f32 %v2728_v48, %v2736_v42  ;;  %v2737_v54 = vmul.f32 %v11840_v50, %v11840_v50  ;;  %v2765_v46 = vsub.f32 %v11757_v49, %v11840_v50 }
 0x3c7   : > { %v2712_v57 = vpop.xlane.xlu1 %2711  ;;  %v2644_v58 = vpop.xlane.xlu0 %2643 }
 0x3c8   : > { %10865 = vrsqrt.f32 %v2775_v51  ;;  %v2752_v61 = vmax.f32 %v2744_v52, 0.0  ;;  %v2729_v1 = vmul.f32 0.0056818184, %v2712_v57  ;;  %v11844_v2 = vmul.f32 0.0056818184, %v2644_v58 }
 0x3ca   : > { %v10862_v7 = vpop.eup %10861  ;;  %v2776_v12 = vadd.f32 1e-05, %v2752_v61  ;;  %v2745_v16 = vsub.f32 %v2729_v1, %v2737_v54  ;;  %v2738_v60 = vmul.f32 %v11844_v2, %v11844_v2  ;;  %v2766_v54 = vsub.f32 %v11762_v53, %v11840_v50 }
 0x3cb   : > { %v2789_v20 = vmul.f32 %v10862_v7, %v2757_v3  ;;  %v2790_v21 = vmul.f32 %v10862_v7, %v2758_v4  ;;  %v2716_v0 = vpop.xlane.xlu0 %2715  ;;  %v2648_v17 = vpop.xlane.xlu1 %2647 }
 0x3cc   : > { %10867 = vrsqrt.f32 %v2776_v12  ;;  %v2753_v6 = vmax.f32 %v2745_v16, 0.0  ;;  %v2730_v23 = vmul.f32 0.0056818184, %v2716_v0  ;;  %v11858_v25 = vmul.f32 0.0056818184, %v2648_v17 }
 0x3cd   : > { %vm2805_vm2 = vcmp.ge.f32.partialorder %v2789_v20, 0.0  ;;  %vm2806_vm3 = vcmp.ge.f32.partialorder %v2790_v21, 0.0  ;;  %v2821_v9 = vmul.f32 0.01, %v2789_v20  ;;  %v2822_v22 = vmul.f32 0.01, %v2790_v21 }
 0x3ce   : > { %v10864_v24 = vpop.eup %10863  ;;  %v2777_v27 = vadd.f32 1e-05, %v2753_v6  ;;  %v2746_v28 = vsub.f32 %v2730_v23, %v2738_v60  ;;  %v2739_v40 = vmul.f32 %v11858_v25, %v11858_v25  ;;  %v2767_v60 = vsub.f32 %v11774_v10, %v11844_v2 }
 0x3cf   : > { %v2837_v30 = vsel %vm2805_vm2, %v2789_v20, %v2821_v9  ;;  %v2838_v31 = vsel %vm2806_vm3, %v2790_v21, %v2822_v22  ;;  %v2791_v38 = vmul.f32 %v10864_v24, %v2759_v5  ;;  %v2792_v59 = vmul.f32 %v10864_v24, %v2760_v8  ;;  %v2720_v63 = vpop.xlane.xlu1 %2719  ;;  %v2652_v62 = vpop.xlane.xlu0 %2651 }
 0x3d0   : > { %10869 = vrsqrt.f32 %v2777_v27  ;;  %v2754_v18 = vmax.f32 %v2746_v28, 0.0  ;;  %v2731_v32 = vmul.f32 0.0056818184, %v2720_v63  ;;  %v11866_v37 = vmul.f32 0.0056818184, %v2652_v62 }
 0x3d1   : > { %vm2807_vm4 = vcmp.ge.f32.partialorder %v2791_v38, 0.0  ;;  %vm2808_vm5 = vcmp.ge.f32.partialorder %v2792_v59, 0.0  ;;  %v2823_v34 = vmul.f32 0.01, %v2791_v38  ;;  %v2824_v33 = vmul.f32 0.01, %v2792_v59 }
 0x3d2   : > { %v10866_v36 = vpop.eup %10865  ;;  %v2778_v35 = vadd.f32 1e-05, %v2754_v18  ;;  %v2747_v41 = vsub.f32 %v2731_v32, %v2739_v40  ;;  %v11868_v42 = vpack.i.bf16 %v2838_v31, %v2837_v30  ;;  %v2740_v49 = vmul.f32 %v11866_v37, %v11866_v37 }
 0x3d3   : > { %v2793_v43 = vmul.f32 %v10866_v36, %v2761_v11  ;;  %v2794_v45 = vmul.f32 %v10866_v36, %v2762_v14  ;;  %v2724_v48 = vpop.xlane.xlu0 %2723  ;;  %v2840_v51 = vsel %vm2808_vm5, %v2792_v59, %v2824_v33  ;;  %v2839_v52 = vsel %vm2807_vm4, %v2791_v38, %v2823_v34 }
 0x3d4   : > { %10871 = vrsqrt.f32 %v2778_v35  ;;  %v2755_v57 = vmax.f32 %v2747_v41, 0.0  ;;  %10302 = vrot.lane.b32.xlu1 %v11868_v42, %s14583_s2  ;;  %v2732_v4 = vmul.f32 0.0056818184, %v2724_v48  ;;  %v9096_v5 = vpack.c.bf16 %v2840_v51, %v2838_v31 }
 0x3d5   : > { %vm2809_vm6 = vcmp.ge.f32.partialorder %v2793_v43, 0.0  ;;  %vm2810_vm7 = vcmp.ge.f32.partialorder %v2794_v45, 0.0  ;;  %v2825_v58 = vmul.f32 0.01, %v2793_v43  ;;  %v2826_v61 = vmul.f32 0.01, %v2794_v45 }
 0x3d6   : > { %v10868_v1 = vpop.eup %10867  ;;  %v2779_v3 = vadd.f32 1e-05, %v2755_v57  ;;  %v2748_v50 = vsub.f32 %v2732_v4, %v2740_v49  ;;  %9097 = vmatprep.subr.bf16.mxu1 %v9096_v5  ;;  %v11878_v12 = vpack.i.bf16 %v2840_v51, %v2839_v52  ;;  %v9098_v16 = vpack.c.bf16 %v2839_v52, %v2837_v30  ;;  %v2853_v5 = vld [vmem:[%s14518_s6] sm:$0xff] }
 0x3d7   : > { %v2841_v7 = vsel %vm2809_vm6, %v2793_v43, %v2825_v58  ;;  %v2842_v8 = vsel %vm2810_vm7, %v2794_v45, %v2826_v61  ;;  %v2795_v11 = vmul.f32 %v10868_v1, %v2763_v56  ;;  %v2796_v53 = vmul.f32 %v10868_v1, %v2764_v26 }
 0x3d8   : > { %10873 = vrsqrt.f32 %v2779_v3  ;;  %v2768_v0 = vsub.f32 %v11778_v13, %v11844_v2  ;;  %v2756_v17 = vmax.f32 %v2748_v50, 0.0  ;;  %10307 = vrot.lane.b32.xlu0 %v11878_v12, %s14583_s2  ;;  %9099 = vmatpush1.bf16.msra.mxu1 %v9098_v16  ;;  %v11886_v6 = vpack.i.bf16 %v2842_v8, %v2841_v7  ;;  %v2858_v50 = vld [vmem:[%s14518_s6 + $0x28] sm:$0xff]  ;;  %v2859_v16 = vld [vmem:[%s14518_s6 + $0x30] sm:$0xff] }
 0x3d9   : > { %vm2811_vm1 = vcmp.ge.f32.partialorder %v2795_v11, 0.0  ;;  %vm2812_vm2 = vcmp.ge.f32.partialorder %v2796_v53, 0.0  ;;  %v2827_v20 = vmul.f32 0.01, %v2795_v11  ;;  %v2828_v21 = vmul.f32 0.01, %v2796_v53 }
 0x3da   : > { %v10870_v14 = vpop.eup %10869  ;;  %v2780_v56 = vadd.f32 1e-05, %v2756_v17  ;;  %10312 = vrot.lane.b32.xlu1 %v11886_v6, %s14583_s2  ;;  %v2769_v63 = vsub.f32 %v11789_v29, %v11858_v25  ;;  %v2770_v62 = vsub.f32 %v11794_v39, %v11858_v25  ;;  %v2771_v51 = vsub.f32 %v11806_v44, %v11866_v37 }
 0x3db   : > { %v2843_v23 = vsel %vm2811_vm1, %v2795_v11, %v2827_v20  ;;  %v2844_v9 = vsel %vm2812_vm2, %v2796_v53, %v2828_v21  ;;  %v2797_v22 = vmul.f32 %v10870_v14, %v2765_v46  ;;  %v2798_v24 = vmul.f32 %v10870_v14, %v2766_v54  ;;  %v2856_v11 = vld [vmem:[%s14518_s6 + $0x18] sm:$0xff]  ;;  %v2857_v53 = vld [vmem:[%s14518_s6 + $0x20] sm:$0xff] }
 0x3dc   : > { %v9100_v26 = vpack.c.bf16 %v2844_v9, %v2842_v8  ;;  %v11890_v10 = vpack.i.bf16 %v2844_v9, %v2843_v23  ;;  %v9102_v27 = vpack.c.bf16 %v2843_v23, %v2841_v7  ;;  %10875 = vrsqrt.f32 %v2780_v56  ;;  %v2854_v7 = vld [vmem:[%s14518_s6 + $0x8] sm:$0xff]  ;;  %v2855_v8 = vld [vmem:[%s14518_s6 + $0x10] sm:$0xff]  ;;  %v2860_v20 = vld [vmem:[%s14518_s6 + $0x38] sm:$0xff] }
 0x3dd   : > { %vm2813_vm3 = vcmp.ge.f32.partialorder %v2797_v22, 0.0  ;;  %vm2814_vm4 = vcmp.ge.f32.partialorder %v2798_v24, 0.0  ;;  %v2829_v13 = vmul.f32 0.01, %v2797_v22  ;;  %v2830_v2 = vmul.f32 0.01, %v2798_v24 }
 0x3de   : > { %v10872_v28 = vpop.eup %10871  ;;  %9101 = vmatprep.subr.bf16.mxu1 %v9100_v26  ;;  %10317 = vrot.lane.b32.xlu1 %v11890_v10, %s14583_s2  ;;  %v2772_v52 = vsub.f32 %v11810_v47, %v11866_v37 }
 0x3df   : > { %v2845_v30 = vsel %vm2813_vm3, %v2797_v22, %v2829_v13  ;;  %v2846_v31 = vsel %vm2814_vm4, %v2798_v24, %v2830_v2  ;;  %v2799_v38 = vmul.f32 %v10872_v28, %v2767_v60  ;;  %v2800_v59 = vmul.f32 %v10872_v28, %v2768_v0  ;;  %9103 = vmatpush1.bf16.msra.mxu1 %v9102_v27 }
 0x3e0   : > { %v11898_v18 = vpack.i.bf16 %v2846_v31, %v2845_v30  ;;  %vm2942_vm4 = vcmask 523264  }
 0x3e1   : > { %vm2815_vm5 = vcmp.ge.f32.partialorder %v2799_v38, 0.0  ;;  %vm2816_vm6 = vcmp.ge.f32.partialorder %v2800_v59, 0.0  ;;  %v2831_v40 = vmul.f32 0.01, %v2799_v38  ;;  %v2832_v32 = vmul.f32 0.01, %v2800_v59 }
 0x3e2   : > { %v10874_v34 = vpop.eup %10873  ;;  %10322 = vrot.lane.b32.xlu0 %v11898_v18, %s14583_s2 }
 0x3e3   : > { %v2847_v33 = vsel %vm2815_vm5, %v2799_v38, %v2831_v40  ;;  %v2848_v36 = vsel %vm2816_vm6, %v2800_v59, %v2832_v32  ;;  %v2801_v35 = vmul.f32 %v10874_v34, %v2769_v63  ;;  %v2802_v29 = vmul.f32 %v10874_v34, %v2770_v62 }
 0x3e4   : > { %v9104_v41 = vpack.c.bf16 %v2848_v36, %v2846_v31  ;;  %v11902_v43 = vpack.i.bf16 %v2848_v36, %v2847_v33  ;;  %v9106_v39 = vpack.c.bf16 %v2847_v33, %v2845_v30  ;;  %v4743_v33 = vld [vmem:[%s14519_s7] sm:$0xff] }
 0x3e5   : > { %vm2817_vm7 = vcmp.ge.f32.partialorder %v2801_v35, 0.0  ;;  %vm2818_vm1 = vcmp.ge.f32.partialorder %v2802_v29, 0.0  ;;  %v2833_v25 = vmul.f32 0.01, %v2801_v35  ;;  %v2834_v45 = vmul.f32 0.01, %v2802_v29 }
 0x3e6   : > { %9105 = vmatprep.subr.bf16.mxu1 %v9104_v41  ;;  %10327 = vrot.lane.b32.xlu1 %v11902_v43, %s14583_s2  ;;  %v10876_v54 = vpop.eup %10875 }
 0x3e7   : > { %v2849_v46 = vsel %vm2817_vm7, %v2801_v35, %v2833_v25  ;;  %v2850_v48 = vsel %vm2818_vm1, %v2802_v29, %v2834_v45  ;;  %9107 = vmatpush1.bf16.msra.mxu1 %v9106_v39  ;;  %v2803_v58 = vmul.f32 %v10876_v54, %v2771_v51  ;;  %v2804_v61 = vmul.f32 %v10876_v54, %v2772_v52  ;;  %v4745_v29 = vld [vmem:[%s14519_s7 + $0x10] sm:$0xff]  ;;  %v4744_v25 = vld [vmem:[%s14519_s7 + $0x8] sm:$0xff]  ;;  %v4747_v51 = vld [vmem:[%s14519_s7 + $0x20] sm:$0xff] }
 0x3e8   : > { %v11910_v57 = vpack.i.bf16 %v2850_v48, %v2849_v46 }
 0x3e9   : > { %vm2819_vm2 = vcmp.ge.f32.partialorder %v2803_v58, 0.0  ;;  %vm2820_vm3 = vcmp.ge.f32.partialorder %v2804_v61, 0.0  ;;  %v2835_v1 = vmul.f32 0.01, %v2803_v58  ;;  %v2836_v3 = vmul.f32 0.01, %v2804_v61 }
 0x3ea   : > { %10332 = vrot.lane.b32.xlu0 %v11910_v57, %s14583_s2 }
 0x3eb   : > { %v2851_v49 = vsel %vm2819_vm2, %v2803_v58, %v2835_v1  ;;  %v2852_v4 = vsel %vm2820_vm3, %v2804_v61, %v2836_v3  ;;  %v4746_v3 = vld [vmem:[%s14519_s7 + $0x18] sm:$0xff] }
 0x3ec   : > { %v9108_v44 = vpack.c.bf16 %v2852_v4, %v2850_v48  ;;  %v11916_v47 = vpack.i.bf16 %v2852_v4, %v2851_v49  ;;  %v9110_v37 = vpack.c.bf16 %v2851_v49, %v2849_v46 }
 0x3ee   : > { %10342 = vrot.lane.b32.xlu0 %v11868_v42, %s14584_s4  ;;  %9109 = vmatprep.subr.bf16.mxu1 %v9108_v44 }
 0x3ef   : > { %10337 = vrot.lane.b32.xlu1 %v11916_v47, %s14583_s2  ;;  %9111 = vmatpush1.bf16.msra.mxu1 %v9110_v37  ;;  %v4749_v37 = vld [vmem:[%s14519_s7 + $0x30] sm:$0xff] }
 0x3f2   : > { %10352 = vrot.lane.b32.xlu0 %v11886_v6, %s14584_s4  ;;  %8513 = vmatmul.mubr.msk.f32.vlgmr.msra.gmra.mrb[0].mxu1 %vm2942_vm4, %v2853_v5 }
 0x3f3   : > { %10347 = vrot.lane.b32.xlu1 %v11878_v12, %s14584_s4  ;;  %3174 = vmatprep.mubr.f32.mxu1 %v10975_v55 }
 0x3f6   : > { %10362 = vrot.lane.b32.xlu0 %v11898_v18, %s14584_s4  ;;  %8514 = vmatmul.mubr.msk.f32.gmra.mrb[2].mxu1 %vm2942_vm4, %v2854_v7 }
 0x3f7   : > { %10357 = vrot.lane.b32.xlu1 %v11890_v10, %s14584_s4  ;;  %3180 = vmatprep.mubr.f32.mxu1 %v10975_v55 }
 0x3fa   : > { %10372 = vrot.lane.b32.xlu0 %v11910_v57, %s14584_s4  ;;  %8515 = vmatmul.mubr.msk.f32.gmra.mrb[4].mxu1 %vm2942_vm4, %v2855_v8  ;;  %v8521_v8 = vld [vmem:[%s14518_s6 + $0x80] sm:$0xff] }
 0x3fb   : > { %10367 = vrot.lane.b32.xlu1 %v11902_v43, %s14584_s4  ;;  %3186 = vmatprep.mubr.f32.mxu1 %v10975_v55 }
 0x3fe   : > { %10382 = vrot.lane.b32.xlu0 %v11868_v42, %s14585_s23  ;;  %8516 = vmatmul.mubr.msk.f32.gmra.mrb[6].mxu1 %vm2942_vm4, %v2856_v11 }
 0x3ff   : > { %10377 = vrot.lane.b32.xlu1 %v11916_v47, %s14584_s4  ;;  %3192 = vmatprep.mubr.f32.mxu1 %v10975_v55 }
 0x402   : > { %10392 = vrot.lane.b32.xlu0 %v11886_v6, %s14585_s23  ;;  %8517 = vmatmul.mubr.msk.f32.gmra.mrb[8].mxu1 %vm2942_vm4, %v2857_v53 }
 0x403   : > { %10387 = vrot.lane.b32.xlu1 %v11878_v12, %s14585_s23  ;;  %3198 = vmatprep.mubr.f32.mxu1 %v10975_v55 }
 0x406   : > { %10402 = vrot.lane.b32.xlu0 %v11898_v18, %s14585_s23  ;;  %8518 = vmatmul.mubr.msk.f32.gmra.mrb[10].mxu1 %vm2942_vm4, %v2858_v50 }
 0x407   : > { %10397 = vrot.lane.b32.xlu1 %v11890_v10, %s14585_s23  ;;  %3204 = vmatprep.mubr.f32.mxu1 %v10975_v55 }
 0x40a   : > { %10412 = vrot.lane.b32.xlu0 %v11910_v57, %s14585_s23  ;;  %8519 = vmatmul.mubr.msk.f32.gmra.mrb[12].mxu1 %vm2942_vm4, %v2859_v16 }
 0x40b   : > { %10407 = vrot.lane.b32.xlu1 %v11902_v43, %s14585_s23  ;;  %3210 = vmatprep.mubr.f32.mxu1 %v10975_v55 }
 0x40e   : > { %10422 = vrot.lane.b32.xlu0 %v11868_v42, %s14586_s27  ;;  %8520 = vmatmul.mubr.msk.f32.gmra.mrb[14].mxu1 %vm2942_vm4, %v2860_v20  ;;  %v4748_v20 = vld [vmem:[%s14519_s7 + $0x28] sm:$0xff] }
 0x40f   : > { %10417 = vrot.lane.b32.xlu1 %v11916_v47, %s14585_s23  ;;  %3370 = vmatprep.mubr.f32.mxu1 %v10975_v55 }
 0x412   : > { %10432 = vrot.lane.b32.xlu0 %v11886_v6, %s14586_s27 }
 0x413   : > { %10427 = vrot.lane.b32.xlu1 %v11878_v12, %s14586_s27 }
 0x416   : > { %10442 = vrot.lane.b32.xlu0 %v11898_v18, %s14586_s27 }
 0x417   : > { %10437 = vrot.lane.b32.xlu1 %v11890_v10, %s14586_s27 }
 0x41a   : > { %10452 = vrot.lane.b32.xlu0 %v11910_v57, %s14586_s27 }
 0x41b   : > { %10447 = vrot.lane.b32.xlu1 %v11902_v43, %s14586_s27 }
 0x41e   : > { %10462 = vrot.lane.b32.xlu0 %v11868_v42, %s14587_s0 }
 0x41f   : > { %10457 = vrot.lane.b32.xlu1 %v11916_v47, %s14586_s27 }
 0x422   : > { %10472 = vrot.lane.b32.xlu0 %v11886_v6, %s14587_s0 }
 0x423   : > { %10467 = vrot.lane.b32.xlu1 %v11878_v12, %s14587_s0 }
 0x426   : > { %10482 = vrot.lane.b32.xlu0 %v11898_v18, %s14587_s0 }
 0x427   : > { %10477 = vrot.lane.b32.xlu1 %v11890_v10, %s14587_s0 }
 0x42a   : > { %10492 = vrot.lane.b32.xlu0 %v11910_v57, %s14587_s0 }
 0x42b   : > { %10487 = vrot.lane.b32.xlu1 %v11902_v43, %s14587_s0 }
 0x42e   : > { %10502 = vrot.lane.b32.xlu0 %v11868_v42, %s14588_s26 }
 0x42f   : > { %10497 = vrot.lane.b32.xlu1 %v11916_v47, %s14587_s0 }
 0x432   : > { %10512 = vrot.lane.b32.xlu0 %v11886_v6, %s14588_s26 }
 0x433   : > { %10507 = vrot.lane.b32.xlu1 %v11878_v12, %s14588_s26 }
 0x436   : > { %10522 = vrot.lane.b32.xlu0 %v11898_v18, %s14588_s26 }
 0x437   : > { %10517 = vrot.lane.b32.xlu1 %v11890_v10, %s14588_s26 }
 0x43a   : > { %10532 = vrot.lane.b32.xlu0 %v11910_v57, %s14588_s26 }
 0x43b   : > { %10527 = vrot.lane.b32.xlu1 %v11902_v43, %s14588_s26 }
 0x43e   : > { %10537 = vrot.lane.b32.xlu0 %v11868_v42, %s14589_s24 }
 0x43f   : > { %10542 = vrot.lane.b32.xlu1 %v11916_v47, %s14588_s26 }
 0x442   : > { %10552 = vrot.lane.b32.xlu0 %v11868_v42, %s10982_s28 }
 0x443   : > { %10547 = vrot.lane.b32.xlu1 %v11878_v12, %s14589_s24 }
 0x446   : > { %10562 = vrot.lane.b32.xlu0 %v11886_v6, %s14589_s24  ;;  %v10303_v21 = vpop.permute.xlu1 %10302 }
 0x447   : > { %10557 = vrot.lane.b32.xlu1 %v11878_v12, %s10982_s28  ;;  %v10305_v14 = vunpack.i.h.bf16 %v10303_v21  ;;  %v10304_v60 = vunpack.i.l.bf16 %v10303_v21 }
 0x449   : > { %v3258_v9 = vsel %vm1216_vm10, %v10304_v60, %v10305_v14 }
 0x44a   : > { %10572 = vrot.lane.b32.xlu0 %v11886_v6, %s10982_s28  ;;  %v10308_v0 = vpop.permute.xlu0 %10307 }
 0x44b   : > { %10567 = vrot.lane.b32.xlu1 %v11890_v10, %s14589_s24  ;;  %v10310_v42 = vunpack.i.h.bf16 %v10308_v0  ;;  %v10309_v17 = vunpack.i.l.bf16 %v10308_v0 }
 0x44c   : > { %v10313_v23 = vpop.permute.xlu1 %10312 }
 0x44d   : > { %v3259_v22 = vsel %vm1216_vm10, %v10309_v17, %v10310_v42  ;;  %v9112_v12 = vpack.c.bf16 %v10310_v42, %v10305_v14  ;;  %v10315_v24 = vunpack.i.h.bf16 %v10313_v23  ;;  %v10314_v56 = vunpack.i.l.bf16 %v10313_v23 }
 0x44e   : > { %10582 = vrot.lane.b32.xlu0 %v11898_v18, %s14589_s24  ;;  %v9114_v6 = vpack.c.bf16 %v3259_v22, %v3258_v9  ;;  %v8522_v9 = vld [vmem:[%s14518_s6 + $0x88] sm:$0xff] }
 0x44f   : > { %10577 = vrot.lane.b32.xlu1 %v11890_v10, %s10982_s28  ;;  %9113 = vmatprep.subr.bf16.mxu1 %v9112_v12  ;;  %v3260_v28 = vsel %vm1216_vm10, %v10314_v56, %v10315_v24 }
 0x450   : > { %9115 = vmatpush1.bf16.msra.mxu1 %v9114_v6  ;;  %v10318_v26 = vpop.permute.xlu1 %10317 }
 0x451   : > { %v10320_v27 = vunpack.i.h.bf16 %v10318_v26  ;;  %v10319_v13 = vunpack.i.l.bf16 %v10318_v26 }
 0x452   : > { %10592 = vrot.lane.b32.xlu0 %v11898_v18, %s10982_s28 }
 0x453   : > { %10587 = vrot.lane.b32.xlu1 %v11902_v43, %s14589_s24  ;;  %v3261_v30 = vsel %vm1216_vm10, %v10319_v13, %v10320_v27  ;;  %v9116_v10 = vpack.c.bf16 %v10320_v27, %v10315_v24  ;;  %v4750_v24 = vld [vmem:[%s14519_s7 + $0x38] sm:$0xff] }
 0x454   : > { %v10323_v2 = vpop.permute.xlu0 %10322  ;;  %v9118_v31 = vpack.c.bf16 %v3261_v30, %v3260_v28  ;;  %v8523_v30 = vld [vmem:[%s14518_s6 + $0x90] sm:$0xff] }
 0x455   : > { %v10325_v38 = vunpack.i.h.bf16 %v10323_v2  ;;  %v10324_v59 = vunpack.i.l.bf16 %v10323_v2  ;;  %9117 = vmatprep.subr.bf16.mxu1 %v9116_v10 }
 0x456   : > { %10602 = vrot.lane.b32.xlu0 %v11910_v57, %s14589_s24  ;;  %9119 = vmatpush1.bf16.msra.mxu1 %v9118_v31 }
 0x457   : > { %10597 = vrot.lane.b32.xlu1 %v11902_v43, %s10982_s28  ;;  %v3262_v40 = vsel %vm1216_vm10, %v10324_v59, %v10325_v38 }
 0x458   : > { %v10328_v63 = vpop.permute.xlu1 %10327 }
 0x459   : > { %v10330_v62 = vunpack.i.h.bf16 %v10328_v63  ;;  %v10329_v18 = vunpack.i.l.bf16 %v10328_v63 }
 0x45a   : > { %10607 = vrot.lane.b32.xlu0 %v11910_v57, %s10982_s28 }
 0x45b   : > { %v3263_v32 = vsel %vm1216_vm10, %v10329_v18, %v10330_v62  ;;  %v9120_v34 = vpack.c.bf16 %v10330_v62, %v10325_v38  ;;  %10612 = vrot.lane.b32.xlu1 %v11916_v47, %s14589_s24 }
 0x45c   : > { %v10333_v36 = vpop.permute.xlu0 %10332  ;;  %v9122_v35 = vpack.c.bf16 %v3263_v32, %v3262_v40 }
 0x45d   : > { %9121 = vmatprep.subr.bf16.mxu1 %v9120_v34  ;;  %v10335_v43 = vunpack.i.h.bf16 %v10333_v36  ;;  %v10334_v39 = vunpack.i.l.bf16 %v10333_v36  ;;  %v8524_v34 = vld [vmem:[%s14518_s6 + $0x98] sm:$0xff] }
 0x45e   : > { %4753 = vperm.xlu0 %10138, %v4743_v33   ;;  %9123 = vmatpush1.bf16.msra.mxu1 %v9122_v35 }
 0x45f   : > { %10617 = vrot.lane.b32.xlu1 %v11916_v47, %s10982_s28  ;;  %v3264_v58 = vsel %vm1216_vm10, %v10334_v39, %v10335_v43 }
 0x460   : > { %v10343_v41 = vpop.permute.xlu0 %10342 }
 0x461   : > { %v10338_v45 = vpop.permute.xlu1 %10337  ;;  %v10345_v52 = vunpack.i.h.bf16 %v10343_v41  ;;  %v10344_v54 = vunpack.i.l.bf16 %v10343_v41 }
 0x462   : > { %4763 = vperm.xlu0 %10138, %v4745_v29   ;;  %v10340_v46 = vunpack.i.h.bf16 %v10338_v45  ;;  %v10339_v48 = vunpack.i.l.bf16 %v10338_v45  ;;  %v8525_v45 = vld [vmem:[%s14518_s6 + $0xa0] sm:$0xff] }
 0x463   : > { %4758 = vperm.xlu1 %10140, %v4744_v25   ;;  %v3476_v5 = vsel %vm1407_vm11, %v10344_v54, %v10345_v52 }
 0x464   : > { %v10353_v57 = vpop.permute.xlu0 %10352  ;;  %v3265_v61 = vsel %vm1216_vm10, %v10339_v48, %v10340_v46  ;;  %v9124_v1 = vpack.c.bf16 %v10340_v46, %v10335_v43 }
 0x465   : > { %v10348_v49 = vpop.permute.xlu1 %10347  ;;  %v9126_v4 = vpack.c.bf16 %v3265_v61, %v3264_v58  ;;  %v10355_v53 = vunpack.i.h.bf16 %v10353_v57  ;;  %v10354_v50 = vunpack.i.l.bf16 %v10353_v57  ;;  %v8527_v58 = vld [vmem:[%s14518_s6 + $0xb0] sm:$0xff] }
 0x466   : > { %4773 = vperm.xlu0 %10138, %v4747_v51   ;;  %v10350_v44 = vunpack.i.h.bf16 %v10348_v49  ;;  %v10349_v47 = vunpack.i.l.bf16 %v10348_v49  ;;  %9125 = vmatprep.subr.bf16.mxu1 %v9124_v1  ;;  %v8528_v49 = vld [vmem:[%s14518_s6 + $0xb8] sm:$0xff] }
 0x467   : > { %4768 = vperm.xlu1 %10140, %v4746_v3   ;;  %9127 = vmatpush1.bf16.msra.mxu1 %v9126_v4  ;;  %v3478_v22 = vsel %vm1407_vm11, %v10354_v50, %v10355_v53 }
 0x468   : > { %v10363_v7 = vpop.permute.xlu0 %10362  ;;  %v3477_v11 = vsel %vm1407_vm11, %v10349_v47, %v10350_v44  ;;  %v9128_v16 = vpack.c.bf16 %v10350_v44, %v10345_v52  ;;  %v8526_v52 = vld [vmem:[%s14518_s6 + $0xa8] sm:$0xff] }
 0x469   : > { %v10358_v21 = vpop.permute.xlu1 %10357  ;;  %v9130_v14 = vpack.c.bf16 %v3477_v11, %v3476_v5  ;;  %v10365_v42 = vunpack.i.h.bf16 %v10363_v7  ;;  %v10364_v17 = vunpack.i.l.bf16 %v10363_v7 }
 0x46a   : > { %4783 = vperm.xlu0 %10138, %v4749_v37   ;;  %v10360_v60 = vunpack.i.h.bf16 %v10358_v21  ;;  %v10359_v0 = vunpack.i.l.bf16 %v10358_v21  ;;  %8529 = vmatmul.mubr.msk.f32.vlgmr.msra.gmra.mrb[0].mxu1 %vm2942_vm4, %v8521_v8  ;;  %v8537_v8 = vld [vmem:[%s14518_s6 + $0xc0] sm:$0xff] }
 0x46b   : > { %9129 = vmatprep.subr.bf16.mxu1 %v9128_v16  ;;  %4778 = vperm.xlu1 %10140, %v4748_v20   ;;  %v3480_v2 = vsel %vm1407_vm11, %v10364_v17, %v10365_v42  ;;  %v8538_v17 = vld [vmem:[%s14518_s6 + $0xc8] sm:$0xff] }
 0x46c   : > { %9131 = vmatpush1.bf16.msra.mxu1 %v9130_v14  ;;  %v10373_v23 = vpop.permute.xlu0 %10372  ;;  %v3479_v12 = vsel %vm1407_vm11, %v10359_v0, %v10360_v60  ;;  %3376 = vmatprep.mubr.f32.mxu1 %v10975_v55  ;;  %v9132_v6 = vpack.c.bf16 %v10360_v60, %v10355_v53 }
 0x46d   : > { %v10368_v56 = vpop.permute.xlu1 %10367  ;;  %v9134_v26 = vpack.c.bf16 %v3479_v12, %v3478_v22  ;;  %v10375_v31 = vunpack.i.h.bf16 %v10373_v23  ;;  %v10374_v38 = vunpack.i.l.bf16 %v10373_v23 }
 0x46e   : > { %v10370_v27 = vunpack.i.h.bf16 %v10368_v56  ;;  %v10369_v13 = vunpack.i.l.bf16 %v10368_v56  ;;  %8530 = vmatmul.mubr.msk.f32.gmra.mrb[2].mxu1 %vm2942_vm4, %v8522_v9  ;;  %9133 = vmatprep.subr.bf16.mxu1 %v9132_v6 }
 0x46f   : > { %4788 = vperm.xlu1 %10140, %v4750_v24   ;;  %3382 = vmatprep.mubr.f32.mxu1 %v10975_v55  ;;  %v3482_v33 = vsel %vm1407_vm11, %v10374_v38, %v10375_v31 }
 0x470   : > { %9135 = vmatpush1.bf16.msra.mxu1 %v9134_v26  ;;  %v10383_v28 = vpop.permute.xlu0 %10382  ;;  %v3481_v10 = vsel %vm1407_vm11, %v10369_v13, %v10370_v27  ;;  %v9136_v59 = vpack.c.bf16 %v10370_v27, %v10365_v42 }
 0x471   : > { %v10378_v63 = vpop.permute.xlu1 %10377  ;;  %v9138_v62 = vpack.c.bf16 %v3481_v10, %v3480_v2  ;;  %v10385_v43 = vunpack.i.h.bf16 %v10383_v28  ;;  %v10384_v4 = vunpack.i.l.bf16 %v10383_v28  ;;  %v8539_v2 = vld [vmem:[%s14518_s6 + $0xd0] sm:$0xff] }
 0x472   : > { %v10380_v18 = vunpack.i.h.bf16 %v10378_v63  ;;  %v10379_v40 = vunpack.i.l.bf16 %v10378_v63  ;;  %8531 = vmatmul.mubr.msk.f32.gmra.mrb[4].mxu1 %vm2942_vm4, %v8523_v30  ;;  %9137 = vmatprep.subr.bf16.mxu1 %v9136_v59 }
 0x473   : > { %3388 = vmatprep.mubr.f32.mxu1 %v10975_v55  ;;  %v3694_v11 = vsel %vm1598_vm12, %v10384_v4, %v10385_v43 }
 0x474   : > { %9139 = vmatpush1.bf16.msra.mxu1 %v9138_v62  ;;  %v10393_v32 = vpop.permute.xlu0 %10392  ;;  %v3483_v36 = vsel %vm1407_vm11, %v10379_v40, %v10380_v18  ;;  %v9140_v35 = vpack.c.bf16 %v10380_v18, %v10375_v31  ;;  %v8540_v40 = vld [vmem:[%s14518_s6 + $0xd8] sm:$0xff] }
 0x475   : > { %v10388_v29 = vpop.permute.xlu1 %10387  ;;  %v9142_v41 = vpack.c.bf16 %v3483_v36, %v3482_v33  ;;  %v10395_v53 = vunpack.i.h.bf16 %v10393_v32  ;;  %v10394_v50 = vunpack.i.l.bf16 %v10393_v32 }
 0x476   : > { %v10390_v39 = vunpack.i.h.bf16 %v10388_v29  ;;  %8532 = vmatmul.mubr.msk.f32.gmra.mrb[6].mxu1 %vm2942_vm4, %v8524_v34  ;;  %9141 = vmatprep.subr.bf16.mxu1 %v9140_v35  ;;  %v10389_v1 = vunpack.i.l.bf16 %v10388_v29 }
 0x477   : > { %3394 = vmatprep.mubr.f32.mxu1 %v10975_v55  ;;  %v3696_v23 = vsel %vm1598_vm12, %v10394_v50, %v10395_v53 }
 0x478   : > { %9143 = vmatpush1.bf16.msra.mxu1 %v9142_v41  ;;  %v10403_v25 = vpop.permute.xlu0 %10402  ;;  %v9144_v46 = vpack.c.bf16 %v10390_v39, %v10385_v43  ;;  %v3695_v47 = vsel %vm1598_vm12, %v10389_v1, %v10390_v39  ;;  %v8541_v41 = vld [vmem:[%s14518_s6 + $0xe0] sm:$0xff] }
 0x479   : > { %v10398_v48 = vpop.permute.xlu1 %10397  ;;  %v9146_v20 = vpack.c.bf16 %v3695_v47, %v3694_v11  ;;  %v10405_v9 = vunpack.i.h.bf16 %v10403_v25  ;;  %v10404_v22 = vunpack.i.l.bf16 %v10403_v25  ;;  %v8542_v25 = vld [vmem:[%s14518_s6 + $0xe8] sm:$0xff] }
 0x47a   : > { %8533 = vmatmul.mubr.msk.f32.gmra.mrb[8].mxu1 %vm2942_vm4, %v8525_v45  ;;  %9145 = vmatprep.subr.bf16.mxu1 %v9144_v46  ;;  %v10400_v37 = vunpack.i.h.bf16 %v10398_v48  ;;  %v10399_v5 = vunpack.i.l.bf16 %v10398_v48  ;;  %v8543_v48 = vld [vmem:[%s14518_s6 + $0xf0] sm:$0xff] }
 0x47b   : > { %3400 = vmatprep.mubr.f32.mxu1 %v10975_v55  ;;  %v3698_v28 = vsel %vm1598_vm12, %v10404_v22, %v10405_v9 }
 0x47c   : > { %v12134_v51 = vpop.permute.xlu0 %10412  ;;  %v3697_v21 = vsel %vm1598_vm12, %v10399_v5, %v10400_v37  ;;  %v9148_v0 = vpack.c.bf16 %v10400_v37, %v10395_v53  ;;  %v8553_v37 = vld [vmem:[%s14518_s6 + $0x100] sm:$0xff] }
 0x47d   : > { %v10408_v54 = vpop.permute.xlu1 %10407  ;;  %v9150_v6 = vpack.c.bf16 %v3697_v21, %v3696_v23  ;;  %v10415_v30 = vunpack.i.h.bf16 %v12134_v51  ;;  %v10414_v10 = vunpack.i.l.bf16 %v12134_v51 }
 0x47e   : > { %8534 = vmatmul.mubr.msk.f32.gmra.mrb[10].mxu1 %vm2942_vm4, %v8526_v52  ;;  %v10410_v14 = vunpack.i.h.bf16 %v10408_v54  ;;  %v10409_v60 = vunpack.i.l.bf16 %v10408_v54 }
 0x47f   : > { %3406 = vmatprep.mubr.f32.mxu1 %v10975_v55  ;;  %v3700_v32 = vsel %vm1598_vm12, %v10414_v10, %v10415_v30 }
 0x480   : > { %v12141_v57 = vpop.permute.xlu0 %10422  ;;  %v3699_v24 = vsel %vm1598_vm12, %v10409_v60, %v10410_v14  ;;  %v9152_v27 = vpack.c.bf16 %v10410_v14, %v10405_v9 }
 0x481   : > { %v10418_v61 = vpop.permute.xlu1 %10417  ;;  %v9154_v38 = vpack.c.bf16 %v3699_v24, %v3698_v28  ;;  %v10425_v34 = vunpack.i.h.bf16 %v12141_v57 }
 0x482   : > { %8535 = vmatmul.mubr.msk.f32.gmra.mrb[12].mxu1 %vm2942_vm4, %v8527_v58  ;;  %v10420_v56 = vunpack.i.h.bf16 %v10418_v61  ;;  %v10419_v26 = vunpack.i.l.bf16 %v10418_v61  ;;  %v8544_v58 = vld [vmem:[%s14518_s6 + $0xf8] sm:$0xff]  ;;  %v10424_v61 = vunpack.i.l.bf16 %v12141_v57 }
 0x483   : > { %3412 = vmatprep.mubr.f32.mxu1 %v10975_v55 }
 0x484   : > { %v12148_v3 = vpop.permute.xlu0 %10432  ;;  %v3701_v59 = vsel %vm1598_vm12, %v10419_v26, %v10420_v56  ;;  %v9156_v62 = vpack.c.bf16 %v10420_v56, %v10415_v30  ;;  %v3912_v57 = vsel %vm1789_vm13, %v10424_v61, %v10425_v34 }
 0x485   : > { %v12154_v44 = vpop.permute.xlu1 %10427  ;;  %v9158_v36 = vpack.c.bf16 %v3701_v59, %v3700_v32  ;;  %v10435_v5 = vunpack.i.h.bf16 %v12148_v3 }
 0x486   : > { %8536 = vmatmul.mubr.msk.f32.gmra.mrb[14].mxu1 %vm2942_vm4, %v8528_v49  ;;  %v10430_v63 = vunpack.i.h.bf16 %v12154_v44  ;;  %v10429_v52 = vunpack.i.l.bf16 %v12154_v44 }
 0x487   : > { %3588 = vmatprep.mubr.f32.mxu1 %v10975_v55 }
 0x488   : > { %v12158_v7 = vpop.permute.xlu0 %10442  ;;  %v9160_v35 = vpack.c.bf16 %v10430_v63, %v10425_v34  ;;  %v3913_v49 = vsel %vm1789_vm13, %v10429_v52, %v10430_v63  ;;  %v8557_v52 = vld [vmem:[%s14518_s6 + $0x120] sm:$0xff] }
 0x489   : > { %v12165_v16 = vpop.permute.xlu1 %10437  ;;  %v9162_v53 = vpack.c.bf16 %v3913_v49, %v3912_v57  ;;  %v8558_v57 = vld [vmem:[%s14518_s6 + $0x128] sm:$0xff] }
 0x48a   : > { %8545 = vmatmul.mubr.msk.f32.vlgmr.msra.gmra.mrb[0].mxu1 %vm2942_vm4, %v8537_v8  ;;  %v10440_v4 = vunpack.i.h.bf16 %v12165_v16  ;;  %v10439_v44 = vunpack.i.l.bf16 %v12165_v16  ;;  %v10434_v8 = vunpack.i.l.bf16 %v12148_v3  ;;  %v8554_v3 = vld [vmem:[%s14518_s6 + $0x108] sm:$0xff] }
 0x48b   : > { %9147 = vmatpush1.bf16.msra.mxu1 %v9146_v20  ;;  %3594 = vmatprep.mubr.f32.mxu1 %v10975_v55 }
 0x48c   : > { %v12169_v42 = vpop.permute.xlu0 %10452  ;;  %9149 = vmatprep.subr.bf16.mxu1 %v9148_v0  ;;  %v3915_v50 = vsel %vm1789_vm13, %v10439_v44, %v10440_v4  ;;  %v9164_v21 = vpack.c.bf16 %v10440_v4, %v10435_v5  ;;  %v3914_v60 = vsel %vm1789_vm13, %v10434_v8, %v10435_v5  ;;  %v10445_v0 = vunpack.i.h.bf16 %v12158_v7 }
 0x48d   : > { %v12176_v12 = vpop.permute.xlu1 %10447  ;;  %v9166_v9 = vpack.c.bf16 %v3915_v50, %v3914_v60 }
 0x48e   : > { %8546 = vmatmul.mubr.msk.f32.gmra.mrb[2].mxu1 %vm2942_vm4, %v8538_v17  ;;  %v10450_v16 = vunpack.i.h.bf16 %v12176_v12  ;;  %v10449_v20 = vunpack.i.l.bf16 %v12176_v12  ;;  %v10444_v17 = vunpack.i.l.bf16 %v12158_v7  ;;  %v8555_v7 = vld [vmem:[%s14518_s6 + $0x110] sm:$0xff] }
 0x48f   : > { %9151 = vmatpush1.bf16.msra.mxu1 %v9150_v6  ;;  %3600 = vmatprep.mubr.f32.mxu1 %v10975_v55 }
 0x490   : > { %v12180_v13 = vpop.permute.xlu0 %10462  ;;  %9153 = vmatprep.subr.bf16.mxu1 %v9152_v27  ;;  %v3917_v22 = vsel %vm1789_vm13, %v10449_v20, %v10450_v16  ;;  %v9168_v24 = vpack.c.bf16 %v10450_v16, %v10445_v0  ;;  %v3916_v26 = vsel %vm1789_vm13, %v10444_v17, %v10445_v0  ;;  %v10455_v27 = vunpack.i.h.bf16 %v12169_v42 }
 0x491   : > { %v12189_v31 = vpop.permute.xlu1 %10457  ;;  %v9170_v30 = vpack.c.bf16 %v3917_v22, %v3916_v26 }
 0x492   : > { %8547 = vmatmul.mubr.msk.f32.gmra.mrb[4].mxu1 %vm2942_vm4, %v8539_v2  ;;  %v10460_v12 = vunpack.i.h.bf16 %v12189_v31  ;;  %v10459_v6 = vunpack.i.l.bf16 %v12189_v31  ;;  %v10454_v2 = vunpack.i.l.bf16 %v12169_v42  ;;  %v8556_v42 = vld [vmem:[%s14518_s6 + $0x118] sm:$0xff] }
 0x493   : > { %9155 = vmatpush1.bf16.msra.mxu1 %v9154_v38  ;;  %3606 = vmatprep.mubr.f32.mxu1 %v10975_v55 }
 0x494   : > { %v12194_v18 = vpop.permute.xlu0 %10472  ;;  %9157 = vmatprep.subr.bf16.mxu1 %v9156_v62  ;;  %v3919_v10 = vsel %vm1789_vm13, %v10459_v6, %v10460_v12  ;;  %v9172_v38 = vpack.c.bf16 %v10460_v12, %v10455_v27  ;;  %v3918_v63 = vsel %vm1789_vm13, %v10454_v2, %v10455_v27  ;;  %v10465_v62 = vunpack.i.h.bf16 %v12180_v13  ;;  %v8560_v6 = vld [vmem:[%s14518_s6 + $0x138] sm:$0xff] }
 0x495   : > { %v12202_v33 = vpop.permute.xlu1 %10467 }
 0x496   : > { %8548 = vmatmul.mubr.msk.f32.gmra.mrb[6].mxu1 %vm2942_vm4, %v8540_v40  ;;  %v10470_v31 = vunpack.i.h.bf16 %v12202_v33  ;;  %v10469_v17 = vunpack.i.l.bf16 %v12202_v33 }
 0x497   : > { %9159 = vmatpush1.bf16.msra.mxu1 %v9158_v36  ;;  %3612 = vmatprep.mubr.f32.mxu1 %v10975_v55  ;;  %v9174_v36 = vpack.c.bf16 %v3919_v10, %v3918_v63 }
 0x498   : > { %v12205_v29 = vpop.permute.xlu0 %10482  ;;  %9161 = vmatprep.subr.bf16.mxu1 %v9160_v35  ;;  %v4131_v33 = vsel %vm1980_vm14, %v10469_v17, %v10470_v31 }
 0x499   : > { %v12211_v43 = vpop.permute.xlu1 %10477 }
 0x49a   : > { %8549 = vmatmul.mubr.msk.f32.gmra.mrb[8].mxu1 %vm2942_vm4, %v8541_v41  ;;  %v10480_v27 = vunpack.i.h.bf16 %v12211_v43  ;;  %v10479_v2 = vunpack.i.l.bf16 %v12211_v43 }
 0x49b   : > { %3618 = vmatprep.mubr.f32.mxu1 %v10975_v55 }
 0x49c   : > { %v12214_v39 = vpop.permute.xlu0 %10492 }
 0x49d   : > { %v12220_v45 = vpop.permute.xlu1 %10487 }
 0x49e   : > { %8550 = vmatmul.mubr.msk.f32.gmra.mrb[10].mxu1 %vm2942_vm4, %v8542_v25  ;;  %v9176_v25 = vpack.c.bf16 %v10470_v31, %v10465_v62  ;;  %v8569_v31 = vld [vmem:[%s14518_s6 + $0x140] sm:$0xff] }
 0x49f   : > { %3624 = vmatprep.mubr.f32.mxu1 %v10975_v55 }
 0x4a0   : > { %v12223_v46 = vpop.permute.xlu0 %10502 }
 0x4a1   : > { %v12229_v51 = vpop.permute.xlu1 %10497 }
 0x4a2   : > { %8551 = vmatmul.mubr.msk.f32.gmra.mrb[12].mxu1 %vm2942_vm4, %v8543_v48  ;;  %v10499_v17 = vunpack.i.l.bf16 %v12229_v51 }
 0x4a3   : > { %3630 = vmatprep.mubr.f32.mxu1 %v10975_v55 }
 0x4a4   : > { %v12233_v54 = vpop.permute.xlu0 %10512 }
 0x4a5   : > { %v12240_v1 = vpop.permute.xlu1 %10507 }
 0x4a6   : > { %8552 = vmatmul.mubr.msk.f32.gmra.mrb[14].mxu1 %vm2942_vm4, %v8544_v58 }
 0x4a7   : > { %3806 = vmatprep.mubr.f32.mxu1 %v10975_v55 }
 0x4a8   : > { %v12246_v47 = vpop.permute.xlu0 %10522 }
 0x4a9   : > { %v12255_v11 = vpop.permute.xlu1 %10517 }
 0x4aa   : > { %8561 = vmatmul.mubr.msk.f32.vlgmr.msra.gmra.mrb[0].mxu1 %vm2942_vm4, %v8553_v37 }
 0x4ab   : > { %9163 = vmatpush1.bf16.msra.mxu1 %v9162_v53  ;;  %3812 = vmatprep.mubr.f32.mxu1 %v10975_v55 }
 0x4ac   : > { %v12261_v14 = vpop.permute.xlu0 %10532  ;;  %9165 = vmatprep.subr.bf16.mxu1 %v9164_v21  ;;  %v8559_v21 = vld [vmem:[%s14518_s6 + $0x130] sm:$0xff] }
 0x4ad   : > { %v12270_v23 = vpop.permute.xlu1 %10527 }
 0x4ae   : > { %8562 = vmatmul.mubr.msk.f32.gmra.mrb[2].mxu1 %vm2942_vm4, %v8554_v3 }
 0x4af   : > { %9167 = vmatpush1.bf16.msra.mxu1 %v9166_v9  ;;  %3818 = vmatprep.mubr.f32.mxu1 %v10975_v55 }
 0x4b0   : > { %v10538_v56 = vpop.permute.xlu0 %10537  ;;  %9169 = vmatprep.subr.bf16.mxu1 %v9168_v24  ;;  %v10464_v24 = vunpack.i.l.bf16 %v12180_v13 }
 0x4b1   : > { %v12283_v28 = vpop.permute.xlu1 %10542  ;;  %v10540_v40 = vunpack.i.h.bf16 %v10538_v56  ;;  %v10539_v32 = vunpack.i.l.bf16 %v10538_v56 }
 0x4b2   : > { %8563 = vmatmul.mubr.msk.f32.gmra.mrb[4].mxu1 %vm2942_vm4, %v8555_v7  ;;  %v4130_v43 = vsel %vm1980_vm14, %v10464_v24, %v10465_v62  ;;  %v10495_v24 = vunpack.i.h.bf16 %v12214_v39 }
 0x4b3   : > { %9171 = vmatpush1.bf16.msra.mxu1 %v9170_v30  ;;  %3824 = vmatprep.mubr.f32.mxu1 %v10975_v55  ;;  %v2918_v58 = vsel %vm903_vm8, %v10539_v32, %v10540_v40 }
 0x4b4   : > { %v12288_v59 = vpop.permute.xlu0 %10552  ;;  %9173 = vmatprep.subr.bf16.mxu1 %v9172_v38  ;;  %v10475_v38 = vunpack.i.h.bf16 %v12194_v18 }
 0x4b5   : > { %v10548_v34 = vpop.permute.xlu1 %10547 }
 0x4b6   : > { %v10550_v35 = vunpack.i.h.bf16 %v10548_v34  ;;  %v10549_v41 = vunpack.i.l.bf16 %v10548_v34  ;;  %8564 = vmatmul.mubr.msk.f32.gmra.mrb[6].mxu1 %vm2942_vm4, %v8556_v42  ;;  %v10474_v42 = vunpack.i.l.bf16 %v12194_v18  ;;  %v10489_v18 = vunpack.i.l.bf16 %v12220_v45 }
 0x4b7   : > { %9175 = vmatpush1.bf16.msra.mxu1 %v9174_v36  ;;  %3830 = vmatprep.mubr.f32.mxu1 %v10975_v55  ;;  %v9180_v13 = vpack.c.bf16 %v10480_v27, %v10475_v38 }
 0x4b8   : > { %v10563_v48 = vpop.permute.xlu0 %10562  ;;  %v2919_v61 = vsel %vm903_vm8, %v10549_v41, %v10550_v35  ;;  %9177 = vmatprep.subr.bf16.mxu1 %v9176_v25  ;;  %v9080_v49 = vpack.c.bf16 %v10550_v35, %v10540_v40  ;;  %v10490_v35 = vunpack.i.h.bf16 %v12220_v45  ;;  %v4132_v62 = vsel %vm1980_vm14, %v10474_v42, %v10475_v38  ;;  %v8497_v42 = vld [vmem:[%s14518_s6 + $0x40] sm:$0xff] }
 0x4b9   : > { %v12305_v4 = vpop.permute.xlu1 %10557  ;;  %v9082_v44 = vpack.c.bf16 %v2919_v61, %v2918_v58  ;;  %v10565_v5 = vunpack.i.h.bf16 %v10563_v48  ;;  %v10564_v8 = vunpack.i.l.bf16 %v10563_v48  ;;  %v4133_v58 = vsel %vm1980_vm14, %v10479_v2, %v10480_v27 }
 0x4ba   : > { %9081 = vmatprep.subr.bf16.mxu0 %v9080_v49  ;;  %8565 = vmatmul.mubr.msk.f32.gmra.mrb[8].mxu1 %vm2942_vm4, %v8557_v52  ;;  %v9178_v52 = vpack.c.bf16 %v4131_v33, %v4130_v43 }
 0x4bb   : > { %9083 = vmatpush1.bf16.msra.mxu0 %v9082_v44  ;;  %3836 = vmatprep.mubr.f32.mxu1 %v10975_v55  ;;  %v2920_v3 = vsel %vm903_vm8, %v10564_v8, %v10565_v5  ;;  %v10485_v44 = vunpack.i.h.bf16 %v12205_v29 }
 0x4bc   : > { %v12308_v37 = vpop.permute.xlu0 %10572 }
 0x4bd   : > { %v10568_v53 = vpop.permute.xlu1 %10567 }
 0x4be   : > { %v10570_v50 = vunpack.i.h.bf16 %v10568_v53  ;;  %v10569_v16 = vunpack.i.l.bf16 %v10568_v53  ;;  %8566 = vmatmul.mubr.msk.f32.gmra.mrb[10].mxu1 %vm2942_vm4, %v8558_v57  ;;  %v10484_v57 = vunpack.i.l.bf16 %v12205_v29  ;;  %v4135_v29 = vsel %vm1980_vm14, %v10489_v18, %v10490_v35  ;;  %v8575_v18 = vld [vmem:[%s14518_s6 + $0x170] sm:$0xff] }
 0x4bf   : > { %3842 = vmatprep.mubr.f32.mxu1 %v10975_v55 }
 0x4c0   : > { %v10583_v20 = vpop.permute.xlu0 %10582  ;;  %v2921_v60 = vsel %vm903_vm8, %v10569_v16, %v10570_v50  ;;  %v9084_v0 = vpack.c.bf16 %v10570_v50, %v10565_v5  ;;  %v8570_v5 = vld [vmem:[%s14518_s6 + $0x148] sm:$0xff] }
 0x4c1   : > { %v12322_v9 = vpop.permute.xlu1 %10577  ;;  %v9086_v22 = vpack.c.bf16 %v2921_v60, %v2920_v3  ;;  %v10585_v56 = vunpack.i.h.bf16 %v10583_v20  ;;  %v10584_v7 = vunpack.i.l.bf16 %v10583_v20  ;;  %v9182_v3 = vpack.c.bf16 %v4133_v58, %v4132_v62 }
 0x4c2   : > { %9085 = vmatprep.subr.bf16.mxu0 %v9084_v0  ;;  %8567 = vmatmul.mubr.msk.f32.gmra.mrb[12].mxu1 %vm2942_vm4, %v8559_v21  ;;  %v9184_v60 = vpack.c.bf16 %v10490_v35, %v10485_v44  ;;  %v10500_v0 = vunpack.i.h.bf16 %v12229_v51  ;;  %v8499_v35 = vld [vmem:[%s14518_s6 + $0x50] sm:$0xff]  ;;  %v10504_v58 = vunpack.i.l.bf16 %v12223_v46 }
 0x4c3   : > { %9087 = vmatpush1.bf16.msra.mxu0 %v9086_v22  ;;  %3848 = vmatprep.mubr.f32.mxu1 %v10975_v55  ;;  %v2922_v32 = vsel %vm903_vm8, %v10584_v7, %v10585_v56  ;;  %v10494_v7 = vunpack.i.l.bf16 %v12214_v39  ;;  %v8572_v39 = vld [vmem:[%s14518_s6 + $0x158] sm:$0xff] }
 0x4c4   : > { %v10593_v12 = vpop.permute.xlu0 %10592  ;;  %v9188_v38 = vpack.c.bf16 %v10500_v0, %v10495_v24 }
 0x4c5   : > { %v10588_v26 = vpop.permute.xlu1 %10587  ;;  %v10595_v63 = vunpack.i.h.bf16 %v10593_v12  ;;  %v10594_v40 = vunpack.i.l.bf16 %v10593_v12 }
 0x4c6   : > { %v10590_v30 = vunpack.i.h.bf16 %v10588_v26  ;;  %v10589_v10 = vunpack.i.l.bf16 %v10588_v26  ;;  %8568 = vmatmul.mubr.msk.f32.gmra.mrb[14].mxu1 %vm2942_vm4, %v8560_v6  ;;  %v4134_v6 = vsel %vm1980_vm14, %v10484_v57, %v10485_v44  ;;  %v10514_v44 = vunpack.i.l.bf16 %v12233_v54 }
 0x4c7   : > { %4024 = vmatprep.mubr.f32.mxu1 %v10975_v55  ;;  %v12353_v45 = vsel %vm2362_vm0, %v10594_v40, %v10595_v63  ;;  %v9186_v2 = vpack.c.bf16 %v4135_v29, %v4134_v6  ;;  %v10505_v40 = vunpack.i.h.bf16 %v12223_v46  ;;  %v8502_v46 = vld [vmem:[%s14518_s6 + $0x68] sm:$0xff] }
 0x4c8   : > { %v2923_v34 = vsel %vm903_vm8, %v10589_v10, %v10590_v30  ;;  %v9088_v36 = vpack.c.bf16 %v10590_v30, %v10585_v56  ;;  %v10603_v48 = vpop.permute.xlu0 %10602  ;;  %v8571_v56 = vld [vmem:[%s14518_s6 + $0x150] sm:$0xff]  ;;  %v4137_v30 = vsel %vm1980_vm14, %v10499_v17, %v10500_v0  ;;  %v10510_v10 = vunpack.i.h.bf16 %v12240_v1 }
 0x4c9   : > { %v9090_v41 = vpack.c.bf16 %v2923_v34, %v2922_v32  ;;  %v10598_v25 = vpop.permute.xlu1 %10597  ;;  %v10605_v50 = vunpack.i.h.bf16 %v10603_v48  ;;  %v10604_v16 = vunpack.i.l.bf16 %v10603_v48  ;;  %v8573_v32 = vld [vmem:[%s14518_s6 + $0x160] sm:$0xff]  ;;  %v8498_v34 = vld [vmem:[%s14518_s6 + $0x48] sm:$0xff]  ;;  %v8576_v48 = vld [vmem:[%s14518_s6 + $0x178] sm:$0xff]  ;;  %v4348_v62 = vsel %vm2171_vm15, %v10504_v58, %v10505_v40 }
 0x4ca   : > { %v10600_v61 = vunpack.i.h.bf16 %v10598_v25  ;;  %v10599_v49 = vunpack.i.l.bf16 %v10598_v25  ;;  %9089 = vmatprep.subr.bf16.mxu0 %v9088_v36  ;;  %8577 = vmatmul.mubr.msk.f32.vlgmr.msra.gmra.mrb[0].mxu1 %vm2942_vm4, %v8569_v31  ;;  %v9192_v43 = vpack.c.bf16 %v10510_v10, %v10505_v40  ;;  %v8574_v36 = vld [vmem:[%s14518_s6 + $0x168] sm:$0xff]  ;;  %v10509_v25 = vunpack.i.l.bf16 %v12240_v1 }
 0x4cb   : > { %9179 = vmatpush1.bf16.msra.mxu1 %v9178_v52  ;;  %9091 = vmatpush1.bf16.msra.mxu0 %v9090_v41  ;;  %v2924_v33 = vsel %vm903_vm8, %v10604_v16, %v10605_v50  ;;  %v8500_v41 = vld [vmem:[%s14518_s6 + $0x58] sm:$0xff]  ;;  %v8501_v52 = vld [vmem:[%s14518_s6 + $0x60] sm:$0xff]  ;;  %v10529_v16 = vunpack.i.l.bf16 %v12270_v23  ;;  %v10559_v40 = vunpack.i.l.bf16 %v12305_v4 }
 0x4cc   : > { %v12359_v8 = vsel %vm2362_vm0, %v10599_v49, %v10600_v61  ;;  %v12361_v53 = vpack.c.bf16 %v10600_v61, %v10595_v63  ;;  %9181 = vmatprep.subr.bf16.mxu1 %v9180_v13  ;;  %4030 = vmatprep.mubr.f32.mxu1 %v10975_v55  ;;  %v4136_v63 = vsel %vm1980_vm14, %v10494_v7, %v10495_v24  ;;  %v10520_v61 = vunpack.i.h.bf16 %v12255_v11  ;;  %v8585_v13 = vld [vmem:[%s14518_s6 + $0x180] sm:$0xff]  ;;  %v8504_v24 = vld [vmem:[%s14518_s6 + $0x78] sm:$0xff] }
 0x4cd   : > { %v9218_v20 = vpack.c.bf16 %v12359_v8, %v12353_v45  ;;  %v10613_v21 = vpop.permute.xlu1 %10612  ;;  %v9190_v31 = vpack.c.bf16 %v4137_v30, %v4136_v63  ;;  %v4349_v1 = vsel %vm2171_vm15, %v10509_v25, %v10510_v10  ;;  %v10519_v49 = vunpack.i.l.bf16 %v12255_v11  ;;  %v8591_v63 = vld [vmem:[%s14518_s6 + $0x1b0] sm:$0xff]  ;;  %v8605_v45 = vld [vmem:[%s14518_s6 + $0x1e0] sm:$0xff]  ;;  %v8606_v8 = vld [vmem:[%s14518_s6 + $0x1e8] sm:$0xff] }
 0x4ce   : > { %v10615_v22 = vunpack.i.h.bf16 %v10613_v21  ;;  %v10614_v12 = vunpack.i.l.bf16 %v10613_v21  ;;  %8578 = vmatmul.mubr.msk.f32.gmra.mrb[2].mxu1 %vm2942_vm4, %v8570_v5  ;;  %v10515_v11 = vunpack.i.h.bf16 %v12233_v54  ;;  %v9194_v57 = vpack.c.bf16 %v4349_v1, %v4348_v62  ;;  %v8586_v21 = vld [vmem:[%s14518_s6 + $0x188] sm:$0xff]  ;;  %v8503_v54 = vld [vmem:[%s14518_s6 + $0x70] sm:$0xff] }
 0x4cf   : > { %9183 = vmatpush1.bf16.msra.mxu1 %v9182_v3  ;;  %4036 = vmatprep.mubr.f32.mxu1 %v10975_v55  ;;  %v4351_v5 = vsel %vm2171_vm15, %v10519_v49, %v10520_v61  ;;  %v10534_v7 = vunpack.i.l.bf16 %v12261_v14  ;;  %v10555_v30 = vunpack.i.h.bf16 %v12288_v59  ;;  %vm4835_vm14 = vcmask 244736  }
 0x4d0   : > { %v2925_v51 = vsel %vm903_vm8, %v10614_v12, %v10615_v22  ;;  %v9092_v26 = vpack.c.bf16 %v10615_v22, %v10605_v50  ;;  %9185 = vmatprep.subr.bf16.mxu1 %v9184_v60  ;;  %v10530_v50 = vunpack.i.h.bf16 %v12270_v23  ;;  %v9196_v29 = vpack.c.bf16 %v10520_v61, %v10515_v11  ;;  %v10608_v61 = vpop.permute.xlu0 %10607 }
 0x4d1   : > { %v9094_v27 = vpack.c.bf16 %v2925_v51, %v2924_v33  ;;  %v4350_v3 = vsel %vm2171_vm15, %v10514_v44, %v10515_v11  ;;  %v10525_v23 = vunpack.i.h.bf16 %v12246_v47  ;;  %v10524_v60 = vunpack.i.l.bf16 %v12246_v47  ;;  %v8587_v47 = vld [vmem:[%s14518_s6 + $0x190] sm:$0xff] }
 0x4d2   : > { %9093 = vmatprep.subr.bf16.mxu0 %v9092_v26  ;;  %8579 = vmatmul.mubr.msk.f32.gmra.mrb[4].mxu1 %vm2942_vm4, %v8571_v56  ;;  %v9198_v0 = vpack.c.bf16 %v4351_v5, %v4350_v3  ;;  %v4353_v17 = vsel %vm2171_vm15, %v10529_v16, %v10530_v50  ;;  %v10545_v22 = vunpack.i.h.bf16 %v12283_v28  ;;  %v10544_v12 = vunpack.i.l.bf16 %v12283_v28  ;;  %v8617_v16 = vld [vmem:[%s14518_s6 + $0x200] sm:$0xff] }
 0x4d3   : > { %9187 = vmatpush1.bf16.msra.mxu1 %v9186_v2  ;;  %9095 = vmatpush1.bf16.msra.mxu0 %v9094_v27  ;;  %v9200_v6 = vpack.c.bf16 %v10530_v50, %v10525_v23  ;;  %v4352_v56 = vsel %vm2171_vm15, %v10524_v60, %v10525_v23  ;;  %v10535_v28 = vunpack.i.h.bf16 %v12261_v14  ;;  %v10560_v26 = vunpack.i.h.bf16 %v12305_v4  ;;  %v8588_v14 = vld [vmem:[%s14518_s6 + $0x198] sm:$0xff]  ;;  %v8601_v4 = vld [vmem:[%s14518_s6 + $0x1c0] sm:$0xff]  ;;  %v8622_v23 = vld [vmem:[%s14518_s6 + $0x228] sm:$0xff] }
 0x4d4   : > { %9189 = vmatprep.subr.bf16.mxu1 %v9188_v38  ;;  %4042 = vmatprep.mubr.f32.mxu1 %v10975_v55  ;;  %v9202_v33 = vpack.c.bf16 %v4353_v17, %v4352_v56  ;;  %v4355_v51 = vsel %vm2171_vm15, %v10544_v12, %v10545_v22  ;;  %v10609_v62 = vunpack.i.l.bf16 %v10608_v61  ;;  %v8621_v3 = vld [vmem:[%s14518_s6 + $0x220] sm:$0xff]  ;;  %v8623_v60 = vld [vmem:[%s14518_s6 + $0x230] sm:$0xff] }
 0x4d5   : > { %v9204_v27 = vpack.c.bf16 %v10545_v22, %v10535_v28  ;;  %v4354_v2 = vsel %vm2171_vm15, %v10534_v7, %v10535_v28  ;;  %v9208_v38 = vpack.c.bf16 %v10560_v26, %v10555_v30 }
 0x4d6   : > { %8580 = vmatmul.mubr.msk.f32.gmra.mrb[6].mxu1 %vm2942_vm4, %v8572_v39  ;;  %8505 = vmatmul.mubr.msk.f32.vlgmr.msra.gmra.mrb[16].mxu0 %vm2942_vm4, %v8497_v42  ;;  %v9206_v10 = vpack.c.bf16 %v4355_v51, %v4354_v2  ;;  %v8589_v39 = vld [vmem:[%s14518_s6 + $0x1a0] sm:$0xff]  ;;  %v8590_v42 = vld [vmem:[%s14518_s6 + $0x1a8] sm:$0xff] }
 0x4d7   : > { %9191 = vmatpush1.bf16.msra.mxu1 %v9190_v31  ;;  %4048 = vmatprep.mubr.f32.mxu1 %v10975_v55  ;;  %v8592_v31 = vld [vmem:[%s14518_s6 + $0x1b8] sm:$0xff] }
 0x4d8   : > { %9193 = vmatprep.subr.bf16.mxu1 %v9192_v43  ;;  %3037 = vmatprep.mubr.f32.mxu0 %v10975_v55  ;;  %v10554_v43 = vunpack.i.l.bf16 %v12288_v59  ;;  %v10574_v59 = vunpack.i.l.bf16 %v12308_v37 }
 0x4da   : > { %8581 = vmatmul.mubr.msk.f32.gmra.mrb[8].mxu1 %vm2942_vm4, %v8573_v32  ;;  %8506 = vmatmul.mubr.msk.f32.gmra.mrb[18].mxu0 %vm2942_vm4, %v8498_v34  ;;  %v4567_v32 = vsel %vm2362_vm0, %v10559_v40, %v10560_v26  ;;  %v10580_v34 = vunpack.i.h.bf16 %v12322_v9 }
 0x4db   : > { %4054 = vmatprep.mubr.f32.mxu1 %v10975_v55  ;;  %3043 = vmatprep.mubr.f32.mxu0 %v10975_v55 }
 0x4dd   : > { %v4754_v40 = vpop.permute.xlu0 %4753 }
 0x4de   : > { %8582 = vmatmul.mubr.msk.f32.gmra.mrb[10].mxu1 %vm2942_vm4, %v8574_v36  ;;  %8507 = vmatmul.mubr.msk.f32.gmra.mrb[20].mxu0 %vm2942_vm4, %v8499_v35  ;;  %v10579_v36 = vunpack.i.l.bf16 %v12322_v9  ;;  %v4566_v35 = vsel %vm2362_vm0, %v10554_v43, %v10555_v30  ;;  %v10618_v9 = vpop.permute.xlu1 %10617 }
 0x4df   : > { %4060 = vmatprep.mubr.f32.mxu1 %v10975_v55  ;;  %3049 = vmatprep.mubr.f32.mxu0 %v10975_v55  ;;  %v10619_v49 = vunpack.i.l.bf16 %v10618_v9 }
 0x4e0   : > { %v4569_v25 = vsel %vm2362_vm0, %v10579_v36, %v10580_v34 }
 0x4e2   : > { %8583 = vmatmul.mubr.msk.f32.gmra.mrb[12].mxu1 %vm2942_vm4, %v8575_v18  ;;  %8508 = vmatmul.mubr.msk.f32.gmra.mrb[22].mxu0 %vm2942_vm4, %v8500_v41  ;;  %v10575_v18 = vunpack.i.h.bf16 %v12308_v37  ;;  %v9210_v41 = vpack.c.bf16 %v4567_v32, %v4566_v35  ;;  %v10620_v37 = vunpack.i.h.bf16 %v10618_v9 }
 0x4e3   : > { %4066 = vmatprep.mubr.f32.mxu1 %v10975_v55  ;;  %3055 = vmatprep.mubr.f32.mxu0 %v10975_v55 }
 0x4e4   : > { %v4568_v58 = vsel %vm2362_vm0, %v10574_v59, %v10575_v18  ;;  %v4573_v11 = vsel %vm2362_vm0, %v10619_v49, %v10620_v37 }
 0x4e5   : > { %v9214_v1 = vpack.c.bf16 %v4569_v25, %v4568_v58 }
 0x4e6   : > { %8584 = vmatmul.mubr.msk.f32.gmra.mrb[14].mxu1 %vm2942_vm4, %v8576_v48  ;;  %8509 = vmatmul.mubr.msk.f32.gmra.mrb[24].mxu0 %vm2942_vm4, %v8501_v52  ;;  %v9212_v48 = vpack.c.bf16 %v10580_v34, %v10575_v18  ;;  %v8602_v52 = vld [vmem:[%s14518_s6 + $0x1c8] sm:$0xff]  ;;  %v4759_v18 = vpop.permute.xlu1 %4758 }
 0x4e7   : > { %4242 = vmatprep.mubr.f32.mxu1 %v10975_v55  ;;  %3061 = vmatprep.mubr.f32.mxu0 %v10975_v55 }
 0x4ea   : > { %8593 = vmatmul.mubr.msk.f32.vlgmr.msra.gmra.mrb[0].mxu1 %vm2942_vm4, %v8585_v13  ;;  %8510 = vmatmul.mubr.msk.f32.gmra.mrb[26].mxu0 %vm2942_vm4, %v8502_v46  ;;  %v8603_v13 = vld [vmem:[%s14518_s6 + $0x1d0] sm:$0xff]  ;;  %v10610_v46 = vunpack.i.h.bf16 %v10608_v61 }
 0x4eb   : > { %9195 = vmatpush1.bf16.msra.mxu1 %v9194_v57  ;;  %4248 = vmatprep.mubr.f32.mxu1 %v10975_v55  ;;  %v8604_v57 = vld [vmem:[%s14518_s6 + $0x1d8] sm:$0xff] }
 0x4ec   : > { %9197 = vmatprep.subr.bf16.mxu1 %v9196_v29  ;;  %3067 = vmatprep.mubr.f32.mxu0 %v10975_v55  ;;  %v9220_v44 = vpack.c.bf16 %v10620_v37, %v10610_v46  ;;  %v4572_v5 = vsel %vm2362_vm0, %v10609_v62, %v10610_v46  ;;  %v8618_v29 = vld [vmem:[%s14518_s6 + $0x208] sm:$0xff] }
 0x4ed   : > { %v9222_v50 = vpack.c.bf16 %v4573_v11, %v4572_v5  ;;  %v4764_v11 = vpop.permute.xlu0 %4763 }
 0x4ee   : > { %8594 = vmatmul.mubr.msk.f32.gmra.mrb[2].mxu1 %vm2942_vm4, %v8586_v21  ;;  %8511 = vmatmul.mubr.msk.f32.gmra.mrb[28].mxu0 %vm2942_vm4, %v8503_v54  ;;  %v8619_v21 = vld [vmem:[%s14518_s6 + $0x210] sm:$0xff]  ;;  %v8620_v54 = vld [vmem:[%s14518_s6 + $0x218] sm:$0xff] }
 0x4ef   : > { %9199 = vmatpush1.bf16.msra.mxu1 %v9198_v0  ;;  %4254 = vmatprep.mubr.f32.mxu1 %v10975_v55  ;;  %v8624_v0 = vld [vmem:[%s14518_s6 + $0x238] sm:$0xff] }
 0x4f0   : > { %9201 = vmatprep.subr.bf16.mxu1 %v9200_v6  ;;  %3073 = vmatprep.mubr.f32.mxu0 %v10975_v55 }
 0x4f2   : > { %8595 = vmatmul.mubr.msk.f32.gmra.mrb[4].mxu1 %vm2942_vm4, %v8587_v47  ;;  %8512 = vmatmul.mubr.msk.f32.gmra.mrb[30].mxu0 %vm2942_vm4, %v8504_v24 }
 0x4f3   : > { %9203 = vmatpush1.bf16.msra.mxu1 %v9202_v33  ;;  %4260 = vmatprep.mubr.f32.mxu1 %v10975_v55 }
 0x4f4   : > { %9205 = vmatprep.subr.bf16.mxu1 %v9204_v27  ;;  %5225 = vmatprep.mubr.f32.mxu0 %v10975_v55 }
 0x4f6   : > { %8596 = vmatmul.mubr.msk.f32.gmra.mrb[6].mxu1 %vm2942_vm4, %v8588_v14 }
 0x4f7   : > { %9207 = vmatpush1.bf16.msra.mxu1 %v9206_v10  ;;  %4266 = vmatprep.mubr.f32.mxu1 %v10975_v55  ;;  %v4807_v10 = vld [vmem:[%s14520_s8] sm:$0x3] }
 0x4f8   : > { %9209 = vmatprep.subr.bf16.mxu1 %v9208_v38  ;;  %v12633_v43 = vrot.slane %v4807_v10, %v11177_v19 }
 0x4fa   : > { %8597 = vmatmul.mubr.msk.f32.gmra.mrb[8].mxu1 %vm2942_vm4, %v8589_v39 }
 0x4fb   : > { %4272 = vmatprep.mubr.f32.mxu1 %v10975_v55 }
 0x4fe   : > { %8598 = vmatmul.mubr.msk.f32.gmra.mrb[10].mxu1 %vm2942_vm4, %v8590_v42 }
 0x4ff   : > { %4278 = vmatprep.mubr.f32.mxu1 %v10975_v55 }
 0x502   : > { %8599 = vmatmul.mubr.msk.f32.gmra.mrb[12].mxu1 %vm2942_vm4, %v8591_v63  ;;  %v12630_v63 = vrot.slane %v4807_v10, %v11173_v15 }
 0x503   : > { %4284 = vmatprep.mubr.f32.mxu1 %v10975_v55 }
 0x506   : > { %8600 = vmatmul.mubr.msk.f32.gmra.mrb[14].mxu1 %vm2942_vm4, %v8592_v31 }
 0x507   : > { %4460 = vmatprep.mubr.f32.mxu1 %v10975_v55 }
 0x50a   : > { %8609 = vmatmul.mubr.msk.f32.vlgmr.msra.gmra.mrb[0].mxu1 %vm2942_vm4, %v8601_v4 }
 0x50b   : > { %9211 = vmatpush1.bf16.msra.mxu1 %v9210_v41  ;;  %4466 = vmatprep.mubr.f32.mxu1 %v10975_v55 }
 0x50c   : > { %9213 = vmatprep.subr.bf16.mxu1 %v9212_v48 }
 0x50e   : > { %8610 = vmatmul.mubr.msk.f32.gmra.mrb[2].mxu1 %vm2942_vm4, %v8602_v52 }
 0x50f   : > { %9215 = vmatpush1.bf16.msra.mxu1 %v9214_v1  ;;  %4472 = vmatprep.mubr.f32.mxu1 %v10975_v55 }
 0x510   : > { %9217 = vmatprep.subr.bf16.mxu1 %v12361_v53  ;;  %v8607_v53 = vld [vmem:[%s14518_s6 + $0x1f0] sm:$0xff] }
 0x512   : > { %8611 = vmatmul.mubr.msk.f32.gmra.mrb[4].mxu1 %vm2942_vm4, %v8603_v13 }
 0x513   : > { %9219 = vmatpush1.bf16.msra.mxu1 %v9218_v20  ;;  %4478 = vmatprep.mubr.f32.mxu1 %v10975_v55  ;;  %v8608_v20 = vld [vmem:[%s14518_s6 + $0x1f8] sm:$0xff] }
 0x514   : > { %9221 = vmatprep.subr.bf16.mxu1 %v9220_v44 }
 0x516   : > { %8612 = vmatmul.mubr.msk.f32.gmra.mrb[6].mxu1 %vm2942_vm4, %v8604_v57 }
 0x517   : > { %9223 = vmatpush1.bf16.msra.mxu1 %v9222_v50  ;;  %4484 = vmatprep.mubr.f32.mxu1 %v10975_v55 }
 0x51a   : > { %8613 = vmatmul.mubr.msk.f32.gmra.mrb[8].mxu1 %vm2942_vm4, %v8605_v45 }
 0x51b   : > { %4490 = vmatprep.mubr.f32.mxu1 %v10975_v55 }
 0x51e   : > { %8614 = vmatmul.mubr.msk.f32.gmra.mrb[10].mxu1 %vm2942_vm4, %v8606_v8 }
 0x51f   : > { %4496 = vmatprep.mubr.f32.mxu1 %v10975_v55 }
 0x522   : > { %8615 = vmatmul.mubr.msk.f32.gmra.mrb[12].mxu1 %vm2942_vm4, %v8607_v53 }
 0x523   : > { %4502 = vmatprep.mubr.f32.mxu1 %v10975_v55 }
 0x526   : > { %8616 = vmatmul.mubr.msk.f32.gmra.mrb[14].mxu1 %vm2942_vm4, %v8608_v20 }
 0x527   : > { %4678 = vmatprep.mubr.f32.mxu1 %v10975_v55 }
 0x52a   : > { %8625 = vmatmul.mubr.msk.f32.vlgmr.msra.gmra.mrb[0].mxu1 %vm2942_vm4, %v8617_v16 }
 0x52b   : > { %4684 = vmatprep.mubr.f32.mxu1 %v10975_v55 }
 0x52e   : > { %8626 = vmatmul.mubr.msk.f32.gmra.mrb[2].mxu1 %vm2942_vm4, %v8618_v29 }
 0x52f   : > { %4690 = vmatprep.mubr.f32.mxu1 %v10975_v55 }
 0x532   : > { %8627 = vmatmul.mubr.msk.f32.gmra.mrb[4].mxu1 %vm2942_vm4, %v8619_v21 }
 0x533   : > { %4696 = vmatprep.mubr.f32.mxu1 %v10975_v55 }
 0x536   : > { %8628 = vmatmul.mubr.msk.f32.gmra.mrb[6].mxu1 %vm2942_vm4, %v8620_v54 }
 0x537   : > { %4702 = vmatprep.mubr.f32.mxu1 %v10975_v55 }
 0x53a   : > { %8629 = vmatmul.mubr.msk.f32.gmra.mrb[8].mxu1 %vm2942_vm4, %v8621_v3 }
 0x53b   : > { %4708 = vmatprep.mubr.f32.mxu1 %v10975_v55 }
 0x53e   : > { %8630 = vmatmul.mubr.msk.f32.gmra.mrb[10].mxu1 %vm2942_vm4, %v8622_v23 }
 0x53f   : > { %4714 = vmatprep.mubr.f32.mxu1 %v10975_v55 }
 0x542   : > { %8631 = vmatmul.mubr.msk.f32.gmra.mrb[12].mxu1 %vm2942_vm4, %v8623_v60 }
 0x543   : > { %4720 = vmatprep.mubr.f32.mxu1 %v10975_v55 }
 0x546   : > { %8632 = vmatmul.mubr.msk.f32.gmra.mrb[14].mxu1 %vm2942_vm4, %v8624_v0 }
 0x547   : > { %6311 = vmatprep.mubr.f32.mxu1 %v10975_v55 }
 0x5a9   : > { %v3033_v17 = vpop.f32.mrb[16].mxu0 }
 0x5aa   : > { %v3035_v22 = vpop.f32.mrb[17].mxu0 }
 0x5ad   : > { %v3039_v12 = vpop.f32.mrb[18].mxu0 }
 0x5ae   : > { %v3041_v6 = vpop.f32.mrb[19].mxu0 }
 0x5b1   : > { %v3045_v47 = vpop.f32.mrb[20].mxu0 }
 0x5b2   : > { %v3047_v24 = vpop.f32.mrb[21].mxu0 }
 0x5b5   : > { %v3051_v56 = vpop.f32.mrb[22].mxu0 }
 0x5b6   : > { %v3053_v28 = vpop.f32.mrb[23].mxu0 }
 0x5b9   : > { %v12610_v7 = vpop.f32.mrb[24].mxu0 }
 0x5ba   : > { %v12612_v33 = vpop.f32.mrb[25].mxu0 }
 0x5bd   : > { %v12614_v51 = vpop.f32.mrb[26].mxu0 }
 0x5be   : > { %v12616_v26 = vpop.f32.mrb[27].mxu0 }
 0x5c1   : > { %v12618_v27 = vpop.f32.mrb[28].mxu0 }
 0x5c2   : > { %v12620_v14 = vpop.f32.mrb[29].mxu0 }
 0x5c5   : > { %v12622_v2 = vpop.f32.mrb[30].mxu0 }
 0x5c6   : > { %v12624_v30 = vpop.f32.mrb[31].mxu0 }
 0x5fd   : > { %v4680_v38 = vpop.f32.mrb[0].mxu1 }
 0x5fe   : > { %v9746_v39 = vadd.f32 %v4680_v38, %v3033_v17  ;;  %v4682_v42 = vpop.f32.mrb[1].mxu1  ;;  %v4769_v17 = vpop.permute.xlu1 %4768 }
 0x5ff   : > { %v9747_v31 = vadd.f32 %v4682_v42, %v3035_v22 }
 0x600   : > { %v12635_v32 = vadd.f32 %v9746_v39, %v4754_v40 }
 0x601   : > { %v12637_v34 = vadd.f32 %v9747_v31, %v4754_v40  ;;  %v4686_v36 = vpop.f32.mrb[2].mxu1 }
 0x602   : > { %v9748_v4 = vadd.f32 %v4686_v36, %v3039_v12  ;;  %v4688_v35 = vpop.f32.mrb[3].mxu1  ;;  %v4876_v48 = vmul.f32 %v12635_v32, %v12635_v32  ;;  %v4819_v52 = vmul.f32 %v12633_v43, %v12635_v32 }
 0x603   : > { %v4877_v59 = vmul.f32 %v12637_v34, %v12637_v34  ;;  %v9749_v41 = vadd.f32 %v4688_v35, %v3041_v6  ;;  %v4820_v25 = vmul.f32 %v12630_v63, %v12637_v34 }
 0x604   : > { %v12645_v9 = vadd.f32 %v9748_v4, %v4759_v18  ;;  %v4892_v8 = vmul.f32 %v4876_v48, %v12633_v43 }
 0x605   : > { %v12649_v58 = vadd.f32 %v9749_v41, %v4759_v18  ;;  %v4692_v1 = vpop.f32.mrb[4].mxu1  ;;  %v4836_v61 = vsel %vm4835_vm14, %v4820_v25, 0.0  ;;  %v4893_v37 = vmul.f32 %v4877_v59, %v12630_v63  ;;  %v4774_v18 = vpop.permute.xlu0 %4773 }
 0x606   : > { %v4878_v49 = vmul.f32 %v12645_v9, %v12645_v9  ;;  %v9750_v13 = vadd.f32 %v4692_v1, %v3045_v47  ;;  %v4694_v46 = vpop.f32.mrb[5].mxu1  ;;  %v4837_v62 = vadd.f32 %v4836_v61, %v4819_v52  ;;  %v4821_v53 = vmul.f32 %v12633_v43, %v12645_v9 }
 0x607   : > { %v4879_v44 = vmul.f32 %v12649_v58, %v12649_v58  ;;  %v9751_v57 = vadd.f32 %v4694_v46, %v3047_v24  ;;  %v4908_v5 = vsel %vm4835_vm14, %v4893_v37, 0.0  ;;  %v4822_v50 = vmul.f32 %v12630_v63, %v12649_v58 }
 0x608   : > { %v12660_v45 = vadd.f32 %v9750_v13, %v4764_v11  ;;  %4838 = vadd.xlane.f32.xlu0 %v4837_v62  ;;  %v4909_v23 = vadd.f32 %v4908_v5, %v4892_v8  ;;  %v4894_v0 = vmul.f32 %v4878_v49, %v12633_v43 }
 0x609   : > { %v12665_v20 = vadd.f32 %v9751_v57, %v4764_v11  ;;  %v4698_v16 = vpop.f32.mrb[6].mxu1  ;;  %v4840_v29 = vsel %vm4835_vm14, %v4822_v50, 0.0  ;;  %v4895_v21 = vmul.f32 %v4879_v44, %v12630_v63  ;;  %v4779_v57 = vpop.permute.xlu1 %4778 }
 0x60a   : > { %v9752_v54 = vadd.f32 %v4698_v16, %v3051_v56  ;;  %v4700_v3 = vpop.f32.mrb[7].mxu1  ;;  %v4841_v60 = vadd.f32 %v4840_v29, %v4821_v53  ;;  %v4880_v24 = vmul.f32 %v12660_v45, %v12660_v45  ;;  %v4823_v56 = vmul.f32 %v12633_v43, %v12660_v45 }
 0x60b   : > { %v4881_v22 = vmul.f32 %v12665_v20, %v12665_v20  ;;  %v9753_v12 = vadd.f32 %v4700_v3, %v3053_v28  ;;  %v4912_v6 = vsel %vm4835_vm14, %v4895_v21, 0.0  ;;  %v4824_v47 = vmul.f32 %v12630_v63, %v12665_v20 }
 0x60c   : > { %v12677_v10 = vadd.f32 %v9752_v54, %v4769_v17  ;;  %4910 = vadd.xlane.f32.xlu0 %v4909_v23  ;;  %4842 = vadd.xlane.f32.xlu1 %v4841_v60  ;;  %v4913_v4 = vadd.f32 %v4912_v6, %v4894_v0 }
 0x60d   : > { %v12681_v38 = vadd.f32 %v9753_v12, %v4769_v17  ;;  %v4704_v39 = vpop.f32.mrb[8].mxu1  ;;  %v4844_v28 = vsel %vm4835_vm14, %v4824_v47, 0.0  ;;  %v4897_v42 = vmul.f32 %v4881_v22, %v12630_v63  ;;  %v4784_v12 = vpop.permute.xlu0 %4783 }
 0x60e   : > { %v4882_v40 = vmul.f32 %v12677_v10, %v12677_v10  ;;  %v9754_v31 = vadd.f32 %v4704_v39, %v12610_v7  ;;  %v4706_v36 = vpop.f32.mrb[9].mxu1  ;;  %v4845_v35 = vadd.f32 %v4844_v28, %v4823_v56  ;;  %v4896_v7 = vmul.f32 %v4880_v24, %v12633_v43 }
 0x60f   : > { %v4883_v59 = vmul.f32 %v12681_v38, %v12681_v38  ;;  %v9755_v41 = vadd.f32 %v4706_v36, %v12612_v33  ;;  %v4916_v25 = vsel %vm4835_vm14, %v4897_v42, 0.0  ;;  %v4826_v48 = vmul.f32 %v12630_v63, %v12681_v38 }
 0x610   : > { %v12694_v52 = vadd.f32 %v9754_v31, %v4774_v18  ;;  %4914 = vadd.xlane.f32.xlu0 %v4913_v4  ;;  %4846 = vadd.xlane.f32.xlu1 %v4845_v35  ;;  %v4825_v1 = vmul.f32 %v12633_v43, %v12677_v10  ;;  %v4917_v62 = vadd.f32 %v4916_v25, %v4896_v7 }
 0x611   : > { %v12699_v61 = vadd.f32 %v9755_v41, %v4774_v18  ;;  %v4710_v37 = vpop.f32.mrb[10].mxu1  ;;  %v4848_v49 = vsel %vm4835_vm14, %v4826_v48, 0.0  ;;  %v4899_v33 = vmul.f32 %v4883_v59, %v12630_v63  ;;  %v4898_v44 = vmul.f32 %v4882_v40, %v12633_v43  ;;  %v4789_v41 = vpop.permute.xlu1 %4788 }
 0x612   : > { %v9756_v13 = vadd.f32 %v4710_v37, %v12614_v51  ;;  %v4712_v46 = vpop.f32.mrb[11].mxu1  ;;  %v4849_v11 = vadd.f32 %v4848_v49, %v4825_v1  ;;  %v4884_v16 = vmul.f32 %v12694_v52, %v12694_v52  ;;  %v4827_v29 = vmul.f32 %v12633_v43, %v12694_v52 }
 0x613   : > { %v4885_v5 = vmul.f32 %v12699_v61, %v12699_v61  ;;  %v9757_v50 = vadd.f32 %v4712_v46, %v12616_v26  ;;  %v4920_v8 = vsel %vm4835_vm14, %v4899_v33, 0.0  ;;  %v4828_v53 = vmul.f32 %v12630_v63, %v12699_v61 }
 0x614   : > { %v12713_v51 = vadd.f32 %v9756_v13, %v4779_v57  ;;  %4918 = vadd.xlane.f32.xlu1 %v4917_v62  ;;  %4850 = vadd.xlane.f32.xlu0 %v4849_v11  ;;  %v4921_v17 = vadd.f32 %v4920_v8, %v4898_v44 }
 0x615   : > { %v12717_v21 = vadd.f32 %v9757_v50, %v4779_v57  ;;  %v4716_v54 = vpop.f32.mrb[12].mxu1  ;;  %v4852_v26 = vsel %vm4835_vm14, %v4828_v53, 0.0  ;;  %v4901_v3 = vmul.f32 %v4885_v5, %v12630_v63 }
 0x616   : > { %v4886_v23 = vmul.f32 %v12713_v51, %v12713_v51  ;;  %v9758_v60 = vadd.f32 %v4716_v54, %v12618_v27  ;;  %v4718_v0 = vpop.f32.mrb[13].mxu1  ;;  %v4853_v22 = vadd.f32 %v4852_v26, %v4827_v29  ;;  %v4900_v27 = vmul.f32 %v4884_v16, %v12633_v43 }
 0x617   : > { %v4887_v6 = vmul.f32 %v12717_v21, %v12717_v21  ;;  %v9759_v47 = vadd.f32 %v4718_v0, %v12620_v14  ;;  %v4924_v24 = vsel %vm4835_vm14, %v4901_v3, 0.0  ;;  %v4830_v56 = vmul.f32 %v12630_v63, %v12717_v21 }
 0x618   : > { %v12730_v39 = vadd.f32 %v9758_v60, %v4784_v12  ;;  %4922 = vadd.xlane.f32.xlu0 %v4921_v17  ;;  %4854 = vadd.xlane.f32.xlu1 %v4853_v22  ;;  %v4829_v28 = vmul.f32 %v12633_v43, %v12713_v51  ;;  %v4925_v35 = vadd.f32 %v4924_v24, %v4900_v27 }
 0x619   : > { %v12735_v42 = vadd.f32 %v9759_v47, %v4784_v12  ;;  %v4722_v40 = vpop.f32.mrb[14].mxu1  ;;  %v4856_v31 = vsel %vm4835_vm14, %v4830_v56, 0.0  ;;  %v4903_v14 = vmul.f32 %v4887_v6, %v12630_v63  ;;  %v4902_v59 = vmul.f32 %v4886_v23, %v12633_v43 }
 0x61a   : > { %v9760_v36 = vadd.f32 %v4722_v40, %v12622_v2  ;;  %v4724_v4 = vpop.f32.mrb[15].mxu1  ;;  %v4857_v18 = vadd.f32 %v4856_v31, %v4829_v28  ;;  %v4888_v37 = vmul.f32 %v12730_v39, %v12730_v39  ;;  %v4831_v49 = vmul.f32 %v12633_v43, %v12730_v39 }
 0x61b   : > { %v4889_v25 = vmul.f32 %v12735_v42, %v12735_v42  ;;  %v9761_v48 = vadd.f32 %v4724_v4, %v12624_v30  ;;  %v4928_v7 = vsel %vm4835_vm14, %v4903_v14, 0.0  ;;  %v4832_v1 = vmul.f32 %v12630_v63, %v12735_v42 }
 0x61c   : > { %v12749_v2 = vadd.f32 %v9760_v36, %v4789_v41  ;;  %4926 = vadd.xlane.f32.xlu1 %v4925_v35  ;;  %4858 = vadd.xlane.f32.xlu0 %v4857_v18  ;;  %v4929_v46 = vadd.f32 %v4928_v7, %v4902_v59  ;;  %v4904_v50 = vmul.f32 %v4888_v37, %v12633_v43 }
 0x61d   : > { %v12753_v33 = vadd.f32 %v9761_v48, %v4789_v41  ;;  %v4860_v13 = vsel %vm4835_vm14, %v4832_v1, 0.0  ;;  %v4905_v30 = vmul.f32 %v4889_v25, %v12630_v63 }
 0x61e   : > { %v4861_v62 = vadd.f32 %v4860_v13, %v4831_v49  ;;  %v4890_v5 = vmul.f32 %v12749_v2, %v12749_v2  ;;  %v4833_v8 = vmul.f32 %v12633_v43, %v12749_v2 }
 0x61f   : > { %v4891_v11 = vmul.f32 %v12753_v33, %v12753_v33  ;;  %v4932_v44 = vsel %vm4835_vm14, %v4905_v30, 0.0  ;;  %v4834_v57 = vmul.f32 %v12630_v63, %v12753_v33 }
 0x620   : > { %4930 = vadd.xlane.f32.xlu0 %v4929_v46  ;;  %4862 = vadd.xlane.f32.xlu1 %v4861_v62  ;;  %v4933_v29 = vadd.f32 %v4932_v44, %v4904_v50  ;;  %v4906_v3 = vmul.f32 %v4890_v5, %v12633_v43 }
 0x621   : > { %v4864_v53 = vsel %vm4835_vm14, %v4834_v57, 0.0  ;;  %v4907_v16 = vmul.f32 %v4891_v11, %v12630_v63 }
 0x622   : > { %v4865_v54 = vadd.f32 %v4864_v53, %v4833_v8 }
 0x623   : > { %v4936_v26 = vsel %vm4835_vm14, %v4907_v16, 0.0 }
 0x624   : > { %4934 = vadd.xlane.f32.xlu1 %v4933_v29  ;;  %4866 = vadd.xlane.f32.xlu0 %v4865_v54  ;;  %v4937_v23 = vadd.f32 %v4936_v26, %v4906_v3 }
 0x628   : > { %4938 = vadd.xlane.f32.xlu0 %v4937_v23 }
 0x695   : > { %v4839_v60 = vpop.xlane.xlu0 %4838 }
 0x696   : > { %v4868_v0 = vmul.f32 0.007936508, %v4839_v60 }
 0x698   : > { %v4948_v12 = vmul.f32 %v4868_v0, %v4868_v0  ;;  %v4972_v53 = vsub.f32 %v12635_v32, %v4868_v0  ;;  %v4973_v16 = vsub.f32 %v12637_v34, %v4868_v0 }
 0x699   : > { %v4911_v17 = vpop.xlane.xlu0 %4910  ;;  %v4843_v22 = vpop.xlane.xlu1 %4842 }
 0x69a   : > { %v4940_v6 = vmul.f32 0.007936508, %v4911_v17  ;;  %v12771_v47 = vmul.f32 0.007936508, %v4843_v22 }
 0x69c   : > { %v4956_v24 = vsub.f32 %v4940_v6, %v4948_v12  ;;  %v4949_v40 = vmul.f32 %v12771_v47, %v12771_v47  ;;  %v4974_v54 = vsub.f32 %v12645_v9, %v12771_v47  ;;  %v4975_v26 = vsub.f32 %v12649_v58, %v12771_v47 }
 0x69d   : > { %v4915_v63 = vpop.xlane.xlu0 %4914  ;;  %v4847_v56 = vpop.xlane.xlu1 %4846 }
 0x69e   : > { %v4964_v27 = vmax.f32 %v4956_v24, 0.0  ;;  %v4941_v28 = vmul.f32 0.007936508, %v4915_v63  ;;  %v12775_v31 = vmul.f32 0.007936508, %v4847_v56 }
 0x6a0   : > { %v4988_v43 = vadd.f32 1e-05, %v4964_v27  ;;  %v4957_v14 = vsub.f32 %v4941_v28, %v4949_v40  ;;  %v4950_v36 = vmul.f32 %v12775_v31, %v12775_v31  ;;  %v4976_v22 = vsub.f32 %v12660_v45, %v12775_v31 }
 0x6a1   : > { %v4919_v4 = vpop.xlane.xlu1 %4918  ;;  %v4851_v35 = vpop.xlane.xlu0 %4850  ;;  %v4977_v58 = vsub.f32 %v12665_v20, %v12775_v31 }
 0x6a2   : > { %10877 = vrsqrt.f32 %v4988_v43  ;;  %v4965_v18 = vmax.f32 %v4957_v14, 0.0  ;;  %v4942_v59 = vmul.f32 0.007936508, %v4919_v4  ;;  %v12779_v41 = vmul.f32 0.007936508, %v4851_v35 }
 0x6a4   : > { %v4989_v25 = vadd.f32 1e-05, %v4965_v18  ;;  %v4958_v48 = vsub.f32 %v4942_v59, %v4950_v36  ;;  %v4951_v7 = vmul.f32 %v12779_v41, %v12779_v41  ;;  %v4978_v45 = vsub.f32 %v12677_v10, %v12779_v41 }
 0x6a5   : > { %v4923_v1 = vpop.xlane.xlu0 %4922  ;;  %v4855_v37 = vpop.xlane.xlu1 %4854  ;;  %v4979_v10 = vsub.f32 %v12681_v38, %v12779_v41 }
 0x6a6   : > { %10879 = vrsqrt.f32 %v4989_v25  ;;  %v4966_v49 = vmax.f32 %v4958_v48, 0.0  ;;  %v4943_v13 = vmul.f32 0.007936508, %v4923_v1  ;;  %v12783_v30 = vmul.f32 0.007936508, %v4855_v37 }
 0x6a8   : > { %v4990_v46 = vadd.f32 1e-05, %v4966_v49  ;;  %v4959_v62 = vsub.f32 %v4943_v13, %v4951_v7  ;;  %v4952_v11 = vmul.f32 %v12783_v30, %v12783_v30  ;;  %v4980_v7 = vsub.f32 %v12694_v52, %v12783_v30 }
 0x6a9   : > { %v4927_v44 = vpop.xlane.xlu1 %4926  ;;  %v4859_v57 = vpop.xlane.xlu0 %4858 }
 0x6aa   : > { %10881 = vrsqrt.f32 %v4990_v46  ;;  %v4967_v5 = vmax.f32 %v4959_v62, 0.0  ;;  %v4944_v50 = vmul.f32 0.007936508, %v4927_v44  ;;  %v12787_v8 = vmul.f32 0.007936508, %v4859_v57 }
 0x6ac   : > { %v10878_v29 = vpop.eup %10877  ;;  %v4991_v3 = vadd.f32 1e-05, %v4967_v5  ;;  %v4960_v23 = vsub.f32 %v4944_v50, %v4952_v11  ;;  %v4953_v12 = vmul.f32 %v12787_v8, %v12787_v8 }
 0x6ad   : > { %v5004_v60 = vmul.f32 %v10878_v29, %v4972_v53  ;;  %v5005_v17 = vmul.f32 %v10878_v29, %v4973_v16  ;;  %v4931_v32 = vpop.xlane.xlu0 %4930  ;;  %v4863_v6 = vpop.xlane.xlu1 %4862 }
 0x6ae   : > { %10883 = vrsqrt.f32 %v4991_v3  ;;  %v4968_v34 = vmax.f32 %v4960_v23, 0.0  ;;  %v4945_v0 = vmul.f32 0.007936508, %v4931_v32  ;;  %v12799_v24 = vmul.f32 0.007936508, %v4863_v6 }
 0x6af   : > { %v5036_v9 = vmul.f32 0.01, %v5004_v60  ;;  %v5037_v63 = vmul.f32 0.01, %v5005_v17  ;;  %vm5020_vm15 = vcmp.ge.f32.partialorder %v5004_v60, 0.0  ;;  %vm5021_vm0 = vcmp.ge.f32.partialorder %v5005_v17, 0.0 }
 0x6b0   : > { %v10880_v47 = vpop.eup %10879  ;;  %v4992_v56 = vadd.f32 1e-05, %v4968_v34  ;;  %v4961_v27 = vsub.f32 %v4945_v0, %v4953_v12  ;;  %v4954_v43 = vmul.f32 %v12799_v24, %v12799_v24  ;;  %v4981_v23 = vsub.f32 %v12699_v61, %v12783_v30 }
 0x6b1   : > { %v5006_v28 = vmul.f32 %v10880_v47, %v4974_v54  ;;  %v5007_v40 = vmul.f32 %v10880_v47, %v4975_v26  ;;  %v4935_v14 = vpop.xlane.xlu1 %4934  ;;  %v4867_v36 = vpop.xlane.xlu0 %4866  ;;  %v12807_v4 = vsel %vm5020_vm15, %v5004_v60, %v5036_v9  ;;  %v12813_v25 = vsel %vm5021_vm0, %v5005_v17, %v5037_v63 }
 0x6b2   : > { %10885 = vrsqrt.f32 %v4992_v56  ;;  %v4969_v35 = vmax.f32 %v4961_v27, 0.0  ;;  %v4946_v20 = vmul.f32 0.007936508, %v4935_v14  ;;  %v12809_v31 = vmul.f32 0.007936508, %v4867_v36 }
 0x6b3   : > { %v5038_v18 = vmul.f32 0.01, %v5006_v28  ;;  %v5039_v59 = vmul.f32 0.01, %v5007_v40  ;;  %vm5022_vm5 = vcmp.ge.f32.partialorder %v5006_v28, 0.0  ;;  %v12819_v46 = vpack.i.bf16 %v12813_v25, %v12807_v4 }
 0x6b4   : > { %v10882_v48 = vpop.eup %10881  ;;  %v4993_v1 = vadd.f32 1e-05, %v4969_v35  ;;  %v4962_v37 = vsub.f32 %v4946_v20, %v4954_v43  ;;  %v4955_v62 = vmul.f32 %v12809_v31, %v12809_v31  ;;  %vm5023_vm6 = vcmp.ge.f32.partialorder %v5007_v40, 0.0 }
 0x6b5   : > { %v5008_v49 = vmul.f32 %v10882_v48, %v4976_v22  ;;  %v5009_v13 = vmul.f32 %v10882_v48, %v4977_v58  ;;  %v4939_v11 = vpop.xlane.xlu0 %4938  ;;  %10622 = vrot.lane.b32.xlu1 %v12819_v46, %s14589_s24  ;;  %v12825_v52 = vsel %vm5022_vm5, %v5006_v28, %v5038_v18  ;;  %v12827_v5 = vsel %vm5023_vm6, %v5007_v40, %v5039_v59 }
 0x6b6   : > { %10887 = vrsqrt.f32 %v4993_v1  ;;  %v4970_v38 = vmax.f32 %v4962_v37, 0.0  ;;  %v4947_v41 = vmul.f32 0.007936508, %v4939_v11  ;;  %v12831_v29 = vpack.i.bf16 %v12827_v5, %v12825_v52 }
 0x6b7   : > { %v5040_v44 = vmul.f32 0.01, %v5008_v49  ;;  %v5041_v57 = vmul.f32 0.01, %v5009_v13  ;;  %vm5024_vm7 = vcmp.ge.f32.partialorder %v5008_v49, 0.0  ;;  %vm5025_vm1 = vcmp.ge.f32.partialorder %v5009_v13, 0.0 }
 0x6b8   : > { %v10884_v50 = vpop.eup %10883  ;;  %v4994_v53 = vadd.f32 1e-05, %v4970_v38  ;;  %v4963_v16 = vsub.f32 %v4947_v41, %v4955_v62  ;;  %10627 = vrot.lane.b32.xlu0 %v12831_v29, %s14589_s24  ;;  %v4982_v63 = vsub.f32 %v12713_v51, %v12787_v8  ;;  %v4983_v58 = vsub.f32 %v12717_v21, %v12787_v8 }
 0x6b9   : > { %v5010_v54 = vmul.f32 %v10884_v50, %v4978_v45  ;;  %v5011_v26 = vmul.f32 %v10884_v50, %v4979_v10  ;;  %v12833_v3 = vsel %vm5024_vm7, %v5008_v49, %v5040_v44  ;;  %v12839_v17 = vsel %vm5025_vm1, %v5009_v13, %v5041_v57 }
 0x6ba   : > { %10889 = vrsqrt.f32 %v4994_v53  ;;  %v4971_v60 = vmax.f32 %v4963_v16, 0.0  ;;  %v12843_v32 = vpack.i.bf16 %v12839_v17, %v12833_v3  ;;  %v4984_v21 = vsub.f32 %v12730_v39, %v12799_v24 }
 0x6bb   : > { %v5042_v22 = vmul.f32 0.01, %v5010_v54  ;;  %v5043_v12 = vmul.f32 0.01, %v5011_v26  ;;  %vm5026_vm2 = vcmp.ge.f32.partialorder %v5010_v54, 0.0  ;;  %vm5027_vm3 = vcmp.ge.f32.partialorder %v5011_v26, 0.0 }
 0x6bc   : > { %v10886_v6 = vpop.eup %10885  ;;  %v4995_v34 = vadd.f32 1e-05, %v4971_v60  ;;  %10632 = vrot.lane.b32.xlu1 %v12843_v32, %s14589_s24  ;;  %v4985_v8 = vsub.f32 %v12735_v42, %v12799_v24  ;;  %v4986_v42 = vsub.f32 %v12749_v2, %v12809_v31  ;;  %v4987_v24 = vsub.f32 %v12753_v33, %v12809_v31 }
 0x6bd   : > { %v5012_v0 = vmul.f32 %v10886_v6, %v4980_v7  ;;  %v5013_v9 = vmul.f32 %v10886_v6, %v4981_v23  ;;  %v12847_v61 = vsel %vm5026_vm2, %v5010_v54, %v5042_v22  ;;  %v12849_v30 = vsel %vm5027_vm3, %v5011_v26, %v5043_v12  ;;  %v6032_v22 = vld [vmem:[%s14522_s10 + $0x8] sm:$0xff]  ;;  %v6034_v12 = vld [vmem:[%s14522_s10 + $0x18] sm:$0xff] }
 0x6be   : > { %10891 = vrsqrt.f32 %v4995_v34  ;;  %v12857_v47 = vpack.i.bf16 %v12849_v30, %v12847_v61  ;;  %v9240_v38 = vpack.c.bf16 %v12827_v5, %v12813_v25  ;;  %v9242_v41 = vpack.c.bf16 %v12825_v52, %v12807_v4  ;;  %v8635_v4 = vld [vmem:[%s14521_s9 + $0x30] sm:$0xff] }
 0x6bf   : > { %v5044_v45 = vmul.f32 0.01, %v5012_v0  ;;  %v5045_v56 = vmul.f32 0.01, %v5013_v9  ;;  %vm5028_vm14 = vcmp.ge.f32.partialorder %v5012_v0, 0.0  ;;  %vm5029_vm15 = vcmp.ge.f32.partialorder %v5013_v9, 0.0 }
 0x6c0   : > { %v10888_v27 = vpop.eup %10887  ;;  %10637 = vrot.lane.b32.xlu1 %v12857_v47, %s14589_s24  ;;  %v9244_v50 = vpack.c.bf16 %v12849_v30, %v12839_v17  ;;  %v9246_v53 = vpack.c.bf16 %v12847_v61, %v12833_v3  ;;  %v8636_v3 = vld [vmem:[%s14521_s9 + $0x38] sm:$0xff] }
 0x6c1   : > { %v5014_v28 = vmul.f32 %v10888_v27, %v4982_v63  ;;  %v5015_v40 = vmul.f32 %v10888_v27, %v4983_v58  ;;  %v12861_v43 = vsel %vm5028_vm14, %v5012_v0, %v5044_v45  ;;  %v12863_v51 = vsel %vm5029_vm15, %v5013_v9, %v5045_v56 }
 0x6c2   : > { %v12871_v14 = vpack.i.bf16 %v12863_v51, %v12861_v43 }
 0x6c3   : > { %v5046_v36 = vmul.f32 0.01, %v5014_v28  ;;  %v5047_v35 = vmul.f32 0.01, %v5015_v40  ;;  %vm5030_vm0 = vcmp.ge.f32.partialorder %v5014_v28, 0.0  ;;  %vm5031_vm5 = vcmp.ge.f32.partialorder %v5015_v40, 0.0 }
 0x6c4   : > { %v10890_v20 = vpop.eup %10889  ;;  %10642 = vrot.lane.b32.xlu0 %v12871_v14, %s14589_s24 }
 0x6c5   : > { %v5016_v18 = vmul.f32 %v10890_v20, %v4984_v21  ;;  %v5017_v59 = vmul.f32 %v10890_v20, %v4985_v8  ;;  %v12875_v10 = vsel %vm5030_vm0, %v5014_v28, %v5046_v36  ;;  %v12877_v39 = vsel %vm5031_vm5, %v5015_v40, %v5047_v35 }
 0x6c6   : > { %v10646_v48 = vpack.i.bf16 %v12877_v39, %v12875_v10  ;;  %v9248_v54 = vpack.c.bf16 %v12877_v39, %v12863_v51  ;;  %v9250_v26 = vpack.c.bf16 %v12875_v10, %v12861_v43 }
 0x6c7   : > { %v5048_v7 = vmul.f32 0.01, %v5016_v18  ;;  %v5049_v1 = vmul.f32 0.01, %v5017_v59  ;;  %vm5032_vm6 = vcmp.ge.f32.partialorder %v5016_v18, 0.0  ;;  %vm5033_vm7 = vcmp.ge.f32.partialorder %v5017_v59, 0.0 }
 0x6c8   : > { %v10892_v37 = vpop.eup %10891  ;;  %10647 = vrot.lane.b32.xlu1 %v10646_v48, %s14589_s24 }
 0x6c9   : > { %v5018_v49 = vmul.f32 %v10892_v37, %v4986_v42  ;;  %v5019_v13 = vmul.f32 %v10892_v37, %v4987_v24  ;;  %v12886_v62 = vsel %vm5032_vm6, %v5016_v18, %v5048_v7  ;;  %v12888_v11 = vsel %vm5033_vm7, %v5017_v59, %v5049_v1 }
 0x6ca   : > { %v10651_v2 = vpack.i.bf16 %v12888_v11, %v12886_v62 }
 0x6cb   : > { %v5050_v33 = vmul.f32 0.01, %v5018_v49  ;;  %v5051_v31 = vmul.f32 0.01, %v5019_v13  ;;  %vm5034_vm1 = vcmp.ge.f32.partialorder %v5018_v49, 0.0  ;;  %vm5035_vm2 = vcmp.ge.f32.partialorder %v5019_v13, 0.0 }
 0x6cc   : > { %10652 = vrot.lane.b32.xlu0 %v10651_v2, %s14589_s24 }
 0x6cd   : > { %v12897_v44 = vsel %vm5034_vm1, %v5018_v49, %v5050_v33  ;;  %v12899_v57 = vsel %vm5035_vm2, %v5019_v13, %v5051_v31 }
 0x6ce   : > { %v10656_v16 = vpack.i.bf16 %v12899_v57, %v12897_v44  ;;  %v9252_v23 = vpack.c.bf16 %v12899_v57, %v12888_v11  ;;  %v9254_v60 = vpack.c.bf16 %v12897_v44, %v12886_v62  ;;  %v5068_v11 = vld [vmem:[%s14521_s9] sm:$0xff] }
 0x6d0   : > { %10662 = vrot.lane.b32.xlu0 %v12819_v46, %s14583_s2  ;;  %10657 = vrot.lane.b32.xlu1 %v10656_v16, %s14589_s24 }
 0x6d4   : > { %10672 = vrot.lane.b32.xlu0 %v12843_v32, %s14583_s2  ;;  %10667 = vrot.lane.b32.xlu1 %v12831_v29, %s14583_s2 }
 0x6d8   : > { %10682 = vrot.lane.b32.xlu0 %v12871_v14, %s14583_s2  ;;  %10677 = vrot.lane.b32.xlu1 %v12857_v47, %s14583_s2 }
 0x6dc   : > { %10692 = vrot.lane.b32.xlu0 %v10651_v2, %s14583_s2  ;;  %10687 = vrot.lane.b32.xlu1 %v10646_v48, %s14583_s2 }
 0x6e0   : > { %10697 = vrot.lane.b32.xlu0 %v12819_v46, %s14584_s4  ;;  %10702 = vrot.lane.b32.xlu1 %v10656_v16, %s14583_s2 }
 0x6e4   : > { %10712 = vrot.lane.b32.xlu0 %v12843_v32, %s14584_s4  ;;  %10707 = vrot.lane.b32.xlu1 %v12831_v29, %s14584_s4 }
 0x6e8   : > { %10722 = vrot.lane.b32.xlu0 %v12871_v14, %s14584_s4  ;;  %10717 = vrot.lane.b32.xlu1 %v12857_v47, %s14584_s4 }
 0x6ec   : > { %10732 = vrot.lane.b32.xlu0 %v10651_v2, %s14584_s4  ;;  %10727 = vrot.lane.b32.xlu1 %v10646_v48, %s14584_s4 }
 0x6f0   : > { %10737 = vrot.lane.b32.xlu0 %v12819_v46, %s14585_s23  ;;  %10742 = vrot.lane.b32.xlu1 %v10656_v16, %s14584_s4 }
 0x6f4   : > { %10752 = vrot.lane.b32.xlu0 %v12843_v32, %s14585_s23  ;;  %10747 = vrot.lane.b32.xlu1 %v12831_v29, %s14585_s23 }
 0x6f8   : > { %10762 = vrot.lane.b32.xlu0 %v12871_v14, %s14585_s23  ;;  %10757 = vrot.lane.b32.xlu1 %v12857_v47, %s14585_s23 }
 0x6fc   : > { %10772 = vrot.lane.b32.xlu0 %v10651_v2, %s14585_s23  ;;  %10767 = vrot.lane.b32.xlu1 %v10646_v48, %s14585_s23 }
 0x700   : > { %10777 = vrot.lane.b32.xlu0 %v12819_v46, %s14586_s27  ;;  %10782 = vrot.lane.b32.xlu1 %v10656_v16, %s14585_s23  ;;  %v6031_v46 = vld [vmem:[%s14522_s10] sm:$0xff] }
 0x704   : > { %10792 = vrot.lane.b32.xlu0 %v12843_v32, %s14586_s27  ;;  %10787 = vrot.lane.b32.xlu1 %v12831_v29, %s14586_s27  ;;  %v6033_v29 = vld [vmem:[%s14522_s10 + $0x10] sm:$0xff] }
 0x708   : > { %10802 = vrot.lane.b32.xlu0 %v12871_v14, %s14586_s27  ;;  %10797 = vrot.lane.b32.xlu1 %v12857_v47, %s14586_s27 }
 0x70c   : > { %10812 = vrot.lane.b32.xlu0 %v10651_v2, %s14586_s27  ;;  %10807 = vrot.lane.b32.xlu1 %v10646_v48, %s14586_s27 }
 0x710   : > { %6037 = vperm.xlu0 %10138, %v6031_v46   ;;  %10817 = vrot.lane.b32.xlu1 %v10656_v16, %s14586_s27 }
 0x714   : > { %6047 = vperm.xlu0 %10138, %v6033_v29   ;;  %6042 = vperm.xlu1 %10140, %v6032_v22  }
 0x718   : > { %6052 = vperm.xlu1 %10140, %v6034_v12  }
 0x727   : > { %v10623_v32 = vpop.permute.xlu1 %10622 }
 0x728   : > { %v10625_v6 = vunpack.i.h.bf16 %v10623_v32  ;;  %v10624_v34 = vunpack.i.l.bf16 %v10623_v32 }
 0x72a   : > { %v10628_v0 = vpop.permute.xlu0 %10627  ;;  %v5125_v58 = vsel %vm903_vm8, %v10624_v34, %v10625_v6 }
 0x72b   : > { %v10630_v9 = vunpack.i.h.bf16 %v10628_v0  ;;  %v10629_v63 = vunpack.i.l.bf16 %v10628_v0 }
 0x72d   : > { %v9224_v47 = vpack.c.bf16 %v10630_v9, %v10625_v6  ;;  %v5126_v45 = vsel %vm903_vm8, %v10629_v63, %v10630_v9 }
 0x72e   : > { %v10633_v56 = vpop.permute.xlu1 %10632  ;;  %v9226_v27 = vpack.c.bf16 %v5126_v45, %v5125_v58  ;;  %v8633_v58 = vld [vmem:[%s14521_s9 + $0x20] sm:$0xff] }
 0x72f   : > { %9225 = vmatprep.subr.bf16.mxu0 %v9224_v47  ;;  %v10635_v28 = vunpack.i.h.bf16 %v10633_v56  ;;  %v10634_v40 = vunpack.i.l.bf16 %v10633_v56  ;;  %v8634_v56 = vld [vmem:[%s14521_s9 + $0x28] sm:$0xff] }
 0x730   : > { %9227 = vmatpush1.bf16.msra.mxu0 %v9226_v27 }
 0x731   : > { %v5127_v36 = vsel %vm903_vm8, %v10634_v40, %v10635_v28 }
 0x732   : > { %v10638_v21 = vpop.permute.xlu1 %10637 }
 0x733   : > { %v10640_v8 = vunpack.i.h.bf16 %v10638_v21  ;;  %v10639_v14 = vunpack.i.l.bf16 %v10638_v21  ;;  %v5069_v21 = vld [vmem:[%s14521_s9 + $0x8] sm:$0xff] }
 0x735   : > { %v5128_v35 = vsel %vm903_vm8, %v10639_v14, %v10640_v8  ;;  %v9228_v20 = vpack.c.bf16 %v10640_v8, %v10635_v28 }
 0x736   : > { %v10643_v18 = vpop.permute.xlu0 %10642  ;;  %v9230_v59 = vpack.c.bf16 %v5128_v35, %v5127_v36 }
 0x737   : > { %9229 = vmatprep.subr.bf16.mxu0 %v9228_v20  ;;  %v10645_v42 = vunpack.i.h.bf16 %v10643_v18  ;;  %v10644_v24 = vunpack.i.l.bf16 %v10643_v18 }
 0x738   : > { %9231 = vmatpush1.bf16.msra.mxu0 %v9230_v59 }
 0x739   : > { %v5129_v37 = vsel %vm903_vm8, %v10644_v24, %v10645_v42 }
 0x73a   : > { %v10648_v48 = vpop.permute.xlu1 %10647 }
 0x73b   : > { %v10650_v7 = vunpack.i.h.bf16 %v10648_v48  ;;  %v10649_v1 = vunpack.i.l.bf16 %v10648_v48 }
 0x73d   : > { %v5130_v49 = vsel %vm903_vm8, %v10649_v1, %v10650_v7  ;;  %v9232_v13 = vpack.c.bf16 %v10650_v7, %v10645_v42  ;;  %v5070_v7 = vld [vmem:[%s14521_s9 + $0x10] sm:$0xff] }
 0x73e   : > { %v9234_v2 = vpack.c.bf16 %v5130_v49, %v5129_v37  ;;  %v10653_v33 = vpop.permute.xlu0 %10652 }
 0x73f   : > { %9233 = vmatprep.subr.bf16.mxu0 %v9232_v13  ;;  %v10655_v31 = vunpack.i.h.bf16 %v10653_v33  ;;  %v10654_v16 = vunpack.i.l.bf16 %v10653_v33 }
 0x740   : > { %9235 = vmatpush1.bf16.msra.mxu0 %v9234_v2 }
 0x741   : > { %v5131_v32 = vsel %vm903_vm8, %v10654_v16, %v10655_v31 }
 0x742   : > { %v10658_v46 = vpop.permute.xlu1 %10657  ;;  %v10663_v29 = vpop.permute.xlu0 %10662 }
 0x743   : > { %v10660_v22 = vunpack.i.h.bf16 %v10658_v46  ;;  %v10659_v12 = vunpack.i.l.bf16 %v10658_v46  ;;  %v10665_v61 = vunpack.i.h.bf16 %v10663_v29  ;;  %v10664_v51 = vunpack.i.l.bf16 %v10663_v29 }
 0x745   : > { %v5132_v6 = vsel %vm903_vm8, %v10659_v12, %v10660_v22  ;;  %v9236_v34 = vpack.c.bf16 %v10660_v22, %v10655_v31  ;;  %v5388_v57 = vsel %vm1216_vm10, %v10664_v51, %v10665_v61  ;;  %v5071_v22 = vld [vmem:[%s14521_s9 + $0x18] sm:$0xff]  ;;  %v8646_v51 = vld [vmem:[%s14521_s9 + $0x48] sm:$0xff] }
 0x746   : > { %v9238_v0 = vpack.c.bf16 %v5132_v6, %v5131_v32  ;;  %v10668_v9 = vpop.permute.xlu1 %10667  ;;  %v10673_v63 = vpop.permute.xlu0 %10672 }
 0x747   : > { %9237 = vmatprep.subr.bf16.mxu0 %v9236_v34  ;;  %v10670_v30 = vunpack.i.h.bf16 %v10668_v9 }
 0x748   : > { %9239 = vmatpush1.bf16.msra.mxu0 %v9238_v0 }
 0x749   : > { %9241 = vmatprep.subr.bf16.mxu0 %v9240_v38  ;;  %v10669_v38 = vunpack.i.l.bf16 %v10668_v9  ;;  %v9256_v43 = vpack.c.bf16 %v10670_v30, %v10665_v61 }
 0x74a   : > { %v10678_v47 = vpop.permute.xlu1 %10677  ;;  %v12994_v45 = vpop.permute.xlu0 %10682 }
 0x74b   : > { %8637 = vmatmul.mubr.msk.f32.vlgmr.msra.gmra.mrb[32].mxu0 %vm2942_vm4, %v8633_v58  ;;  %v10680_v10 = vunpack.i.h.bf16 %v10678_v47  ;;  %v10685_v14 = vunpack.i.h.bf16 %v12994_v45  ;;  %v10684_v36 = vunpack.i.l.bf16 %v12994_v45  ;;  %v8645_v45 = vld [vmem:[%s14521_s9 + $0x40] sm:$0xff] }
 0x74c   : > { %9243 = vmatpush1.bf16.msra.mxu0 %v9242_v41  ;;  %5231 = vmatprep.mubr.f32.mxu0 %v10975_v55 }
 0x74d   : > { %9245 = vmatprep.subr.bf16.mxu0 %v9244_v50  ;;  %v5389_v50 = vsel %vm1216_vm10, %v10669_v38, %v10670_v30  ;;  %v5392_v1 = vsel %vm1216_vm10, %v10684_v36, %v10685_v14  ;;  %v8648_v36 = vld [vmem:[%s14521_s9 + $0x58] sm:$0xff] }
 0x74e   : > { %v10688_v25 = vpop.permute.xlu1 %10687  ;;  %v13007_v5 = vpop.permute.xlu0 %10692 }
 0x74f   : > { %8638 = vmatmul.mubr.msk.f32.gmra.mrb[34].mxu0 %vm2942_vm4, %v8634_v56  ;;  %v10690_v44 = vunpack.i.h.bf16 %v10688_v25  ;;  %v10695_v37 = vunpack.i.h.bf16 %v13007_v5  ;;  %v10694_v49 = vunpack.i.l.bf16 %v13007_v5 }
 0x750   : > { %9247 = vmatpush1.bf16.msra.mxu0 %v9246_v53  ;;  %5237 = vmatprep.mubr.f32.mxu0 %v10975_v55  ;;  %v10679_v53 = vunpack.i.l.bf16 %v10678_v47 }
 0x751   : > { %9249 = vmatprep.subr.bf16.mxu0 %v9248_v54  ;;  %v10675_v54 = vunpack.i.h.bf16 %v10673_v63  ;;  %v9264_v42 = vpack.c.bf16 %v10690_v44, %v10685_v14  ;;  %v5394_v12 = vsel %vm1216_vm10, %v10694_v49, %v10695_v37 }
 0x752   : > { %v10703_v52 = vpop.permute.xlu1 %10702  ;;  %v13020_v17 = vpop.permute.xlu0 %10697  ;;  %v5391_v40 = vsel %vm1216_vm10, %v10679_v53, %v10680_v10 }
 0x753   : > { %8639 = vmatmul.mubr.msk.f32.gmra.mrb[36].mxu0 %vm2942_vm4, %v8635_v4  ;;  %v9260_v62 = vpack.c.bf16 %v10680_v10, %v10675_v54  ;;  %v10705_v24 = vunpack.i.h.bf16 %v10703_v52  ;;  %v10704_v48 = vunpack.i.l.bf16 %v10703_v52  ;;  %v10700_v32 = vunpack.i.h.bf16 %v13020_v17 }
 0x754   : > { %9251 = vmatpush1.bf16.msra.mxu0 %v9250_v26  ;;  %5243 = vmatprep.mubr.f32.mxu0 %v10975_v55  ;;  %v10674_v26 = vunpack.i.l.bf16 %v10673_v63  ;;  %v10699_v6 = vunpack.i.l.bf16 %v13020_v17 }
 0x755   : > { %9253 = vmatprep.subr.bf16.mxu0 %v9252_v23  ;;  %v9258_v23 = vpack.c.bf16 %v5389_v50, %v5388_v57  ;;  %v5395_v33 = vsel %vm1216_vm10, %v10704_v48, %v10705_v24  ;;  %v9268_v31 = vpack.c.bf16 %v10705_v24, %v10695_v37  ;;  %v8653_v37 = vld [vmem:[%s14521_s9 + $0x60] sm:$0xff] }
 0x756   : > { %v13033_v39 = vpop.permute.xlu1 %10707  ;;  %v13035_v41 = vpop.permute.xlu0 %10712  ;;  %v5390_v8 = vsel %vm1216_vm10, %v10674_v26, %v10675_v54  ;;  %v9270_v34 = vpack.c.bf16 %v5395_v33, %v5394_v12  ;;  %v5558_v56 = vsel %vm1407_vm11, %v10699_v6, %v10700_v32 }
 0x757   : > { %8640 = vmatmul.mubr.msk.f32.gmra.mrb[38].mxu0 %vm2942_vm4, %v8636_v3  ;;  %v9262_v35 = vpack.c.bf16 %v5391_v40, %v5390_v8  ;;  %v10710_v16 = vunpack.i.h.bf16 %v13033_v39  ;;  %v10709_v46 = vunpack.i.l.bf16 %v13033_v39  ;;  %v10714_v5 = vunpack.i.l.bf16 %v13035_v41 }
 0x758   : > { %9255 = vmatpush1.bf16.msra.mxu0 %v9254_v60  ;;  %5326 = vmatprep.mubr.f32.mxu0 %v10975_v55  ;;  %v10689_v60 = vunpack.i.l.bf16 %v10688_v25  ;;  %v10715_v25 = vunpack.i.h.bf16 %v13035_v41 }
 0x759   : > { %9257 = vmatprep.subr.bf16.mxu0 %v9256_v43  ;;  %v5559_v9 = vsel %vm1407_vm11, %v10709_v46, %v10710_v16  ;;  %v9272_v63 = vpack.c.bf16 %v10710_v16, %v10700_v32  ;;  %v8654_v32 = vld [vmem:[%s14521_s9 + $0x68] sm:$0xff] }
 0x75a   : > { %v13047_v27 = vpop.permute.xlu1 %10717  ;;  %v13049_v28 = vpop.permute.xlu0 %10722  ;;  %v5393_v59 = vsel %vm1216_vm10, %v10689_v60, %v10690_v44  ;;  %v9274_v4 = vpack.c.bf16 %v5559_v9, %v5558_v56  ;;  %v5560_v39 = vsel %vm1407_vm11, %v10714_v5, %v10715_v25 }
 0x75b   : > { %8641 = vmatmul.mubr.msk.f32.vlgmr.msra.gmra.mrb[32].mxu0 %vm2942_vm4, %v5068_v11  ;;  %v9266_v13 = vpack.c.bf16 %v5393_v59, %v5392_v1  ;;  %v10720_v58 = vunpack.i.h.bf16 %v13047_v27  ;;  %v10719_v47 = vunpack.i.l.bf16 %v13047_v27  ;;  %v10725_v41 = vunpack.i.h.bf16 %v13049_v28 }
 0x75c   : > { %9259 = vmatpush1.bf16.msra.mxu0 %v9258_v23  ;;  %5332 = vmatprep.mubr.f32.mxu0 %v10975_v55  ;;  %v10724_v50 = vunpack.i.l.bf16 %v13049_v28  ;;  %v8647_v23 = vld [vmem:[%s14521_s9 + $0x50] sm:$0xff] }
 0x75d   : > { %9261 = vmatprep.subr.bf16.mxu0 %v9260_v62  ;;  %v5561_v30 = vsel %vm1407_vm11, %v10719_v47, %v10720_v58  ;;  %v9276_v38 = vpack.c.bf16 %v10720_v58, %v10715_v25  ;;  %v8655_v25 = vld [vmem:[%s14521_s9 + $0x70] sm:$0xff] }
 0x75e   : > { %v10728_v20 = vpop.permute.xlu1 %10727  ;;  %v13060_v18 = vpop.permute.xlu0 %10732  ;;  %v9278_v43 = vpack.c.bf16 %v5561_v30, %v5560_v39  ;;  %v5562_v27 = vsel %vm1407_vm11, %v10724_v50, %v10725_v41  ;;  %v8656_v39 = vld [vmem:[%s14521_s9 + $0x78] sm:$0xff] }
 0x75f   : > { %8642 = vmatmul.mubr.msk.f32.gmra.mrb[34].mxu0 %vm2942_vm4, %v5069_v21  ;;  %v10730_v3 = vunpack.i.h.bf16 %v10728_v20  ;;  %v10729_v61 = vunpack.i.l.bf16 %v10728_v20  ;;  %v10735_v28 = vunpack.i.h.bf16 %v13060_v18  ;;  %v10734_v40 = vunpack.i.l.bf16 %v13060_v18 }
 0x760   : > { %9263 = vmatpush1.bf16.msra.mxu0 %v9262_v35  ;;  %5338 = vmatprep.mubr.f32.mxu0 %v10975_v55 }
 0x761   : > { %9265 = vmatprep.subr.bf16.mxu0 %v9264_v42  ;;  %v5563_v53 = vsel %vm1407_vm11, %v10729_v61, %v10730_v3  ;;  %v9280_v11 = vpack.c.bf16 %v10730_v3, %v10725_v41  ;;  %v5564_v35 = vsel %vm1407_vm11, %v10734_v40, %v10735_v28 }
 0x762   : > { %v10743_v2 = vpop.permute.xlu1 %10742  ;;  %v13075_v29 = vpop.permute.xlu0 %10737  ;;  %v9282_v62 = vpack.c.bf16 %v5563_v53, %v5562_v27  ;;  %v8661_v27 = vld [vmem:[%s14521_s9 + $0x80] sm:$0xff] }
 0x763   : > { %8643 = vmatmul.mubr.msk.f32.gmra.mrb[36].mxu0 %vm2942_vm4, %v5070_v7  ;;  %v10745_v57 = vunpack.i.h.bf16 %v10743_v2  ;;  %v10744_v54 = vunpack.i.l.bf16 %v10743_v2  ;;  %v10740_v20 = vunpack.i.h.bf16 %v13075_v29  ;;  %v10739_v18 = vunpack.i.l.bf16 %v13075_v29 }
 0x764   : > { %9267 = vmatpush1.bf16.msra.mxu0 %v9266_v13  ;;  %5344 = vmatprep.mubr.f32.mxu0 %v10975_v55 }
 0x765   : > { %9269 = vmatprep.subr.bf16.mxu0 %v9268_v31  ;;  %v5565_v44 = vsel %vm1407_vm11, %v10744_v54, %v10745_v57  ;;  %v9284_v60 = vpack.c.bf16 %v10745_v57, %v10735_v28  ;;  %v5728_v49 = vsel %vm1598_vm12, %v10739_v18, %v10740_v20  ;;  %vm6083_vm11 = vcmask 80896  }
 0x766   : > { %v10748_v0 = vpop.permute.xlu1 %10747  ;;  %v13095_v52 = vpop.permute.xlu0 %10752  ;;  %v9286_v59 = vpack.c.bf16 %v5565_v44, %v5564_v35  ;;  %v8662_v35 = vld [vmem:[%s14521_s9 + $0x88] sm:$0xff] }
 0x767   : > { %8644 = vmatmul.mubr.msk.f32.gmra.mrb[38].mxu0 %vm2942_vm4, %v5071_v22  ;;  %v10750_v21 = vunpack.i.h.bf16 %v10748_v0  ;;  %v10749_v8 = vunpack.i.l.bf16 %v10748_v0  ;;  %v10755_v13 = vunpack.i.h.bf16 %v13095_v52  ;;  %v10754_v2 = vunpack.i.l.bf16 %v13095_v52 }
 0x768   : > { %9271 = vmatpush1.bf16.msra.mxu0 %v9270_v34  ;;  %5488 = vmatprep.mubr.f32.mxu0 %v10975_v55 }
 0x769   : > { %9273 = vmatprep.subr.bf16.mxu0 %v9272_v63  ;;  %v5729_v24 = vsel %vm1598_vm12, %v10749_v8, %v10750_v21  ;;  %v9288_v48 = vpack.c.bf16 %v10750_v21, %v10740_v20  ;;  %v5730_v6 = vsel %vm1598_vm12, %v10754_v2, %v10755_v13 }
 0x76a   : > { %v10758_v17 = vpop.permute.xlu1 %10757  ;;  %v13108_v26 = vpop.permute.xlu0 %10762  ;;  %v9290_v33 = vpack.c.bf16 %v5729_v24, %v5728_v49  ;;  %v8663_v49 = vld [vmem:[%s14521_s9 + $0x90] sm:$0xff] }
 0x76b   : > { %8649 = vmatmul.mubr.msk.f32.vlgmr.msra.gmra.mrb[32].mxu0 %vm2942_vm4, %v8645_v45  ;;  %v10760_v7 = vunpack.i.h.bf16 %v10758_v17  ;;  %v10759_v1 = vunpack.i.l.bf16 %v10758_v17  ;;  %v10765_v34 = vunpack.i.h.bf16 %v13108_v26  ;;  %v10764_v0 = vunpack.i.l.bf16 %v13108_v26 }
 0x76c   : > { %9275 = vmatpush1.bf16.msra.mxu0 %v9274_v4  ;;  %5494 = vmatprep.mubr.f32.mxu0 %v10975_v55 }
 0x76d   : > { %9277 = vmatprep.subr.bf16.mxu0 %v9276_v38  ;;  %v5731_v16 = vsel %vm1598_vm12, %v10759_v1, %v10760_v7  ;;  %v9292_v46 = vpack.c.bf16 %v10760_v7, %v10755_v13  ;;  %v5732_v5 = vsel %vm1598_vm12, %v10764_v0, %v10765_v34  ;;  %v8672_v0 = vld [vmem:[%s14521_s9 + $0xb8] sm:$0xff] }
 0x76e   : > { %v10768_v10 = vpop.permute.xlu1 %10767  ;;  %v10773_v42 = vpop.permute.xlu0 %10772  ;;  %v9294_v9 = vpack.c.bf16 %v5731_v16, %v5730_v6  ;;  %v8670_v6 = vld [vmem:[%s14521_s9 + $0xa8] sm:$0xff] }
 0x76f   : > { %8650 = vmatmul.mubr.msk.f32.gmra.mrb[34].mxu0 %vm2942_vm4, %v8646_v51  ;;  %v10770_v29 = vunpack.i.h.bf16 %v10768_v10  ;;  %v10769_v22 = vunpack.i.l.bf16 %v10768_v10  ;;  %v10775_v4 = vunpack.i.h.bf16 %v10773_v42  ;;  %v10774_v52 = vunpack.i.l.bf16 %v10773_v42 }
 0x770   : > { %9279 = vmatpush1.bf16.msra.mxu0 %v9278_v43  ;;  %5500 = vmatprep.mubr.f32.mxu0 %v10975_v55 }
 0x771   : > { %9281 = vmatprep.subr.bf16.mxu0 %v9280_v11  ;;  %v5733_v63 = vsel %vm1598_vm12, %v10769_v22, %v10770_v29  ;;  %v9296_v58 = vpack.c.bf16 %v10770_v29, %v10765_v34  ;;  %v5734_v41 = vsel %vm1598_vm12, %v10774_v52, %v10775_v4  ;;  %v8664_v29 = vld [vmem:[%s14521_s9 + $0x98] sm:$0xff]  ;;  %v8671_v34 = vld [vmem:[%s14521_s9 + $0xb0] sm:$0xff] }
 0x772   : > { %v10783_v14 = vpop.permute.xlu1 %10782  ;;  %v10778_v12 = vpop.permute.xlu0 %10777  ;;  %v9298_v17 = vpack.c.bf16 %v5733_v63, %v5732_v5 }
 0x773   : > { %8651 = vmatmul.mubr.msk.f32.gmra.mrb[36].mxu0 %vm2942_vm4, %v8647_v23  ;;  %v10785_v47 = vunpack.i.h.bf16 %v10783_v14  ;;  %v10784_v45 = vunpack.i.l.bf16 %v10783_v14  ;;  %v10780_v50 = vunpack.i.h.bf16 %v10778_v12  ;;  %v10779_v43 = vunpack.i.l.bf16 %v10778_v12 }
 0x774   : > { %9283 = vmatpush1.bf16.msra.mxu0 %v9282_v62  ;;  %5506 = vmatprep.mubr.f32.mxu0 %v10975_v55 }
 0x775   : > { %9285 = vmatprep.subr.bf16.mxu0 %v9284_v60  ;;  %v5735_v38 = vsel %vm1598_vm12, %v10784_v45, %v10785_v47  ;;  %v9300_v3 = vpack.c.bf16 %v10785_v47, %v10775_v4  ;;  %v5898_v28 = vsel %vm1789_vm13, %v10779_v43, %v10780_v50 }
 0x776   : > { %v10788_v31 = vpop.permute.xlu1 %10787  ;;  %v10793_v30 = vpop.permute.xlu0 %10792  ;;  %v9302_v10 = vpack.c.bf16 %v5735_v38, %v5734_v41 }
 0x777   : > { %8652 = vmatmul.mubr.msk.f32.gmra.mrb[38].mxu0 %vm2942_vm4, %v8648_v36  ;;  %v10790_v61 = vunpack.i.h.bf16 %v10788_v31  ;;  %v10789_v51 = vunpack.i.l.bf16 %v10788_v31  ;;  %v10795_v40 = vunpack.i.h.bf16 %v10793_v30  ;;  %v10794_v62 = vunpack.i.l.bf16 %v10793_v30 }
 0x778   : > { %9287 = vmatpush1.bf16.msra.mxu0 %v9286_v59  ;;  %5658 = vmatprep.mubr.f32.mxu0 %v10975_v55 }
 0x779   : > { %9289 = vmatprep.subr.bf16.mxu0 %v9288_v48  ;;  %v5899_v11 = vsel %vm1789_vm13, %v10789_v51, %v10790_v61  ;;  %v9304_v57 = vpack.c.bf16 %v10790_v61, %v10780_v50  ;;  %v5900_v20 = vsel %vm1789_vm13, %v10794_v62, %v10795_v40 }
 0x77a   : > { %v10798_v56 = vpop.permute.xlu1 %10797  ;;  %v10803_v23 = vpop.permute.xlu0 %10802  ;;  %v9306_v44 = vpack.c.bf16 %v5899_v11, %v5898_v28 }
 0x77b   : > { %8657 = vmatmul.mubr.msk.f32.vlgmr.msra.gmra.mrb[32].mxu0 %vm2942_vm4, %v8653_v37  ;;  %v10800_v54 = vunpack.i.h.bf16 %v10798_v56  ;;  %v10799_v26 = vunpack.i.l.bf16 %v10798_v56  ;;  %v10805_v18 = vunpack.i.h.bf16 %v10803_v23  ;;  %v10804_v59 = vunpack.i.l.bf16 %v10803_v23 }
 0x77c   : > { %9291 = vmatpush1.bf16.msra.mxu0 %v9290_v33  ;;  %5664 = vmatprep.mubr.f32.mxu0 %v10975_v55 }
 0x77d   : > { %9293 = vmatprep.subr.bf16.mxu0 %v9292_v46  ;;  %v5901_v60 = vsel %vm1789_vm13, %v10799_v26, %v10800_v54  ;;  %v9308_v21 = vpack.c.bf16 %v10800_v54, %v10795_v40  ;;  %v5902_v13 = vsel %vm1789_vm13, %v10804_v59, %v10805_v18 }
 0x77e   : > { %v10808_v53 = vpop.permute.xlu1 %10807  ;;  %v9310_v42 = vpack.c.bf16 %v5901_v60, %v5900_v20  ;;  %v10813_v24 = vpop.permute.xlu0 %10812 }
 0x77f   : > { %8658 = vmatmul.mubr.msk.f32.gmra.mrb[34].mxu0 %vm2942_vm4, %v8654_v32  ;;  %v10810_v8 = vunpack.i.h.bf16 %v10808_v53  ;;  %v10809_v14 = vunpack.i.l.bf16 %v10808_v53  ;;  %v10815_v2 = vunpack.i.h.bf16 %v10813_v24  ;;  %v10814_v33 = vunpack.i.l.bf16 %v10813_v24  ;;  %v8669_v32 = vld [vmem:[%s14521_s9 + $0xa0] sm:$0xff] }
 0x780   : > { %9295 = vmatpush1.bf16.msra.mxu0 %v9294_v9  ;;  %5670 = vmatprep.mubr.f32.mxu0 %v10975_v55  ;;  %v6063_v9 = vld [vmem:[%s14523_s11] sm:$0x3] }
 0x781   : > { %9297 = vmatprep.subr.bf16.mxu0 %v9296_v58  ;;  %v5903_v48 = vsel %vm1789_vm13, %v10809_v14, %v10810_v8  ;;  %v9312_v7 = vpack.c.bf16 %v10810_v8, %v10805_v18  ;;  %v5904_v22 = vsel %vm1789_vm13, %v10814_v33, %v10815_v2  ;;  %v6072_v47 = vrot.slane %v6063_v9, %v11173_v15 }
 0x782   : > { %v10818_v36 = vpop.permute.xlu1 %10817  ;;  %v9314_v31 = vpack.c.bf16 %v5903_v48, %v5902_v13  ;;  %v13214_v56 = vrot.slane %v6063_v9, %v11177_v19 }
 0x783   : > { %8659 = vmatmul.mubr.msk.f32.gmra.mrb[36].mxu0 %vm2942_vm4, %v8655_v25  ;;  %v10820_v1 = vunpack.i.h.bf16 %v10818_v36  ;;  %v10819_v37 = vunpack.i.l.bf16 %v10818_v36 }
 0x784   : > { %9299 = vmatpush1.bf16.msra.mxu0 %v9298_v17  ;;  %5676 = vmatprep.mubr.f32.mxu0 %v10975_v55 }
 0x785   : > { %9301 = vmatprep.subr.bf16.mxu0 %v9300_v3  ;;  %v5905_v16 = vsel %vm1789_vm13, %v10819_v37, %v10820_v1  ;;  %v9316_v46 = vpack.c.bf16 %v10820_v1, %v10815_v2 }
 0x786   : > { %v9318_v12 = vpack.c.bf16 %v5905_v16, %v5904_v22 }
 0x787   : > { %8660 = vmatmul.mubr.msk.f32.gmra.mrb[38].mxu0 %vm2942_vm4, %v8656_v39 }
 0x788   : > { %9303 = vmatpush1.bf16.msra.mxu0 %v9302_v10  ;;  %5828 = vmatprep.mubr.f32.mxu0 %v10975_v55 }
 0x789   : > { %9305 = vmatprep.subr.bf16.mxu0 %v9304_v57 }
 0x78b   : > { %8665 = vmatmul.mubr.msk.f32.vlgmr.msra.gmra.mrb[32].mxu0 %vm2942_vm4, %v8661_v27 }
 0x78c   : > { %9307 = vmatpush1.bf16.msra.mxu0 %v9306_v44  ;;  %5834 = vmatprep.mubr.f32.mxu0 %v10975_v55 }
 0x78d   : > { %9309 = vmatprep.subr.bf16.mxu0 %v9308_v21 }
 0x78f   : > { %8666 = vmatmul.mubr.msk.f32.gmra.mrb[34].mxu0 %vm2942_vm4, %v8662_v35  ;;  %v6038_v63 = vpop.permute.xlu0 %6037 }
 0x790   : > { %9311 = vmatpush1.bf16.msra.mxu0 %v9310_v42  ;;  %5840 = vmatprep.mubr.f32.mxu0 %v10975_v55 }
 0x791   : > { %9313 = vmatprep.subr.bf16.mxu0 %v9312_v7 }
 0x793   : > { %8667 = vmatmul.mubr.msk.f32.gmra.mrb[36].mxu0 %vm2942_vm4, %v8663_v49  ;;  %v6043_v4 = vpop.permute.xlu1 %6042  ;;  %v6048_v10 = vpop.permute.xlu0 %6047 }
 0x794   : > { %9315 = vmatpush1.bf16.msra.mxu0 %v9314_v31  ;;  %5846 = vmatprep.mubr.f32.mxu0 %v10975_v55 }
 0x795   : > { %9317 = vmatprep.subr.bf16.mxu0 %v9316_v46 }
 0x797   : > { %8668 = vmatmul.mubr.msk.f32.gmra.mrb[38].mxu0 %vm2942_vm4, %v8664_v29  ;;  %v6053_v14 = vpop.permute.xlu1 %6052 }
 0x798   : > { %9319 = vmatpush1.bf16.msra.mxu0 %v9318_v12  ;;  %5998 = vmatprep.mubr.f32.mxu0 %v10975_v55 }
 0x79b   : > { %8673 = vmatmul.mubr.msk.f32.vlgmr.msra.gmra.mrb[32].mxu0 %vm2942_vm4, %v8669_v32 }
 0x79c   : > { %6004 = vmatprep.mubr.f32.mxu0 %v10975_v55 }
 0x79f   : > { %8674 = vmatmul.mubr.msk.f32.gmra.mrb[34].mxu0 %vm2942_vm4, %v8670_v6 }
 0x7a0   : > { %6010 = vmatprep.mubr.f32.mxu0 %v10975_v55 }
 0x7a3   : > { %8675 = vmatmul.mubr.msk.f32.gmra.mrb[36].mxu0 %vm2942_vm4, %v8671_v34 }
 0x7a4   : > { %6016 = vmatprep.mubr.f32.mxu0 %v10975_v55 }
 0x7a7   : > { %8676 = vmatmul.mubr.msk.f32.gmra.mrb[38].mxu0 %vm2942_vm4, %v8672_v0 }
 0x86e   : > { %v6000_v58 = vpop.f32.mrb[32].mxu0 }
 0x86f   : > { %v13211_v45 = vadd.f32 %v6038_v63, %v6000_v58  ;;  %v6002_v25 = vpop.f32.mrb[33].mxu0 }
 0x870   : > { %v13216_v5 = vadd.f32 %v6038_v63, %v6002_v25 }
 0x871   : > { %v6075_v38 = vmul.f32 %v13214_v56, %v13211_v45  ;;  %v6104_v3 = vmul.f32 %v13211_v45, %v13211_v45 }
 0x872   : > { %v6076_v52 = vmul.f32 %v6072_v47, %v13216_v5  ;;  %v6105_v17 = vmul.f32 %v13216_v5, %v13216_v5  ;;  %v6006_v30 = vpop.f32.mrb[34].mxu0 }
 0x873   : > { %v13225_v61 = vadd.f32 %v6043_v4, %v6006_v30  ;;  %v6008_v51 = vpop.f32.mrb[35].mxu0  ;;  %v6112_v40 = vmul.f32 %v6104_v3, %v13214_v56 }
 0x874   : > { %v13227_v39 = vadd.f32 %v6043_v4, %v6008_v51  ;;  %v6084_v41 = vsel %vm6083_vm11, %v6076_v52, 0.0  ;;  %v6113_v50 = vmul.f32 %v6105_v17, %v6072_v47 }
 0x875   : > { %v6085_v43 = vadd.f32 %v6084_v41, %v6075_v38  ;;  %v6106_v53 = vmul.f32 %v13225_v61, %v13225_v61  ;;  %v6077_v23 = vmul.f32 %v13214_v56, %v13225_v61 }
 0x876   : > { %v6078_v11 = vmul.f32 %v6072_v47, %v13227_v39  ;;  %v6107_v57 = vmul.f32 %v13227_v39, %v13227_v39  ;;  %v6012_v54 = vpop.f32.mrb[36].mxu0  ;;  %v6120_v26 = vsel %vm6083_vm11, %v6113_v50, 0.0 }
 0x877   : > { %v13238_v27 = vadd.f32 %v6048_v10, %v6012_v54  ;;  %6086 = vadd.xlane.f32.xlu0 %v6085_v43  ;;  %v6014_v28 = vpop.f32.mrb[37].mxu0  ;;  %v6121_v21 = vadd.f32 %v6120_v26, %v6112_v40  ;;  %v6114_v18 = vmul.f32 %v6106_v53, %v13214_v56 }
 0x878   : > { %v13241_v62 = vadd.f32 %v6048_v10, %v6014_v28  ;;  %v6088_v44 = vsel %vm6083_vm11, %v6078_v11, 0.0  ;;  %v6115_v60 = vmul.f32 %v6107_v57, %v6072_v47 }
 0x879   : > { %v6089_v8 = vadd.f32 %v6088_v44, %v6077_v23  ;;  %v6079_v42 = vmul.f32 %v13214_v56, %v13238_v27  ;;  %v6108_v24 = vmul.f32 %v13238_v27, %v13238_v27 }
 0x87a   : > { %v6080_v36 = vmul.f32 %v6072_v47, %v13241_v62  ;;  %v6109_v35 = vmul.f32 %v13241_v62, %v13241_v62  ;;  %v6018_v20 = vpop.f32.mrb[38].mxu0  ;;  %v6124_v59 = vsel %vm6083_vm11, %v6115_v60, 0.0 }
 0x87b   : > { %v13253_v48 = vadd.f32 %v6053_v14, %v6018_v20  ;;  %6122 = vadd.xlane.f32.xlu0 %v6121_v21  ;;  %6090 = vadd.xlane.f32.xlu1 %v6089_v8  ;;  %v6020_v7 = vpop.f32.mrb[39].mxu0  ;;  %v6125_v13 = vadd.f32 %v6124_v59, %v6114_v18  ;;  %v6116_v22 = vmul.f32 %v6108_v24, %v13214_v56 }
 0x87c   : > { %v13255_v1 = vadd.f32 %v6053_v14, %v6020_v7  ;;  %v6092_v37 = vsel %vm6083_vm11, %v6080_v36, 0.0  ;;  %v6117_v49 = vmul.f32 %v6109_v35, %v6072_v47 }
 0x87d   : > { %v6093_v2 = vadd.f32 %v6092_v37, %v6079_v42  ;;  %v6081_v46 = vmul.f32 %v13214_v56, %v13253_v48  ;;  %v6110_v29 = vmul.f32 %v13253_v48, %v13253_v48 }
 0x87e   : > { %v6082_v33 = vmul.f32 %v6072_v47, %v13255_v1  ;;  %v6111_v31 = vmul.f32 %v13255_v1, %v13255_v1  ;;  %v6128_v16 = vsel %vm6083_vm11, %v6117_v49, 0.0 }
 0x87f   : > { %6126 = vadd.xlane.f32.xlu0 %v6125_v13  ;;  %6094 = vadd.xlane.f32.xlu1 %v6093_v2  ;;  %v6129_v6 = vadd.f32 %v6128_v16, %v6116_v22  ;;  %v6118_v9 = vmul.f32 %v6110_v29, %v13214_v56 }
 0x880   : > { %v6096_v12 = vsel %vm6083_vm11, %v6082_v33, 0.0  ;;  %v6119_v32 = vmul.f32 %v6111_v31, %v6072_v47 }
 0x881   : > { %v6097_v34 = vadd.f32 %v6096_v12, %v6081_v46 }
 0x882   : > { %v6132_v0 = vsel %vm6083_vm11, %v6119_v32, 0.0  ;;  %vm10984_vm11 = vmmov 0  }
 0x883   : > { %6130 = vadd.xlane.f32.xlu1 %v6129_v6  ;;  %6098 = vadd.xlane.f32.xlu0 %v6097_v34  ;;  %v6133_v63 = vadd.f32 %v6132_v0, %v6118_v9 }
 0x887   : > { %6134 = vadd.xlane.f32.xlu0 %v6133_v63 }
 0x904   : > { %v6087_v58 = vpop.xlane.xlu0 %6086 }
 0x905   : > { %v6100_v25 = vmul.f32 0.010416667, %v6087_v58 }
 0x907   : > { %v6140_v17 = vmul.f32 %v6100_v25, %v6100_v25  ;;  %v6152_v18 = vsub.f32 %v13211_v45, %v6100_v25  ;;  %v6153_v59 = vsub.f32 %v13216_v5, %v6100_v25 }
 0x908   : > { %v6123_v4 = vpop.xlane.xlu0 %6122  ;;  %v6091_v52 = vpop.xlane.xlu1 %6090 }
 0x909   : > { %v6136_v30 = vmul.f32 0.010416667, %v6123_v4  ;;  %v6101_v38 = vmul.f32 0.010416667, %v6091_v52 }
 0x90b   : > { %v6144_v3 = vsub.f32 %v6136_v30, %v6140_v17  ;;  %v6141_v43 = vmul.f32 %v6101_v38, %v6101_v38  ;;  %v6154_v49 = vsub.f32 %v13225_v61, %v6101_v38  ;;  %v6155_v13 = vsub.f32 %v13227_v39, %v6101_v38 }
 0x90c   : > { %v6127_v51 = vpop.xlane.xlu0 %6126  ;;  %v6095_v47 = vpop.xlane.xlu1 %6094 }
 0x90d   : > { %v6148_v41 = vmax.f32 %v6144_v3, 0.0  ;;  %v6137_v50 = vmul.f32 0.010416667, %v6127_v51  ;;  %v6102_v10 = vmul.f32 0.010416667, %v6095_v47 }
 0x90f   : > { %v6160_v53 = vadd.f32 1e-05, %v6148_v41  ;;  %v6145_v11 = vsub.f32 %v6137_v50, %v6141_v43  ;;  %v6142_v57 = vmul.f32 %v6102_v10, %v6102_v10  ;;  %v6156_v29 = vsub.f32 %v13238_v27, %v6102_v10 }
 0x910   : > { %v6131_v56 = vpop.xlane.xlu1 %6130  ;;  %v6099_v54 = vpop.xlane.xlu0 %6098  ;;  %v6157_v22 = vsub.f32 %v13241_v62, %v6102_v10 }
 0x911   : > { %10893 = vrsqrt.f32 %v6160_v53  ;;  %v6149_v26 = vmax.f32 %v6145_v11, 0.0  ;;  %v6138_v23 = vmul.f32 0.010416667, %v6131_v56  ;;  %v6103_v28 = vmul.f32 0.010416667, %v6099_v54  ;;  %v6525_v11 = vld [vmem:[%s14525_s13] sm:$0xff] }
 0x913   : > { %v6161_v40 = vadd.f32 1e-05, %v6149_v26  ;;  %v6146_v44 = vsub.f32 %v6138_v23, %v6142_v57  ;;  %v6143_v8 = vmul.f32 %v6103_v28, %v6103_v28  ;;  %v6158_v6 = vsub.f32 %v13253_v48, %v6103_v28  ;;  %v6526_v57 = vld [vmem:[%s14525_s13 + $0x8] sm:$0xff] }
 0x914   : > { %v6135_v60 = vpop.xlane.xlu0 %6134  ;;  %v6159_v62 = vsub.f32 %v13255_v1, %v6103_v28 }
 0x915   : > { %10895 = vrsqrt.f32 %v6161_v40  ;;  %v6150_v21 = vmax.f32 %v6146_v44, 0.0  ;;  %v6139_v14 = vmul.f32 0.010416667, %v6135_v60 }
 0x917   : > { %v6162_v36 = vadd.f32 1e-05, %v6150_v21  ;;  %v6147_v35 = vsub.f32 %v6139_v14, %v6143_v8 }
 0x919   : > { %10897 = vrsqrt.f32 %v6162_v36  ;;  %v6151_v20 = vmax.f32 %v6147_v35, 0.0 }
 0x91b   : > { %v10894_v42 = vpop.eup %10893  ;;  %v6163_v24 = vadd.f32 1e-05, %v6151_v20 }
 0x91c   : > { %v6168_v7 = vmul.f32 %v10894_v42, %v6152_v18  ;;  %v6169_v37 = vmul.f32 %v10894_v42, %v6153_v59 }
 0x91d   : > { %10899 = vrsqrt.f32 %v6163_v24 }
 0x91e   : > { %vm6176_vm12 = vcmp.ge.f32.partialorder %v6168_v7, 0.0  ;;  %vm6177_vm13 = vcmp.ge.f32.partialorder %v6169_v37, 0.0  ;;  %v6184_v2 = vmul.f32 0.01, %v6168_v7  ;;  %v6185_v33 = vmul.f32 0.01, %v6169_v37 }
 0x91f   : > { %v10896_v31 = vpop.eup %10895 }
 0x920   : > { %v13274_v16 = vsel %vm6176_vm12, %v6168_v7, %v6184_v2  ;;  %v13276_v46 = vsel %vm6177_vm13, %v6169_v37, %v6185_v33  ;;  %v6170_v45 = vmul.f32 %v10896_v31, %v6154_v49  ;;  %v6171_v5 = vmul.f32 %v10896_v31, %v6155_v13  ;;  %v8677_v2 = vld [vmem:[%s14524_s12 + $0x10] sm:$0xff] }
 0x921   : > { %v10821_v61 = vpack.i.bf16 %v13276_v46, %v13274_v16  ;;  %vm8285_vm13 = vcmask 16384  }
 0x922   : > { %vm6178_vm3 = vcmp.ge.f32.partialorder %v6170_v45, 0.0  ;;  %vm6179_vm14 = vcmp.ge.f32.partialorder %v6171_v5, 0.0  ;;  %v6186_v39 = vmul.f32 0.01, %v6170_v45  ;;  %v6187_v12 = vmul.f32 0.01, %v6171_v5 }
 0x923   : > { %v10898_v32 = vpop.eup %10897  ;;  %10822 = vrot.lane.b32.xlu1 %v10821_v61, %s14589_s24 }
 0x924   : > { %v13284_v34 = vsel %vm6178_vm3, %v6170_v45, %v6186_v39  ;;  %v13286_v0 = vsel %vm6179_vm14, %v6171_v5, %v6187_v12  ;;  %v6172_v9 = vmul.f32 %v10898_v32, %v6156_v29  ;;  %v6173_v27 = vmul.f32 %v10898_v32, %v6157_v22  ;;  %v6200_v32 = vld [vmem:[%s14524_s12] sm:$0xff] }
 0x925   : > { %v10826_v63 = vpack.i.bf16 %v13286_v0, %v13284_v34  ;;  %v9328_v58 = vpack.c.bf16 %v13286_v0, %v13276_v46  ;;  %v9330_v25 = vpack.c.bf16 %v13284_v34, %v13274_v16  ;;  %v8678_v46 = vld [vmem:[%s14524_s12 + $0x18] sm:$0xff] }
 0x926   : > { %vm6180_vm15 = vcmp.ge.f32.partialorder %v6172_v9, 0.0  ;;  %vm6181_vm0 = vcmp.ge.f32.partialorder %v6173_v27, 0.0  ;;  %v6188_v48 = vmul.f32 0.01, %v6172_v9  ;;  %v6189_v4 = vmul.f32 0.01, %v6173_v27 }
 0x927   : > { %v10900_v52 = vpop.eup %10899  ;;  %10827 = vrot.lane.b32.xlu0 %v10826_v63, %s14589_s24 }
 0x928   : > { %v13296_v17 = vsel %vm6180_vm15, %v6172_v9, %v6188_v48  ;;  %v6197_v30 = vsel %vm6181_vm0, %v6173_v27, %v6189_v4  ;;  %v6174_v1 = vmul.f32 %v10900_v52, %v6158_v6  ;;  %v6175_v38 = vmul.f32 %v10900_v52, %v6159_v62  ;;  %v8683_v48 = vld [vmem:[%s14524_s12 + $0x20] sm:$0xff]  ;;  %v8684_v4 = vld [vmem:[%s14524_s12 + $0x28] sm:$0xff] }
 0x929   : > { %v10831_v3 = vpack.i.bf16 %v6197_v30, %v13296_v17  ;;  %v6617_v52 = vld [vmem:[%s14527_s15] sm:$0xff] }
 0x92a   : > { %vm6182_vm5 = vcmp.ge.f32.partialorder %v6174_v1, 0.0  ;;  %vm6183_vm6 = vcmp.ge.f32.partialorder %v6175_v38, 0.0  ;;  %v6190_v51 = vmul.f32 0.01, %v6174_v1  ;;  %v6191_v47 = vmul.f32 0.01, %v6175_v38 }
 0x92b   : > { %10832 = vrot.lane.b32.xlu1 %v10831_v3, %s14589_s24  ;;  %10842 = vrot.lane.b32.xlu0 %v10821_v61, %s14583_s2 }
 0x92c   : > { %v6198_v41 = vsel %vm6182_vm5, %v6174_v1, %v6190_v51  ;;  %v6199_v50 = vsel %vm6183_vm6, %v6175_v38, %v6191_v47  ;;  %v10983_v1 = vmov 0.0|0.0   ;;  %v6619_v51 = vld [vmem:[%s14527_s15 + $0x10] sm:$0xff]  ;;  %v6620_v47 = vld [vmem:[%s14527_s15 + $0x18] sm:$0xff] }
 0x92d   : > { %v10836_v43 = vpack.i.bf16 %v6199_v50, %v6198_v41  ;;  %v9332_v10 = vpack.c.bf16 %v6199_v50, %v6197_v30  ;;  %v9334_v53 = vpack.c.bf16 %v6198_v41, %v13296_v17  ;;  %v6618_v17 = vld [vmem:[%s14527_s15 + $0x8] sm:$0xff]  ;;  %v8778_v30 = vld [vmem:[%s14527_s15 + $0x330] sm:$0xff]  ;;  %9344 = vmatprep.subr.bf16.mxu0 %v10983_v1  ;;  %v8780_v50 = vld [vmem:[%s14527_s15 + $0x340] sm:$0xff] }
 0x92e   : > { %v9345_v38 = vpack.c.bf16 %v6618_v17, %v6617_v52  ;;  %v6627_v52 = vld [vmem:[%s14527_s15 + $0x50] sm:$0xff]  ;;  %v6628_v17 = vld [vmem:[%s14527_s15 + $0x58] sm:$0xff] }
 0x92f   : > { %10852 = vrot.lane.b32.xlu0 %v10831_v3, %s14583_s2  ;;  %10837 = vrot.lane.b32.xlu1 %v10836_v43, %s14589_s24  ;;  %v8779_v3 = vld [vmem:[%s14527_s15 + $0x338] sm:$0xff]  ;;  %s8960_s24 = sshll.u32 %s11117_s3, 4  ;;  %s10985_s3 = smov [#allocation2]  }
 0x930   : > { %v9489_v41 = vpack.c.bf16 %v8779_v3, %v8778_v30  ;;  %9346 = vmatpush1.bf16.msra.mxu0 %v9345_v38  ;;  %v8788_v38 = vld [vmem:[%s14527_s15 + $0x380] sm:$0xff]  ;;  %v8789_v3 = vld [vmem:[%s14527_s15 + $0x388] sm:$0xff]  ;;  %s14470_s1 = scalar_lea.hbm %s14533_s21, %s8960_s24  ;;  %s10911_s26 = sshll.u32 %s10985_s3, 4  ;;  %s10912_s26 = int_to_ptr.vmem [resolvable:$false] %s10911_s26 }
 0x931   : > { %9347 = vmatprep.subr.bf16.mxu0 %v10983_v1  ;;  %s10913_s4 = scalar_lea.vmem %s10912_s26, 32 }
 0x933   : > { %6529 = vperm.xlu0 %10138, %v6525_v11   ;;  %10847 = vrot.lane.b32.xlu1 %v10826_v63, %s14583_s2  ;;  %v6201_v63 = vld [vmem:[%s14524_s12 + $0x8] sm:$0xff]  ;;  %v6541_v11 = vld [vmem:[%s14526_s14] sm:$0x3] }
 0x937   : > { %10857 = vrot.lane.b32.xlu1 %v10836_v43, %s14583_s2  ;;  %v8781_v43 = vld [vmem:[%s14527_s15 + $0x348] sm:$0xff]  ;;  %s647_s2 = sand.u32 1, %s10961_s25  }
 0x938   : > { %s648_s23 = scalar_lea.vmem [#allocation2], %s647_s2  ;;  %s8288_s29 = scalar_lea.sflag [#allocation3], %s647_s2 }
 0x939   : > { %s8300_s30 = sshll.u32 %s648_s23, 4  ;;  %s14472_s30 = int_to_ptr.vmem [resolvable:$true] %s8300_s30 }
 0x93a   : > { %s10907_s27 = scalar_lea.vmem %s14472_s30, 16  ;;  %p10914_p0 = scmp.lt.s32.totalorder %s14472_s30, %s10912_s26 }
 0x93b   : > { %6534 = vperm.xlu1 %10140, %v6526_v57   ;;  %p10908_p11 = scmp.ne.s32.totalorder %s14472_s30, %s10907_s27  ;;  %p10915_p1 = scmp.lt.s32.totalorder %s10913_s4, %s10907_s27 }
 0x93d   : > { %p10909_p12 = pnand %p10908_p11, %p11134_p5  ;;  %p10916_p2 = por %p10915_p1, %p10914_p0 }
 0x93f   : > { %p10910_p13 = pneg %p10909_p12 }
 0x941   : > { %p10917_p3 = pnand %p10916_p2, %p10910_p13 }
 0x995   : > { %v10823_v56 = vpop.permute.xlu1 %10822 }
 0x996   : > { %v10825_v54 = vunpack.i.h.bf16 %v10823_v56  ;;  %v10824_v26 = vunpack.i.l.bf16 %v10823_v56 }
 0x998   : > { %v6229_v44 = vsel %vm903_vm8, %v10824_v26, %v10825_v54 }
 0x999   : > { %v10828_v23 = vpop.permute.xlu0 %10827 }
 0x99a   : > { %v10830_v28 = vunpack.i.h.bf16 %v10828_v23  ;;  %v10829_v40 = vunpack.i.l.bf16 %v10828_v23  ;;  %v6546_v23 = vrot.slane %v6541_v11, %v11177_v19 }
 0x99c   : > { %v9320_v60 = vpack.c.bf16 %v10830_v28, %v10825_v54  ;;  %v6230_v21 = vsel %vm903_vm8, %v10829_v40, %v10830_v28  ;;  %v6550_v54 = vrot.slane %v6541_v11, %v11173_v15  ;;  %v6631_v11 = vld [vmem:[%s14527_s15 + $0x70] sm:$0xff] }
 0x99d   : > { %v9322_v8 = vpack.c.bf16 %v6230_v21, %v6229_v44  ;;  %v10833_v14 = vpop.permute.xlu1 %10832  ;;  %v10843_v13 = vpop.permute.xlu0 %10842 }
 0x99e   : > { %9321 = vmatprep.subr.bf16.mxu1 %v9320_v60  ;;  %v10835_v36 = vunpack.i.h.bf16 %v10833_v14  ;;  %v10834_v35 = vunpack.i.l.bf16 %v10833_v14  ;;  %v10845_v45 = vunpack.i.h.bf16 %v10843_v13  ;;  %v10844_v5 = vunpack.i.l.bf16 %v10843_v13 }
 0x99f   : > { %9323 = vmatpush1.bf16.msra.mxu1 %v9322_v8 }
 0x9a0   : > { %v6231_v42 = vsel %vm903_vm8, %v10834_v35, %v10835_v36  ;;  %v6426_v6 = vsel %vm1216_vm10, %v10844_v5, %v10845_v45 }
 0x9a1   : > { %v10838_v20 = vpop.permute.xlu1 %10837  ;;  %v10853_v29 = vpop.permute.xlu0 %10852 }
 0x9a2   : > { %v10840_v18 = vunpack.i.h.bf16 %v10838_v20  ;;  %v10839_v59 = vunpack.i.l.bf16 %v10838_v20  ;;  %v10855_v34 = vunpack.i.h.bf16 %v10853_v29  ;;  %v10854_v0 = vunpack.i.l.bf16 %v10853_v29  ;;  %v6621_v29 = vld [vmem:[%s14527_s15 + $0x20] sm:$0xff] }
 0x9a4   : > { %v9324_v24 = vpack.c.bf16 %v10840_v18, %v10835_v36  ;;  %v6232_v7 = vsel %vm903_vm8, %v10839_v59, %v10840_v18  ;;  %vm6557_vm8 = vcmask 64512  }
 0x9a5   : > { %v9326_v37 = vpack.c.bf16 %v6232_v7, %v6231_v42  ;;  %v10848_v49 = vpop.permute.xlu1 %10847 }
 0x9a6   : > { %9325 = vmatprep.subr.bf16.mxu1 %v9324_v24  ;;  %v10850_v33 = vunpack.i.h.bf16 %v10848_v49  ;;  %v10849_v31 = vunpack.i.l.bf16 %v10848_v49 }
 0x9a7   : > { %9327 = vmatpush1.bf16.msra.mxu1 %v9326_v37 }
 0x9a8   : > { %9329 = vmatprep.subr.bf16.mxu1 %v9328_v58  ;;  %v6427_v22 = vsel %vm1216_vm10, %v10849_v31, %v10850_v33  ;;  %v9336_v61 = vpack.c.bf16 %v10850_v33, %v10845_v45  ;;  %v6428_v58 = vsel %vm1216_vm10, %v10854_v0, %v10855_v34  ;;  %v8784_v0 = vld [vmem:[%s14527_s15 + $0x360] sm:$0xff] }
 0x9a9   : > { %v10858_v16 = vpop.permute.xlu1 %10857  ;;  %v9338_v9 = vpack.c.bf16 %v6427_v22, %v6426_v6  ;;  %v6622_v22 = vld [vmem:[%s14527_s15 + $0x28] sm:$0xff] }
 0x9aa   : > { %8679 = vmatmul.mubr.msk.f32.vlgmr.msra.gmra.mrb[16].mxu1 %vm916_vm9, %v8677_v2  ;;  %v10860_v39 = vunpack.i.h.bf16 %v10858_v16  ;;  %v10859_v12 = vunpack.i.l.bf16 %v10858_v16 }
 0x9ab   : > { %9331 = vmatpush1.bf16.msra.mxu1 %v9330_v25  ;;  %6317 = vmatprep.mubr.f32.mxu1 %v10975_v55 }
 0x9ac   : > { %9333 = vmatprep.subr.bf16.mxu1 %v9332_v10  ;;  %v6429_v27 = vsel %vm1216_vm10, %v10859_v12, %v10860_v39  ;;  %v9340_v62 = vpack.c.bf16 %v10860_v39, %v10855_v34  ;;  %v9348_v10 = vpack.c.bf16 %v6620_v47, %v6619_v51  ;;  %v8782_v39 = vld [vmem:[%s14527_s15 + $0x350] sm:$0xff]  ;;  %v8783_v12 = vld [vmem:[%s14527_s15 + $0x358] sm:$0xff]  ;;  %v9360_v51 = vpack.c.bf16 %v6628_v17, %v6627_v52  ;;  %v6629_v47 = vld [vmem:[%s14527_s15 + $0x60] sm:$0xff] }
 0x9ad   : > { %v9342_v25 = vpack.c.bf16 %v6429_v27, %v6428_v58  ;;  %v9495_v6 = vpack.c.bf16 %v8783_v12, %v8782_v39  ;;  %v6624_v34 = vld [vmem:[%s14527_s15 + $0x38] sm:$0xff]  ;;  %v6626_v58 = vld [vmem:[%s14527_s15 + $0x48] sm:$0xff]  ;;  %v8691_v12 = vld [vmem:[%s14527_s15 + $0xa0] sm:$0xff] }
 0x9ae   : > { %8680 = vmatmul.mubr.msk.f32.gmra.mrb[18].mxu1 %vm916_vm9, %v8678_v46  ;;  %9349 = vmatpush1.bf16.msra.mxu0 %v9348_v10  ;;  %v8791_v10 = vld [vmem:[%s14527_s15 + $0x398] sm:$0xff] }
 0x9af   : > { %9335 = vmatpush1.bf16.msra.mxu1 %v9334_v53  ;;  %6394 = vmatprep.mubr.f32.mxu1 %v10975_v55  ;;  %v9492_v53 = vpack.c.bf16 %v8781_v43, %v8780_v50  ;;  %v9504_v50 = vpack.c.bf16 %v8789_v3, %v8788_v38  ;;  %v8790_v43 = vld [vmem:[%s14527_s15 + $0x390] sm:$0xff]  ;;  %v8690_v39 = vld [vmem:[%s14527_s15 + $0x98] sm:$0xff]  ;;  %v8801_v3 = vld [vmem:[%s14527_s15 + $0x3e0] sm:$0xff] }
 0x9b0   : > { %9337 = vmatprep.subr.bf16.mxu1 %v9336_v61  ;;  %9350 = vmatprep.subr.bf16.mxu0 %v10983_v1  ;;  %v9351_v61 = vpack.c.bf16 %v6622_v22, %v6621_v29  ;;  %v8800_v38 = vld [vmem:[%s14527_s15 + $0x3d8] sm:$0xff] }
 0x9b2   : > { %8681 = vmatmul.mubr.msk.f32.vlgmr.msra.gmra.mrb[16].mxu1 %vm916_vm9, %v6200_v32  ;;  %v6530_v57 = vpop.permute.xlu0 %6529  ;;  %9352 = vmatpush1.bf16.msra.mxu0 %v9351_v61  ;;  %v6623_v32 = vld [vmem:[%s14527_s15 + $0x30] sm:$0xff] }
 0x9b3   : > { %9339 = vmatpush1.bf16.msra.mxu1 %v9338_v9  ;;  %6400 = vmatprep.mubr.f32.mxu1 %v10975_v55  ;;  %v8785_v9 = vld [vmem:[%s14527_s15 + $0x368] sm:$0xff]  ;;  %v9354_v27 = vpack.c.bf16 %v6624_v34, %v6623_v32 }
 0x9b4   : > { %9341 = vmatprep.subr.bf16.mxu1 %v9340_v62  ;;  %9353 = vmatprep.subr.bf16.mxu0 %v10983_v1  ;;  %v9498_v62 = vpack.c.bf16 %v8785_v9, %v8784_v0 }
 0x9b6   : > { %8682 = vmatmul.mubr.msk.f32.gmra.mrb[18].mxu1 %vm916_vm9, %v6201_v63  ;;  %9355 = vmatpush1.bf16.msra.mxu0 %v9354_v27  ;;  %v6625_v63 = vld [vmem:[%s14527_s15 + $0x40] sm:$0xff]  ;;  %v9372_v27 = vpack.c.bf16 %v8691_v12, %v8690_v39 }
 0x9b7   : > { %9343 = vmatpush1.bf16.msra.mxu1 %v9342_v25  ;;  %6508 = vmatprep.mubr.f32.mxu1 %v10975_v55  ;;  %v8786_v25 = vld [vmem:[%s14527_s15 + $0x370] sm:$0xff]  ;;  %v8814_v12 = vld [vmem:[%s14527_s15 + $0x440] sm:$0xff] }
 0x9b8   : > { %9488 = vmatprep.subr.bf16.mxu1 %v10983_v1  ;;  %9356 = vmatprep.subr.bf16.mxu0 %v10983_v1 }
 0x9ba   : > { %8685 = vmatmul.mubr.msk.f32.vlgmr.msra.gmra.mrb[16].mxu1 %vm916_vm9, %v8683_v48  ;;  %v6535_v60 = vpop.permute.xlu1 %6534  ;;  %v9357_v48 = vpack.c.bf16 %v6626_v58, %v6625_v63  ;;  %v8799_v63 = vld [vmem:[%s14527_s15 + $0x3d0] sm:$0xff] }
 0x9bb   : > { %6514 = vmatprep.mubr.f32.mxu1 %v10975_v55  ;;  %9490 = vmatpush1.bf16.msra.mxu1 %v9489_v41  ;;  %v6630_v41 = vld [vmem:[%s14527_s15 + $0x68] sm:$0xff] }
 0x9bc   : > { %9491 = vmatprep.subr.bf16.mxu1 %v10983_v1  ;;  %9358 = vmatpush1.bf16.msra.mxu0 %v9357_v48  ;;  %v8692_v48 = vld [vmem:[%s14527_s15 + $0xa8] sm:$0xff] }
 0x9bd   : > { %9359 = vmatprep.subr.bf16.mxu0 %v10983_v1 }
 0x9be   : > { %8686 = vmatmul.mubr.msk.f32.gmra.mrb[18].mxu1 %vm916_vm9, %v8684_v4  ;;  %v8787_v4 = vld [vmem:[%s14527_s15 + $0x378] sm:$0xff] }
 0x9bf   : > { %9493 = vmatpush1.bf16.msra.mxu1 %v9492_v53  ;;  %v9501_v30 = vpack.c.bf16 %v8787_v4, %v8786_v25  ;;  %v9363_v53 = vpack.c.bf16 %v6630_v41, %v6629_v47  ;;  %v8693_v4 = vld [vmem:[%s14527_s15 + $0xb0] sm:$0xff]  ;;  %v8695_v47 = vld [vmem:[%s14527_s15 + $0xc0] sm:$0xff] }
 0x9c0   : > { %9494 = vmatprep.subr.bf16.mxu1 %v10983_v1  ;;  %9361 = vmatpush1.bf16.msra.mxu0 %v9360_v51  ;;  %v8694_v51 = vld [vmem:[%s14527_s15 + $0xb8] sm:$0xff] }
 0x9c1   : > { %9362 = vmatprep.subr.bf16.mxu0 %v10983_v1 }
 0x9c3   : > { %9496 = vmatpush1.bf16.msra.mxu1 %v9495_v6 }
 0x9c4   : > { %9497 = vmatprep.subr.bf16.mxu1 %v10983_v1  ;;  %9364 = vmatpush1.bf16.msra.mxu0 %v9363_v53  ;;  %v8803_v53 = vld [vmem:[%s14527_s15 + $0x3f0] sm:$0xff] }
 0x9c5   : > { %9365 = vmatprep.subr.bf16.mxu0 %v10983_v1 }
 0x9c7   : > { %9499 = vmatpush1.bf16.msra.mxu1 %v9498_v62  ;;  %v8798_v62 = vld [vmem:[%s14527_s15 + $0x3c8] sm:$0xff] }
 0x9c8   : > { %9500 = vmatprep.subr.bf16.mxu1 %v10983_v1  ;;  %v9516_v17 = vpack.c.bf16 %v8799_v63, %v8798_v62  ;;  %v8812_v62 = vld [vmem:[%s14527_s15 + $0x438] sm:$0xff] }
 0x9cb   : > { %9502 = vmatpush1.bf16.msra.mxu1 %v9501_v30  ;;  %v9375_v30 = vpack.c.bf16 %v8693_v4, %v8692_v48  ;;  %v8816_v48 = vld [vmem:[%s14527_s15 + $0x450] sm:$0xff]  ;;  %v8817_v4 = vld [vmem:[%s14527_s15 + $0x458] sm:$0xff] }
 0x9cc   : > { %9503 = vmatprep.subr.bf16.mxu1 %v10983_v1 }
 0x9cf   : > { %9505 = vmatpush1.bf16.msra.mxu1 %v9504_v50  ;;  %v9519_v50 = vpack.c.bf16 %v8801_v3, %v8800_v38  ;;  %v9540_v38 = vpack.c.bf16 %v8817_v4, %v8816_v48  ;;  %v8728_v48 = vld [vmem:[%s14527_s15 + $0x1b8] sm:$0xff]  ;;  %v8729_v4 = vld [vmem:[%s14527_s15 + $0x1c0] sm:$0xff] }
 0x9d0   : > { %9506 = vmatprep.subr.bf16.mxu1 %v10983_v1 }
 0xa8d   : > { %v6510_v56 = vpop.f32.mrb[16].mxu1 }
 0xa8e   : > { %v13383_v26 = vadd.f32 %v6530_v57, %v6510_v56  ;;  %v6512_v28 = vpop.f32.mrb[17].mxu1  ;;  %v9507_v56 = vpack.c.bf16 %v8791_v10, %v8790_v43  ;;  %v9378_v43 = vpack.c.bf16 %v8695_v47, %v8694_v51  ;;  %v8802_v10 = vld [vmem:[%s14527_s15 + $0x3e8] sm:$0xff]  ;;  %v8818_v51 = vld [vmem:[%s14527_s15 + $0x460] sm:$0xff] }
 0xa8f   : > { %v13386_v40 = vadd.f32 %v6530_v57, %v6512_v28  ;;  %v6632_v57 = vld [vmem:[%s14527_s15 + $0x78] sm:$0xff]  ;;  %v8819_v47 = vld [vmem:[%s14527_s15 + $0x468] sm:$0xff] }
 0xa90   : > { %v6568_v44 = vmul.f32 %v13383_v26, %v13383_v26  ;;  %v6553_v15 = vmul.f32 %v6546_v23, %v13383_v26  ;;  %v9366_v28 = vpack.c.bf16 %v6632_v57, %v6631_v11  ;;  %9508 = vmatpush1.bf16.msra.mxu1 %v9507_v56  ;;  %v8696_v11 = vld [vmem:[%s14527_s15 + $0xc8] sm:$0xff]  ;;  %v8697_v57 = vld [vmem:[%s14527_s15 + $0xd0] sm:$0xff] }
 0xa91   : > { %v6554_v21 = vmul.f32 %v6550_v54, %v13386_v40  ;;  %v6569_v8 = vmul.f32 %v13386_v40, %v13386_v40  ;;  %v6516_v14 = vpop.f32.mrb[18].mxu1  ;;  %9509 = vmatprep.subr.bf16.mxu1 %v10983_v1 }
 0xa92   : > { %v13394_v36 = vadd.f32 %v6535_v60, %v6516_v14  ;;  %v6518_v35 = vpop.f32.mrb[19].mxu1  ;;  %v6572_v42 = vmul.f32 %v6568_v44, %v6546_v23  ;;  %9367 = vmatpush1.bf16.msra.mxu0 %v9366_v28  ;;  %v8804_v28 = vld [vmem:[%s14527_s15 + $0x3f8] sm:$0xff] }
 0xa93   : > { %v13396_v19 = vadd.f32 %v6535_v60, %v6518_v35  ;;  %v6558_v20 = vsel %vm6557_vm8, %v6554_v21, 0.0  ;;  %v6573_v18 = vmul.f32 %v6569_v8, %v6550_v54  ;;  %6669 = vmatprep.subr.mxu0 %v10975_v55  ;;  %v6633_v60 = vld [vmem:[%s14527_s15 + $0x80] sm:$0xff]  ;;  %v8794_v21 = vld [vmem:[%s14527_s15 + $0x3b0] sm:$0xff] }
 0xa94   : > { %v6559_v59 = vadd.f32 %v6558_v20, %v6553_v15  ;;  %v6555_v49 = vmul.f32 %v6546_v23, %v13394_v36  ;;  %v6570_v13 = vmul.f32 %v13394_v36, %v13394_v36 }
 0xa95   : > { %v6556_v24 = vmul.f32 %v6550_v54, %v13396_v19  ;;  %v6571_v7 = vmul.f32 %v13396_v19, %v13396_v19  ;;  %v6576_v37 = vsel %vm6557_vm8, %v6573_v18, 0.0 }
 0xa96   : > { %6560 = vadd.xlane.f32.xlu0 %v6559_v59  ;;  %v6577_v2 = vadd.f32 %v6576_v37, %v6572_v42  ;;  %v6574_v45 = vmul.f32 %v6570_v13, %v6546_v23  ;;  %v8793_v23 = vld [vmem:[%s14527_s15 + $0x3a8] sm:$0xff]  ;;  %6670 = vmatpush1.msra.mxu0 %v6633_v60  ;;  %v8698_v60 = vld [vmem:[%s14527_s15 + $0xd8] sm:$0xff] }
 0xa97   : > { %v6562_v33 = vsel %vm6557_vm8, %v6556_v24, 0.0  ;;  %v6575_v31 = vmul.f32 %v6571_v7, %v6550_v54  ;;  %v8792_v54 = vld [vmem:[%s14527_s15 + $0x3a0] sm:$0xff]  ;;  %9368 = vmatprep.subr.bf16.mxu0 %v10983_v1 }
 0xa98   : > { %6578 = vadd.xlane.f32.xlu1 %v6577_v2  ;;  %v6563_v16 = vadd.f32 %v6562_v33, %v6555_v49  ;;  %v9510_v44 = vpack.c.bf16 %v8793_v23, %v8792_v54  ;;  %v8688_v33 = vld [vmem:[%s14527_s15 + $0x88] sm:$0xff]  ;;  %v9522_v54 = vpack.c.bf16 %v8803_v53, %v8802_v10  ;;  %v9381_v23 = vpack.c.bf16 %v8697_v57, %v8696_v11  ;;  %v8820_v53 = vld [vmem:[%s14527_s15 + $0x470] sm:$0xff]  ;;  %v8821_v11 = vld [vmem:[%s14527_s15 + $0x478] sm:$0xff] }
 0xa99   : > { %v6580_v46 = vsel %vm6557_vm8, %v6575_v31, 0.0  ;;  %v8689_v31 = vld [vmem:[%s14527_s15 + $0x90] sm:$0xff] }
 0xa9a   : > { %6564 = vadd.xlane.f32.xlu0 %v6563_v16  ;;  %v6581_v5 = vadd.f32 %v6580_v46, %v6574_v45  ;;  %9511 = vmatpush1.bf16.msra.mxu1 %v9510_v44  ;;  %v8805_v44 = vld [vmem:[%s14527_s15 + $0x400] sm:$0xff]  ;;  %v8714_v57 = vld [vmem:[%s14527_s15 + $0x150] sm:$0xff] }
 0xa9b   : > { %7234 = vmatprep.subr.mxu1 %v10975_v55 }
 0xa9e   : > { %6582 = vadd.xlane.f32.xlu0 %v6581_v5  ;;  %7235 = vmatpush1.msra.mxu1 %v8794_v21  ;;  %v9369_v5 = vpack.c.bf16 %v8689_v31, %v8688_v33  ;;  %v8699_v21 = vld [vmem:[%s14527_s15 + $0xe0] sm:$0xff]  ;;  %v8810_v33 = vld [vmem:[%s14527_s15 + $0x428] sm:$0xff]  ;;  %v8811_v31 = vld [vmem:[%s14527_s15 + $0x430] sm:$0xff] }
 0xa9f   : > { %9512 = vmatprep.subr.bf16.mxu1 %v10983_v1 }
 0xb23   : > { %v6561_v8 = vpop.xlane.xlu0 %6560 }
 0xb24   : > { %v6566_v14 = vmul.f32 0.0125, %v6561_v8  ;;  %v9525_v8 = vpack.c.bf16 %v8805_v44, %v8804_v28  ;;  %v8822_v28 = vld [vmem:[%s14527_s15 + $0x480] sm:$0xff]  ;;  %v8823_v44 = vld [vmem:[%s14527_s15 + $0x488] sm:$0xff] }
 0xb25   : > { %v6579_v15 = vpop.xlane.xlu1 %6578 }
 0xb26   : > { %v6584_v35 = vmul.f32 0.0125, %v6579_v15  ;;  %v6586_v20 = vmul.f32 %v6566_v14, %v6566_v14  ;;  %v6592_v7 = vsub.f32 %v13383_v26, %v6566_v14  ;;  %v6593_v37 = vsub.f32 %v13386_v40, %v6566_v14  ;;  %v8796_v26 = vld [vmem:[%s14527_s15 + $0x3b8] sm:$0xff]  ;;  %v8797_v40 = vld [vmem:[%s14527_s15 + $0x3c0] sm:$0xff]  ;;  %v8806_v15 = vld [vmem:[%s14527_s15 + $0x408] sm:$0xff] }
 0xb27   : > { %v6565_v24 = vpop.xlane.xlu0 %6564  ;;  %v9513_v9 = vpack.c.bf16 %v8797_v40, %v8796_v26  ;;  %v9384_v14 = vpack.c.bf16 %v8699_v21, %v8698_v60  ;;  %v8707_v26 = vld [vmem:[%s14527_s15 + $0x118] sm:$0xff]  ;;  %v8716_v60 = vld [vmem:[%s14527_s15 + $0x160] sm:$0xff]  ;;  %v8717_v21 = vld [vmem:[%s14527_s15 + $0x168] sm:$0xff] }
 0xb28   : > { %v6588_v18 = vsub.f32 %v6584_v35, %v6586_v20  ;;  %v13514_v29 = vmul.f32 0.0125, %v6565_v24  ;;  %v8807_v35 = vld [vmem:[%s14527_s15 + $0x410] sm:$0xff]  ;;  %v8700_v20 = vld [vmem:[%s14527_s15 + $0xe8] sm:$0xff]  ;;  %v8808_v24 = vld [vmem:[%s14527_s15 + $0x418] sm:$0xff] }
 0xb2a   : > { %v6590_v59 = vmax.f32 %v6588_v18, 0.0  ;;  %v6587_v58 = vmul.f32 %v13514_v29, %v13514_v29  ;;  %v8701_v18 = vld [vmem:[%s14527_s15 + $0xf0] sm:$0xff] }
 0xb2b   : > { %v6583_v45 = vpop.xlane.xlu0 %6582 }
 0xb2c   : > { %v6596_v42 = vadd.f32 1e-05, %v6590_v59  ;;  %v6585_v0 = vmul.f32 0.0125, %v6583_v45  ;;  %v9528_v59 = vpack.c.bf16 %v8807_v35, %v8806_v15  ;;  %v9534_v45 = vpack.c.bf16 %v8811_v31, %v8810_v33  ;;  %v8824_v15 = vld [vmem:[%s14527_s15 + $0x490] sm:$0xff]  ;;  %v8825_v35 = vld [vmem:[%s14527_s15 + $0x498] sm:$0xff] }
 0xb2d   : > { %v8828_v33 = vld [vmem:[%s14527_s15 + $0x4b0] sm:$0xff]  ;;  %v8829_v31 = vld [vmem:[%s14527_s15 + $0x4b8] sm:$0xff] }
 0xb2e   : > { %10901 = vrsqrt.f32 %v6596_v42  ;;  %v6589_v52 = vsub.f32 %v6585_v0, %v6587_v58  ;;  %v9387_v42 = vpack.c.bf16 %v8701_v18, %v8700_v20  ;;  %v8709_v0 = vld [vmem:[%s14527_s15 + $0x128] sm:$0xff]  ;;  %v8718_v20 = vld [vmem:[%s14527_s15 + $0x170] sm:$0xff]  ;;  %v8719_v18 = vld [vmem:[%s14527_s15 + $0x178] sm:$0xff] }
 0xb30   : > { %v6591_v41 = vmax.f32 %v6589_v52, 0.0  ;;  %v8710_v52 = vld [vmem:[%s14527_s15 + $0x130] sm:$0xff] }
 0xb32   : > { %v6597_v56 = vadd.f32 1e-05, %v6591_v41  ;;  %v8712_v41 = vld [vmem:[%s14527_s15 + $0x140] sm:$0xff] }
 0xb34   : > { %10903 = vrsqrt.f32 %v6597_v56  ;;  %v8715_v56 = vld [vmem:[%s14527_s15 + $0x158] sm:$0xff] }
 0xb38   : > { %v10902_v49 = vpop.eup %10901 }
 0xb39   : > { %v6600_v13 = vmul.f32 %v10902_v49, %v6592_v7  ;;  %v6601_v2 = vmul.f32 %v10902_v49, %v6593_v37  ;;  %v8809_v7 = vld [vmem:[%s14527_s15 + $0x420] sm:$0xff]  ;;  %v8702_v37 = vld [vmem:[%s14527_s15 + $0xf8] sm:$0xff] }
 0xb3a   : > { %v8703_v49 = vld [vmem:[%s14527_s15 + $0x100] sm:$0xff] }
 0xb3b   : > { %v6608_v16 = vmul.f32 0.01, %v6600_v13  ;;  %v6609_v46 = vmul.f32 0.01, %v6601_v2  ;;  %vm6605_vm10 = vcmp.ge.f32.partialorder %v6601_v2, 0.0  ;;  %vm6604_vm7 = vcmp.ge.f32.partialorder %v6600_v13, 0.0 }
 0xb3d   : > { %v13516_v22 = vsel %vm6605_vm10, %v6601_v2, %v6609_v46  ;;  %v13518_v61 = vsel %vm6604_vm7, %v6600_v13, %v6608_v16  ;;  %v9531_v13 = vpack.c.bf16 %v8809_v7, %v8808_v24  ;;  %v9390_v2 = vpack.c.bf16 %v8703_v49, %v8702_v37  ;;  %v8826_v24 = vld [vmem:[%s14527_s15 + $0x4a0] sm:$0xff]  ;;  %v8827_v7 = vld [vmem:[%s14527_s15 + $0x4a8] sm:$0xff] }
 0xb3e   : > { %8687 = vmatprep.mubr.msk.f32.mxu0 %vm6557_vm8, %v13516_v22  ;;  %v6728_v32 = vrot.slane %v13516_v22, 1  ;;  %v7198_v6 = vrot.slane %v13516_v22, 6  ;;  %v7197_v34 = vrot.slane %v13518_v61, 6  ;;  %v7292_v25 = vrot.slane %v13516_v22, 7  ;;  %v13628_v16 = vpop.eup %10903  ;;  %v8720_v37 = vld [vmem:[%s14527_s15 + $0x180] sm:$0xff]  ;;  %v8721_v49 = vld [vmem:[%s14527_s15 + $0x188] sm:$0xff] }
 0xb3f   : > { %6702 = vmatmul.mubr.f32.vlgmr.msra.gmra.mrb[40].mxu0 %v13518_v61  ;;  %v6595_v46 = vsub.f32 %v13396_v19, %v13514_v29  ;;  %v8704_v19 = vld [vmem:[%s14527_s15 + $0x108] sm:$0xff]  ;;  %v7291_v58 = vrot.slane %v13518_v61, 7 }
 0xb40   : > { %9370 = vmatpush1.bf16.msra.mxu0 %v9369_v5  ;;  %8705 = vmatprep.mubr.msk.f32.mxu0 %vm6557_vm8, %v6728_v32  ;;  %v8706_v5 = vld [vmem:[%s14527_s15 + $0x110] sm:$0xff]  ;;  %v8815_v32 = vld [vmem:[%s14527_s15 + $0x448] sm:$0xff] }
 0xb41   : > { %8795 = vmatprep.mubr.msk.f32.mxu1 %vm6557_vm8, %v7198_v6  ;;  %9371 = vmatprep.subr.bf16.mxu0 %v10983_v1  ;;  %v6603_v40 = vmul.f32 %v13628_v16, %v6595_v46  ;;  %v9393_v39 = vpack.c.bf16 %v8707_v26, %v8706_v5  ;;  %v6727_v6 = vrot.slane %v13518_v61, 1  ;;  %v9537_v63 = vpack.c.bf16 %v8815_v32, %v8814_v12  ;;  %v8724_v26 = vld [vmem:[%s14527_s15 + $0x198] sm:$0xff]  ;;  %v8726_v32 = vld [vmem:[%s14527_s15 + $0x1a8] sm:$0xff] }
 0xb42   : > { %7267 = vmatmul.mubr.f32.vlgmr.msra.gmra.mrb[20].mxu1 %v7197_v34  ;;  %v8708_v34 = vld [vmem:[%s14527_s15 + $0x120] sm:$0xff]  ;;  %v6594_v46 = vsub.f32 %v13394_v36, %v13514_v29  ;;  %v9558_v5 = vpack.c.bf16 %v8829_v31, %v8828_v33  ;;  %v8722_v36 = vld [vmem:[%s14527_s15 + $0x190] sm:$0xff]  ;;  %v6821_v12 = vrot.slane %v13518_v61, 2 }
 0xb43   : > { %9514 = vmatpush1.bf16.msra.mxu1 %v9513_v9  ;;  %8813 = vmatprep.mubr.msk.f32.mxu1 %vm6557_vm8, %v7292_v25  ;;  %v6611_v9 = vmul.f32 0.01, %v6603_v40  ;;  %vm6607_vm1 = vcmp.ge.f32.partialorder %v6603_v40, 0.0  ;;  %v9396_v25 = vpack.c.bf16 %v8709_v0, %v8708_v34  ;;  %v6916_v34 = vrot.slane %v13516_v22, 3  ;;  %v8830_v0 = vld [vmem:[%s14527_s15 + $0x4c0] sm:$0xff] }
 0xb44   : > { %9373 = vmatpush1.bf16.msra.mxu0 %v9372_v27  ;;  %9515 = vmatprep.subr.bf16.mxu1 %v10983_v1  ;;  %v6822_v27 = vrot.slane %v13516_v22, 2  ;;  %v8742_v31 = vld [vmem:[%s14527_s15 + $0x220] sm:$0xff] }
 0xb45   : > { %9374 = vmatprep.subr.bf16.mxu0 %v10983_v1 }
 0xb47   : > { %9517 = vmatpush1.bf16.msra.mxu1 %v9516_v17  ;;  %v8711_v17 = vld [vmem:[%s14527_s15 + $0x138] sm:$0xff] }
 0xb48   : > { %9376 = vmatpush1.bf16.msra.mxu0 %v9375_v30  ;;  %9518 = vmatprep.subr.bf16.mxu1 %v10983_v1  ;;  %v13680_v30 = vsel %vm6607_vm1, %v6603_v40, %v6611_v9  ;;  %v9399_v3 = vpack.c.bf16 %v8711_v17, %v8710_v52  ;;  %v8725_v40 = vld [vmem:[%s14527_s15 + $0x1a0] sm:$0xff]  ;;  %v9423_v17 = vpack.c.bf16 %v8729_v4, %v8728_v48  ;;  %v8854_v48 = vld [vmem:[%s14527_s15 + $0x570] sm:$0xff]  ;;  %v8855_v4 = vld [vmem:[%s14527_s15 + $0x578] sm:$0xff] }
 0xb49   : > { %9377 = vmatprep.subr.bf16.mxu0 %v10983_v1  ;;  %v9417_v29 = vpack.c.bf16 %v8725_v40, %v8724_v26  ;;  %v8850_v26 = vld [vmem:[%s14527_s15 + $0x550] sm:$0xff]  ;;  %v8851_v40 = vld [vmem:[%s14527_s15 + $0x558] sm:$0xff] }
 0xb4b   : > { %9520 = vmatpush1.bf16.msra.mxu1 %v9519_v50  ;;  %v8713_v50 = vld [vmem:[%s14527_s15 + $0x148] sm:$0xff] }
 0xb4c   : > { %9379 = vmatpush1.bf16.msra.mxu0 %v9378_v43  ;;  %9521 = vmatprep.subr.bf16.mxu1 %v10983_v1  ;;  %v9543_v43 = vpack.c.bf16 %v8819_v47, %v8818_v51  ;;  %v9402_v10 = vpack.c.bf16 %v8713_v50, %v8712_v41  ;;  %v8730_v51 = vld [vmem:[%s14527_s15 + $0x1c8] sm:$0xff]  ;;  %v8731_v47 = vld [vmem:[%s14527_s15 + $0x1d0] sm:$0xff] }
 0xb4d   : > { %9380 = vmatprep.subr.bf16.mxu0 %v10983_v1  ;;  %v9426_v50 = vpack.c.bf16 %v8731_v47, %v8730_v51  ;;  %v8856_v51 = vld [vmem:[%s14527_s15 + $0x580] sm:$0xff]  ;;  %v8857_v47 = vld [vmem:[%s14527_s15 + $0x588] sm:$0xff] }
 0xb4f   : > { %9523 = vmatpush1.bf16.msra.mxu1 %v9522_v54  ;;  %v9546_v54 = vpack.c.bf16 %v8821_v11, %v8820_v53  ;;  %v8732_v53 = vld [vmem:[%s14527_s15 + $0x1d8] sm:$0xff]  ;;  %v8733_v11 = vld [vmem:[%s14527_s15 + $0x1e0] sm:$0xff] }
 0xb50   : > { %9382 = vmatpush1.bf16.msra.mxu0 %v9381_v23  ;;  %9524 = vmatprep.subr.bf16.mxu1 %v10983_v1  ;;  %v9405_v23 = vpack.c.bf16 %v8715_v56, %v8714_v57  ;;  %v9429_v56 = vpack.c.bf16 %v8733_v11, %v8732_v53  ;;  %v8858_v53 = vld [vmem:[%s14527_s15 + $0x590] sm:$0xff]  ;;  %v8859_v11 = vld [vmem:[%s14527_s15 + $0x598] sm:$0xff] }
 0xb51   : > { %9383 = vmatprep.subr.bf16.mxu0 %v10983_v1 }
 0xb53   : > { %9526 = vmatpush1.bf16.msra.mxu1 %v9525_v8  ;;  %v9549_v8 = vpack.c.bf16 %v8823_v44, %v8822_v28  ;;  %v8734_v28 = vld [vmem:[%s14527_s15 + $0x1e8] sm:$0xff]  ;;  %v8735_v44 = vld [vmem:[%s14527_s15 + $0x1f0] sm:$0xff] }
 0xb54   : > { %9385 = vmatpush1.bf16.msra.mxu0 %v9384_v14  ;;  %9527 = vmatprep.subr.bf16.mxu1 %v10983_v1  ;;  %v9408_v14 = vpack.c.bf16 %v8717_v21, %v8716_v60  ;;  %v9432_v21 = vpack.c.bf16 %v8735_v44, %v8734_v28  ;;  %v8860_v28 = vld [vmem:[%s14527_s15 + $0x5a0] sm:$0xff]  ;;  %v8861_v44 = vld [vmem:[%s14527_s15 + $0x5a8] sm:$0xff] }
 0xb55   : > { %9386 = vmatprep.subr.bf16.mxu0 %v10983_v1 }
 0xb57   : > { %9529 = vmatpush1.bf16.msra.mxu1 %v9528_v59  ;;  %v9552_v59 = vpack.c.bf16 %v8825_v35, %v8824_v15  ;;  %v8736_v15 = vld [vmem:[%s14527_s15 + $0x1f8] sm:$0xff]  ;;  %v8737_v35 = vld [vmem:[%s14527_s15 + $0x200] sm:$0xff] }
 0xb58   : > { %9388 = vmatpush1.bf16.msra.mxu0 %v9387_v42  ;;  %9530 = vmatprep.subr.bf16.mxu1 %v10983_v1  ;;  %v9411_v42 = vpack.c.bf16 %v8719_v18, %v8718_v20  ;;  %v9435_v18 = vpack.c.bf16 %v8737_v35, %v8736_v15  ;;  %v8862_v15 = vld [vmem:[%s14527_s15 + $0x5b0] sm:$0xff]  ;;  %v8863_v35 = vld [vmem:[%s14527_s15 + $0x5b8] sm:$0xff] }
 0xb59   : > { %9389 = vmatprep.subr.bf16.mxu0 %v10983_v1 }
 0xb5b   : > { %9532 = vmatpush1.bf16.msra.mxu1 %v9531_v13  ;;  %v9555_v13 = vpack.c.bf16 %v8827_v7, %v8826_v24  ;;  %v8738_v24 = vld [vmem:[%s14527_s15 + $0x208] sm:$0xff]  ;;  %v8739_v7 = vld [vmem:[%s14527_s15 + $0x210] sm:$0xff] }
 0xb5c   : > { %9391 = vmatpush1.bf16.msra.mxu0 %v9390_v2  ;;  %9533 = vmatprep.subr.bf16.mxu1 %v10983_v1  ;;  %v9414_v2 = vpack.c.bf16 %v8721_v49, %v8720_v37  ;;  %v9438_v49 = vpack.c.bf16 %v8739_v7, %v8738_v24  ;;  %v8864_v24 = vld [vmem:[%s14527_s15 + $0x5c0] sm:$0xff]  ;;  %v8865_v7 = vld [vmem:[%s14527_s15 + $0x5c8] sm:$0xff] }
 0xb5d   : > { %6764 = vmatprep.subr.mxu0 %v10975_v55 }
 0xb5f   : > { %9535 = vmatpush1.bf16.msra.mxu1 %v9534_v45  ;;  %v6602_v45 = vmul.f32 %v13628_v16, %v6594_v46  ;;  %v8832_v16 = vld [vmem:[%s14527_s15 + $0x4c8] sm:$0xff] }
 0xb60   : > { %6765 = vmatpush1.msra.mxu0 %v8704_v19  ;;  %7328 = vmatprep.subr.mxu1 %v10975_v55  ;;  %v8833_v19 = vld [vmem:[%s14527_s15 + $0x4d0] sm:$0xff]  ;;  %v8743_v46 = vld [vmem:[%s14527_s15 + $0x228] sm:$0xff] }
 0xb61   : > { %6797 = vmatmul.mubr.f32.vlgmr.msra.gmra.mrb[40].mxu0 %v6727_v6  ;;  %9392 = vmatprep.subr.bf16.mxu0 %v10983_v1  ;;  %v8727_v6 = vld [vmem:[%s14527_s15 + $0x1b0] sm:$0xff]  ;;  %vm6606_vm2 = vcmp.ge.f32.partialorder %v6602_v45, 0.0  ;;  %v9561_v9 = vpack.c.bf16 %v8833_v19, %v8832_v16  ;;  %v8745_v16 = vld [vmem:[%s14527_s15 + $0x238] sm:$0xff]  ;;  %v7010_v19 = vrot.slane %v13516_v22, 4 }
 0xb62   : > { %9394 = vmatpush1.bf16.msra.mxu0 %v9393_v39  ;;  %8723 = vmatprep.mubr.msk.f32.mxu0 %vm6557_vm8, %v6822_v27  ;;  %v6610_v39 = vmul.f32 0.01, %v6602_v45  ;;  %v9420_v27 = vpack.c.bf16 %v8727_v6, %v8726_v32 }
 0xb63   : > { %7329 = vmatpush1.msra.mxu1 %v8812_v62  ;;  %9395 = vmatprep.subr.bf16.mxu0 %v10983_v1  ;;  %v8834_v62 = vld [vmem:[%s14527_s15 + $0x4d8] sm:$0xff] }
 0xb64   : > { %7361 = vmatmul.mubr.f32.vlgmr.msra.gmra.mrb[20].mxu1 %v7291_v58  ;;  %9536 = vmatprep.subr.bf16.mxu1 %v10983_v1  ;;  %v13802_v58 = vsel %vm6606_vm2, %v6602_v45, %v6610_v39  ;;  %v8740_v45 = vld [vmem:[%s14527_s15 + $0x218] sm:$0xff]  ;;  %v8848_v39 = vld [vmem:[%s14527_s15 + $0x548] sm:$0xff] }
 0xb65   : > { %9538 = vmatpush1.bf16.msra.mxu1 %v9537_v63  ;;  %8831 = vmatprep.mubr.msk.f32.mxu1 %vm6557_vm8, %v13680_v30  ;;  %v8835_v63 = vld [vmem:[%s14527_s15 + $0x4e0] sm:$0xff]  ;;  %v7478_v32 = vrot.slane %v13802_v58, 1 }
 0xb66   : > { %9397 = vmatpush1.bf16.msra.mxu0 %v9396_v25  ;;  %9539 = vmatprep.subr.bf16.mxu1 %v10983_v1  ;;  %v7479_v25 = vrot.slane %v13680_v30, 1  ;;  %v9564_v52 = vpack.c.bf16 %v8835_v63, %v8834_v62  ;;  %v8747_v62 = vld [vmem:[%s14527_s15 + $0x248] sm:$0xff] }
 0xb67   : > { %9398 = vmatprep.subr.bf16.mxu0 %v10983_v1 }
 0xb69   : > { %9541 = vmatpush1.bf16.msra.mxu1 %v9540_v38  ;;  %v8836_v38 = vld [vmem:[%s14527_s15 + $0x4e8] sm:$0xff] }
 0xb6a   : > { %9400 = vmatpush1.bf16.msra.mxu0 %v9399_v3  ;;  %9542 = vmatprep.subr.bf16.mxu1 %v10983_v1  ;;  %v8837_v3 = vld [vmem:[%s14527_s15 + $0x4f0] sm:$0xff] }
 0xb6b   : > { %9401 = vmatprep.subr.bf16.mxu0 %v10983_v1  ;;  %v9567_v41 = vpack.c.bf16 %v8837_v3, %v8836_v38  ;;  %v9591_v38 = vpack.c.bf16 %v8855_v4, %v8854_v48  ;;  %v8874_v4 = vld [vmem:[%s14527_s15 + $0x608] sm:$0xff] }
 0xb6d   : > { %9544 = vmatpush1.bf16.msra.mxu1 %v9543_v43  ;;  %v8838_v43 = vld [vmem:[%s14527_s15 + $0x4f8] sm:$0xff] }
 0xb6e   : > { %9403 = vmatpush1.bf16.msra.mxu0 %v9402_v10  ;;  %9545 = vmatprep.subr.bf16.mxu1 %v10983_v1  ;;  %v8839_v10 = vld [vmem:[%s14527_s15 + $0x500] sm:$0xff] }
 0xb6f   : > { %9404 = vmatprep.subr.bf16.mxu0 %v10983_v1  ;;  %v9570_v57 = vpack.c.bf16 %v8839_v10, %v8838_v43  ;;  %v9594_v43 = vpack.c.bf16 %v8857_v47, %v8856_v51  ;;  %v8876_v47 = vld [vmem:[%s14527_s15 + $0x618] sm:$0xff] }
 0xb71   : > { %9547 = vmatpush1.bf16.msra.mxu1 %v9546_v54  ;;  %v8840_v54 = vld [vmem:[%s14527_s15 + $0x508] sm:$0xff] }
 0xb72   : > { %9406 = vmatpush1.bf16.msra.mxu0 %v9405_v23  ;;  %9548 = vmatprep.subr.bf16.mxu1 %v10983_v1  ;;  %v8841_v23 = vld [vmem:[%s14527_s15 + $0x510] sm:$0xff] }
 0xb73   : > { %9407 = vmatprep.subr.bf16.mxu0 %v10983_v1  ;;  %v9573_v60 = vpack.c.bf16 %v8841_v23, %v8840_v54  ;;  %v9597_v54 = vpack.c.bf16 %v8859_v11, %v8858_v53  ;;  %v8878_v11 = vld [vmem:[%s14527_s15 + $0x628] sm:$0xff] }
 0xb75   : > { %9550 = vmatpush1.bf16.msra.mxu1 %v9549_v8  ;;  %v8842_v8 = vld [vmem:[%s14527_s15 + $0x518] sm:$0xff] }
 0xb76   : > { %9409 = vmatpush1.bf16.msra.mxu0 %v9408_v14  ;;  %9551 = vmatprep.subr.bf16.mxu1 %v10983_v1  ;;  %v8843_v14 = vld [vmem:[%s14527_s15 + $0x520] sm:$0xff] }
 0xb77   : > { %9410 = vmatprep.subr.bf16.mxu0 %v10983_v1  ;;  %v9576_v20 = vpack.c.bf16 %v8843_v14, %v8842_v8  ;;  %v9600_v8 = vpack.c.bf16 %v8861_v44, %v8860_v28  ;;  %v8880_v44 = vld [vmem:[%s14527_s15 + $0x638] sm:$0xff] }
 0xb79   : > { %9553 = vmatpush1.bf16.msra.mxu1 %v9552_v59  ;;  %v8844_v59 = vld [vmem:[%s14527_s15 + $0x528] sm:$0xff] }
 0xb7a   : > { %9412 = vmatpush1.bf16.msra.mxu0 %v9411_v42  ;;  %9554 = vmatprep.subr.bf16.mxu1 %v10983_v1  ;;  %v8845_v42 = vld [vmem:[%s14527_s15 + $0x530] sm:$0xff] }
 0xb7b   : > { %9413 = vmatprep.subr.bf16.mxu0 %v10983_v1  ;;  %v9579_v37 = vpack.c.bf16 %v8845_v42, %v8844_v59  ;;  %v9603_v59 = vpack.c.bf16 %v8863_v35, %v8862_v15  ;;  %v8882_v35 = vld [vmem:[%s14527_s15 + $0x648] sm:$0xff] }
 0xb7d   : > { %9556 = vmatpush1.bf16.msra.mxu1 %v9555_v13  ;;  %v8846_v13 = vld [vmem:[%s14527_s15 + $0x538] sm:$0xff] }
 0xb7e   : > { %9415 = vmatpush1.bf16.msra.mxu0 %v9414_v2  ;;  %9557 = vmatprep.subr.bf16.mxu1 %v10983_v1  ;;  %v8847_v2 = vld [vmem:[%s14527_s15 + $0x540] sm:$0xff] }
 0xb7f   : > { %6858 = vmatprep.subr.mxu0 %v10975_v55  ;;  %v9582_v33 = vpack.c.bf16 %v8847_v2, %v8846_v13  ;;  %v8761_v13 = vld [vmem:[%s14527_s15 + $0x2b0] sm:$0xff]  ;;  %v8758_v2 = vld [vmem:[%s14527_s15 + $0x2a0] sm:$0xff] }
 0xb81   : > { %9559 = vmatpush1.bf16.msra.mxu1 %v9558_v5  ;;  %v9441_v5 = vpack.c.bf16 %v8743_v46, %v8742_v31  ;;  %v8868_v31 = vld [vmem:[%s14527_s15 + $0x5d8] sm:$0xff]  ;;  %v8869_v46 = vld [vmem:[%s14527_s15 + $0x5e0] sm:$0xff] }
 0xb82   : > { %6859 = vmatpush1.msra.mxu0 %v8722_v36  ;;  %7420 = vmatprep.subr.mxu1 %v10975_v55  ;;  %v6915_v36 = vrot.slane %v13518_v61, 3 }
 0xb83   : > { %6891 = vmatmul.mubr.f32.vlgmr.msra.gmra.mrb[40].mxu0 %v6821_v12  ;;  %9416 = vmatprep.subr.bf16.mxu0 %v10983_v1  ;;  %v9585_v12 = vpack.c.bf16 %v8851_v40, %v8850_v26  ;;  %v8763_v26 = vld [vmem:[%s14527_s15 + $0x2c0] sm:$0xff]  ;;  %v7104_v40 = vrot.slane %v13516_v22, 5  ;;  %v8871_v22 = vld [vmem:[%s14527_s15 + $0x5f0] sm:$0xff] }
 0xb84   : > { %9418 = vmatpush1.bf16.msra.mxu0 %v9417_v29  ;;  %8741 = vmatprep.mubr.msk.f32.mxu0 %vm6557_vm8, %v6916_v34  ;;  %v8744_v29 = vld [vmem:[%s14527_s15 + $0x230] sm:$0xff]  ;;  %v8852_v34 = vld [vmem:[%s14527_s15 + $0x560] sm:$0xff] }
 0xb85   : > { %7421 = vmatpush1.msra.mxu1 %v8830_v0  ;;  %9419 = vmatprep.subr.bf16.mxu0 %v10983_v1  ;;  %v9444_v6 = vpack.c.bf16 %v8745_v16, %v8744_v29  ;;  %v8853_v0 = vld [vmem:[%s14527_s15 + $0x568] sm:$0xff]  ;;  %v9609_v29 = vpack.c.bf16 %v8869_v46, %v8868_v31  ;;  %v7572_v16 = vrot.slane %v13802_v58, 2  ;;  %v8890_v46 = vld [vmem:[%s14527_s15 + $0x680] sm:$0xff] }
 0xb86   : > { %7453 = vmatmul.mubr.f32.vlgmr.msra.gmra.mrb[20].mxu1 %v13802_v58  ;;  %9560 = vmatprep.subr.bf16.mxu1 %v10983_v1  ;;  %v9588_v63 = vpack.c.bf16 %v8853_v0, %v8852_v34 }
 0xb87   : > { %9562 = vmatpush1.bf16.msra.mxu1 %v9561_v9  ;;  %8849 = vmatprep.mubr.msk.f32.mxu1 %vm6557_vm8, %v7479_v25  ;;  %v7573_v9 = vrot.slane %v13680_v30, 2 }
 0xb88   : > { %9421 = vmatpush1.bf16.msra.mxu0 %v9420_v27  ;;  %9563 = vmatprep.subr.bf16.mxu1 %v10983_v1  ;;  %v8746_v27 = vld [vmem:[%s14527_s15 + $0x240] sm:$0xff] }
 0xb89   : > { %9422 = vmatprep.subr.bf16.mxu0 %v10983_v1  ;;  %v9447_v25 = vpack.c.bf16 %v8747_v62, %v8746_v27  ;;  %v8873_v27 = vld [vmem:[%s14527_s15 + $0x600] sm:$0xff]  ;;  %v8766_v62 = vld [vmem:[%s14527_s15 + $0x2d8] sm:$0xff] }
 0xb8b   : > { %9565 = vmatpush1.bf16.msra.mxu1 %v9564_v52  ;;  %v8748_v52 = vld [vmem:[%s14527_s15 + $0x250] sm:$0xff] }
 0xb8c   : > { %9424 = vmatpush1.bf16.msra.mxu0 %v9423_v17  ;;  %9566 = vmatprep.subr.bf16.mxu1 %v10983_v1  ;;  %v8749_v17 = vld [vmem:[%s14527_s15 + $0x258] sm:$0xff] }
 0xb8d   : > { %9425 = vmatprep.subr.bf16.mxu0 %v10983_v1  ;;  %v9450_v3 = vpack.c.bf16 %v8749_v17, %v8748_v52  ;;  %v8875_v52 = vld [vmem:[%s14527_s15 + $0x610] sm:$0xff]  ;;  %v8768_v17 = vld [vmem:[%s14527_s15 + $0x2e8] sm:$0xff] }
 0xb8f   : > { %9568 = vmatpush1.bf16.msra.mxu1 %v9567_v41  ;;  %v8750_v41 = vld [vmem:[%s14527_s15 + $0x260] sm:$0xff] }
 0xb90   : > { %9427 = vmatpush1.bf16.msra.mxu0 %v9426_v50  ;;  %9569 = vmatprep.subr.bf16.mxu1 %v10983_v1  ;;  %v8751_v50 = vld [vmem:[%s14527_s15 + $0x268] sm:$0xff] }
 0xb91   : > { %9428 = vmatprep.subr.bf16.mxu0 %v10983_v1  ;;  %v9453_v10 = vpack.c.bf16 %v8751_v50, %v8750_v41  ;;  %v8877_v41 = vld [vmem:[%s14527_s15 + $0x620] sm:$0xff]  ;;  %v8770_v50 = vld [vmem:[%s14527_s15 + $0x2f8] sm:$0xff] }
 0xb93   : > { %9571 = vmatpush1.bf16.msra.mxu1 %v9570_v57  ;;  %v8752_v57 = vld [vmem:[%s14527_s15 + $0x270] sm:$0xff] }
 0xb94   : > { %9430 = vmatpush1.bf16.msra.mxu0 %v9429_v56  ;;  %9572 = vmatprep.subr.bf16.mxu1 %v10983_v1  ;;  %v8753_v56 = vld [vmem:[%s14527_s15 + $0x278] sm:$0xff] }
 0xb95   : > { %9431 = vmatprep.subr.bf16.mxu0 %v10983_v1  ;;  %v9456_v23 = vpack.c.bf16 %v8753_v56, %v8752_v57  ;;  %v8879_v57 = vld [vmem:[%s14527_s15 + $0x630] sm:$0xff]  ;;  %v8772_v56 = vld [vmem:[%s14527_s15 + $0x308] sm:$0xff] }
 0xb97   : > { %9574 = vmatpush1.bf16.msra.mxu1 %v9573_v60  ;;  %v8754_v60 = vld [vmem:[%s14527_s15 + $0x280] sm:$0xff] }
 0xb98   : > { %9433 = vmatpush1.bf16.msra.mxu0 %v9432_v21  ;;  %9575 = vmatprep.subr.bf16.mxu1 %v10983_v1  ;;  %v8755_v21 = vld [vmem:[%s14527_s15 + $0x288] sm:$0xff] }
 0xb99   : > { %9434 = vmatprep.subr.bf16.mxu0 %v10983_v1  ;;  %v9459_v14 = vpack.c.bf16 %v8755_v21, %v8754_v60  ;;  %v8881_v60 = vld [vmem:[%s14527_s15 + $0x640] sm:$0xff]  ;;  %v8774_v21 = vld [vmem:[%s14527_s15 + $0x318] sm:$0xff] }
 0xb9b   : > { %9577 = vmatpush1.bf16.msra.mxu1 %v9576_v20  ;;  %v8756_v20 = vld [vmem:[%s14527_s15 + $0x290] sm:$0xff] }
 0xb9c   : > { %9436 = vmatpush1.bf16.msra.mxu0 %v9435_v18  ;;  %9578 = vmatprep.subr.bf16.mxu1 %v10983_v1  ;;  %v8757_v18 = vld [vmem:[%s14527_s15 + $0x298] sm:$0xff] }
 0xb9d   : > { %9437 = vmatprep.subr.bf16.mxu0 %v10983_v1  ;;  %v9462_v42 = vpack.c.bf16 %v8757_v18, %v8756_v20  ;;  %v8883_v20 = vld [vmem:[%s14527_s15 + $0x650] sm:$0xff] }
 0xb9e   : > { %v9630_v18 = vpack.c.bf16 %v8883_v20, %v8882_v35  ;;  %v8923_v35 = vld [vmem:[%s14527_s15 + $0x778] sm:$0xff]  ;;  %v8920_v20 = vld [vmem:[%s14527_s15 + $0x768] sm:$0xff] }
 0xb9f   : > { %9580 = vmatpush1.bf16.msra.mxu1 %v9579_v37  ;;  %v9606_v37 = vpack.c.bf16 %v8865_v7, %v8864_v24  ;;  %v8887_v24 = vld [vmem:[%s14527_s15 + $0x668] sm:$0xff]  ;;  %v7103_v7 = vrot.slane %v13518_v61, 5 }
 0xba0   : > { %9439 = vmatpush1.bf16.msra.mxu0 %v9438_v49  ;;  %9581 = vmatprep.subr.bf16.mxu1 %v10983_v1  ;;  %v8760_v49 = vld [vmem:[%s14527_s15 + $0x2a8] sm:$0xff] }
 0xba1   : > { %6952 = vmatprep.subr.mxu0 %v10975_v55 }
 0xba3   : > { %9583 = vmatpush1.bf16.msra.mxu1 %v9582_v33  ;;  %v9465_v33 = vpack.c.bf16 %v8761_v13, %v8760_v49  ;;  %v7666_v13 = vrot.slane %v13802_v58, 3 }
 0xba4   : > { %6953 = vmatpush1.msra.mxu0 %v8740_v45  ;;  %7515 = vmatprep.subr.mxu1 %v10975_v55  ;;  %v7009_v45 = vrot.slane %v13518_v61, 4  ;;  %v8889_v61 = vld [vmem:[%s14527_s15 + $0x678] sm:$0xff] }
 0xba5   : > { %6985 = vmatmul.mubr.f32.vlgmr.msra.gmra.mrb[40].mxu0 %v6915_v36  ;;  %9440 = vmatprep.subr.bf16.mxu0 %v10983_v1  ;;  %v8866_v36 = vld [vmem:[%s14527_s15 + $0x5d0] sm:$0xff] }
 0xba6   : > { %9442 = vmatpush1.bf16.msra.mxu0 %v9441_v5  ;;  %8759 = vmatprep.mubr.msk.f32.mxu0 %vm6557_vm8, %v7010_v19  ;;  %v8762_v5 = vld [vmem:[%s14527_s15 + $0x2b8] sm:$0xff] }
 0xba7   : > { %7516 = vmatpush1.msra.mxu1 %v8848_v39  ;;  %9443 = vmatprep.subr.bf16.mxu0 %v10983_v1  ;;  %v9468_v19 = vpack.c.bf16 %v8763_v26, %v8762_v5  ;;  %v8870_v39 = vld [vmem:[%s14527_s15 + $0x5e8] sm:$0xff]  ;;  %v8892_v26 = vld [vmem:[%s14527_s15 + $0x690] sm:$0xff] }
 0xba8   : > { %7548 = vmatmul.mubr.f32.vlgmr.msra.gmra.mrb[20].mxu1 %v7478_v32  ;;  %9584 = vmatprep.subr.bf16.mxu1 %v10983_v1  ;;  %v8764_v32 = vld [vmem:[%s14527_s15 + $0x2c8] sm:$0xff]  ;;  %v9612_v34 = vpack.c.bf16 %v8871_v22, %v8870_v39  ;;  %v8896_v39 = vld [vmem:[%s14527_s15 + $0x6b0] sm:$0xff]  ;;  %v8897_v22 = vld [vmem:[%s14527_s15 + $0x6b8] sm:$0xff] }
 0xba9   : > { %9586 = vmatpush1.bf16.msra.mxu1 %v9585_v12  ;;  %8867 = vmatprep.mubr.msk.f32.mxu1 %vm6557_vm8, %v7573_v9  ;;  %v7667_v12 = vrot.slane %v13680_v30, 3  ;;  %v8872_v9 = vld [vmem:[%s14527_s15 + $0x5f8] sm:$0xff] }
 0xbaa   : > { %9445 = vmatpush1.bf16.msra.mxu0 %v9444_v6  ;;  %9587 = vmatprep.subr.bf16.mxu1 %v10983_v1  ;;  %v8765_v6 = vld [vmem:[%s14527_s15 + $0x2d0] sm:$0xff] }
 0xbab   : > { %9446 = vmatprep.subr.bf16.mxu0 %v10983_v1  ;;  %v9471_v0 = vpack.c.bf16 %v8765_v6, %v8764_v32  ;;  %v8898_v32 = vld [vmem:[%s14527_s15 + $0x6c0] sm:$0xff]  ;;  %v8899_v6 = vld [vmem:[%s14527_s15 + $0x6c8] sm:$0xff] }
 0xbad   : > { %9589 = vmatpush1.bf16.msra.mxu1 %v9588_v63  ;;  %v8767_v63 = vld [vmem:[%s14527_s15 + $0x2e0] sm:$0xff] }
 0xbae   : > { %9448 = vmatpush1.bf16.msra.mxu0 %v9447_v25  ;;  %9590 = vmatprep.subr.bf16.mxu1 %v10983_v1  ;;  %v9615_v25 = vpack.c.bf16 %v8873_v27, %v8872_v9  ;;  %v9474_v48 = vpack.c.bf16 %v8767_v63, %v8766_v62  ;;  %v8901_v9 = vld [vmem:[%s14527_s15 + $0x6d8] sm:$0xff]  ;;  %v8904_v62 = vld [vmem:[%s14527_s15 + $0x6e8] sm:$0xff]  ;;  %v8905_v63 = vld [vmem:[%s14527_s15 + $0x6f0] sm:$0xff] }
 0xbaf   : > { %9449 = vmatprep.subr.bf16.mxu0 %v10983_v1 }
 0xbb1   : > { %9592 = vmatpush1.bf16.msra.mxu1 %v9591_v38  ;;  %v8769_v38 = vld [vmem:[%s14527_s15 + $0x2f0] sm:$0xff] }
 0xbb2   : > { %9451 = vmatpush1.bf16.msra.mxu0 %v9450_v3  ;;  %9593 = vmatprep.subr.bf16.mxu1 %v10983_v1  ;;  %v9618_v3 = vpack.c.bf16 %v8875_v52, %v8874_v4  ;;  %v9477_v51 = vpack.c.bf16 %v8769_v38, %v8768_v17  ;;  %v7760_v4 = vrot.slane %v13802_v58, 4  ;;  %v8906_v52 = vld [vmem:[%s14527_s15 + $0x6f8] sm:$0xff]  ;;  %v8907_v17 = vld [vmem:[%s14527_s15 + $0x700] sm:$0xff]  ;;  %v7855_v38 = vrot.slane %v13680_v30, 5 }
 0xbb3   : > { %9452 = vmatprep.subr.bf16.mxu0 %v10983_v1 }
 0xbb5   : > { %9595 = vmatpush1.bf16.msra.mxu1 %v9594_v43  ;;  %v8771_v43 = vld [vmem:[%s14527_s15 + $0x300] sm:$0xff] }
 0xbb6   : > { %9454 = vmatpush1.bf16.msra.mxu0 %v9453_v10  ;;  %9596 = vmatprep.subr.bf16.mxu1 %v10983_v1  ;;  %v9621_v10 = vpack.c.bf16 %v8877_v41, %v8876_v47  ;;  %v9480_v53 = vpack.c.bf16 %v8771_v43, %v8770_v50  ;;  %v8909_v47 = vld [vmem:[%s14527_s15 + $0x710] sm:$0xff]  ;;  %v8910_v50 = vld [vmem:[%s14527_s15 + $0x718] sm:$0xff]  ;;  %v8911_v43 = vld [vmem:[%s14527_s15 + $0x720] sm:$0xff] }
 0xbb7   : > { %9455 = vmatprep.subr.bf16.mxu0 %v10983_v1 }
 0xbb9   : > { %9598 = vmatpush1.bf16.msra.mxu1 %v9597_v54  ;;  %v8773_v54 = vld [vmem:[%s14527_s15 + $0x310] sm:$0xff] }
 0xbba   : > { %9457 = vmatpush1.bf16.msra.mxu0 %v9456_v23  ;;  %9599 = vmatprep.subr.bf16.mxu1 %v10983_v1  ;;  %v9624_v23 = vpack.c.bf16 %v8879_v57, %v8878_v11  ;;  %v9483_v28 = vpack.c.bf16 %v8773_v54, %v8772_v56  ;;  %v8913_v11 = vld [vmem:[%s14527_s15 + $0x730] sm:$0xff]  ;;  %v8914_v56 = vld [vmem:[%s14527_s15 + $0x738] sm:$0xff]  ;;  %v8915_v54 = vld [vmem:[%s14527_s15 + $0x740] sm:$0xff] }
 0xbbb   : > { %9458 = vmatprep.subr.bf16.mxu0 %v10983_v1 }
 0xbbd   : > { %9601 = vmatpush1.bf16.msra.mxu1 %v9600_v8  ;;  %v8775_v8 = vld [vmem:[%s14527_s15 + $0x320] sm:$0xff] }
 0xbbe   : > { %9460 = vmatpush1.bf16.msra.mxu0 %v9459_v14  ;;  %9602 = vmatprep.subr.bf16.mxu1 %v10983_v1  ;;  %v9627_v14 = vpack.c.bf16 %v8881_v60, %v8880_v44  ;;  %v9486_v15 = vpack.c.bf16 %v8775_v8, %v8774_v21  ;;  %v8917_v44 = vld [vmem:[%s14527_s15 + $0x750] sm:$0xff]  ;;  %v8918_v21 = vld [vmem:[%s14527_s15 + $0x758] sm:$0xff]  ;;  %v8919_v8 = vld [vmem:[%s14527_s15 + $0x760] sm:$0xff] }
 0xbbf   : > { %9461 = vmatprep.subr.bf16.mxu0 %v10983_v1 }
 0xbc1   : > { %9604 = vmatpush1.bf16.msra.mxu1 %v9603_v59  ;;  %v8776_v59 = vld [vmem:[%s14527_s15 + $0x328] sm:$0xff] }
 0xbc2   : > { %9463 = vmatpush1.bf16.msra.mxu0 %v9462_v42  ;;  %9605 = vmatprep.subr.bf16.mxu1 %v10983_v1  ;;  %v8886_v42 = vld [vmem:[%s14527_s15 + $0x660] sm:$0xff] }
 0xbc3   : > { %7046 = vmatprep.subr.mxu0 %v10975_v55  ;;  %v9633_v49 = vpack.c.bf16 %v8887_v24, %v8886_v42  ;;  %v8924_v42 = vld [vmem:[%s14527_s15 + $0x780] sm:$0xff]  ;;  %v8925_v24 = vld [vmem:[%s14527_s15 + $0x788] sm:$0xff] }
 0xbc5   : > { %9607 = vmatpush1.bf16.msra.mxu1 %v9606_v37  ;;  %v8884_v37 = vld [vmem:[%s14527_s15 + $0x658] sm:$0xff] }
 0xbc6   : > { %7047 = vmatpush1.msra.mxu0 %v8758_v2  ;;  %7609 = vmatprep.subr.mxu1 %v10975_v55  ;;  %v8888_v2 = vld [vmem:[%s14527_s15 + $0x670] sm:$0xff] }
 0xbc7   : > { %7079 = vmatmul.mubr.f32.vlgmr.msra.gmra.mrb[40].mxu0 %v7009_v45  ;;  %9464 = vmatprep.subr.bf16.mxu0 %v10983_v1  ;;  %v9636_v31 = vpack.c.bf16 %v8889_v61, %v8888_v2  ;;  %v8891_v45 = vld [vmem:[%s14527_s15 + $0x688] sm:$0xff]  ;;  %v8928_v61 = vld [vmem:[%s14527_s15 + $0x7a0] sm:$0xff] }
 0xbc8   : > { %9466 = vmatpush1.bf16.msra.mxu0 %v9465_v33  ;;  %8777 = vmatprep.mubr.msk.f32.mxu0 %vm6557_vm8, %v7104_v40  ;;  %v7761_v33 = vrot.slane %v13680_v30, 4  ;;  %v9639_v5 = vpack.c.bf16 %v8891_v45, %v8890_v46  ;;  %v8893_v40 = vld [vmem:[%s14527_s15 + $0x698] sm:$0xff]  ;;  %v8930_v46 = vld [vmem:[%s14527_s15 + $0x7b0] sm:$0xff] }
 0xbc9   : > { %7610 = vmatpush1.msra.mxu1 %v8866_v36  ;;  %9467 = vmatprep.subr.bf16.mxu0 %v10983_v1  ;;  %v9642_v36 = vpack.c.bf16 %v8893_v40, %v8892_v26  ;;  %v8931_v45 = vld [vmem:[%s14527_s15 + $0x7b8] sm:$0xff]  ;;  %v8121_v26 = vld [vmem:[%s14529_s17] sm:$0xff]  ;;  %v8122_v40 = vld [vmem:[%s14529_s17 + $0x8] sm:$0xff] }
 0xbca   : > { %7642 = vmatmul.mubr.f32.vlgmr.msra.gmra.mrb[20].mxu1 %v7572_v16  ;;  %9608 = vmatprep.subr.bf16.mxu1 %v10983_v1  ;;  %v8895_v16 = vld [vmem:[%s14527_s15 + $0x6a8] sm:$0xff] }
 0xbcb   : > { %9610 = vmatpush1.bf16.msra.mxu1 %v9609_v29  ;;  %8885 = vmatprep.mubr.msk.f32.mxu1 %vm6557_vm8, %v7667_v12  ;;  %v8894_v29 = vld [vmem:[%s14527_s15 + $0x6a0] sm:$0xff]  ;;  %v9648_v12 = vpack.c.bf16 %v8897_v22, %v8896_v39  ;;  %v8124_v39 = vld [vmem:[%s14529_s17 + $0x18] sm:$0xff] }
 0xbcc   : > { %9469 = vmatpush1.bf16.msra.mxu0 %v9468_v19  ;;  %9611 = vmatprep.subr.bf16.mxu1 %v10983_v1  ;;  %v9645_v19 = vpack.c.bf16 %v8895_v16, %v8894_v29  ;;  %v8932_v29 = vld [vmem:[%s14527_s15 + $0x7c0] sm:$0xff]  ;;  %v8933_v16 = vld [vmem:[%s14527_s15 + $0x7c8] sm:$0xff] }
 0xbcd   : > { %9470 = vmatprep.subr.bf16.mxu0 %v10983_v1 }
 0xbcf   : > { %9613 = vmatpush1.bf16.msra.mxu1 %v9612_v34  ;;  %v9651_v34 = vpack.c.bf16 %v8899_v6, %v8898_v32  ;;  %v8125_v32 = vld [vmem:[%s14529_s17 + $0x20] sm:$0xff]  ;;  %v8126_v6 = vld [vmem:[%s14529_s17 + $0x28] sm:$0xff] }
 0xbd0   : > { %9472 = vmatpush1.bf16.msra.mxu0 %v9471_v0  ;;  %9614 = vmatprep.subr.bf16.mxu1 %v10983_v1  ;;  %v8900_v0 = vld [vmem:[%s14527_s15 + $0x6d0] sm:$0xff] }
 0xbd1   : > { %9473 = vmatprep.subr.bf16.mxu0 %v10983_v1  ;;  %v9654_v27 = vpack.c.bf16 %v8901_v9, %v8900_v0  ;;  %v8935_v0 = vld [vmem:[%s14527_s15 + $0x7d8] sm:$0xff]  ;;  %v9735_v9 = vpack.c.bf16 %v8126_v6, %v8125_v32 }
 0xbd3   : > { %9616 = vmatpush1.bf16.msra.mxu1 %v9615_v25  ;;  %v8902_v25 = vld [vmem:[%s14527_s15 + $0x6e0] sm:$0xff] }
 0xbd4   : > { %9475 = vmatpush1.bf16.msra.mxu0 %v9474_v48  ;;  %9617 = vmatprep.subr.bf16.mxu1 %v10983_v1  ;;  %v9657_v48 = vpack.c.bf16 %v8905_v63, %v8904_v62  ;;  %v8936_v62 = vld [vmem:[%s14527_s15 + $0x7e0] sm:$0xff]  ;;  %v8937_v63 = vld [vmem:[%s14527_s15 + $0x7e8] sm:$0xff] }
 0xbd5   : > { %9476 = vmatprep.subr.bf16.mxu0 %v10983_v1 }
 0xbd7   : > { %9619 = vmatpush1.bf16.msra.mxu1 %v9618_v3  ;;  %v9660_v3 = vpack.c.bf16 %v8907_v17, %v8906_v52  ;;  %v8938_v52 = vld [vmem:[%s14527_s15 + $0x7f0] sm:$0xff] }
 0xbd8   : > { %9478 = vmatpush1.bf16.msra.mxu0 %v9477_v51  ;;  %9620 = vmatprep.subr.bf16.mxu1 %v10983_v1  ;;  %v8908_v51 = vld [vmem:[%s14527_s15 + $0x708] sm:$0xff] }
 0xbd9   : > { %9479 = vmatprep.subr.bf16.mxu0 %v10983_v1  ;;  %v9663_v41 = vpack.c.bf16 %v8909_v47, %v8908_v51  ;;  %v8943_v51 = vld [vmem:[%s14527_s15 + $0x810] sm:$0xff]  ;;  %v8043_v47 = vrot.slane %v13680_v30, 7 }
 0xbdb   : > { %9622 = vmatpush1.bf16.msra.mxu1 %v9621_v10  ;;  %v9666_v10 = vpack.c.bf16 %v8911_v43, %v8910_v50  ;;  %v8944_v50 = vld [vmem:[%s14527_s15 + $0x818] sm:$0xff]  ;;  %v8945_v43 = vld [vmem:[%s14527_s15 + $0x820] sm:$0xff] }
 0xbdc   : > { %9481 = vmatpush1.bf16.msra.mxu0 %v9480_v53  ;;  %9623 = vmatprep.subr.bf16.mxu1 %v10983_v1  ;;  %v8912_v53 = vld [vmem:[%s14527_s15 + $0x728] sm:$0xff] }
 0xbdd   : > { %9482 = vmatprep.subr.bf16.mxu0 %v10983_v1  ;;  %v9669_v57 = vpack.c.bf16 %v8913_v11, %v8912_v53  ;;  %v8947_v53 = vld [vmem:[%s14527_s15 + $0x830] sm:$0xff] }
 0xbdf   : > { %9625 = vmatpush1.bf16.msra.mxu1 %v9624_v23  ;;  %v9672_v23 = vpack.c.bf16 %v8915_v54, %v8914_v56  ;;  %v8949_v56 = vld [vmem:[%s14527_s15 + $0x840] sm:$0xff] }
 0xbe0   : > { %9484 = vmatpush1.bf16.msra.mxu0 %v9483_v28  ;;  %9626 = vmatprep.subr.bf16.mxu1 %v10983_v1  ;;  %v8916_v28 = vld [vmem:[%s14527_s15 + $0x748] sm:$0xff] }
 0xbe1   : > { %9485 = vmatprep.subr.bf16.mxu0 %v10983_v1  ;;  %v9675_v60 = vpack.c.bf16 %v8917_v44, %v8916_v28  ;;  %v8951_v28 = vld [vmem:[%s14527_s15 + $0x850] sm:$0xff] }
 0xbe3   : > { %9628 = vmatpush1.bf16.msra.mxu1 %v9627_v14  ;;  %v9678_v14 = vpack.c.bf16 %v8919_v8, %v8918_v21  ;;  %v8953_v21 = vld [vmem:[%s14527_s15 + $0x860] sm:$0xff] }
 0xbe4   : > { %9487 = vmatpush1.bf16.msra.mxu0 %v9486_v15  ;;  %9629 = vmatprep.subr.bf16.mxu1 %v10983_v1  ;;  %v8922_v15 = vld [vmem:[%s14527_s15 + $0x770] sm:$0xff] }
 0xbe5   : > { %7140 = vmatprep.subr.mxu0 %v10975_v55 }
 0xbe7   : > { %9631 = vmatpush1.bf16.msra.mxu1 %v9630_v18  ;;  %v9681_v18 = vpack.c.bf16 %v8923_v35, %v8922_v15  ;;  %v8955_v15 = vld [vmem:[%s14527_s15 + $0x870] sm:$0xff] }
 0xbe8   : > { %7141 = vmatpush1.msra.mxu0 %v8776_v59  ;;  %7703 = vmatprep.subr.mxu1 %v10975_v55  ;;  %v7854_v59 = vrot.slane %v13802_v58, 5 }
 0xbe9   : > { %7173 = vmatmul.mubr.f32.vlgmr.msra.gmra.mrb[40].mxu0 %v7103_v7  ;;  %9728 = vmatprep.subr.bf16.mxu0 %v10983_v1  ;;  %v7949_v7 = vrot.slane %v13680_v30, 6  ;;  %v8946_v30 = vld [vmem:[%s14527_s15 + $0x828] sm:$0xff] }
 0xbea   : > { %v9714_v11 = vpack.c.bf16 %v8947_v53, %v8946_v30  ;;  %8994 = vmatprep.mubr.msk.f32.mxu0 %vm10984_vm11, %v10975_v55 }
 0xbeb   : > { %7704 = vmatpush1.msra.mxu1 %v8884_v37  ;;  %v9684_v37 = vpack.c.bf16 %v8925_v24, %v8924_v42  ;;  %v8127_v24 = vld [vmem:[%s14529_s17 + $0x30] sm:$0xff] }
 0xbec   : > { %7736 = vmatmul.mubr.f32.vlgmr.msra.gmra.mrb[20].mxu1 %v7666_v13  ;;  %9632 = vmatprep.subr.bf16.mxu1 %v10983_v1  ;;  %v8927_v13 = vld [vmem:[%s14527_s15 + $0x798] sm:$0xff] }
 0xbed   : > { %9634 = vmatpush1.bf16.msra.mxu1 %v9633_v49  ;;  %8903 = vmatprep.mubr.msk.f32.mxu1 %vm6557_vm8, %v7761_v33  ;;  %v8926_v49 = vld [vmem:[%s14527_s15 + $0x790] sm:$0xff]  ;;  %v8929_v33 = vld [vmem:[%s14527_s15 + $0x7a8] sm:$0xff] }
 0xbee   : > { %9635 = vmatprep.subr.bf16.mxu1 %v10983_v1  ;;  %v9687_v2 = vpack.c.bf16 %v8927_v13, %v8926_v49 }
 0xbf1   : > { %9637 = vmatpush1.bf16.msra.mxu1 %v9636_v31  ;;  %v9690_v31 = vpack.c.bf16 %v8929_v33, %v8928_v61  ;;  %v8207_v61 = vld [vmem:[%s14531_s19 + $0x8] sm:$0xff] }
 0xbf2   : > { %9638 = vmatprep.subr.bf16.mxu1 %v10983_v1 }
 0xbf5   : > { %9640 = vmatpush1.bf16.msra.mxu1 %v9639_v5  ;;  %v9693_v5 = vpack.c.bf16 %v8931_v45, %v8930_v46 }
 0xbf6   : > { %9641 = vmatprep.subr.bf16.mxu1 %v10983_v1 }
 0xbf9   : > { %9643 = vmatpush1.bf16.msra.mxu1 %v9642_v36  ;;  %v8123_v36 = vld [vmem:[%s14529_s17 + $0x10] sm:$0xff] }
 0xbfa   : > { %9644 = vmatprep.subr.bf16.mxu1 %v10983_v1  ;;  %v9732_v22 = vpack.c.bf16 %v8124_v39, %v8123_v36 }
 0xbfd   : > { %9646 = vmatpush1.bf16.msra.mxu1 %v9645_v19  ;;  %v9729_v19 = vpack.c.bf16 %v8122_v40, %v8121_v26  ;;  %v8208_v26 = vld [vmem:[%s14531_s19 + $0x10] sm:$0xff]  ;;  %v8209_v40 = vld [vmem:[%s14531_s19 + $0x18] sm:$0xff] }
 0xbfe   : > { %9647 = vmatprep.subr.bf16.mxu1 %v10983_v1  ;;  %v9744_v36 = vpack.c.bf16 %v8209_v40, %v8208_v26 }
 0xbff   : > { %9730 = vmatpush3.bf16.msra.mxu0 %v9729_v19 }
 0xc00   : > { %9731 = vmatprep.subr.bf16.mxu0 %v10983_v1 }
 0xc01   : > { %9649 = vmatpush1.bf16.msra.mxu1 %v9648_v12  ;;  %v9696_v12 = vpack.c.bf16 %v8933_v16, %v8932_v29  ;;  %v8129_v29 = vld [vmem:[%s14530_s18] sm:$0x1] }
 0xc02   : > { %9650 = vmatprep.subr.bf16.mxu1 %v10983_v1 }
 0xc03   : > { %9733 = vmatpush3.bf16.msra.mxu0 %v9732_v22  ;;  %v8210_v22 = vld [vmem:[%s14532_s20] sm:$0x1] }
 0xc04   : > { %9734 = vmatprep.subr.bf16.mxu0 %v10983_v1 }
 0xc05   : > { %9652 = vmatpush1.bf16.msra.mxu1 %v9651_v34  ;;  %v8934_v34 = vld [vmem:[%s14527_s15 + $0x7d0] sm:$0xff] }
 0xc06   : > { %9653 = vmatprep.subr.bf16.mxu1 %v10983_v1 }
 0xc07   : > { %9736 = vmatpush3.bf16.msra.mxu0 %v9735_v9 }
 0xc08   : > { %9737 = vmatprep.subr.bf16.mxu0 %v10983_v1 }
 0xc09   : > { %9655 = vmatpush1.bf16.msra.mxu1 %v9654_v27  ;;  %v9699_v27 = vpack.c.bf16 %v8935_v0, %v8934_v34 }
 0xc0a   : > { %7797 = vmatprep.subr.mxu1 %v10975_v55 }
 0xc0d   : > { %7798 = vmatpush1.msra.mxu1 %v8902_v25  ;;  %v9702_v25 = vpack.c.bf16 %v8937_v63, %v8936_v62 }
 0xc0e   : > { %7830 = vmatmul.mubr.f32.vlgmr.msra.gmra.mrb[20].mxu1 %v7760_v4  ;;  %9656 = vmatprep.subr.bf16.mxu1 %v10983_v1  ;;  %v8941_v4 = vld [vmem:[%s14527_s15 + $0x800] sm:$0xff] }
 0xc0f   : > { %9658 = vmatpush1.bf16.msra.mxu1 %v9657_v48  ;;  %8921 = vmatprep.mubr.msk.f32.mxu1 %vm6557_vm8, %v7855_v38  ;;  %v8940_v48 = vld [vmem:[%s14527_s15 + $0x7f8] sm:$0xff]  ;;  %v7948_v38 = vrot.slane %v13802_v58, 6 }
 0xc10   : > { %9659 = vmatprep.subr.bf16.mxu1 %v10983_v1  ;;  %v9705_v17 = vpack.c.bf16 %v8941_v4, %v8940_v48 }
 0xc13   : > { %9661 = vmatpush1.bf16.msra.mxu1 %v9660_v3  ;;  %v8942_v3 = vld [vmem:[%s14527_s15 + $0x808] sm:$0xff] }
 0xc14   : > { %9662 = vmatprep.subr.bf16.mxu1 %v10983_v1 }
 0xc17   : > { %9664 = vmatpush1.bf16.msra.mxu1 %v9663_v41  ;;  %v9708_v41 = vpack.c.bf16 %v8943_v51, %v8942_v3 }
 0xc18   : > { %9665 = vmatprep.subr.bf16.mxu1 %v10983_v1 }
 0xc1b   : > { %9667 = vmatpush1.bf16.msra.mxu1 %v9666_v10  ;;  %v9711_v10 = vpack.c.bf16 %v8945_v43, %v8944_v50 }
 0xc1c   : > { %9668 = vmatprep.subr.bf16.mxu1 %v10983_v1 }
 0xc1f   : > { %9670 = vmatpush1.bf16.msra.mxu1 %v9669_v57  ;;  %v8948_v57 = vld [vmem:[%s14527_s15 + $0x838] sm:$0xff] }
 0xc20   : > { %9671 = vmatprep.subr.bf16.mxu1 %v10983_v1  ;;  %v9717_v54 = vpack.c.bf16 %v8949_v56, %v8948_v57 }
 0xc23   : > { %9673 = vmatpush1.bf16.msra.mxu1 %v9672_v23  ;;  %v8950_v23 = vld [vmem:[%s14527_s15 + $0x848] sm:$0xff] }
 0xc24   : > { %9674 = vmatprep.subr.bf16.mxu1 %v10983_v1  ;;  %v9720_v44 = vpack.c.bf16 %v8951_v28, %v8950_v23 }
 0xc27   : > { %9676 = vmatpush1.bf16.msra.mxu1 %v9675_v60  ;;  %v8952_v60 = vld [vmem:[%s14527_s15 + $0x858] sm:$0xff] }
 0xc28   : > { %9677 = vmatprep.subr.bf16.mxu1 %v10983_v1  ;;  %v9723_v8 = vpack.c.bf16 %v8953_v21, %v8952_v60 }
 0xc2b   : > { %9679 = vmatpush1.bf16.msra.mxu1 %v9678_v14  ;;  %v8954_v14 = vld [vmem:[%s14527_s15 + $0x868] sm:$0xff] }
 0xc2c   : > { %7891 = vmatprep.subr.mxu1 %v10975_v55  ;;  %v9726_v35 = vpack.c.bf16 %v8955_v15, %v8954_v14 }
 0xc2f   : > { %7892 = vmatpush1.msra.mxu1 %v8920_v20  ;;  %v8956_v20 = vld [vmem:[%s14527_s15 + $0x878] sm:$0xff] }
 0xc30   : > { %7924 = vmatmul.mubr.f32.vlgmr.msra.gmra.mrb[20].mxu1 %v7854_v59  ;;  %9680 = vmatprep.subr.bf16.mxu1 %v10983_v1 }
 0xc31   : > { %9682 = vmatpush1.bf16.msra.mxu1 %v9681_v18  ;;  %8939 = vmatprep.mubr.msk.f32.mxu1 %vm6557_vm8, %v7949_v7  ;;  %v8042_v18 = vrot.slane %v13802_v58, 7  ;;  %v8128_v7 = vld [vmem:[%s14529_s17 + $0x38] sm:$0xff]  ;;  %v6616_v58 = vld [vmem:[%s14528_s16] sm:$0x1] }
 0xc32   : > { %9683 = vmatprep.subr.bf16.mxu1 %v10983_v1 }
 0xc35   : > { %9685 = vmatpush1.bf16.msra.mxu1 %v9684_v37  ;;  %v9738_v37 = vpack.c.bf16 %v8128_v7, %v8127_v24 }
 0xc36   : > { %9686 = vmatprep.subr.bf16.mxu1 %v10983_v1 }
 0xc37   : > { %9739 = vmatpush3.bf16.msra.mxu0 %v9738_v37 }
 0xc38   : > { %9740 = vmatprep.subr.bf16.mxu0 %v10983_v1 }
 0xc39   : > { %9688 = vmatpush1.bf16.msra.mxu1 %v9687_v2  ;;  %v8206_v2 = vld [vmem:[%s14531_s19] sm:$0xff] }
 0xc3a   : > { %9689 = vmatprep.subr.bf16.mxu1 %v10983_v1  ;;  %v9741_v45 = vpack.c.bf16 %v8207_v61, %v8206_v2 }
 0xc3d   : > { %9691 = vmatpush1.bf16.msra.mxu1 %v9690_v31 }
 0xc3e   : > { %9692 = vmatprep.subr.bf16.mxu1 %v10983_v1 }
 0xc41   : > { %9694 = vmatpush1.bf16.msra.mxu1 %v9693_v5 }
 0xc42   : > { %9695 = vmatprep.subr.bf16.mxu1 %v10983_v1 }
 0xc45   : > { %9697 = vmatpush1.bf16.msra.mxu1 %v9696_v12 }
 0xc46   : > { %9698 = vmatprep.subr.bf16.mxu1 %v10983_v1 }
 0xc49   : > { %9700 = vmatpush1.bf16.msra.mxu1 %v9699_v27 }
 0xc4a   : > { %9701 = vmatprep.subr.bf16.mxu1 %v10983_v1 }
 0xc4d   : > { %9703 = vmatpush1.bf16.msra.mxu1 %v9702_v25 }
 0xc4e   : > { %7985 = vmatprep.subr.mxu1 %v10975_v55 }
 0xc51   : > { %7986 = vmatpush1.msra.mxu1 %v8938_v52 }
 0xc52   : > { %8018 = vmatmul.mubr.f32.vlgmr.msra.gmra.mrb[20].mxu1 %v7948_v38  ;;  %9704 = vmatprep.subr.bf16.mxu1 %v10983_v1 }
 0xc53   : > { %9706 = vmatpush1.bf16.msra.mxu1 %v9705_v17  ;;  %8957 = vmatprep.mubr.msk.f32.mxu1 %vm6557_vm8, %v8043_v47 }
 0xc54   : > { %9707 = vmatprep.subr.bf16.mxu1 %v10983_v1 }
 0xc57   : > { %9709 = vmatpush1.bf16.msra.mxu1 %v9708_v41 }
 0xc58   : > { %9710 = vmatprep.subr.bf16.mxu1 %v10983_v1 }
 0xc5b   : > { %9712 = vmatpush1.bf16.msra.mxu1 %v9711_v10 }
 0xc5c   : > { %9713 = vmatprep.subr.bf16.mxu1 %v10983_v1 }
 0xc5f   : > { %9715 = vmatpush1.bf16.msra.mxu1 %v9714_v11 }
 0xc60   : > { %9716 = vmatprep.subr.bf16.mxu1 %v10983_v1 }
 0xc63   : > { %9718 = vmatpush1.bf16.msra.mxu1 %v9717_v54 }
 0xc64   : > { %9719 = vmatprep.subr.bf16.mxu1 %v10983_v1 }
 0xc67   : > { %9721 = vmatpush1.bf16.msra.mxu1 %v9720_v44 }
 0xc68   : > { %9722 = vmatprep.subr.bf16.mxu1 %v10983_v1 }
 0xc6b   : > { %9724 = vmatpush1.bf16.msra.mxu1 %v9723_v8 }
 0xc6c   : > { %9725 = vmatprep.subr.bf16.mxu1 %v10983_v1 }
 0xc6f   : > { %9727 = vmatpush1.bf16.msra.mxu1 %v9726_v35 }
 0xc70   : > { %8079 = vmatprep.subr.mxu1 %v10975_v55 }
 0xc73   : > { %8080 = vmatpush1.msra.mxu1 %v8956_v20 }
 0xc74   : > { %8112 = vmatmul.mubr.f32.vlgmr.msra.gmra.mrb[20].mxu1 %v8042_v18 }
 0xcbc   : > { %v7174_v59 = vpop.f32.mrb[40].mxu0 }
 0xcbd   : > { %v7176_v42 = vpop.f32.mrb[41].mxu0  ;;  %v9762_v49 = vadd.f32 %v7174_v59, %v6616_v58 }
 0xd47   : > { %v8113_v13 = vpop.f32.mrb[20].mxu1 }
 0xd48   : > { %v9763_v33 = vadd.f32 %v9762_v49, %v8113_v13  ;;  %v8115_v31 = vpop.f32.mrb[21].mxu1 }
 0xd4a   : > { %vm8118_vm12 = vcmp.ge.f32.partialorder %v9763_v33, 0.0  ;;  %v8119_v46 = vmul.f32 0.01, %v9763_v33 }
 0xd4c   : > { %v8120_v5 = vsel %vm8118_vm12, %v9763_v33, %v8119_v46 }
 0xd4d   : > { %8995 = vmatmul.mubr.msk.f32.vlgmr.msra.gmra.mrb[42].mxu0 %vm2942_vm4, %v8120_v5 }
 0xd4e   : > { %9742 = vmatpush3.bf16.msra.mxu0 %v9741_v45  ;;  %9005 = vmatprep.mubr.msk.f32.mxu0 %vm10984_vm11, %v10975_v55 }
 0xd4f   : > { %9743 = vmatprep.subr.bf16.mxu0 %v10983_v1 }
 0xd52   : > { %9745 = vmatpush3.bf16.msra.mxu0 %v9744_v36 }
 0xe20   : > { %v8199_v16 = vpop.f32.mrb[42].mxu0 }
 0xe21   : > { %v8200_v55 = vadd.f32 %v8199_v16, %v8129_v29  ;;  %v8996_v19 = vpop.f32.mrb[43].mxu0 }
 0xe23   : > { %vm8203_vm4 = vcmp.ge.f32.partialorder %v8200_v55, 0.0  ;;  %v8204_v1 = vmul.f32 0.01, %v8200_v55 }
 0xe25   : > { %v8205_v39 = vsel %vm8203_vm4, %v8200_v55, %v8204_v1 }
 0xe26   : > { %9006 = vmatmul.mubr.msk.f32.vlgmr.msra.gmra.mrb[44].mxu0 %vm916_vm9, %v8205_v39 }
 0xef9   : > { %v8280_v12 = vpop.f32.mrb[44].mxu0 }
 0xefa   : > { %v8281_v32 = vadd.f32 %v8280_v12, %v8210_v22  ;;  %v9007_v6 = vpop.f32.mrb[45].mxu0 }
 0xefc   : > { %10905 = vtanh.f32 %v8281_v32 }
 0xf06   : > { %v10906_v34 = vpop.eup %10905 }
 0xf07   : > { %8286 = vst.msk [vmem:[%s648_s23] sm:$0x1] %vm8285_vm13, %v10906_v34 }
 0xf08   : > { %10920 = shalt.err (!%p10917_p3)
}
 0xf09   : > { %s10921_s22 = scalar_lea.hbm %s14470_s1, 16  ;;  %s10925_s23 = scalar_lea.hbm %s14533_s21, 32 }
 0xf0a   : > { %p10922_p4 = scmp.ne.s32.totalorder %s14470_s1, %s10921_s22  ;;  %p10926_p9 = scmp.lt.u32.totalorder %s14470_s1, %s14533_s21 }
 0xf0b   : > { %p10927_p10 = scmp.lt.u32.totalorder %s10925_s23, %s10921_s22  ;;  %p10929_p12 = scmp.lt.u32.totalorder %s10921_s22, %s14470_s1 }
 0xf0c   : > { %p10923_p7 = pnand %p10922_p4, %p11134_p5 }
 0xf0d   : > { %p10928_p11 = por %p10927_p10, %p10926_p9 }
 0xf0e   : > { %p10924_p8 = pneg %p10923_p7 }
 0xf0f   : > { %p10930_p13 = por %p10929_p12, %p10928_p11 }
 0xf11   : > { %p10931_p0 = pnand %p10930_p13, %p10924_p8 }
 0xf13   : > { %10934 = shalt.err (!%p10931_p0)
}
 0xf14   : > { %10080 = dma.vmem_to_hbm [thread:$0]  (%p11134_p5), %s14472_s30, 16, %s14470_s1, %s8288_s29  }
 0xf15 PF: > { %s14590_s27 = sld [smem:[#allocation7_spill]]  ;;  %s14591_s3 = sld [smem:[#allocation5_spill]] }
 0xf1b   : > { %p10086_p1 = scmp.ge.s32.totalorder %s14590_s27, 2  ;;  %s8312_s4 = sand.u32 1, %s14591_s3  }
 0xf1c   : > { %s8313_s2 = scalar_lea.sflag [#allocation3], %s8312_s4 }
 0xf1d   : > { %p10083_p2 = pnand %p10086_p1, %p11138_p6 }
 0xf1f   : > { %10952 = dma.done.wait (!%p10083_p2), %s8313_s2, 16  }
 0xf20   : > { %10954 = vsyncadd (!%p10083_p2), %s8313_s2, 4294967280  ;;  %s14593_s27 = sld [smem:[#allocation8_spill]]  ;;  %s14594_s22 = sld [smem:[#allocation6_spill]] }
 0xf21   : > { %s14595_s26 = sld [smem:[#allocation9_spill]]  ;;  %s14596_s2 = smov %s10961_s25 }
 0xf26   : > { %p31_p3 = scmp.ge.s32.totalorder %s14593_s27, 4   ;;  %s14597_s25 = smov %s14594_s22 }
 0xf28   :  { %33 = sbr.rel (!%p31_p3) target bundleno = 10 (0xa), region = 177 }
 0xf2f   :  { %8317 = vsyncpa [#allocation3], 1 }
 0xf30   :  { %8319 = vsyncpa [#allocation3 + $0x1], 1 }

</bundles_post_ra>
